<compile_context>
chip_gen: v6e
topology: v6e:2x2x1
jax: 0.10.0
libtpu: 0.0.40
codegen_flags: <defaults>
</compile_context>

<pallas_src>
import functools

import jax
import jax.numpy as jnp
import numpy as np
from jax.experimental import pallas as pl
from jax.experimental.pallas import tpu as pltpu


def _round_up(x, m):
    return ((x + m - 1) // m) * m


# -----------------------------------------------------------------------------
# Fused kernel: conv3x3 + folded-BN + ReLU  ->  conv3x3 + folded-BN + ReLU
# (one batch element per grid step; K-folded single matmul per conv stage)
# -----------------------------------------------------------------------------
def _make_fused_kernel(Wp, Wo, HoWp, off0, Lpad, Cm, cdtype):
    tail = Lpad - (off0 + HoWp)          # rows after the interior store
    inv_wp = 1.0 / Wp

    def _taps(src_ref):
        # 9 shifted views of a zero-padded, row-flattened image (row stride Wp):
        # tap (kh, kw) of wide output row q lives at flat row q + kh*Wp + kw.
        return [src_ref[pl.ds(kh * Wp + kw, HoWp), :]
                for kh in range(3) for kw in range(3)]

    def kernel(xu_ref, xt_ref, w1_ref, b1_ref, w2_ref, b2_ref, o_ref, y1_ref):
        # xu_ref: (Lpad, Cin)  padded/flattened upsampled x
        # xt_ref: (Lpad, Cs)   padded/flattened skip connection x_trace
        # w1_ref: (9*(Cin+Cs), Cm) K-folded conv1 taps (BN scale folded in)
        # w2_ref: (9*Cm, Co)       K-folded conv2 taps
        # b1_ref/b2_ref: (1, Cm)/(1, Co) folded BN biases (f32)
        # o_ref:  (HoWp, Co)   "wide" output (junk columns dropped by caller)
        # y1_ref: (Lpad, Cm)   VMEM scratch: zero-padded conv1 output image

        # In-kernel column mask: col = q mod Wp, computed via f32 floor-div
        # (exact at these magnitudes; +0.5 keeps floor() robust to the inexact
        # 1/Wp) -- avoids relying on vector integer div/rem.
        q = jax.lax.broadcasted_iota(jnp.int32, (HoWp, 1), 0).astype(jnp.float32)
        col = q - jnp.floor((q + 0.5) * inv_wp) * Wp
        keep = jnp.where(col < Wo, 1.0, 0.0)                   # (HoWp, 1) f32

        # ---- conv1: one K-folded matmul over 9 taps x (Cin + Cs) channels ----
        lhs1 = jnp.concatenate(_taps(xu_ref) + _taps(xt_ref), axis=-1)
        a1 = jnp.dot(lhs1.astype(cdtype), w1_ref[...],
                     preferred_element_type=jnp.float32)
        y1 = jnp.maximum(a1 + b1_ref[...], 0.0) * keep         # f32 epilogue

        # Park conv1 output as a zero-padded image in VMEM (never touches HBM).
        # Only border rows need explicit zeros; the interior (masked junk
        # columns included) is fully overwritten every step, so this is safe
        # even when the batch axis is split across TensorCores.
        y1_ref[pl.ds(0, off0), :] = jnp.zeros((off0, Cm), jnp.float32)
        y1_ref[pl.ds(off0 + HoWp, tail), :] = jnp.zeros((tail, Cm), jnp.float32)
        y1_ref[pl.ds(off0, HoWp), :] = y1

        # ---- conv2: one K-folded matmul over 9 taps x Cm channels ----
        lhs2 = jnp.concatenate(_taps(y1_ref), axis=-1)
        a2 = jnp.dot(lhs2.astype(cdtype), w2_ref[...],
                     preferred_element_type=jnp.float32)
        o_ref[...] = jnp.maximum(a2 + b2_ref[...], 0.0).astype(o_ref.dtype)

    return kernel


def _fold_conv_bn(params, eps):
    """(w OIHW, gamma, beta, mean, var) -> ((9, Cin, Cout) BN-folded taps, (1, Cout) bias)."""
    w, gamma, beta, mean, var = params
    cout, cin = w.shape[0], w.shape[1]
    scale = gamma / jnp.sqrt(var + eps)                           # (Cout,)
    w9 = jnp.transpose(w, (2, 3, 1, 0)).reshape(9, cin, cout)     # tap-major (kh*3+kw)
    w9 = w9 * scale[None, None, :]
    bias = (beta - mean * scale).reshape(1, cout).astype(jnp.float32)
    return w9, bias


def fused_double_conv_bn_relu(xu_nhwc, xt_nhwc, params1, params2, *,
                              compute_dtype=jnp.bfloat16, eps=1e-5):
    """Fused (ConvBnRelu -> ConvBnRelu) over concat([xu, xt], channels) without
    materializing the concatenated activation (or any im2col) in HBM."""
    B, Ho, Wo, Cin = xu_nhwc.shape
    _, _, _, Cs = xt_nhwc.shape
    w1_9, b1 = _fold_conv_bn(params1, eps)
    w2_9, b2 = _fold_conv_bn(params2, eps)
    Cm, Co = w1_9.shape[-1], w2_9.shape[-1]
    assert w1_9.shape[1] == Cin + Cs and w2_9.shape[1] == Cm

    # K-folded weights; row order matches the in-kernel im2col lane order:
    # [tap-major xu channels | tap-major xt channels].
    w1f = jnp.concatenate(
        [w1_9[:, :Cin, :].reshape(9 * Cin, Cm),
         w1_9[:, Cin:, :].reshape(9 * Cs, Cm)], axis=0).astype(compute_dtype)
    w2f = w2_9.reshape(9 * Cm, Co).astype(compute_dtype)

    Hp, Wp = Ho + 2, Wo + 2
    HoWp = Ho * Wp                 # "wide" output rows (Wp-Wo junk cols per row)
    off0 = Wp + 1                  # flat offset of pixel (0,0) in a padded image
    Lpad = _round_up(Hp * Wp + 2, 8)   # largest tap offset (2*Wp+2) stays in-bounds

    def pad_flatten(img):          # spatial zero-pad -> flatten rows -> tail pad
        p = jnp.pad(img, ((0, 0), (1, 1), (1, 1), (0, 0))).reshape(B, Hp * Wp, -1)
        return jnp.pad(p, ((0, 0), (0, Lpad - Hp * Wp), (0, 0)))

    xu_flat = pad_flatten(xu_nhwc.astype(jnp.float32))   # pads fuse into one copy
    xt_flat = pad_flatten(xt_nhwc.astype(jnp.float32))

    kernel = _make_fused_kernel(Wp, Wo, HoWp, off0, Lpad, Cm, compute_dtype)

    wsize = jnp.dtype(compute_dtype).itemsize
    cost = pl.CostEstimate(
        flops=2 * B * HoWp * 9 * ((Cin + Cs) * Cm + Cm * Co),
        transcendentals=0,
        bytes_accessed=(B * Lpad * (Cin + Cs) * 4            # activations in (f32)
                        + 9 * ((Cin + Cs) * Cm + Cm * Co) * wsize
                        + B * HoWp * Co * 4),                 # output
    )

    out_wide = pl.pallas_call(
        kernel,
        out_shape=jax.ShapeDtypeStruct((B, HoWp, Co), jnp.float32),
        grid_spec=pltpu.PrefetchScalarGridSpec(
            num_scalar_prefetch=0,
            grid=(B,),
            in_specs=[
                pl.BlockSpec((None, Lpad, Cin), lambda b: (b, 0, 0)),   # upsampled x
                pl.BlockSpec((None, Lpad, Cs), lambda b: (b, 0, 0)),    # skip x_trace
                pl.BlockSpec((9 * (Cin + Cs), Cm), lambda b: (0, 0)),   # conv1 taps (K-folded)
                pl.BlockSpec((1, Cm), lambda b: (0, 0)),                # conv1 bias
                pl.BlockSpec((9 * Cm, Co), lambda b: (0, 0)),           # conv2 taps (K-folded)
                pl.BlockSpec((1, Co), lambda b: (0, 0)),                # conv2 bias
            ],
            out_specs=pl.BlockSpec((None, HoWp, Co), lambda b: (b, 0, 0)),
            scratch_shapes=[pltpu.VMEM((Lpad, Cm), jnp.float32)],
        ),
        compiler_params=pltpu.CompilerParams(
            # Batch axis -> megacore where available; a no-op on 1-TC chips.
            # TODO(synk): production variant should use a halo'd spatial-strip
            # grid axis as the parallel/pipelining axis and derive vmem_limit.
            dimension_semantics=("parallel",),
        ),
        cost_estimate=cost,
    )(xu_flat, xt_flat, w1f, b1, w2f, b2)

    # Drop the junk pad columns; back to NHWC.
    return out_wide.reshape(B, Ho, Wp, Co)[:, :, :Wo, :]


# -----------------------------------------------------------------------------
# Bilinear 2x upsample matching torch.nn.Upsample(scale_factor=2, mode='bilinear',
# align_corners=False) -- plain JAX glue (gather + weighted sum).
# -----------------------------------------------------------------------------
def bilinear_upsample_2x(x_nhwc):
    B, H, W, C = x_nhwc.shape

    def idx_weights(out_size, in_size):
        o = jnp.arange(out_size, dtype=jnp.float32)
        src = (o + 0.5) / 2.0 - 0.5
        src = jnp.maximum(src, 0.0)                 # torch clamps negative src to 0
        i0 = jnp.floor(src).astype(jnp.int32)
        i1 = jnp.minimum(i0 + 1, in_size - 1)
        w1 = src - i0.astype(jnp.float32)
        w0 = 1.0 - w1
        return i0, i1, w0, w1

    r0, r1, rw0, rw1 = idx_weights(2 * H, H)
    c0, c1, cw0, cw1 = idx_weights(2 * W, W)

    rows = (x_nhwc[:, r0, :, :] * rw0[None, :, None, None]
            + x_nhwc[:, r1, :, :] * rw1[None, :, None, None])
    out = (rows[:, :, c0, :] * cw0[None, None, :, None]
           + rows[:, :, c1, :] * cw1[None, None, :, None])
    return out


# -----------------------------------------------------------------------------
# BasicDecoderBlock forward (PyTorch-facing NCHW interface)
# -----------------------------------------------------------------------------
@functools.partial(jax.jit, static_argnames=("compute_dtype",))
def basic_decoder_block(x_nchw, x_trace_nchw, params1, params2,
                        compute_dtype=jnp.bfloat16):
    """x: (B, Cin, H, W), x_trace: (B, Cskip, 2H, 2W) -> (B, Cout, 2H, 2W)."""
    x = jnp.transpose(x_nchw, (0, 2, 3, 1))          # NCHW -> NHWC (small, pre-upsample)
    xt = jnp.transpose(x_trace_nchw, (0, 2, 3, 1))
    xu = bilinear_upsample_2x(x)                     # (B, 2H, 2W, Cin), NHWC directly
    # Note: no jnp.concatenate -- the kernel fuses both channel chunks into conv1.
    y = fused_double_conv_bn_relu(xu, xt, params1, params2,
                                  compute_dtype=compute_dtype)
    return jnp.transpose(y, (0, 3, 1, 2))            # back to NCHW


# -----------------------------------------------------------------------------
# Deterministic parameter init + pure-JAX reference for the self-check
# -----------------------------------------------------------------------------
def init_conv_bn_params(key, cin, cout):
    kw, kg, kb, km, kv = jax.random.split(key, 5)
    w = jax.random.normal(kw, (cout, cin, 3, 3), jnp.float32) / jnp.sqrt(9.0 * cin)
    gamma = 1.0 + 0.1 * jax.random.normal(kg, (cout,), jnp.float32)
    beta = 0.1 * jax.random.normal(kb, (cout,), jnp.float32)
    mean = 0.1 * jax.random.normal(km, (cout,), jnp.float32)
    var = 0.5 + jax.random.uniform(kv, (cout,), jnp.float32)
    return (w, gamma, beta, mean, var)


def _ref_conv_bn_relu(x_nhwc, w, gamma, beta, mean, var, eps=1e-5):
    y = jax.lax.conv_general_dilated(
        x_nhwc,
        jnp.transpose(w, (2, 3, 1, 0)),  # HWIO
        window_strides=(1, 1),
        padding="SAME",
        dimension_numbers=("NHWC", "HWIO", "NHWC"),
    )
    scale = gamma / jnp.sqrt(var + eps)
    bias = beta - mean * scale
    return jnp.maximum(y * scale + bias, 0.0)


def _ref_decoder_block(x_nchw, x_trace_nchw, params1, params2):
    x = jnp.transpose(x_nchw, (0, 2, 3, 1))
    xt = jnp.transpose(x_trace_nchw, (0, 2, 3, 1))
    xu = bilinear_upsample_2x(x)
    xc = jnp.concatenate([xu, xt], axis=-1)
    y = _ref_conv_bn_relu(xc, *params1)
    y = _ref_conv_bn_relu(y, *params2)
    return jnp.transpose(y, (0, 3, 1, 2))


if __name__ == "__main__":
    B = 2
    in_channels, skip_channels, mid_channels, out_channels = 4, 4, 8, 8
    H, W = 8, 8  # x spatial; x_trace / output spatial is 2H x 2W = 16 x 16

    key = jax.random.PRNGKey(0)
    kx, kt, kp1, kp2 = jax.random.split(key, 4)
    x = jax.random.normal(kx, (B, in_channels, H, W), jnp.float32)
    x_trace = jax.random.normal(kt, (B, skip_channels, 2 * H, 2 * W), jnp.float32)

    params1 = init_conv_bn_params(kp1, in_channels + skip_channels, mid_channels)
    params2 = init_conv_bn_params(kp2, mid_channels, out_channels)

    ref = jax.block_until_ready(_ref_decoder_block(x, x_trace, params1, params2))

    # f32 compute path: tight check against the XLA conv reference.
    out_f32 = jax.block_until_ready(
        basic_decoder_block(x, x_trace, params1, params2,
                            compute_dtype=jnp.float32))
    assert out_f32.shape == (B, out_channels, 2 * H, 2 * W)
    np.testing.assert_allclose(np.asarray(out_f32), np.asarray(ref),
                               rtol=1e-4, atol=1e-4)

    # bf16 MXU operands (default on v5e/v6e/v7x), f32 accumulation + f32 epilogue.
    out_bf16 = jax.block_until_ready(
        basic_decoder_block(x, x_trace, params1, params2,
                            compute_dtype=jnp.bfloat16))
    assert out_bf16.shape == (B, out_channels, 2 * H, 2 * W)
    np.testing.assert_allclose(np.asarray(out_bf16), np.asarray(ref),
                               rtol=3e-2, atol=3e-2)

    print("KERNEL_OK")
</pallas_src>

<mosaic_0001>
module attributes {stable_mosaic.version = 11 : i64} {
  func.func @kernel(%arg0: i32, %arg1: memref<1x328x4xf32, #tpu.memory_space<vmem>>, %arg2: memref<1x328x4xf32, #tpu.memory_space<vmem>>, %arg3: memref<72x8xf32, #tpu.memory_space<vmem>>, %arg4: memref<1x8xf32, #tpu.memory_space<vmem>>, %arg5: memref<72x8xf32, #tpu.memory_space<vmem>>, %arg6: memref<1x8xf32, #tpu.memory_space<vmem>>, %arg7: memref<1x288x8xf32, #tpu.memory_space<vmem>>, %arg8: memref<328x8xf32, #tpu.memory_space<vmem>>) attributes {dimension_semantics = [#tpu.dimension_semantics<parallel>], iteration_bounds = array<i64: 2>, scalar_prefetch = 0 : i64, scratch_operands = 1 : i64, tpu.core_type = #tpu.core_type<tc>, window_params = [{transform_indices = @transform_0, window_bounds = array<i64: 1, 328, 4>}, {transform_indices = @transform_1, window_bounds = array<i64: 1, 328, 4>}, {pipeline_mode = #tpu.pipeline_mode<synchronous>, transform_indices = @transform_2, window_bounds = array<i64: 72, 8>}, {pipeline_mode = #tpu.pipeline_mode<synchronous>, transform_indices = @transform_3, window_bounds = array<i64: 1, 8>}, {pipeline_mode = #tpu.pipeline_mode<synchronous>, transform_indices = @transform_4, window_bounds = array<i64: 72, 8>}, {pipeline_mode = #tpu.pipeline_mode<synchronous>, transform_indices = @transform_5, window_bounds = array<i64: 1, 8>}, {transform_indices = @transform_6, window_bounds = array<i64: 1, 288, 8>}]} {
    %0 = tpu.iota {dimensions = array<i32: 0>} : vector<288x1xi32>
    %1 = arith.sitofp %0 : vector<288x1xi32> to vector<288x1xf32>
    %cst = arith.constant 5.000000e-01 : f32
    %2 = vector.broadcast %cst : f32 to vector<288x1xf32>
    %3 = arith.addf %1, %2 : vector<288x1xf32>
    %cst_0 = arith.constant 0.055555556 : f32
    %4 = vector.broadcast %cst_0 : f32 to vector<288x1xf32>
    %5 = arith.mulf %3, %4 : vector<288x1xf32>
    %6 = math.floor %5 : vector<288x1xf32>
    %cst_1 = arith.constant 1.800000e+01 : f32
    %7 = vector.broadcast %cst_1 : f32 to vector<288x1xf32>
    %8 = arith.mulf %6, %7 : vector<288x1xf32>
    %9 = arith.subf %1, %8 : vector<288x1xf32>
    %cst_2 = arith.constant 1.600000e+01 : f32
    %10 = vector.broadcast %cst_2 : f32 to vector<288x1xf32>
    %11 = arith.cmpf olt, %9, %10 : vector<288x1xf32>
    %cst_3 = arith.constant 1.000000e+00 : f32
    %cst_4 = arith.constant 0.000000e+00 : f32
    %12 = vector.broadcast %cst_3 : f32 to vector<288x1xf32>
    %13 = vector.broadcast %cst_4 : f32 to vector<288x1xf32>
    %14 = arith.select %11, %12, %13 : vector<288x1xi1>, vector<288x1xf32>
    %c0 = arith.constant 0 : index
    %c0_5 = arith.constant 0 : index
    %c0_6 = arith.constant 0 : index
    %15 = vector.load %arg1[%c0, %c0_5, %c0_6] : memref<1x328x4xf32, #tpu.memory_space<vmem>>, vector<1x288x4xf32>
    %16 = vector.shape_cast %15 : vector<1x288x4xf32> to vector<288x4xf32>
    %c0_7 = arith.constant 0 : index
    %c1 = arith.constant 1 : index
    %c0_8 = arith.constant 0 : index
    %17 = vector.load %arg1[%c0_7, %c1, %c0_8] : memref<1x328x4xf32, #tpu.memory_space<vmem>>, vector<1x288x4xf32>
    %18 = vector.shape_cast %17 : vector<1x288x4xf32> to vector<288x4xf32>
    %c0_9 = arith.constant 0 : index
    %c2 = arith.constant 2 : index
    %c0_10 = arith.constant 0 : index
    %19 = vector.load %arg1[%c0_9, %c2, %c0_10] : memref<1x328x4xf32, #tpu.memory_space<vmem>>, vector<1x288x4xf32>
    %20 = vector.shape_cast %19 : vector<1x288x4xf32> to vector<288x4xf32>
    %c0_11 = arith.constant 0 : index
    %c18 = arith.constant 18 : index
    %c0_12 = arith.constant 0 : index
    %21 = vector.load %arg1[%c0_11, %c18, %c0_12] : memref<1x328x4xf32, #tpu.memory_space<vmem>>, vector<1x288x4xf32>
    %22 = vector.shape_cast %21 : vector<1x288x4xf32> to vector<288x4xf32>
    %c0_13 = arith.constant 0 : index
    %c19 = arith.constant 19 : index
    %c0_14 = arith.constant 0 : index
    %23 = vector.load %arg1[%c0_13, %c19, %c0_14] : memref<1x328x4xf32, #tpu.memory_space<vmem>>, vector<1x288x4xf32>
    %24 = vector.shape_cast %23 : vector<1x288x4xf32> to vector<288x4xf32>
    %c0_15 = arith.constant 0 : index
    %c20 = arith.constant 20 : index
    %c0_16 = arith.constant 0 : index
    %25 = vector.load %arg1[%c0_15, %c20, %c0_16] : memref<1x328x4xf32, #tpu.memory_space<vmem>>, vector<1x288x4xf32>
    %26 = vector.shape_cast %25 : vector<1x288x4xf32> to vector<288x4xf32>
    %c0_17 = arith.constant 0 : index
    %c36 = arith.constant 36 : index
    %c0_18 = arith.constant 0 : index
    %27 = vector.load %arg1[%c0_17, %c36, %c0_18] : memref<1x328x4xf32, #tpu.memory_space<vmem>>, vector<1x288x4xf32>
    %28 = vector.shape_cast %27 : vector<1x288x4xf32> to vector<288x4xf32>
    %c0_19 = arith.constant 0 : index
    %c37 = arith.constant 37 : index
    %c0_20 = arith.constant 0 : index
    %29 = vector.load %arg1[%c0_19, %c37, %c0_20] : memref<1x328x4xf32, #tpu.memory_space<vmem>>, vector<1x288x4xf32>
    %30 = vector.shape_cast %29 : vector<1x288x4xf32> to vector<288x4xf32>
    %c0_21 = arith.constant 0 : index
    %c38 = arith.constant 38 : index
    %c0_22 = arith.constant 0 : index
    %31 = vector.load %arg1[%c0_21, %c38, %c0_22] : memref<1x328x4xf32, #tpu.memory_space<vmem>>, vector<1x288x4xf32>
    %32 = vector.shape_cast %31 : vector<1x288x4xf32> to vector<288x4xf32>
    %c0_23 = arith.constant 0 : index
    %c0_24 = arith.constant 0 : index
    %c0_25 = arith.constant 0 : index
    %33 = vector.load %arg2[%c0_23, %c0_24, %c0_25] : memref<1x328x4xf32, #tpu.memory_space<vmem>>, vector<1x288x4xf32>
    %34 = vector.shape_cast %33 : vector<1x288x4xf32> to vector<288x4xf32>
    %c0_26 = arith.constant 0 : index
    %c1_27 = arith.constant 1 : index
    %c0_28 = arith.constant 0 : index
    %35 = vector.load %arg2[%c0_26, %c1_27, %c0_28] : memref<1x328x4xf32, #tpu.memory_space<vmem>>, vector<1x288x4xf32>
    %36 = vector.shape_cast %35 : vector<1x288x4xf32> to vector<288x4xf32>
    %c0_29 = arith.constant 0 : index
    %c2_30 = arith.constant 2 : index
    %c0_31 = arith.constant 0 : index
    %37 = vector.load %arg2[%c0_29, %c2_30, %c0_31] : memref<1x328x4xf32, #tpu.memory_space<vmem>>, vector<1x288x4xf32>
    %38 = vector.shape_cast %37 : vector<1x288x4xf32> to vector<288x4xf32>
    %c0_32 = arith.constant 0 : index
    %c18_33 = arith.constant 18 : index
    %c0_34 = arith.constant 0 : index
    %39 = vector.load %arg2[%c0_32, %c18_33, %c0_34] : memref<1x328x4xf32, #tpu.memory_space<vmem>>, vector<1x288x4xf32>
    %40 = vector.shape_cast %39 : vector<1x288x4xf32> to vector<288x4xf32>
    %c0_35 = arith.constant 0 : index
    %c19_36 = arith.constant 19 : index
    %c0_37 = arith.constant 0 : index
    %41 = vector.load %arg2[%c0_35, %c19_36, %c0_37] : memref<1x328x4xf32, #tpu.memory_space<vmem>>, vector<1x288x4xf32>
    %42 = vector.shape_cast %41 : vector<1x288x4xf32> to vector<288x4xf32>
    %c0_38 = arith.constant 0 : index
    %c20_39 = arith.constant 20 : index
    %c0_40 = arith.constant 0 : index
    %43 = vector.load %arg2[%c0_38, %c20_39, %c0_40] : memref<1x328x4xf32, #tpu.memory_space<vmem>>, vector<1x288x4xf32>
    %44 = vector.shape_cast %43 : vector<1x288x4xf32> to vector<288x4xf32>
    %c0_41 = arith.constant 0 : index
    %c36_42 = arith.constant 36 : index
    %c0_43 = arith.constant 0 : index
    %45 = vector.load %arg2[%c0_41, %c36_42, %c0_43] : memref<1x328x4xf32, #tpu.memory_space<vmem>>, vector<1x288x4xf32>
    %46 = vector.shape_cast %45 : vector<1x288x4xf32> to vector<288x4xf32>
    %c0_44 = arith.constant 0 : index
    %c37_45 = arith.constant 37 : index
    %c0_46 = arith.constant 0 : index
    %47 = vector.load %arg2[%c0_44, %c37_45, %c0_46] : memref<1x328x4xf32, #tpu.memory_space<vmem>>, vector<1x288x4xf32>
    %48 = vector.shape_cast %47 : vector<1x288x4xf32> to vector<288x4xf32>
    %c0_47 = arith.constant 0 : index
    %c38_48 = arith.constant 38 : index
    %c0_49 = arith.constant 0 : index
    %49 = vector.load %arg2[%c0_47, %c38_48, %c0_49] : memref<1x328x4xf32, #tpu.memory_space<vmem>>, vector<1x288x4xf32>
    %50 = vector.shape_cast %49 : vector<1x288x4xf32> to vector<288x4xf32>
    %51 = tpu.concatenate %16, %18, %20, %22, %24, %26, %28, %30, %32, %34, %36, %38, %40, %42, %44, %46 in 1 : vector<288x4xf32>, vector<288x4xf32>, vector<288x4xf32>, vector<288x4xf32>, vector<288x4xf32>, vector<288x4xf32>, vector<288x4xf32>, vector<288x4xf32>, vector<288x4xf32>, vector<288x4xf32>, vector<288x4xf32>, vector<288x4xf32>, vector<288x4xf32>, vector<288x4xf32>, vector<288x4xf32>, vector<288x4xf32> -> vector<288x64xf32>
    %52 = tpu.concatenate %48, %50 in 1 : vector<288x4xf32>, vector<288x4xf32> -> vector<288x8xf32>
    %53 = tpu.concatenate %51, %52 in 1 : vector<288x64xf32>, vector<288x8xf32> -> vector<288x72xf32>
    %c0_50 = arith.constant 0 : index
    %c0_51 = arith.constant 0 : index
    %54 = vector.load %arg3[%c0_50, %c0_51] : memref<72x8xf32, #tpu.memory_space<vmem>>, vector<72x8xf32>
    %cst_52 = arith.constant dense<0.000000e+00> : vector<288x8xf32>
    %55 = tpu.matmul %53, %54, %cst_52 {dimension_numbers = #tpu.dot_dimension_numbers<[1], [0], [0], [1], [0, 0, 1, 1], [], []>} : vector<288x72xf32>, vector<72x8xf32>, vector<288x8xf32> -> vector<288x8xf32>
    %c0_53 = arith.constant 0 : index
    %c0_54 = arith.constant 0 : index
    %56 = vector.load %arg4[%c0_53, %c0_54] : memref<1x8xf32, #tpu.memory_space<vmem>>, vector<1x8xf32>
    %57 = vector.broadcast %56 : vector<1x8xf32> to vector<288x8xf32>
    %58 = arith.addf %55, %57 : vector<288x8xf32>
    %cst_55 = arith.constant 0.000000e+00 : f32
    %59 = vector.broadcast %cst_55 : f32 to vector<288x8xf32>
    %60 = arith.maximumf %58, %59 : vector<288x8xf32>
    %61 = vector.broadcast %14 : vector<288x1xf32> to vector<288x8xf32>
    %62 = arith.mulf %60, %61 : vector<288x8xf32>
    %cst_56 = arith.constant 0.000000e+00 : f32
    %63 = vector.broadcast %cst_56 : f32 to vector<19x8xf32>
    %c0_57 = arith.constant 0 : index
    %c0_58 = arith.constant 0 : index
    %64 = vector.load %arg8[%c0_57, %c0_58] : memref<328x8xf32, #tpu.memory_space<vmem>>, vector<19x8xf32>
    tpu.vector_store %arg8[%c0_57, %c0_58], %63 {strides = array<i32>} : memref<328x8xf32, #tpu.memory_space<vmem>>, vector<19x8xf32>,
    %cst_59 = arith.constant 0.000000e+00 : f32
    %65 = vector.broadcast %cst_59 : f32 to vector<21x8xf32>
    %c307 = arith.constant 307 : index
    %c0_60 = arith.constant 0 : index
    %66 = vector.load %arg8[%c307, %c0_60] : memref<328x8xf32, #tpu.memory_space<vmem>>, vector<21x8xf32>
    tpu.vector_store %arg8[%c307, %c0_60], %65 {strides = array<i32>} : memref<328x8xf32, #tpu.memory_space<vmem>>, vector<21x8xf32>,
    %c19_61 = arith.constant 19 : index
    %c0_62 = arith.constant 0 : index
    %67 = vector.load %arg8[%c19_61, %c0_62] : memref<328x8xf32, #tpu.memory_space<vmem>>, vector<288x8xf32>
    tpu.vector_store %arg8[%c19_61, %c0_62], %62 {strides = array<i32>} : memref<328x8xf32, #tpu.memory_space<vmem>>, vector<288x8xf32>,
    %c0_63 = arith.constant 0 : index
    %c0_64 = arith.constant 0 : index
    %68 = vector.load %arg8[%c0_63, %c0_64] : memref<328x8xf32, #tpu.memory_space<vmem>>, vector<288x8xf32>
    %c1_65 = arith.constant 1 : index
    %c0_66 = arith.constant 0 : index
    %69 = vector.load %arg8[%c1_65, %c0_66] : memref<328x8xf32, #tpu.memory_space<vmem>>, vector<288x8xf32>
    %c2_67 = arith.constant 2 : index
    %c0_68 = arith.constant 0 : index
    %70 = vector.load %arg8[%c2_67, %c0_68] : memref<328x8xf32, #tpu.memory_space<vmem>>, vector<288x8xf32>
    %c18_69 = arith.constant 18 : index
    %c0_70 = arith.constant 0 : index
    %71 = vector.load %arg8[%c18_69, %c0_70] : memref<328x8xf32, #tpu.memory_space<vmem>>, vector<288x8xf32>
    %c19_71 = arith.constant 19 : index
    %c0_72 = arith.constant 0 : index
    %72 = vector.load %arg8[%c19_71, %c0_72] : memref<328x8xf32, #tpu.memory_space<vmem>>, vector<288x8xf32>
    %c20_73 = arith.constant 20 : index
    %c0_74 = arith.constant 0 : index
    %73 = vector.load %arg8[%c20_73, %c0_74] : memref<328x8xf32, #tpu.memory_space<vmem>>, vector<288x8xf32>
    %c36_75 = arith.constant 36 : index
    %c0_76 = arith.constant 0 : index
    %74 = vector.load %arg8[%c36_75, %c0_76] : memref<328x8xf32, #tpu.memory_space<vmem>>, vector<288x8xf32>
    %c37_77 = arith.constant 37 : index
    %c0_78 = arith.constant 0 : index
    %75 = vector.load %arg8[%c37_77, %c0_78] : memref<328x8xf32, #tpu.memory_space<vmem>>, vector<288x8xf32>
    %c38_79 = arith.constant 38 : index
    %c0_80 = arith.constant 0 : index
    %76 = vector.load %arg8[%c38_79, %c0_80] : memref<328x8xf32, #tpu.memory_space<vmem>>, vector<288x8xf32>
    %77 = tpu.concatenate %68, %69, %70, %71, %72, %73, %74, %75, %76 in 1 : vector<288x8xf32>, vector<288x8xf32>, vector<288x8xf32>, vector<288x8xf32>, vector<288x8xf32>, vector<288x8xf32>, vector<288x8xf32>, vector<288x8xf32>, vector<288x8xf32> -> vector<288x72xf32>
    %c0_81 = arith.constant 0 : index
    %c0_82 = arith.constant 0 : index
    %78 = vector.load %arg5[%c0_81, %c0_82] : memref<72x8xf32, #tpu.memory_space<vmem>>, vector<72x8xf32>
    %cst_83 = arith.constant dense<0.000000e+00> : vector<288x8xf32>
    %79 = tpu.matmul %77, %78, %cst_83 {dimension_numbers = #tpu.dot_dimension_numbers<[1], [0], [0], [1], [0, 0, 1, 1], [], []>} : vector<288x72xf32>, vector<72x8xf32>, vector<288x8xf32> -> vector<288x8xf32>
    %c0_84 = arith.constant 0 : index
    %c0_85 = arith.constant 0 : index
    %80 = vector.load %arg6[%c0_84, %c0_85] : memref<1x8xf32, #tpu.memory_space<vmem>>, vector<1x8xf32>
    %81 = vector.broadcast %80 : vector<1x8xf32> to vector<288x8xf32>
    %82 = arith.addf %79, %81 : vector<288x8xf32>
    %cst_86 = arith.constant 0.000000e+00 : f32
    %83 = vector.broadcast %cst_86 : f32 to vector<288x8xf32>
    %84 = arith.maximumf %82, %83 : vector<288x8xf32>
    %c0_87 = arith.constant 0 : index
    %c0_88 = arith.constant 0 : index
    %c0_89 = arith.constant 0 : index
    %85 = vector.load %arg7[%c0_87, %c0_88, %c0_89] : memref<1x288x8xf32, #tpu.memory_space<vmem>>, vector<1x288x8xf32>
    %86 = vector.shape_cast %85 : vector<1x288x8xf32> to vector<288x8xf32>
    %87 = vector.shape_cast %84 : vector<288x8xf32> to vector<1x288x8xf32>
    tpu.vector_store %arg7[%c0_87, %c0_88, %c0_89], %87 {strides = array<i32>} : memref<1x288x8xf32, #tpu.memory_space<vmem>>, vector<1x288x8xf32>,
    return
  }
  func.func @transform_0(%arg0: i32) -> (i32, i32, i32) {
    %c0_i32 = arith.constant 0 : i32
    %c0_i32_0 = arith.constant 0 : i32
    %c0_i32_1 = arith.constant 0 : i32
    return %arg0, %c0_i32, %c0_i32_0 : i32, i32, i32
  }
  func.func @transform_1(%arg0: i32) -> (i32, i32, i32) {
    %c0_i32 = arith.constant 0 : i32
    %c0_i32_0 = arith.constant 0 : i32
    %c0_i32_1 = arith.constant 0 : i32
    return %arg0, %c0_i32, %c0_i32_0 : i32, i32, i32
  }
  func.func @transform_2(%arg0: i32) -> (i32, i32) {
    %c0_i32 = arith.constant 0 : i32
    %c0_i32_0 = arith.constant 0 : i32
    %c0_i32_1 = arith.constant 0 : i32
    return %c0_i32, %c0_i32_0 : i32, i32
  }
  func.func @transform_3(%arg0: i32) -> (i32, i32) {
    %c0_i32 = arith.constant 0 : i32
    %c0_i32_0 = arith.constant 0 : i32
    %c0_i32_1 = arith.constant 0 : i32
    return %c0_i32, %c0_i32_0 : i32, i32
  }
  func.func @transform_4(%arg0: i32) -> (i32, i32) {
    %c0_i32 = arith.constant 0 : i32
    %c0_i32_0 = arith.constant 0 : i32
    %c0_i32_1 = arith.constant 0 : i32
    return %c0_i32, %c0_i32_0 : i32, i32
  }
  func.func @transform_5(%arg0: i32) -> (i32, i32) {
    %c0_i32 = arith.constant 0 : i32
    %c0_i32_0 = arith.constant 0 : i32
    %c0_i32_1 = arith.constant 0 : i32
    return %c0_i32, %c0_i32_0 : i32, i32
  }
  func.func @transform_6(%arg0: i32) -> (i32, i32, i32) {
    %c0_i32 = arith.constant 0 : i32
    %c0_i32_0 = arith.constant 0 : i32
    %c0_i32_1 = arith.constant 0 : i32
    return %arg0, %c0_i32, %c0_i32_0 : i32, i32, i32
  }
}

</mosaic_0001>

<bundles_post_ra>
// kernel: basic_decoder_block.1
= control target key start
LH: loop header
LB: loop body
LE: loop exit
PB: predicated region body
PF: predicated region fallthrough
CT: control target
= control target key end

     0   :  { %s7076_s21 = smov 0   ;;  %s13102_s0 = inlined_call_operand.vmem [shape: f32[2,328,4], index: 0, kind: input, shape index: {}]   ;;  %s13103_s1 = inlined_call_operand.vmem [shape: f32[2,328,4], index: 1, kind: input, shape index: {}]   ;;  %s13104_s2 = inlined_call_operand.vmem [shape: f32[72,8], index: 2, kind: input, shape index: {}]   ;;  %s13105_s3 = inlined_call_operand.vmem [shape: f32[1,8], index: 3, kind: input, shape index: {}]   ;;  %s13106_s4 = inlined_call_operand.vmem [shape: f32[72,8], index: 4, kind: input, shape index: {}]   ;;  %s13107_s5 = inlined_call_operand.vmem [shape: f32[1,8], index: 5, kind: input, shape index: {}]   ;;  %s13108_s6 = inlined_call_operand.vmem [shape: f32[2,288,8], index: 6, kind: output, shape index: {}]  }
   0x1 LB: > { %s6671_s22 = sadd.s32 4294967295, %s7022_s21   ;;  %p6675_p0 = scmp.ge.s32.totalorder %s7022_s21, 1  ;;  %s7022_s21 = sphi %s7076_s21, %s16_s21  }
   0x2   : > { %p222_p1 = scmp.lt.s32.totalorder %s7022_s21, 3 }
   0x4   : > { %p223_p2 = pnand %p6675_p0, %p222_p1 }
   0x6   : > { %226 = sbr.rel (%p223_p2) target bundleno = 2451 (0x993), region = 44 }
   0xb   : > { %p257_p3 = scmp.lt.s32.totalorder %s6671_s22, 1  ;;  %s7024_s27 = smov 4   ;;  %vm3133_vm0 = vcmask 31744   ;;  %vm3170_vm1 = vcmask 64512   ;;  %vm3207_vm2 = vcmask 97280   ;;  %vm3244_vm3 = vcmask 130048  }
   0xc   : > { %s7025_s28 = smov 8   ;;  %s7026_s29 = smov 12   ;;  %vm3281_vm4 = vcmask 162816   ;;  %vm3318_vm5 = vcmask 195584   ;;  %vm3355_vm6 = vcmask 228352   ;;  %vm3392_vm7 = vcmask 261120  }
   0xd   : > { %s14266_s22 = smov (!%p257_p3, %s6671_s22), 1  ;;  %s7027_s30 = smov 16   ;;  %vm3429_vm8 = vcmask 293888   ;;  %vm3466_vm9 = vcmask 326656   ;;  %vm3503_vm10 = vcmask 359424   ;;  %vm3540_vm11 = vcmask 392192  }
   0xe   : > { %s6989_s23 = smul.u32 328, %s14266_s22  ;;  %s7028_s7 = smov 20   ;;  %vm3577_vm12 = vcmask 424960   ;;  %vm3614_vm13 = vcmask 457728   ;;  %vm3651_vm14 = vcmask 490496   ;;  %vm4012_vm15 = vcmask 523264  }
   0xf   : > { %s7029_s8 = smov 24   ;;  %s7030_s9 = smov 28  }
  0x10   : > { %s7092_s26 = scalar_lea.vmem %s13102_s0, %s6989_s23  ;;  %s7031_s10 = smov 32  }
  0x11   : > { %v635_v0 = vld [vmem:[%s7092_s26 + $0x11] sm:$0xff]  ;;  %v633_v1 = vld [vmem:[%s7092_s26 + $0x1] sm:$0xff]  ;;  %v636_v2 = vld [vmem:[%s7092_s26 + $0x19] sm:$0xff]  ;;  %s8337_s13 = scalar_lea.vmem %s13103_s1, %s6989_s23  ;;  %s7032_s14 = smov 36  }
  0x12   : > { %1149 = vrot.lane.b32.xlu1 %v635_v0, %s7024_s27  ;;  %1145 = vrot.lane.b32.xlu0 %v633_v1, %s7024_s27  ;;  %v634_v3 = vld [vmem:[%s7092_s26 + $0x9] sm:$0xff]  ;;  %v637_v5 = vld [vmem:[%s7092_s26 + $0x21] sm:$0xff]  ;;  %s7033_s15 = smov 40   ;;  %s7034_s16 = smov 44  }
  0x13   : > { %v638_v4 = vld [vmem:[%s7092_s26 + $0x29] sm:$0xff]  ;;  %v640_v6 = vld [vmem:[%s7092_s26 + $0x39] sm:$0xff]  ;;  %v639_v7 = vld [vmem:[%s7092_s26 + $0x31] sm:$0xff]  ;;  %s7035_s17 = smov 48   ;;  %s7036_s18 = smov 52  }
  0x14   : > { %v642_v8 = vld [vmem:[%s7092_s26 + $0x49] sm:$0xff]  ;;  %v641_v9 = vld [vmem:[%s7092_s26 + $0x41] sm:$0xff]  ;;  %v644_v10 = vld [vmem:[%s7092_s26 + $0x59] sm:$0xff]  ;;  %s7037_s19 = smov 56   ;;  %s7038_s20 = smov 60  }
  0x15   : > { %v643_v11 = vld [vmem:[%s7092_s26 + $0x51] sm:$0xff]  ;;  %v646_v12 = vld [vmem:[%s7092_s26 + $0x69] sm:$0xff]  ;;  %v645_v13 = vld [vmem:[%s7092_s26 + $0x61] sm:$0xff] }
  0x16   : > { %1151 = vrot.lane.b32.xlu1 %v636_v2, %s7024_s27  ;;  %1147 = vrot.lane.b32.xlu0 %v634_v3, %s7024_s27  ;;  %v648_v14 = vld [vmem:[%s7092_s26 + $0x79] sm:$0xff]  ;;  %v647_v15 = vld [vmem:[%s7092_s26 + $0x71] sm:$0xff] }
  0x17   : > { %v650_v16 = vld [vmem:[%s7092_s26 + $0x89] sm:$0xff]  ;;  %v649_v17 = vld [vmem:[%s7092_s26 + $0x81] sm:$0xff]  ;;  %v652_v18 = vld [vmem:[%s7092_s26 + $0x99] sm:$0xff] }
  0x18   : > { %v651_v19 = vld [vmem:[%s7092_s26 + $0x91] sm:$0xff]  ;;  %v654_v20 = vld [vmem:[%s7092_s26 + $0xa9] sm:$0xff]  ;;  %v653_v21 = vld [vmem:[%s7092_s26 + $0xa1] sm:$0xff] }
  0x19   : > { %v656_v22 = vld [vmem:[%s7092_s26 + $0xb9] sm:$0xff]  ;;  %v655_v23 = vld [vmem:[%s7092_s26 + $0xb1] sm:$0xff]  ;;  %v658_v24 = vld [vmem:[%s7092_s26 + $0xc9] sm:$0xff] }
  0x1a   : > { %1155 = vrot.lane.b32.xlu1 %v638_v4, %s7024_s27  ;;  %1153 = vrot.lane.b32.xlu0 %v637_v5, %s7024_s27  ;;  %v657_v25 = vld [vmem:[%s7092_s26 + $0xc1] sm:$0xff]  ;;  %v660_v26 = vld [vmem:[%s7092_s26 + $0xd9] sm:$0xff] }
  0x1b   : > { %v659_v27 = vld [vmem:[%s7092_s26 + $0xd1] sm:$0xff]  ;;  %v662_v28 = vld [vmem:[%s7092_s26 + $0xe9] sm:$0xff]  ;;  %v661_v29 = vld [vmem:[%s7092_s26 + $0xe1] sm:$0xff] }
  0x1c   : > { %v664_v30 = vld [vmem:[%s7092_s26 + $0xf9] sm:$0xff]  ;;  %v663_v31 = vld [vmem:[%s7092_s26 + $0xf1] sm:$0xff]  ;;  %v666_v32 = vld [vmem:[%s7092_s26 + $0x109] sm:$0xff] }
  0x1d   : > { %v665_v33 = vld [vmem:[%s7092_s26 + $0x101] sm:$0xff]  ;;  %v668_v34 = vld [vmem:[%s7092_s26 + $0x119] sm:$0xff]  ;;  %v667_v35 = vld [vmem:[%s7092_s26 + $0x111] sm:$0xff] }
  0x1e   : > { %1159 = vrot.lane.b32.xlu1 %v640_v6, %s7024_s27  ;;  %1157 = vrot.lane.b32.xlu0 %v639_v7, %s7024_s27  ;;  %v670_v36 = vld [vmem:[%s7092_s26 + $0xa] sm:$0xff]  ;;  %v669_v37 = vld [vmem:[%s7092_s26 + $0x2] sm:$0xff] }
  0x1f   : > { %v7171_v38 = vld [vmem:[%s7092_s26 + $0x1a] sm:$0xff]  ;;  %v7174_v39 = vld [vmem:[%s7092_s26 + $0x12] sm:$0xff]  ;;  %v7181_v40 = vld [vmem:[%s7092_s26 + $0x2a] sm:$0xff] }
  0x20   : > { %v7184_v41 = vld [vmem:[%s7092_s26 + $0x22] sm:$0xff]  ;;  %v7191_v42 = vld [vmem:[%s7092_s26 + $0x3a] sm:$0xff]  ;;  %v7194_v43 = vld [vmem:[%s7092_s26 + $0x32] sm:$0xff] }
  0x21   : > { %v7201_v44 = vld [vmem:[%s7092_s26 + $0x4a] sm:$0xff]  ;;  %v7204_v45 = vld [vmem:[%s7092_s26 + $0x42] sm:$0xff]  ;;  %v7211_v46 = vld [vmem:[%s7092_s26 + $0x5a] sm:$0xff] }
  0x22   : > { %1163 = vrot.lane.b32.xlu1 %v642_v8, %s7024_s27  ;;  %1161 = vrot.lane.b32.xlu0 %v641_v9, %s7024_s27  ;;  %v7214_v47 = vld [vmem:[%s7092_s26 + $0x52] sm:$0xff]  ;;  %v7221_v48 = vld [vmem:[%s7092_s26 + $0x6a] sm:$0xff] }
  0x23   : > { %v7224_v49 = vld [vmem:[%s7092_s26 + $0x62] sm:$0xff]  ;;  %v7231_v50 = vld [vmem:[%s7092_s26 + $0x7a] sm:$0xff]  ;;  %v7234_v51 = vld [vmem:[%s7092_s26 + $0x72] sm:$0xff] }
  0x24   : > { %v7241_v52 = vld [vmem:[%s7092_s26 + $0x8a] sm:$0xff]  ;;  %v7244_v53 = vld [vmem:[%s7092_s26 + $0x82] sm:$0xff]  ;;  %v7251_v54 = vld [vmem:[%s7092_s26 + $0x9a] sm:$0xff] }
  0x25   : > { %v7254_v55 = vld [vmem:[%s7092_s26 + $0x92] sm:$0xff]  ;;  %v7261_v56 = vld [vmem:[%s7092_s26 + $0xaa] sm:$0xff]  ;;  %v7264_v57 = vld [vmem:[%s7092_s26 + $0xa2] sm:$0xff] }
  0x26   : > { %1167 = vrot.lane.b32.xlu1 %v644_v10, %s7024_s27  ;;  %1165 = vrot.lane.b32.xlu0 %v643_v11, %s7024_s27  ;;  %v7271_v58 = vld [vmem:[%s7092_s26 + $0xba] sm:$0xff]  ;;  %v7274_v59 = vld [vmem:[%s7092_s26 + $0xb2] sm:$0xff] }
  0x27   : > { %v7285_v62 = vld [vmem:[%s7092_s26 + $0xca] sm:$0xff]  ;;  %v7288_v63 = vld [vmem:[%s7092_s26 + $0xc2] sm:$0xff]  ;;  %v7299_v2 = vld [vmem:[%s7092_s26 + $0xda] sm:$0xff] }
  0x28   : > { %v7302_v3 = vld [vmem:[%s7092_s26 + $0xd2] sm:$0xff]  ;;  %v7313_v6 = vld [vmem:[%s7092_s26 + $0xea] sm:$0xff]  ;;  %v7316_v7 = vld [vmem:[%s7092_s26 + $0xe2] sm:$0xff] }
  0x29   : > { %v7327_v10 = vld [vmem:[%s7092_s26 + $0xfa] sm:$0xff]  ;;  %v7330_v11 = vld [vmem:[%s7092_s26 + $0xf2] sm:$0xff] }
  0x2a   : > { %1171 = vrot.lane.b32.xlu1 %v646_v12, %s7024_s27  ;;  %1169 = vrot.lane.b32.xlu0 %v645_v13, %s7024_s27 }
  0x2e   : > { %1175 = vrot.lane.b32.xlu1 %v648_v14, %s7024_s27  ;;  %1173 = vrot.lane.b32.xlu0 %v647_v15, %s7024_s27  ;;  %v7341_v14 = vld [vmem:[%s7092_s26 + $0x10a] sm:$0xff]  ;;  %v7344_v15 = vld [vmem:[%s7092_s26 + $0x102] sm:$0xff] }
  0x32   : > { %1179 = vrot.lane.b32.xlu1 %v650_v16, %s7024_s27  ;;  %1177 = vrot.lane.b32.xlu0 %v649_v17, %s7024_s27 }
  0x36   : > { %1183 = vrot.lane.b32.xlu1 %v652_v18, %s7024_s27  ;;  %1181 = vrot.lane.b32.xlu0 %v651_v19, %s7024_s27  ;;  %v7355_v18 = vld [vmem:[%s7092_s26 + $0x11a] sm:$0xff]  ;;  %v7358_v19 = vld [vmem:[%s7092_s26 + $0x112] sm:$0xff] }
  0x3a   : > { %1187 = vrot.lane.b32.xlu1 %v654_v20, %s7024_s27  ;;  %1185 = vrot.lane.b32.xlu0 %v653_v21, %s7024_s27 }
  0x3e   : > { %1191 = vrot.lane.b32.xlu1 %v656_v22, %s7024_s27  ;;  %1189 = vrot.lane.b32.xlu0 %v655_v23, %s7024_s27 }
  0x42   : > { %1195 = vrot.lane.b32.xlu1 %v658_v24, %s7024_s27  ;;  %1193 = vrot.lane.b32.xlu0 %v657_v25, %s7024_s27 }
  0x46   : > { %1199 = vrot.lane.b32.xlu1 %v660_v26, %s7024_s27  ;;  %1197 = vrot.lane.b32.xlu0 %v659_v27, %s7024_s27 }
  0x4a   : > { %1203 = vrot.lane.b32.xlu1 %v662_v28, %s7024_s27  ;;  %1201 = vrot.lane.b32.xlu0 %v661_v29, %s7024_s27 }
  0x4e   : > { %1207 = vrot.lane.b32.xlu1 %v664_v30, %s7024_s27  ;;  %1205 = vrot.lane.b32.xlu0 %v663_v31, %s7024_s27 }
  0x52   : > { %1211 = vrot.lane.b32.xlu1 %v666_v32, %s7024_s27  ;;  %1209 = vrot.lane.b32.xlu0 %v665_v33, %s7024_s27 }
  0x56   : > { %1215 = vrot.lane.b32.xlu1 %v668_v34, %s7024_s27  ;;  %1213 = vrot.lane.b32.xlu0 %v667_v35, %s7024_s27 }
  0x5a   : > { %1291 = vrot.lane.b32.xlu1 %v670_v36, %s7025_s28  ;;  %1289 = vrot.lane.b32.xlu0 %v669_v37, %s7025_s28 }
  0x5e   : > { %1295 = vrot.lane.b32.xlu1 %v7171_v38, %s7025_s28  ;;  %1293 = vrot.lane.b32.xlu0 %v7174_v39, %s7025_s28 }
  0x62   : > { %1299 = vrot.lane.b32.xlu1 %v7181_v40, %s7025_s28  ;;  %1297 = vrot.lane.b32.xlu0 %v7184_v41, %s7025_s28 }
  0x66   : > { %1303 = vrot.lane.b32.xlu1 %v7191_v42, %s7025_s28  ;;  %1301 = vrot.lane.b32.xlu0 %v7194_v43, %s7025_s28 }
  0x6a   : > { %1307 = vrot.lane.b32.xlu1 %v7201_v44, %s7025_s28  ;;  %1305 = vrot.lane.b32.xlu0 %v7204_v45, %s7025_s28 }
  0x6e   : > { %1311 = vrot.lane.b32.xlu1 %v7211_v46, %s7025_s28  ;;  %1309 = vrot.lane.b32.xlu0 %v7214_v47, %s7025_s28 }
  0x72   : > { %1315 = vrot.lane.b32.xlu1 %v7221_v48, %s7025_s28  ;;  %1313 = vrot.lane.b32.xlu0 %v7224_v49, %s7025_s28 }
  0x76   : > { %1319 = vrot.lane.b32.xlu1 %v7231_v50, %s7025_s28  ;;  %1317 = vrot.lane.b32.xlu0 %v7234_v51, %s7025_s28 }
  0x7a   : > { %1323 = vrot.lane.b32.xlu1 %v7241_v52, %s7025_s28  ;;  %1321 = vrot.lane.b32.xlu0 %v7244_v53, %s7025_s28 }
  0x7e   : > { %1327 = vrot.lane.b32.xlu1 %v7251_v54, %s7025_s28  ;;  %1325 = vrot.lane.b32.xlu0 %v7254_v55, %s7025_s28 }
  0x82   : > { %1331 = vrot.lane.b32.xlu1 %v7261_v56, %s7025_s28  ;;  %1329 = vrot.lane.b32.xlu0 %v7264_v57, %s7025_s28 }
  0x84   : > { %v7276_v60 = vpop.permute.xlu1 %1149  ;;  %v7278_v61 = vpop.permute.xlu0 %1145 }
  0x86   : > { %1335 = vrot.lane.b32.xlu1 %v7271_v58, %s7025_s28  ;;  %1333 = vrot.lane.b32.xlu0 %v7274_v59, %s7025_s28 }
  0x88   : > { %v7290_v0 = vpop.permute.xlu1 %1151  ;;  %v7292_v1 = vpop.permute.xlu0 %1147 }
  0x8a   : > { %1339 = vrot.lane.b32.xlu1 %v7285_v62, %s7025_s28  ;;  %1337 = vrot.lane.b32.xlu0 %v7288_v63, %s7025_s28 }
  0x8c   : > { %v7304_v4 = vpop.permute.xlu1 %1155  ;;  %v7306_v5 = vpop.permute.xlu0 %1153 }
  0x8e   : > { %1343 = vrot.lane.b32.xlu1 %v7299_v2, %s7025_s28  ;;  %1341 = vrot.lane.b32.xlu0 %v7302_v3, %s7025_s28 }
  0x90   : > { %v7318_v8 = vpop.permute.xlu1 %1159  ;;  %v7320_v9 = vpop.permute.xlu0 %1157 }
  0x92   : > { %1347 = vrot.lane.b32.xlu1 %v7313_v6, %s7025_s28  ;;  %1345 = vrot.lane.b32.xlu0 %v7316_v7, %s7025_s28 }
  0x94   : > { %v7332_v12 = vpop.permute.xlu1 %1163  ;;  %v7334_v13 = vpop.permute.xlu0 %1161 }
  0x96   : > { %1351 = vrot.lane.b32.xlu1 %v7327_v10, %s7025_s28  ;;  %1349 = vrot.lane.b32.xlu0 %v7330_v11, %s7025_s28 }
  0x98   : > { %v7346_v16 = vpop.permute.xlu1 %1167  ;;  %v7348_v17 = vpop.permute.xlu0 %1165 }
  0x9a   : > { %1355 = vrot.lane.b32.xlu1 %v7341_v14, %s7025_s28  ;;  %1353 = vrot.lane.b32.xlu0 %v7344_v15, %s7025_s28 }
  0x9c   : > { %v7360_v20 = vpop.permute.xlu1 %1171  ;;  %v7362_v21 = vpop.permute.xlu0 %1169 }
  0x9e   : > { %1359 = vrot.lane.b32.xlu1 %v7355_v18, %s7025_s28  ;;  %1357 = vrot.lane.b32.xlu0 %v7358_v19, %s7025_s28 }
  0xa0   : > { %v7368_v22 = vpop.permute.xlu1 %1175  ;;  %v7370_v23 = vpop.permute.xlu0 %1173 }
  0xa2   : > { %1401 = vrot.lane.b32.xlu1 %v7171_v38, %s7026_s29  ;;  %1399 = vrot.lane.b32.xlu0 %v7174_v39, %s7026_s29 }
  0xa4   : > { %v7376_v24 = vpop.permute.xlu1 %1179  ;;  %v7378_v25 = vpop.permute.xlu0 %1177 }
  0xa6   : > { %1405 = vrot.lane.b32.xlu1 %v7181_v40, %s7026_s29  ;;  %1403 = vrot.lane.b32.xlu0 %v7184_v41, %s7026_s29 }
  0xa8   : > { %v7384_v26 = vpop.permute.xlu1 %1183  ;;  %v7386_v27 = vpop.permute.xlu0 %1181 }
  0xaa   : > { %1409 = vrot.lane.b32.xlu1 %v7191_v42, %s7026_s29  ;;  %1407 = vrot.lane.b32.xlu0 %v7194_v43, %s7026_s29 }
  0xac   : > { %v7392_v28 = vpop.permute.xlu1 %1187  ;;  %v7394_v29 = vpop.permute.xlu0 %1185 }
  0xae   : > { %1413 = vrot.lane.b32.xlu1 %v7201_v44, %s7026_s29  ;;  %1411 = vrot.lane.b32.xlu0 %v7204_v45, %s7026_s29 }
  0xb0   : > { %v7400_v30 = vpop.permute.xlu1 %1191  ;;  %v7402_v31 = vpop.permute.xlu0 %1189 }
  0xb2   : > { %1417 = vrot.lane.b32.xlu1 %v7211_v46, %s7026_s29  ;;  %1415 = vrot.lane.b32.xlu0 %v7214_v47, %s7026_s29 }
  0xb4   : > { %v7408_v32 = vpop.permute.xlu1 %1195  ;;  %v7410_v33 = vpop.permute.xlu0 %1193 }
  0xb6   : > { %1421 = vrot.lane.b32.xlu1 %v7221_v48, %s7026_s29  ;;  %1419 = vrot.lane.b32.xlu0 %v7224_v49, %s7026_s29 }
  0xb8   : > { %v7416_v34 = vpop.permute.xlu1 %1199  ;;  %v7418_v35 = vpop.permute.xlu0 %1197 }
  0xb9   : > { %13110 = vst [vmem:[#allocation3_spill] sm:$0xff] %v7416_v34  ;;  %13111 = vst [vmem:[#allocation4_spill] sm:$0xff] %v7418_v35 }
  0xba   : > { %1425 = vrot.lane.b32.xlu1 %v7231_v50, %s7026_s29  ;;  %1423 = vrot.lane.b32.xlu0 %v7234_v51, %s7026_s29 }
  0xbc   : > { %v7424_v36 = vpop.permute.xlu1 %1203  ;;  %v7426_v37 = vpop.permute.xlu0 %1201 }
  0xbd   : > { %13112 = vst [vmem:[#allocation5_spill] sm:$0xff] %v7424_v36  ;;  %13113 = vst [vmem:[#allocation6_spill] sm:$0xff] %v7426_v37 }
  0xbe   : > { %1429 = vrot.lane.b32.xlu1 %v7241_v52, %s7026_s29  ;;  %1427 = vrot.lane.b32.xlu0 %v7244_v53, %s7026_s29 }
  0xc0   : > { %v7432_v38 = vpop.permute.xlu1 %1207  ;;  %v7434_v39 = vpop.permute.xlu0 %1205 }
  0xc1   : > { %13114 = vst [vmem:[#allocation7_spill] sm:$0xff] %v7432_v38  ;;  %13115 = vst [vmem:[#allocation8_spill] sm:$0xff] %v7434_v39 }
  0xc2   : > { %1433 = vrot.lane.b32.xlu1 %v7251_v54, %s7026_s29  ;;  %1431 = vrot.lane.b32.xlu0 %v7254_v55, %s7026_s29 }
  0xc4   : > { %v7440_v40 = vpop.permute.xlu1 %1211  ;;  %v7442_v41 = vpop.permute.xlu0 %1209 }
  0xc5   : > { %13116 = vst [vmem:[#allocation9_spill] sm:$0xff] %v7440_v40  ;;  %13117 = vst [vmem:[#allocation10_spill] sm:$0xff] %v7442_v41 }
  0xc6   : > { %1437 = vrot.lane.b32.xlu1 %v7261_v56, %s7026_s29  ;;  %1435 = vrot.lane.b32.xlu0 %v7264_v57, %s7026_s29  ;;  %v706_v56 = vld [vmem:[%s7092_s26 + $0x12a] sm:$0xff]  ;;  %v705_v57 = vld [vmem:[%s7092_s26 + $0x122] sm:$0xff] }
  0xc8   : > { %v7448_v42 = vpop.permute.xlu1 %1215  ;;  %v7450_v43 = vpop.permute.xlu0 %1213 }
  0xc9   : > { %13118 = vst [vmem:[#allocation11_spill] sm:$0xff] %v7448_v42  ;;  %13119 = vst [vmem:[#allocation12_spill] sm:$0xff] %v7450_v43 }
  0xca   : > { %1441 = vrot.lane.b32.xlu1 %v7271_v58, %s7026_s29  ;;  %1439 = vrot.lane.b32.xlu0 %v7274_v59, %s7026_s29 }
  0xcc   : > { %v7456_v44 = vpop.permute.xlu1 %1291  ;;  %v7458_v45 = vpop.permute.xlu0 %1289 }
  0xcd   : > { %13120 = vst [vmem:[#allocation13_spill] sm:$0xff] %v7456_v44  ;;  %13121 = vst [vmem:[#allocation14_spill] sm:$0xff] %v7458_v45 }
  0xce   : > { %1445 = vrot.lane.b32.xlu1 %v7285_v62, %s7026_s29  ;;  %1443 = vrot.lane.b32.xlu0 %v7288_v63, %s7026_s29  ;;  %v708_v62 = vld [vmem:[%s7092_s26 + $0x1b] sm:$0xff]  ;;  %v707_v63 = vld [vmem:[%s7092_s26 + $0x13] sm:$0xff] }
  0xd0   : > { %v7464_v46 = vpop.permute.xlu1 %1295  ;;  %v7466_v47 = vpop.permute.xlu0 %1293 }
  0xd1   : > { %13122 = vst [vmem:[#allocation15_spill] sm:$0xff] %v7464_v46  ;;  %13123 = vst [vmem:[#allocation16_spill] sm:$0xff] %v7466_v47 }
  0xd2   : > { %1449 = vrot.lane.b32.xlu1 %v7299_v2, %s7026_s29  ;;  %1447 = vrot.lane.b32.xlu0 %v7302_v3, %s7026_s29 }
  0xd4   : > { %v7472_v48 = vpop.permute.xlu1 %1299  ;;  %v7474_v49 = vpop.permute.xlu0 %1297 }
  0xd5   : > { %13124 = vst [vmem:[#allocation17_spill] sm:$0xff] %v7472_v48  ;;  %13125 = vst [vmem:[#allocation18_spill] sm:$0xff] %v7474_v49 }
  0xd6   : > { %1453 = vrot.lane.b32.xlu1 %v7313_v6, %s7026_s29  ;;  %1451 = vrot.lane.b32.xlu0 %v7316_v7, %s7026_s29  ;;  %v710_v6 = vld [vmem:[%s7092_s26 + $0x2b] sm:$0xff]  ;;  %v709_v7 = vld [vmem:[%s7092_s26 + $0x23] sm:$0xff] }
  0xd8   : > { %v7480_v50 = vpop.permute.xlu1 %1303  ;;  %v7482_v51 = vpop.permute.xlu0 %1301 }
  0xd9   : > { %13126 = vst [vmem:[#allocation19_spill] sm:$0xff] %v7480_v50  ;;  %13127 = vst [vmem:[#allocation20_spill] sm:$0xff] %v7482_v51 }
  0xda   : > { %1457 = vrot.lane.b32.xlu1 %v7327_v10, %s7026_s29  ;;  %1455 = vrot.lane.b32.xlu0 %v7330_v11, %s7026_s29 }
  0xdc   : > { %v7488_v52 = vpop.permute.xlu1 %1307  ;;  %v7490_v53 = vpop.permute.xlu0 %1305 }
  0xdd   : > { %13128 = vst [vmem:[#allocation21_spill] sm:$0xff] %v7488_v52  ;;  %13129 = vst [vmem:[#allocation22_spill] sm:$0xff] %v7490_v53 }
  0xde   : > { %1461 = vrot.lane.b32.xlu1 %v7341_v14, %s7026_s29  ;;  %1459 = vrot.lane.b32.xlu0 %v7344_v15, %s7026_s29  ;;  %v712_v14 = vld [vmem:[%s7092_s26 + $0x3b] sm:$0xff]  ;;  %v711_v15 = vld [vmem:[%s7092_s26 + $0x33] sm:$0xff] }
  0xe0   : > { %v7496_v54 = vpop.permute.xlu1 %1311  ;;  %v7498_v55 = vpop.permute.xlu0 %1309 }
  0xe1   : > { %13130 = vst [vmem:[#allocation23_spill] sm:$0xff] %v7496_v54  ;;  %13131 = vst [vmem:[#allocation24_spill] sm:$0xff] %v7498_v55 }
  0xe2   : > { %1465 = vrot.lane.b32.xlu1 %v7355_v18, %s7026_s29  ;;  %1463 = vrot.lane.b32.xlu0 %v7358_v19, %s7026_s29 }
  0xe4   : > { %v7506_v58 = vpop.permute.xlu1 %1315  ;;  %v7508_v59 = vpop.permute.xlu0 %1313 }
  0xe5   : > { %13132 = vst [vmem:[#allocation25_spill] sm:$0xff] %v7506_v58  ;;  %13133 = vst [vmem:[#allocation26_spill] sm:$0xff] %v7508_v59 }
  0xe6   : > { %1469 = vrot.lane.b32.xlu1 %v706_v56, %s7026_s29  ;;  %1467 = vrot.lane.b32.xlu0 %v705_v57, %s7026_s29  ;;  %v714_v56 = vld [vmem:[%s7092_s26 + $0x4b] sm:$0xff]  ;;  %v713_v57 = vld [vmem:[%s7092_s26 + $0x43] sm:$0xff] }
  0xe8   : > { %v7514_v2 = vpop.permute.xlu1 %1319  ;;  %v7516_v3 = vpop.permute.xlu0 %1317 }
  0xe9   : > { %13134 = vst [vmem:[#allocation27_spill] sm:$0xff] %v7514_v2  ;;  %13135 = vst [vmem:[#allocation28_spill] sm:$0xff] %v7516_v3 }
  0xea   : > { %1545 = vrot.lane.b32.xlu1 %v708_v62, %s7027_s30  ;;  %1543 = vrot.lane.b32.xlu0 %v707_v63, %s7027_s30 }
  0xec   : > { %v7522_v10 = vpop.permute.xlu1 %1323  ;;  %v7524_v11 = vpop.permute.xlu0 %1321 }
  0xed   : > { %13136 = vst [vmem:[#allocation29_spill] sm:$0xff] %v7522_v10  ;;  %13137 = vst [vmem:[#allocation30_spill] sm:$0xff] %v7524_v11 }
  0xee   : > { %1549 = vrot.lane.b32.xlu1 %v710_v6, %s7027_s30  ;;  %1547 = vrot.lane.b32.xlu0 %v709_v7, %s7027_s30  ;;  %v716_v6 = vld [vmem:[%s7092_s26 + $0x5b] sm:$0xff]  ;;  %v715_v7 = vld [vmem:[%s7092_s26 + $0x53] sm:$0xff] }
  0xf0   : > { %v7530_v18 = vpop.permute.xlu1 %1327  ;;  %v7532_v19 = vpop.permute.xlu0 %1325 }
  0xf1   : > { %13138 = vst [vmem:[#allocation31_spill] sm:$0xff] %v7530_v18  ;;  %13139 = vst [vmem:[#allocation32_spill] sm:$0xff] %v7532_v19 }
  0xf2   : > { %1553 = vrot.lane.b32.xlu1 %v712_v14, %s7027_s30  ;;  %1551 = vrot.lane.b32.xlu0 %v711_v15, %s7027_s30  ;;  %v718_v15 = vld [vmem:[%s7092_s26 + $0x6b] sm:$0xff] }
  0xf4   : > { %v7538_v62 = vpop.permute.xlu1 %1331  ;;  %v7540_v63 = vpop.permute.xlu0 %1329 }
  0xf5   : > { %13140 = vst [vmem:[#allocation33_spill] sm:$0xff] %v7538_v62  ;;  %13141 = vst [vmem:[#allocation34_spill] sm:$0xff] %v7540_v63  ;;  %v717_v62 = vld [vmem:[%s7092_s26 + $0x63] sm:$0xff] }
  0xf6   : > { %1557 = vrot.lane.b32.xlu1 %v714_v56, %s7027_s30  ;;  %1555 = vrot.lane.b32.xlu0 %v713_v57, %s7027_s30  ;;  %v720_v57 = vld [vmem:[%s7092_s26 + $0x7b] sm:$0xff] }
  0xf8   : > { %v7546_v19 = vpop.permute.xlu1 %1335  ;;  %v7548_v14 = vpop.permute.xlu0 %1333 }
  0xf9   : > { %13142 = vst [vmem:[#allocation35_spill] sm:$0xff] %v7546_v19  ;;  %13143 = vst [vmem:[#allocation36_spill] sm:$0xff] %v7548_v14  ;;  %v719_v19 = vld [vmem:[%s7092_s26 + $0x73] sm:$0xff] }
  0xfa   : > { %1561 = vrot.lane.b32.xlu1 %v716_v6, %s7027_s30  ;;  %1559 = vrot.lane.b32.xlu0 %v715_v7, %s7027_s30  ;;  %v722_v7 = vld [vmem:[%s7092_s26 + $0x8b] sm:$0xff] }
  0xfc   : > { %v7554_v63 = vpop.permute.xlu1 %1339  ;;  %v7556_v56 = vpop.permute.xlu0 %1337 }
  0xfd   : > { %13144 = vst [vmem:[#allocation37_spill] sm:$0xff] %v7554_v63  ;;  %13145 = vst [vmem:[#allocation38_spill] sm:$0xff] %v7556_v56  ;;  %v721_v63 = vld [vmem:[%s7092_s26 + $0x83] sm:$0xff] }
  0xfe   : > { %1565 = vrot.lane.b32.xlu1 %v718_v15, %s7027_s30  ;;  %1563 = vrot.lane.b32.xlu0 %v717_v62, %s7027_s30  ;;  %v724_v62 = vld [vmem:[%s7092_s26 + $0x9b] sm:$0xff] }
 0x100   : > { %v7562_v14 = vpop.permute.xlu1 %1343  ;;  %v7564_v6 = vpop.permute.xlu0 %1341 }
 0x101   : > { %13146 = vst [vmem:[#allocation39_spill] sm:$0xff] %v7562_v14  ;;  %13147 = vst [vmem:[#allocation40_spill] sm:$0xff] %v7564_v6  ;;  %v723_v14 = vld [vmem:[%s7092_s26 + $0x93] sm:$0xff] }
 0x102   : > { %1569 = vrot.lane.b32.xlu1 %v720_v57, %s7027_s30  ;;  %1567 = vrot.lane.b32.xlu0 %v719_v19, %s7027_s30  ;;  %v726_v19 = vld [vmem:[%s7092_s26 + $0xab] sm:$0xff] }
 0x104   : > { %v7570_v56 = vpop.permute.xlu1 %1347  ;;  %v7572_v15 = vpop.permute.xlu0 %1345 }
 0x105   : > { %13148 = vst [vmem:[#allocation41_spill] sm:$0xff] %v7570_v56  ;;  %13149 = vst [vmem:[#allocation42_spill] sm:$0xff] %v7572_v15  ;;  %v725_v56 = vld [vmem:[%s7092_s26 + $0xa3] sm:$0xff] }
 0x106   : > { %1573 = vrot.lane.b32.xlu1 %v722_v7, %s7027_s30  ;;  %1571 = vrot.lane.b32.xlu0 %v721_v63, %s7027_s30  ;;  %v728_v63 = vld [vmem:[%s7092_s26 + $0xbb] sm:$0xff] }
 0x108   : > { %v7578_v6 = vpop.permute.xlu1 %1351  ;;  %v7580_v57 = vpop.permute.xlu0 %1349 }
 0x109   : > { %13150 = vst [vmem:[#allocation43_spill] sm:$0xff] %v7578_v6  ;;  %13151 = vst [vmem:[#allocation44_spill] sm:$0xff] %v7580_v57  ;;  %v727_v6 = vld [vmem:[%s7092_s26 + $0xb3] sm:$0xff] }
 0x10a   : > { %1577 = vrot.lane.b32.xlu1 %v724_v62, %s7027_s30  ;;  %1575 = vrot.lane.b32.xlu0 %v723_v14, %s7027_s30  ;;  %v730_v14 = vld [vmem:[%s7092_s26 + $0xcb] sm:$0xff] }
 0x10c   : > { %v7586_v15 = vpop.permute.xlu1 %1355  ;;  %v7588_v7 = vpop.permute.xlu0 %1353 }
 0x10d   : > { %13152 = vst [vmem:[#allocation45_spill] sm:$0xff] %v7586_v15  ;;  %13153 = vst [vmem:[#allocation46_spill] sm:$0xff] %v7588_v7  ;;  %v729_v15 = vld [vmem:[%s7092_s26 + $0xc3] sm:$0xff] }
 0x10e   : > { %1581 = vrot.lane.b32.xlu1 %v726_v19, %s7027_s30  ;;  %1579 = vrot.lane.b32.xlu0 %v725_v56, %s7027_s30  ;;  %v732_v56 = vld [vmem:[%s7092_s26 + $0xdb] sm:$0xff] }
 0x110   : > { %v7594_v57 = vpop.permute.xlu1 %1359  ;;  %v7596_v62 = vpop.permute.xlu0 %1357 }
 0x111   : > { %13154 = vst [vmem:[#allocation47_spill] sm:$0xff] %v7594_v57  ;;  %13155 = vst [vmem:[#allocation48_spill] sm:$0xff] %v7596_v62  ;;  %v731_v57 = vld [vmem:[%s7092_s26 + $0xd3] sm:$0xff] }
 0x112   : > { %1585 = vrot.lane.b32.xlu1 %v728_v63, %s7027_s30  ;;  %1583 = vrot.lane.b32.xlu0 %v727_v6, %s7027_s30  ;;  %v734_v6 = vld [vmem:[%s7092_s26 + $0xeb] sm:$0xff] }
 0x114   : > { %v7602_v7 = vpop.permute.xlu1 %1401  ;;  %v7604_v19 = vpop.permute.xlu0 %1399 }
 0x115   : > { %13156 = vst [vmem:[#allocation49_spill] sm:$0xff] %v7602_v7  ;;  %13157 = vst [vmem:[#allocation50_spill] sm:$0xff] %v7604_v19  ;;  %v733_v7 = vld [vmem:[%s7092_s26 + $0xe3] sm:$0xff] }
 0x116   : > { %1589 = vrot.lane.b32.xlu1 %v730_v14, %s7027_s30  ;;  %1587 = vrot.lane.b32.xlu0 %v729_v15, %s7027_s30  ;;  %v736_v15 = vld [vmem:[%s7092_s26 + $0xfb] sm:$0xff] }
 0x118   : > { %v7610_v62 = vpop.permute.xlu1 %1405  ;;  %v7612_v63 = vpop.permute.xlu0 %1403 }
 0x119   : > { %13158 = vst [vmem:[#allocation51_spill] sm:$0xff] %v7610_v62  ;;  %13159 = vst [vmem:[#allocation52_spill] sm:$0xff] %v7612_v63  ;;  %v735_v62 = vld [vmem:[%s7092_s26 + $0xf3] sm:$0xff] }
 0x11a   : > { %1593 = vrot.lane.b32.xlu1 %v732_v56, %s7027_s30  ;;  %1591 = vrot.lane.b32.xlu0 %v731_v57, %s7027_s30  ;;  %v738_v57 = vld [vmem:[%s7092_s26 + $0x10b] sm:$0xff] }
 0x11c   : > { %v7618_v19 = vpop.permute.xlu1 %1409  ;;  %v7620_v14 = vpop.permute.xlu0 %1407 }
 0x11d   : > { %13160 = vst [vmem:[#allocation53_spill] sm:$0xff] %v7618_v19  ;;  %13161 = vst [vmem:[#allocation54_spill] sm:$0xff] %v7620_v14  ;;  %v737_v19 = vld [vmem:[%s7092_s26 + $0x103] sm:$0xff] }
 0x11e   : > { %1597 = vrot.lane.b32.xlu1 %v734_v6, %s7027_s30  ;;  %1595 = vrot.lane.b32.xlu0 %v733_v7, %s7027_s30  ;;  %v740_v7 = vld [vmem:[%s7092_s26 + $0x11b] sm:$0xff] }
 0x120   : > { %v7626_v63 = vpop.permute.xlu1 %1413  ;;  %v7628_v56 = vpop.permute.xlu0 %1411 }
 0x121   : > { %13162 = vst [vmem:[#allocation55_spill] sm:$0xff] %v7626_v63  ;;  %13163 = vst [vmem:[#allocation56_spill] sm:$0xff] %v7628_v56  ;;  %v739_v63 = vld [vmem:[%s7092_s26 + $0x113] sm:$0xff] }
 0x122   : > { %1601 = vrot.lane.b32.xlu1 %v736_v15, %s7027_s30  ;;  %1599 = vrot.lane.b32.xlu0 %v735_v62, %s7027_s30  ;;  %v742_v62 = vld [vmem:[%s7092_s26 + $0x12b] sm:$0xff]  ;;  %v741_v15 = vld [vmem:[%s7092_s26 + $0x123] sm:$0xff] }
 0x124   : > { %v7634_v14 = vpop.permute.xlu1 %1417  ;;  %v7636_v6 = vpop.permute.xlu0 %1415 }
 0x125   : > { %13164 = vst [vmem:[#allocation57_spill] sm:$0xff] %v7634_v14  ;;  %13165 = vst [vmem:[#allocation58_spill] sm:$0xff] %v7636_v6 }
 0x126   : > { %1605 = vrot.lane.b32.xlu1 %v738_v57, %s7027_s30  ;;  %1603 = vrot.lane.b32.xlu0 %v737_v19, %s7027_s30  ;;  %v744_v19 = vld [vmem:[%s7092_s26 + $0x1c] sm:$0xff]  ;;  %v743_v57 = vld [vmem:[%s7092_s26 + $0x14] sm:$0xff] }
 0x128   : > { %v7642_v56 = vpop.permute.xlu1 %1421  ;;  %v7644_v18 = vpop.permute.xlu0 %1419 }
 0x129   : > { %13166 = vst [vmem:[#allocation59_spill] sm:$0xff] %v7642_v56  ;;  %13167 = vst [vmem:[#allocation60_spill] sm:$0xff] %v7644_v18 }
 0x12a   : > { %1609 = vrot.lane.b32.xlu1 %v740_v7, %s7027_s30  ;;  %1607 = vrot.lane.b32.xlu0 %v739_v63, %s7027_s30  ;;  %v7665_v63 = vld [vmem:[%s7092_s26 + $0x2c] sm:$0xff] }
 0x12c   : > { %v7650_v6 = vpop.permute.xlu1 %1425  ;;  %v7652_v14 = vpop.permute.xlu0 %1423 }
 0x12d   : > { %13168 = vst [vmem:[#allocation61_spill] sm:$0xff] %v7650_v6  ;;  %13169 = vst [vmem:[#allocation62_spill] sm:$0xff] %v7652_v14  ;;  %v7668_v14 = vld [vmem:[%s7092_s26 + $0x24] sm:$0xff] }
 0x12e   : > { %1613 = vrot.lane.b32.xlu1 %v742_v62, %s7027_s30  ;;  %1611 = vrot.lane.b32.xlu0 %v741_v15, %s7027_s30 }
 0x130   : > { %v7658_v18 = vpop.permute.xlu1 %1429  ;;  %v7660_v7 = vpop.permute.xlu0 %1427 }
 0x131   : > { %13170 = vst [vmem:[#allocation63_spill] sm:$0xff] %v7658_v18  ;;  %13171 = vst [vmem:[#allocation64_spill] sm:$0xff] %v7660_v7  ;;  %v7679_v7 = vld [vmem:[%s7092_s26 + $0x3c] sm:$0xff] }
 0x132   : > { %1689 = vrot.lane.b32.xlu1 %v744_v19, %s7028_s7  ;;  %1687 = vrot.lane.b32.xlu0 %v743_v57, %s7028_s7  ;;  %v7682_v19 = vld [vmem:[%s7092_s26 + $0x34] sm:$0xff] }
 0x134   : > { %v7670_v62 = vpop.permute.xlu1 %1433  ;;  %v7672_v15 = vpop.permute.xlu0 %1431 }
 0x135   : > { %13172 = vst [vmem:[#allocation65_spill] sm:$0xff] %v7670_v62  ;;  %13173 = vst [vmem:[#allocation66_spill] sm:$0xff] %v7672_v15  ;;  %v7693_v15 = vld [vmem:[%s7092_s26 + $0x4c] sm:$0xff]  ;;  %v7696_v62 = vld [vmem:[%s7092_s26 + $0x44] sm:$0xff] }
 0x136   : > { %1693 = vrot.lane.b32.xlu1 %v7665_v63, %s7028_s7  ;;  %1691 = vrot.lane.b32.xlu0 %v7668_v14, %s7028_s7 }
 0x138   : > { %v7684_v57 = vpop.permute.xlu1 %1437  ;;  %v7686_v18 = vpop.permute.xlu0 %1435 }
 0x139   : > { %13174 = vst [vmem:[#allocation67_spill] sm:$0xff] %v7684_v57  ;;  %13175 = vst [vmem:[#allocation68_spill] sm:$0xff] %v7686_v18  ;;  %v7707_v18 = vld [vmem:[%s7092_s26 + $0x5c] sm:$0xff]  ;;  %v7710_v57 = vld [vmem:[%s7092_s26 + $0x54] sm:$0xff] }
 0x13a   : > { %1697 = vrot.lane.b32.xlu1 %v7679_v7, %s7028_s7  ;;  %1695 = vrot.lane.b32.xlu0 %v7682_v19, %s7028_s7 }
 0x13c   : > { %v7698_v6 = vpop.permute.xlu1 %1441  ;;  %v7700_v56 = vpop.permute.xlu0 %1439 }
 0x13d   : > { %13176 = vst [vmem:[#allocation69_spill] sm:$0xff] %v7698_v6  ;;  %13177 = vst [vmem:[#allocation70_spill] sm:$0xff] %v7700_v56  ;;  %v7721_v56 = vld [vmem:[%s7092_s26 + $0x6c] sm:$0xff]  ;;  %v7724_v6 = vld [vmem:[%s7092_s26 + $0x64] sm:$0xff] }
 0x13e   : > { %1701 = vrot.lane.b32.xlu1 %v7693_v15, %s7028_s7  ;;  %1699 = vrot.lane.b32.xlu0 %v7696_v62, %s7028_s7 }
 0x140   : > { %v7712_v11 = vpop.permute.xlu1 %1445  ;;  %v7714_v10 = vpop.permute.xlu0 %1443 }
 0x141   : > { %13178 = vst [vmem:[#allocation71_spill] sm:$0xff] %v7712_v11  ;;  %13179 = vst [vmem:[#allocation72_spill] sm:$0xff] %v7714_v10  ;;  %v7735_v10 = vld [vmem:[%s7092_s26 + $0x7c] sm:$0xff]  ;;  %v7738_v11 = vld [vmem:[%s7092_s26 + $0x74] sm:$0xff] }
 0x142   : > { %1705 = vrot.lane.b32.xlu1 %v7707_v18, %s7028_s7  ;;  %1703 = vrot.lane.b32.xlu0 %v7710_v57, %s7028_s7 }
 0x144   : > { %v7726_v3 = vpop.permute.xlu1 %1449  ;;  %v7728_v2 = vpop.permute.xlu0 %1447 }
 0x145   : > { %13180 = vst [vmem:[#allocation73_spill] sm:$0xff] %v7726_v3  ;;  %13181 = vst [vmem:[#allocation74_spill] sm:$0xff] %v7728_v2  ;;  %v7749_v2 = vld [vmem:[%s7092_s26 + $0x8c] sm:$0xff]  ;;  %v7752_v3 = vld [vmem:[%s7092_s26 + $0x84] sm:$0xff] }
 0x146   : > { %1709 = vrot.lane.b32.xlu1 %v7721_v56, %s7028_s7  ;;  %1707 = vrot.lane.b32.xlu0 %v7724_v6, %s7028_s7 }
 0x148   : > { %v7740_v59 = vpop.permute.xlu1 %1453  ;;  %v7742_v58 = vpop.permute.xlu0 %1451 }
 0x149   : > { %13182 = vst [vmem:[#allocation75_spill] sm:$0xff] %v7740_v59  ;;  %13183 = vst [vmem:[#allocation76_spill] sm:$0xff] %v7742_v58  ;;  %v7763_v58 = vld [vmem:[%s7092_s26 + $0x9c] sm:$0xff]  ;;  %v7766_v59 = vld [vmem:[%s7092_s26 + $0x94] sm:$0xff] }
 0x14a   : > { %1713 = vrot.lane.b32.xlu1 %v7735_v10, %s7028_s7  ;;  %1711 = vrot.lane.b32.xlu0 %v7738_v11, %s7028_s7 }
 0x14c   : > { %v7754_v55 = vpop.permute.xlu1 %1457  ;;  %v7756_v54 = vpop.permute.xlu0 %1455 }
 0x14d   : > { %13184 = vst [vmem:[#allocation77_spill] sm:$0xff] %v7754_v55  ;;  %13185 = vst [vmem:[#allocation78_spill] sm:$0xff] %v7756_v54  ;;  %v7777_v54 = vld [vmem:[%s7092_s26 + $0xac] sm:$0xff]  ;;  %v7780_v55 = vld [vmem:[%s7092_s26 + $0xa4] sm:$0xff] }
 0x14e   : > { %1717 = vrot.lane.b32.xlu1 %v7749_v2, %s7028_s7  ;;  %1715 = vrot.lane.b32.xlu0 %v7752_v3, %s7028_s7 }
 0x150   : > { %v7768_v53 = vpop.permute.xlu1 %1461  ;;  %v7770_v52 = vpop.permute.xlu0 %1459 }
 0x151   : > { %13186 = vst [vmem:[#allocation79_spill] sm:$0xff] %v7768_v53  ;;  %13187 = vst [vmem:[#allocation80_spill] sm:$0xff] %v7770_v52  ;;  %v7791_v52 = vld [vmem:[%s7092_s26 + $0xbc] sm:$0xff]  ;;  %v7794_v53 = vld [vmem:[%s7092_s26 + $0xb4] sm:$0xff] }
 0x152   : > { %1721 = vrot.lane.b32.xlu1 %v7763_v58, %s7028_s7  ;;  %1719 = vrot.lane.b32.xlu0 %v7766_v59, %s7028_s7 }
 0x154   : > { %v7782_v51 = vpop.permute.xlu1 %1465  ;;  %v7784_v50 = vpop.permute.xlu0 %1463 }
 0x155   : > { %13188 = vst [vmem:[#allocation81_spill] sm:$0xff] %v7782_v51  ;;  %13189 = vst [vmem:[#allocation82_spill] sm:$0xff] %v7784_v50  ;;  %v7805_v50 = vld [vmem:[%s7092_s26 + $0xcc] sm:$0xff]  ;;  %v7808_v51 = vld [vmem:[%s7092_s26 + $0xc4] sm:$0xff] }
 0x156   : > { %1725 = vrot.lane.b32.xlu1 %v7777_v54, %s7028_s7  ;;  %1723 = vrot.lane.b32.xlu0 %v7780_v55, %s7028_s7 }
 0x158   : > { %v7796_v49 = vpop.permute.xlu1 %1469  ;;  %v7798_v48 = vpop.permute.xlu0 %1467 }
 0x159   : > { %13190 = vst [vmem:[#allocation83_spill] sm:$0xff] %v7796_v49  ;;  %13191 = vst [vmem:[#allocation84_spill] sm:$0xff] %v7798_v48  ;;  %v7819_v48 = vld [vmem:[%s7092_s26 + $0xdc] sm:$0xff]  ;;  %v7822_v49 = vld [vmem:[%s7092_s26 + $0xd4] sm:$0xff] }
 0x15a   : > { %1729 = vrot.lane.b32.xlu1 %v7791_v52, %s7028_s7  ;;  %1727 = vrot.lane.b32.xlu0 %v7794_v53, %s7028_s7 }
 0x15c   : > { %v7810_v47 = vpop.permute.xlu1 %1545  ;;  %v7812_v46 = vpop.permute.xlu0 %1543 }
 0x15d   : > { %13192 = vst [vmem:[#allocation85_spill] sm:$0xff] %v7810_v47  ;;  %13193 = vst [vmem:[#allocation86_spill] sm:$0xff] %v7812_v46  ;;  %v7833_v46 = vld [vmem:[%s7092_s26 + $0xec] sm:$0xff]  ;;  %v7836_v47 = vld [vmem:[%s7092_s26 + $0xe4] sm:$0xff] }
 0x15e   : > { %1733 = vrot.lane.b32.xlu1 %v7805_v50, %s7028_s7  ;;  %1731 = vrot.lane.b32.xlu0 %v7808_v51, %s7028_s7 }
 0x160   : > { %v7824_v45 = vpop.permute.xlu1 %1549  ;;  %v7826_v44 = vpop.permute.xlu0 %1547 }
 0x161   : > { %13194 = vst [vmem:[#allocation87_spill] sm:$0xff] %v7824_v45  ;;  %13195 = vst [vmem:[#allocation88_spill] sm:$0xff] %v7826_v44  ;;  %v7847_v44 = vld [vmem:[%s7092_s26 + $0xfc] sm:$0xff]  ;;  %v7850_v45 = vld [vmem:[%s7092_s26 + $0xf4] sm:$0xff] }
 0x162   : > { %1737 = vrot.lane.b32.xlu1 %v7819_v48, %s7028_s7  ;;  %1735 = vrot.lane.b32.xlu0 %v7822_v49, %s7028_s7 }
 0x164   : > { %v7838_v43 = vpop.permute.xlu1 %1553  ;;  %v7840_v42 = vpop.permute.xlu0 %1551 }
 0x165   : > { %13196 = vst [vmem:[#allocation89_spill] sm:$0xff] %v7838_v43  ;;  %13197 = vst [vmem:[#allocation90_spill] sm:$0xff] %v7840_v42  ;;  %v7861_v42 = vld [vmem:[%s7092_s26 + $0x10c] sm:$0xff]  ;;  %v7864_v43 = vld [vmem:[%s7092_s26 + $0x104] sm:$0xff] }
 0x166   : > { %1741 = vrot.lane.b32.xlu1 %v7833_v46, %s7028_s7  ;;  %1739 = vrot.lane.b32.xlu0 %v7836_v47, %s7028_s7 }
 0x168   : > { %v7852_v41 = vpop.permute.xlu1 %1557  ;;  %v7854_v40 = vpop.permute.xlu0 %1555 }
 0x169   : > { %13198 = vst [vmem:[#allocation91_spill] sm:$0xff] %v7852_v41  ;;  %13199 = vst [vmem:[#allocation92_spill] sm:$0xff] %v7854_v40  ;;  %v7875_v40 = vld [vmem:[%s7092_s26 + $0x11c] sm:$0xff]  ;;  %v7878_v41 = vld [vmem:[%s7092_s26 + $0x114] sm:$0xff] }
 0x16a   : > { %1745 = vrot.lane.b32.xlu1 %v7847_v44, %s7028_s7  ;;  %1743 = vrot.lane.b32.xlu0 %v7850_v45, %s7028_s7 }
 0x16c   : > { %v7866_v39 = vpop.permute.xlu1 %1561  ;;  %v7868_v38 = vpop.permute.xlu0 %1559 }
 0x16d   : > { %13200 = vst [vmem:[#allocation93_spill] sm:$0xff] %v7866_v39  ;;  %13201 = vst [vmem:[#allocation94_spill] sm:$0xff] %v7868_v38  ;;  %v7889_v38 = vld [vmem:[%s7092_s26 + $0x12c] sm:$0xff]  ;;  %v7892_v39 = vld [vmem:[%s7092_s26 + $0x124] sm:$0xff] }
 0x16e   : > { %1749 = vrot.lane.b32.xlu1 %v7861_v42, %s7028_s7  ;;  %1747 = vrot.lane.b32.xlu0 %v7864_v43, %s7028_s7 }
 0x170   : > { %v7880_v37 = vpop.permute.xlu1 %1565  ;;  %v7882_v36 = vpop.permute.xlu0 %1563 }
 0x171   : > { %13202 = vst [vmem:[#allocation95_spill] sm:$0xff] %v7880_v37  ;;  %13203 = vst [vmem:[#allocation96_spill] sm:$0xff] %v7882_v36 }
 0x172   : > { %1753 = vrot.lane.b32.xlu1 %v7875_v40, %s7028_s7  ;;  %1751 = vrot.lane.b32.xlu0 %v7878_v41, %s7028_s7 }
 0x174   : > { %v7894_v35 = vpop.permute.xlu1 %1569  ;;  %v7896_v34 = vpop.permute.xlu0 %1567 }
 0x175   : > { %13204 = vst [vmem:[#allocation97_spill] sm:$0xff] %v7894_v35  ;;  %13205 = vst [vmem:[#allocation98_spill] sm:$0xff] %v7896_v34 }
 0x176   : > { %1757 = vrot.lane.b32.xlu1 %v7889_v38, %s7028_s7  ;;  %1755 = vrot.lane.b32.xlu0 %v7892_v39, %s7028_s7 }
 0x178   : > { %v7902_v36 = vpop.permute.xlu1 %1573  ;;  %v7904_v37 = vpop.permute.xlu0 %1571 }
 0x179   : > { %13206 = vst [vmem:[#allocation99_spill] sm:$0xff] %v7902_v36  ;;  %13207 = vst [vmem:[#allocation100_spill] sm:$0xff] %v7904_v37 }
 0x17a   : > { %1799 = vrot.lane.b32.xlu1 %v7665_v63, %s7029_s8  ;;  %1797 = vrot.lane.b32.xlu0 %v7668_v14, %s7029_s8 }
 0x17c   : > { %v7910_v35 = vpop.permute.xlu1 %1577  ;;  %v7912_v34 = vpop.permute.xlu0 %1575 }
 0x17d   : > { %13208 = vst [vmem:[#allocation101_spill] sm:$0xff] %v7910_v35  ;;  %13209 = vst [vmem:[#allocation102_spill] sm:$0xff] %v7912_v34 }
 0x17e   : > { %1803 = vrot.lane.b32.xlu1 %v7679_v7, %s7029_s8  ;;  %1801 = vrot.lane.b32.xlu0 %v7682_v19, %s7029_s8 }
 0x180   : > { %v7918_v36 = vpop.permute.xlu1 %1581  ;;  %v7920_v37 = vpop.permute.xlu0 %1579 }
 0x181   : > { %13210 = vst [vmem:[#allocation103_spill] sm:$0xff] %v7918_v36  ;;  %13211 = vst [vmem:[#allocation104_spill] sm:$0xff] %v7920_v37 }
 0x182   : > { %1807 = vrot.lane.b32.xlu1 %v7693_v15, %s7029_s8  ;;  %1805 = vrot.lane.b32.xlu0 %v7696_v62, %s7029_s8 }
 0x184   : > { %v7926_v14 = vpop.permute.xlu1 %1585  ;;  %v7928_v63 = vpop.permute.xlu0 %1583 }
 0x185   : > { %13212 = vst [vmem:[#allocation105_spill] sm:$0xff] %v7926_v14  ;;  %13213 = vst [vmem:[#allocation106_spill] sm:$0xff] %v7928_v63 }
 0x186   : > { %1811 = vrot.lane.b32.xlu1 %v7707_v18, %s7029_s8  ;;  %1809 = vrot.lane.b32.xlu0 %v7710_v57, %s7029_s8 }
 0x188   : > { %v7934_v7 = vpop.permute.xlu1 %1589  ;;  %v7936_v19 = vpop.permute.xlu0 %1587 }
 0x189   : > { %13214 = vst [vmem:[#allocation107_spill] sm:$0xff] %v7934_v7  ;;  %13215 = vst [vmem:[#allocation108_spill] sm:$0xff] %v7936_v19 }
 0x18a   : > { %1815 = vrot.lane.b32.xlu1 %v7721_v56, %s7029_s8  ;;  %1813 = vrot.lane.b32.xlu0 %v7724_v6, %s7029_s8 }
 0x18c   : > { %v7942_v62 = vpop.permute.xlu1 %1593  ;;  %v7944_v15 = vpop.permute.xlu0 %1591 }
 0x18d   : > { %13216 = vst [vmem:[#allocation109_spill] sm:$0xff] %v7942_v62  ;;  %13217 = vst [vmem:[#allocation110_spill] sm:$0xff] %v7944_v15 }
 0x18e   : > { %1819 = vrot.lane.b32.xlu1 %v7735_v10, %s7029_s8  ;;  %1817 = vrot.lane.b32.xlu0 %v7738_v11, %s7029_s8 }
 0x190   : > { %v7950_v18 = vpop.permute.xlu1 %1597  ;;  %v7952_v57 = vpop.permute.xlu0 %1595 }
 0x191   : > { %13218 = vst [vmem:[#allocation111_spill] sm:$0xff] %v7950_v18  ;;  %13219 = vst [vmem:[#allocation112_spill] sm:$0xff] %v7952_v57 }
 0x192   : > { %1823 = vrot.lane.b32.xlu1 %v7749_v2, %s7029_s8  ;;  %1821 = vrot.lane.b32.xlu0 %v7752_v3, %s7029_s8 }
 0x194   : > { %v7958_v56 = vpop.permute.xlu1 %1601  ;;  %v7960_v6 = vpop.permute.xlu0 %1599 }
 0x195   : > { %13220 = vst [vmem:[#allocation113_spill] sm:$0xff] %v7958_v56  ;;  %13221 = vst [vmem:[#allocation114_spill] sm:$0xff] %v7960_v6 }
 0x196   : > { %1827 = vrot.lane.b32.xlu1 %v7763_v58, %s7029_s8  ;;  %1825 = vrot.lane.b32.xlu0 %v7766_v59, %s7029_s8 }
 0x198   : > { %v7966_v10 = vpop.permute.xlu1 %1605  ;;  %v7968_v11 = vpop.permute.xlu0 %1603 }
 0x199   : > { %13222 = vst [vmem:[#allocation115_spill] sm:$0xff] %v7966_v10  ;;  %13223 = vst [vmem:[#allocation116_spill] sm:$0xff] %v7968_v11 }
 0x19a   : > { %1831 = vrot.lane.b32.xlu1 %v7777_v54, %s7029_s8  ;;  %1829 = vrot.lane.b32.xlu0 %v7780_v55, %s7029_s8 }
 0x19c   : > { %v7974_v2 = vpop.permute.xlu1 %1609  ;;  %v7976_v3 = vpop.permute.xlu0 %1607 }
 0x19d   : > { %13224 = vst [vmem:[#allocation117_spill] sm:$0xff] %v7974_v2  ;;  %13225 = vst [vmem:[#allocation118_spill] sm:$0xff] %v7976_v3 }
 0x19e   : > { %1835 = vrot.lane.b32.xlu1 %v7791_v52, %s7029_s8  ;;  %1833 = vrot.lane.b32.xlu0 %v7794_v53, %s7029_s8 }
 0x1a0   : > { %v7982_v58 = vpop.permute.xlu1 %1613  ;;  %v7984_v59 = vpop.permute.xlu0 %1611 }
 0x1a1   : > { %13226 = vst [vmem:[#allocation119_spill] sm:$0xff] %v7982_v58  ;;  %13227 = vst [vmem:[#allocation120_spill] sm:$0xff] %v7984_v59 }
 0x1a2   : > { %1839 = vrot.lane.b32.xlu1 %v7805_v50, %s7029_s8  ;;  %1837 = vrot.lane.b32.xlu0 %v7808_v51, %s7029_s8 }
 0x1a4   : > { %v7990_v54 = vpop.permute.xlu1 %1689  ;;  %v7992_v55 = vpop.permute.xlu0 %1687 }
 0x1a5   : > { %13228 = vst [vmem:[#allocation121_spill] sm:$0xff] %v7990_v54  ;;  %13229 = vst [vmem:[#allocation122_spill] sm:$0xff] %v7992_v55 }
 0x1a6   : > { %1843 = vrot.lane.b32.xlu1 %v7819_v48, %s7029_s8  ;;  %1841 = vrot.lane.b32.xlu0 %v7822_v49, %s7029_s8 }
 0x1a8   : > { %v7998_v52 = vpop.permute.xlu1 %1693  ;;  %v8000_v53 = vpop.permute.xlu0 %1691 }
 0x1a9   : > { %13230 = vst [vmem:[#allocation123_spill] sm:$0xff] %v7998_v52  ;;  %13231 = vst [vmem:[#allocation124_spill] sm:$0xff] %v8000_v53 }
 0x1aa   : > { %1847 = vrot.lane.b32.xlu1 %v7833_v46, %s7029_s8  ;;  %1845 = vrot.lane.b32.xlu0 %v7836_v47, %s7029_s8 }
 0x1ac   : > { %v8006_v50 = vpop.permute.xlu1 %1697  ;;  %v8008_v51 = vpop.permute.xlu0 %1695 }
 0x1ad   : > { %13232 = vst [vmem:[#allocation125_spill] sm:$0xff] %v8006_v50  ;;  %13233 = vst [vmem:[#allocation126_spill] sm:$0xff] %v8008_v51 }
 0x1ae   : > { %1851 = vrot.lane.b32.xlu1 %v7847_v44, %s7029_s8  ;;  %1849 = vrot.lane.b32.xlu0 %v7850_v45, %s7029_s8 }
 0x1b0   : > { %v8014_v48 = vpop.permute.xlu1 %1701  ;;  %v8016_v49 = vpop.permute.xlu0 %1699 }
 0x1b1   : > { %13234 = vst [vmem:[#allocation127_spill] sm:$0xff] %v8014_v48  ;;  %13235 = vst [vmem:[#allocation128_spill] sm:$0xff] %v8016_v49 }
 0x1b2   : > { %1855 = vrot.lane.b32.xlu1 %v7861_v42, %s7029_s8  ;;  %1853 = vrot.lane.b32.xlu0 %v7864_v43, %s7029_s8  ;;  %v780_v42 = vld [vmem:[%s7092_s26 + $0x13c] sm:$0xff]  ;;  %v779_v43 = vld [vmem:[%s7092_s26 + $0x134] sm:$0xff] }
 0x1b4   : > { %v8022_v46 = vpop.permute.xlu1 %1705  ;;  %v8024_v47 = vpop.permute.xlu0 %1703 }
 0x1b5   : > { %13236 = vst [vmem:[#allocation129_spill] sm:$0xff] %v8022_v46  ;;  %13237 = vst [vmem:[#allocation130_spill] sm:$0xff] %v8024_v47 }
 0x1b6   : > { %1859 = vrot.lane.b32.xlu1 %v7875_v40, %s7029_s8  ;;  %1857 = vrot.lane.b32.xlu0 %v7878_v41, %s7029_s8  ;;  %v782_v41 = vld [vmem:[%s7092_s26 + $0x2d] sm:$0xff] }
 0x1b8   : > { %v8030_v44 = vpop.permute.xlu1 %1709  ;;  %v8032_v45 = vpop.permute.xlu0 %1707 }
 0x1b9   : > { %13238 = vst [vmem:[#allocation131_spill] sm:$0xff] %v8030_v44  ;;  %13239 = vst [vmem:[#allocation132_spill] sm:$0xff] %v8032_v45  ;;  %v781_v45 = vld [vmem:[%s7092_s26 + $0x25] sm:$0xff] }
 0x1ba   : > { %1863 = vrot.lane.b32.xlu1 %v7889_v38, %s7029_s8  ;;  %1861 = vrot.lane.b32.xlu0 %v7892_v39, %s7029_s8  ;;  %v784_v39 = vld [vmem:[%s7092_s26 + $0x3d] sm:$0xff] }
 0x1bc   : > { %v8040_v47 = vpop.permute.xlu1 %1713  ;;  %v8042_v40 = vpop.permute.xlu0 %1711 }
 0x1bd   : > { %13240 = vst [vmem:[#allocation133_spill] sm:$0xff] %v8040_v47  ;;  %13241 = vst [vmem:[#allocation134_spill] sm:$0xff] %v8042_v40  ;;  %v783_v40 = vld [vmem:[%s7092_s26 + $0x35] sm:$0xff] }
 0x1be   : > { %1867 = vrot.lane.b32.xlu1 %v780_v42, %s7029_s8  ;;  %1865 = vrot.lane.b32.xlu0 %v779_v43, %s7029_s8  ;;  %v786_v43 = vld [vmem:[%s7092_s26 + $0x4d] sm:$0xff] }
 0x1c0   : > { %v8048_v44 = vpop.permute.xlu1 %1717  ;;  %v8050_v38 = vpop.permute.xlu0 %1715 }
 0x1c1   : > { %13242 = vst [vmem:[#allocation135_spill] sm:$0xff] %v8048_v44  ;;  %13243 = vst [vmem:[#allocation136_spill] sm:$0xff] %v8050_v38  ;;  %v785_v38 = vld [vmem:[%s7092_s26 + $0x45] sm:$0xff] }
 0x1c2   : > { %1943 = vrot.lane.b32.xlu1 %v782_v41, %s7030_s9  ;;  %1941 = vrot.lane.b32.xlu0 %v781_v45, %s7030_s9  ;;  %v788_v45 = vld [vmem:[%s7092_s26 + $0x5d] sm:$0xff] }
 0x1c4   : > { %v8056_v47 = vpop.permute.xlu1 %1721  ;;  %v8058_v42 = vpop.permute.xlu0 %1719 }
 0x1c5   : > { %13244 = vst [vmem:[#allocation137_spill] sm:$0xff] %v8056_v47  ;;  %13245 = vst [vmem:[#allocation138_spill] sm:$0xff] %v8058_v42  ;;  %v787_v47 = vld [vmem:[%s7092_s26 + $0x55] sm:$0xff] }
 0x1c6   : > { %1947 = vrot.lane.b32.xlu1 %v784_v39, %s7030_s9  ;;  %1945 = vrot.lane.b32.xlu0 %v783_v40, %s7030_s9  ;;  %v790_v40 = vld [vmem:[%s7092_s26 + $0x6d] sm:$0xff] }
 0x1c8   : > { %v8064_v44 = vpop.permute.xlu1 %1725  ;;  %v8066_v41 = vpop.permute.xlu0 %1723 }
 0x1c9   : > { %13246 = vst [vmem:[#allocation139_spill] sm:$0xff] %v8064_v44  ;;  %13247 = vst [vmem:[#allocation140_spill] sm:$0xff] %v8066_v41  ;;  %v789_v44 = vld [vmem:[%s7092_s26 + $0x65] sm:$0xff] }
 0x1ca   : > { %1951 = vrot.lane.b32.xlu1 %v786_v43, %s7030_s9  ;;  %1949 = vrot.lane.b32.xlu0 %v785_v38, %s7030_s9  ;;  %v792_v38 = vld [vmem:[%s7092_s26 + $0x7d] sm:$0xff] }
 0x1cc   : > { %v8072_v42 = vpop.permute.xlu1 %1729  ;;  %v8074_v39 = vpop.permute.xlu0 %1727 }
 0x1cd   : > { %13248 = vst [vmem:[#allocation141_spill] sm:$0xff] %v8072_v42  ;;  %13249 = vst [vmem:[#allocation142_spill] sm:$0xff] %v8074_v39  ;;  %v791_v42 = vld [vmem:[%s7092_s26 + $0x75] sm:$0xff] }
 0x1ce   : > { %1955 = vrot.lane.b32.xlu1 %v788_v45, %s7030_s9  ;;  %1953 = vrot.lane.b32.xlu0 %v787_v47, %s7030_s9  ;;  %v794_v47 = vld [vmem:[%s7092_s26 + $0x8d] sm:$0xff] }
 0x1d0   : > { %v8080_v41 = vpop.permute.xlu1 %1733  ;;  %v8082_v43 = vpop.permute.xlu0 %1731 }
 0x1d1   : > { %13250 = vst [vmem:[#allocation143_spill] sm:$0xff] %v8080_v41  ;;  %13251 = vst [vmem:[#allocation144_spill] sm:$0xff] %v8082_v43  ;;  %v793_v41 = vld [vmem:[%s7092_s26 + $0x85] sm:$0xff] }
 0x1d2   : > { %1959 = vrot.lane.b32.xlu1 %v790_v40, %s7030_s9  ;;  %1957 = vrot.lane.b32.xlu0 %v789_v44, %s7030_s9  ;;  %v796_v44 = vld [vmem:[%s7092_s26 + $0x9d] sm:$0xff] }
 0x1d4   : > { %v8088_v39 = vpop.permute.xlu1 %1737  ;;  %v8090_v45 = vpop.permute.xlu0 %1735 }
 0x1d5   : > { %13252 = vst [vmem:[#allocation145_spill] sm:$0xff] %v8088_v39  ;;  %13253 = vst [vmem:[#allocation146_spill] sm:$0xff] %v8090_v45  ;;  %v795_v39 = vld [vmem:[%s7092_s26 + $0x95] sm:$0xff] }
 0x1d6   : > { %1963 = vrot.lane.b32.xlu1 %v792_v38, %s7030_s9  ;;  %1961 = vrot.lane.b32.xlu0 %v791_v42, %s7030_s9  ;;  %v798_v42 = vld [vmem:[%s7092_s26 + $0xad] sm:$0xff] }
 0x1d8   : > { %v8096_v43 = vpop.permute.xlu1 %1741  ;;  %v8098_v40 = vpop.permute.xlu0 %1739 }
 0x1d9   : > { %13254 = vst [vmem:[#allocation147_spill] sm:$0xff] %v8096_v43  ;;  %13255 = vst [vmem:[#allocation148_spill] sm:$0xff] %v8098_v40  ;;  %v797_v43 = vld [vmem:[%s7092_s26 + $0xa5] sm:$0xff] }
 0x1da   : > { %1967 = vrot.lane.b32.xlu1 %v794_v47, %s7030_s9  ;;  %1965 = vrot.lane.b32.xlu0 %v793_v41, %s7030_s9  ;;  %v800_v41 = vld [vmem:[%s7092_s26 + $0xbd] sm:$0xff] }
 0x1dc   : > { %v8104_v45 = vpop.permute.xlu1 %1745  ;;  %v8106_v38 = vpop.permute.xlu0 %1743 }
 0x1dd   : > { %13256 = vst [vmem:[#allocation149_spill] sm:$0xff] %v8104_v45  ;;  %13257 = vst [vmem:[#allocation150_spill] sm:$0xff] %v8106_v38  ;;  %v799_v45 = vld [vmem:[%s7092_s26 + $0xb5] sm:$0xff] }
 0x1de   : > { %1971 = vrot.lane.b32.xlu1 %v796_v44, %s7030_s9  ;;  %1969 = vrot.lane.b32.xlu0 %v795_v39, %s7030_s9  ;;  %v802_v39 = vld [vmem:[%s7092_s26 + $0xcd] sm:$0xff] }
 0x1e0   : > { %v8112_v40 = vpop.permute.xlu1 %1749  ;;  %v8114_v47 = vpop.permute.xlu0 %1747 }
 0x1e1   : > { %13258 = vst [vmem:[#allocation151_spill] sm:$0xff] %v8112_v40  ;;  %13259 = vst [vmem:[#allocation152_spill] sm:$0xff] %v8114_v47  ;;  %v801_v40 = vld [vmem:[%s7092_s26 + $0xc5] sm:$0xff] }
 0x1e2   : > { %1975 = vrot.lane.b32.xlu1 %v798_v42, %s7030_s9  ;;  %1973 = vrot.lane.b32.xlu0 %v797_v43, %s7030_s9  ;;  %v804_v43 = vld [vmem:[%s7092_s26 + $0xdd] sm:$0xff] }
 0x1e4   : > { %v8120_v38 = vpop.permute.xlu1 %1753  ;;  %v8122_v44 = vpop.permute.xlu0 %1751 }
 0x1e5   : > { %13260 = vst [vmem:[#allocation153_spill] sm:$0xff] %v8120_v38  ;;  %13261 = vst [vmem:[#allocation154_spill] sm:$0xff] %v8122_v44  ;;  %v803_v38 = vld [vmem:[%s7092_s26 + $0xd5] sm:$0xff] }
 0x1e6   : > { %1979 = vrot.lane.b32.xlu1 %v800_v41, %s7030_s9  ;;  %1977 = vrot.lane.b32.xlu0 %v799_v45, %s7030_s9  ;;  %v806_v45 = vld [vmem:[%s7092_s26 + $0xed] sm:$0xff] }
 0x1e8   : > { %v8128_v47 = vpop.permute.xlu1 %1757  ;;  %v8130_v42 = vpop.permute.xlu0 %1755 }
 0x1e9   : > { %13262 = vst [vmem:[#allocation155_spill] sm:$0xff] %v8128_v47  ;;  %13263 = vst [vmem:[#allocation156_spill] sm:$0xff] %v8130_v42  ;;  %v805_v47 = vld [vmem:[%s7092_s26 + $0xe5] sm:$0xff] }
 0x1ea   : > { %1983 = vrot.lane.b32.xlu1 %v802_v39, %s7030_s9  ;;  %1981 = vrot.lane.b32.xlu0 %v801_v40, %s7030_s9  ;;  %v808_v40 = vld [vmem:[%s7092_s26 + $0xfd] sm:$0xff] }
 0x1ec   : > { %v8136_v44 = vpop.permute.xlu1 %1799  ;;  %v8138_v41 = vpop.permute.xlu0 %1797 }
 0x1ed   : > { %13264 = vst [vmem:[#allocation157_spill] sm:$0xff] %v8136_v44  ;;  %13265 = vst [vmem:[#allocation158_spill] sm:$0xff] %v8138_v41  ;;  %v807_v44 = vld [vmem:[%s7092_s26 + $0xf5] sm:$0xff] }
 0x1ee   : > { %1987 = vrot.lane.b32.xlu1 %v804_v43, %s7030_s9  ;;  %1985 = vrot.lane.b32.xlu0 %v803_v38, %s7030_s9  ;;  %v810_v38 = vld [vmem:[%s7092_s26 + $0x10d] sm:$0xff] }
 0x1f0   : > { %v8144_v42 = vpop.permute.xlu1 %1803  ;;  %v8146_v39 = vpop.permute.xlu0 %1801 }
 0x1f1   : > { %13266 = vst [vmem:[#allocation159_spill] sm:$0xff] %v8144_v42  ;;  %13267 = vst [vmem:[#allocation160_spill] sm:$0xff] %v8146_v39  ;;  %v809_v42 = vld [vmem:[%s7092_s26 + $0x105] sm:$0xff] }
 0x1f2   : > { %1991 = vrot.lane.b32.xlu1 %v806_v45, %s7030_s9  ;;  %1989 = vrot.lane.b32.xlu0 %v805_v47, %s7030_s9  ;;  %v812_v47 = vld [vmem:[%s7092_s26 + $0x11d] sm:$0xff] }
 0x1f4   : > { %v8152_v41 = vpop.permute.xlu1 %1807  ;;  %v8154_v43 = vpop.permute.xlu0 %1805 }
 0x1f5   : > { %13268 = vst [vmem:[#allocation161_spill] sm:$0xff] %v8152_v41  ;;  %13269 = vst [vmem:[#allocation162_spill] sm:$0xff] %v8154_v43  ;;  %v811_v41 = vld [vmem:[%s7092_s26 + $0x115] sm:$0xff] }
 0x1f6   : > { %1995 = vrot.lane.b32.xlu1 %v808_v40, %s7030_s9  ;;  %1993 = vrot.lane.b32.xlu0 %v807_v44, %s7030_s9  ;;  %v814_v44 = vld [vmem:[%s7092_s26 + $0x12d] sm:$0xff] }
 0x1f8   : > { %v8160_v39 = vpop.permute.xlu1 %1811  ;;  %v8162_v45 = vpop.permute.xlu0 %1809 }
 0x1f9   : > { %13270 = vst [vmem:[#allocation163_spill] sm:$0xff] %v8160_v39  ;;  %13271 = vst [vmem:[#allocation164_spill] sm:$0xff] %v8162_v45  ;;  %v813_v39 = vld [vmem:[%s7092_s26 + $0x125] sm:$0xff] }
 0x1fa   : > { %1999 = vrot.lane.b32.xlu1 %v810_v38, %s7030_s9  ;;  %1997 = vrot.lane.b32.xlu0 %v809_v42, %s7030_s9  ;;  %v816_v42 = vld [vmem:[%s7092_s26 + $0x13d] sm:$0xff]  ;;  %v815_v38 = vld [vmem:[%s7092_s26 + $0x135] sm:$0xff] }
 0x1fc   : > { %v8168_v43 = vpop.permute.xlu1 %1815  ;;  %v8170_v40 = vpop.permute.xlu0 %1813 }
 0x1fd   : > { %13272 = vst [vmem:[#allocation165_spill] sm:$0xff] %v8168_v43  ;;  %13273 = vst [vmem:[#allocation166_spill] sm:$0xff] %v8170_v40 }
 0x1fe   : > { %2003 = vrot.lane.b32.xlu1 %v812_v47, %s7030_s9  ;;  %2001 = vrot.lane.b32.xlu0 %v811_v41, %s7030_s9  ;;  %v818_v41 = vld [vmem:[%s7092_s26 + $0x2e] sm:$0xff]  ;;  %v817_v47 = vld [vmem:[%s7092_s26 + $0x26] sm:$0xff] }
 0x200   : > { %v8176_v45 = vpop.permute.xlu1 %1819  ;;  %v8178_v46 = vpop.permute.xlu0 %1817 }
 0x201   : > { %13274 = vst [vmem:[#allocation167_spill] sm:$0xff] %v8176_v45  ;;  %13275 = vst [vmem:[#allocation168_spill] sm:$0xff] %v8178_v46 }
 0x202   : > { %2007 = vrot.lane.b32.xlu1 %v814_v44, %s7030_s9  ;;  %2005 = vrot.lane.b32.xlu0 %v813_v39, %s7030_s9  ;;  %v820_v39 = vld [vmem:[%s7092_s26 + $0x3e] sm:$0xff] }
 0x204   : > { %v8184_v40 = vpop.permute.xlu1 %1823  ;;  %v8186_v43 = vpop.permute.xlu0 %1821 }
 0x205   : > { %13276 = vst [vmem:[#allocation169_spill] sm:$0xff] %v8184_v40  ;;  %13277 = vst [vmem:[#allocation170_spill] sm:$0xff] %v8186_v43  ;;  %v819_v43 = vld [vmem:[%s7092_s26 + $0x36] sm:$0xff] }
 0x206   : > { %2011 = vrot.lane.b32.xlu1 %v816_v42, %s7030_s9  ;;  %2009 = vrot.lane.b32.xlu0 %v815_v38, %s7030_s9  ;;  %v822_v38 = vld [vmem:[%s7092_s26 + $0x4e] sm:$0xff]  ;;  %s7039_s9 = smov 64  }
 0x208   : > { %v8192_v46 = vpop.permute.xlu1 %1827  ;;  %v8194_v44 = vpop.permute.xlu0 %1825 }
 0x209   : > { %13278 = vst [vmem:[#allocation171_spill] sm:$0xff] %v8192_v46  ;;  %13279 = vst [vmem:[#allocation172_spill] sm:$0xff] %v8194_v44  ;;  %v821_v44 = vld [vmem:[%s7092_s26 + $0x46] sm:$0xff] }
 0x20a   : > { %2087 = vrot.lane.b32.xlu1 %v818_v41, %s7031_s10  ;;  %2085 = vrot.lane.b32.xlu0 %v817_v47, %s7031_s10  ;;  %v824_v47 = vld [vmem:[%s7092_s26 + $0x5e] sm:$0xff] }
 0x20c   : > { %v8200_v40 = vpop.permute.xlu1 %1831  ;;  %v8202_v42 = vpop.permute.xlu0 %1829 }
 0x20d   : > { %13280 = vst [vmem:[#allocation173_spill] sm:$0xff] %v8200_v40  ;;  %13281 = vst [vmem:[#allocation174_spill] sm:$0xff] %v8202_v42  ;;  %v823_v40 = vld [vmem:[%s7092_s26 + $0x56] sm:$0xff] }
 0x20e   : > { %2091 = vrot.lane.b32.xlu1 %v820_v39, %s7031_s10  ;;  %2089 = vrot.lane.b32.xlu0 %v819_v43, %s7031_s10  ;;  %v826_v43 = vld [vmem:[%s7092_s26 + $0x6e] sm:$0xff] }
 0x210   : > { %v8208_v46 = vpop.permute.xlu1 %1835  ;;  %v8210_v41 = vpop.permute.xlu0 %1833 }
 0x211   : > { %13282 = vst [vmem:[#allocation175_spill] sm:$0xff] %v8208_v46  ;;  %13283 = vst [vmem:[#allocation176_spill] sm:$0xff] %v8210_v41  ;;  %v825_v46 = vld [vmem:[%s7092_s26 + $0x66] sm:$0xff] }
 0x212   : > { %2095 = vrot.lane.b32.xlu1 %v822_v38, %s7031_s10  ;;  %2093 = vrot.lane.b32.xlu0 %v821_v44, %s7031_s10  ;;  %v828_v44 = vld [vmem:[%s7092_s26 + $0x7e] sm:$0xff] }
 0x214   : > { %v8216_v42 = vpop.permute.xlu1 %1839  ;;  %v8218_v39 = vpop.permute.xlu0 %1837 }
 0x215   : > { %13284 = vst [vmem:[#allocation177_spill] sm:$0xff] %v8216_v42  ;;  %13285 = vst [vmem:[#allocation178_spill] sm:$0xff] %v8218_v39  ;;  %v827_v42 = vld [vmem:[%s7092_s26 + $0x76] sm:$0xff] }
 0x216   : > { %2099 = vrot.lane.b32.xlu1 %v824_v47, %s7031_s10  ;;  %2097 = vrot.lane.b32.xlu0 %v823_v40, %s7031_s10  ;;  %v830_v40 = vld [vmem:[%s7092_s26 + $0x8e] sm:$0xff] }
 0x218   : > { %v8224_v41 = vpop.permute.xlu1 %1843  ;;  %v8226_v38 = vpop.permute.xlu0 %1841 }
 0x219   : > { %13286 = vst [vmem:[#allocation179_spill] sm:$0xff] %v8224_v41  ;;  %13287 = vst [vmem:[#allocation180_spill] sm:$0xff] %v8226_v38  ;;  %v829_v41 = vld [vmem:[%s7092_s26 + $0x86] sm:$0xff] }
 0x21a   : > { %2103 = vrot.lane.b32.xlu1 %v826_v43, %s7031_s10  ;;  %2101 = vrot.lane.b32.xlu0 %v825_v46, %s7031_s10  ;;  %v832_v46 = vld [vmem:[%s7092_s26 + $0x9e] sm:$0xff] }
 0x21c   : > { %v8232_v39 = vpop.permute.xlu1 %1847  ;;  %v8234_v47 = vpop.permute.xlu0 %1845 }
 0x21d   : > { %13288 = vst [vmem:[#allocation181_spill] sm:$0xff] %v8232_v39  ;;  %13289 = vst [vmem:[#allocation182_spill] sm:$0xff] %v8234_v47  ;;  %v831_v39 = vld [vmem:[%s7092_s26 + $0x96] sm:$0xff] }
 0x21e   : > { %2107 = vrot.lane.b32.xlu1 %v828_v44, %s7031_s10  ;;  %2105 = vrot.lane.b32.xlu0 %v827_v42, %s7031_s10  ;;  %v834_v42 = vld [vmem:[%s7092_s26 + $0xae] sm:$0xff] }
 0x220   : > { %v8240_v38 = vpop.permute.xlu1 %1851  ;;  %v8242_v43 = vpop.permute.xlu0 %1849 }
 0x221   : > { %13290 = vst [vmem:[#allocation183_spill] sm:$0xff] %v8240_v38  ;;  %13291 = vst [vmem:[#allocation184_spill] sm:$0xff] %v8242_v43  ;;  %v833_v38 = vld [vmem:[%s7092_s26 + $0xa6] sm:$0xff] }
 0x222   : > { %2111 = vrot.lane.b32.xlu1 %v830_v40, %s7031_s10  ;;  %2109 = vrot.lane.b32.xlu0 %v829_v41, %s7031_s10  ;;  %v836_v41 = vld [vmem:[%s7092_s26 + $0xbe] sm:$0xff] }
 0x224   : > { %v8248_v47 = vpop.permute.xlu1 %1855  ;;  %v8250_v44 = vpop.permute.xlu0 %1853 }
 0x225   : > { %13292 = vst [vmem:[#allocation185_spill] sm:$0xff] %v8248_v47  ;;  %13293 = vst [vmem:[#allocation186_spill] sm:$0xff] %v8250_v44  ;;  %v835_v47 = vld [vmem:[%s7092_s26 + $0xb6] sm:$0xff] }
 0x226   : > { %2115 = vrot.lane.b32.xlu1 %v832_v46, %s7031_s10  ;;  %2113 = vrot.lane.b32.xlu0 %v831_v39, %s7031_s10  ;;  %v838_v39 = vld [vmem:[%s7092_s26 + $0xce] sm:$0xff] }
 0x228   : > { %v8256_v43 = vpop.permute.xlu1 %1859  ;;  %v8258_v40 = vpop.permute.xlu0 %1857 }
 0x229   : > { %13294 = vst [vmem:[#allocation187_spill] sm:$0xff] %v8256_v43  ;;  %13295 = vst [vmem:[#allocation188_spill] sm:$0xff] %v8258_v40  ;;  %v837_v43 = vld [vmem:[%s7092_s26 + $0xc6] sm:$0xff] }
 0x22a   : > { %2119 = vrot.lane.b32.xlu1 %v834_v42, %s7031_s10  ;;  %2117 = vrot.lane.b32.xlu0 %v833_v38, %s7031_s10  ;;  %v840_v38 = vld [vmem:[%s7092_s26 + $0xde] sm:$0xff] }
 0x22c   : > { %v8264_v44 = vpop.permute.xlu1 %1863  ;;  %v8266_v46 = vpop.permute.xlu0 %1861 }
 0x22d   : > { %13296 = vst [vmem:[#allocation189_spill] sm:$0xff] %v8264_v44  ;;  %13297 = vst [vmem:[#allocation190_spill] sm:$0xff] %v8266_v46  ;;  %v839_v44 = vld [vmem:[%s7092_s26 + $0xd6] sm:$0xff] }
 0x22e   : > { %2123 = vrot.lane.b32.xlu1 %v836_v41, %s7031_s10  ;;  %2121 = vrot.lane.b32.xlu0 %v835_v47, %s7031_s10  ;;  %v842_v47 = vld [vmem:[%s7092_s26 + $0xee] sm:$0xff] }
 0x230   : > { %v8272_v40 = vpop.permute.xlu1 %1867  ;;  %v8274_v42 = vpop.permute.xlu0 %1865 }
 0x231   : > { %13298 = vst [vmem:[#allocation191_spill] sm:$0xff] %v8272_v40  ;;  %13299 = vst [vmem:[#allocation192_spill] sm:$0xff] %v8274_v42  ;;  %v841_v40 = vld [vmem:[%s7092_s26 + $0xe6] sm:$0xff] }
 0x232   : > { %2127 = vrot.lane.b32.xlu1 %v838_v39, %s7031_s10  ;;  %2125 = vrot.lane.b32.xlu0 %v837_v43, %s7031_s10  ;;  %v844_v43 = vld [vmem:[%s7092_s26 + $0xfe] sm:$0xff] }
 0x234   : > { %v8280_v46 = vpop.permute.xlu1 %1943  ;;  %v8282_v41 = vpop.permute.xlu0 %1941 }
 0x235   : > { %13300 = vst [vmem:[#allocation193_spill] sm:$0xff] %v8280_v46  ;;  %13301 = vst [vmem:[#allocation194_spill] sm:$0xff] %v8282_v41  ;;  %v843_v46 = vld [vmem:[%s7092_s26 + $0xf6] sm:$0xff] }
 0x236   : > { %2131 = vrot.lane.b32.xlu1 %v840_v38, %s7031_s10  ;;  %2129 = vrot.lane.b32.xlu0 %v839_v44, %s7031_s10  ;;  %v846_v44 = vld [vmem:[%s7092_s26 + $0x10e] sm:$0xff] }
 0x238   : > { %v8288_v42 = vpop.permute.xlu1 %1947  ;;  %v8290_v39 = vpop.permute.xlu0 %1945 }
 0x239   : > { %13302 = vst [vmem:[#allocation195_spill] sm:$0xff] %v8288_v42  ;;  %13303 = vst [vmem:[#allocation196_spill] sm:$0xff] %v8290_v39  ;;  %v845_v42 = vld [vmem:[%s7092_s26 + $0x106] sm:$0xff] }
 0x23a   : > { %2135 = vrot.lane.b32.xlu1 %v842_v47, %s7031_s10  ;;  %2133 = vrot.lane.b32.xlu0 %v841_v40, %s7031_s10  ;;  %v848_v40 = vld [vmem:[%s7092_s26 + $0x11e] sm:$0xff] }
 0x23c   : > { %v8296_v41 = vpop.permute.xlu1 %1951  ;;  %v8298_v38 = vpop.permute.xlu0 %1949 }
 0x23d   : > { %13304 = vst [vmem:[#allocation197_spill] sm:$0xff] %v8296_v41  ;;  %13305 = vst [vmem:[#allocation198_spill] sm:$0xff] %v8298_v38  ;;  %v847_v38 = vld [vmem:[%s7092_s26 + $0x116] sm:$0xff] }
 0x23e   : > { %2139 = vrot.lane.b32.xlu1 %v844_v43, %s7031_s10  ;;  %2137 = vrot.lane.b32.xlu0 %v843_v46, %s7031_s10  ;;  %v850_v46 = vld [vmem:[%s7092_s26 + $0x12e] sm:$0xff] }
 0x240   : > { %v8304_v39 = vpop.permute.xlu1 %1955  ;;  %v8306_v47 = vpop.permute.xlu0 %1953 }
 0x241   : > { %13306 = vst [vmem:[#allocation199_spill] sm:$0xff] %v8304_v39  ;;  %13307 = vst [vmem:[#allocation200_spill] sm:$0xff] %v8306_v47  ;;  %v849_v39 = vld [vmem:[%s7092_s26 + $0x126] sm:$0xff] }
 0x242   : > { %2143 = vrot.lane.b32.xlu1 %v846_v44, %s7031_s10  ;;  %2141 = vrot.lane.b32.xlu0 %v845_v42, %s7031_s10  ;;  %v852_v42 = vld [vmem:[%s7092_s26 + $0x13e] sm:$0xff]  ;;  %v851_v44 = vld [vmem:[%s7092_s26 + $0x136] sm:$0xff] }
 0x244   : > { %v8312_v41 = vpop.permute.xlu1 %1959  ;;  %v8314_v43 = vpop.permute.xlu0 %1957 }
 0x245   : > { %13308 = vst [vmem:[#allocation201_spill] sm:$0xff] %v8312_v41  ;;  %13309 = vst [vmem:[#allocation202_spill] sm:$0xff] %v8314_v43 }
 0x246   : > { %2147 = vrot.lane.b32.xlu1 %v848_v40, %s7031_s10  ;;  %2145 = vrot.lane.b32.xlu0 %v847_v38, %s7031_s10  ;;  %v853_v38 = vld [vmem:[%s8337_s13] sm:$0xff] }
 0x248   : > { %v8320_v45 = vpop.permute.xlu1 %1963  ;;  %v8322_v47 = vpop.permute.xlu0 %1961 }
 0x249   : > { %13310 = vst [vmem:[#allocation203_spill] sm:$0xff] %v8320_v45  ;;  %13311 = vst [vmem:[#allocation204_spill] sm:$0xff] %v8322_v47 }
 0x24a   : > { %2151 = vrot.lane.b32.xlu1 %v850_v46, %s7031_s10  ;;  %2149 = vrot.lane.b32.xlu0 %v849_v39, %s7031_s10  ;;  %v854_v39 = vld [vmem:[%s8337_s13 + $0x8] sm:$0xff] }
 0x24c   : > { %v8328_v49 = vpop.permute.xlu1 %1967  ;;  %v8330_v41 = vpop.permute.xlu0 %1965 }
 0x24d   : > { %13312 = vst [vmem:[#allocation205_spill] sm:$0xff] %v8328_v49  ;;  %13313 = vst [vmem:[#allocation206_spill] sm:$0xff] %v8330_v41  ;;  %v856_v41 = vld [vmem:[%s8337_s13 + $0x18] sm:$0xff]  ;;  %v855_v49 = vld [vmem:[%s8337_s13 + $0x10] sm:$0xff] }
 0x24e   : > { %2155 = vrot.lane.b32.xlu1 %v852_v42, %s7031_s10  ;;  %2153 = vrot.lane.b32.xlu0 %v851_v44, %s7031_s10  ;;  %v858_v44 = vld [vmem:[%s8337_s13 + $0x28] sm:$0xff] }
 0x250   : > { %v8343_v40 = vpop.permute.xlu1 %1971  ;;  %v8345_v46 = vpop.permute.xlu0 %1969 }
 0x251   : > { %13314 = vst [vmem:[#allocation207_spill] sm:$0xff] %v8343_v40  ;;  %13315 = vst [vmem:[#allocation208_spill] sm:$0xff] %v8345_v46  ;;  %v857_v46 = vld [vmem:[%s8337_s13 + $0x20] sm:$0xff] }
 0x252   : > { %2231 = vrot.lane.b32.xlu1 %v854_v39, %s7032_s14  ;;  %2229 = vrot.lane.b32.xlu0 %v853_v38, %s7032_s14  ;;  %v860_v38 = vld [vmem:[%s8337_s13 + $0x38] sm:$0xff] }
 0x254   : > { %v8351_v47 = vpop.permute.xlu1 %1975  ;;  %v8353_v42 = vpop.permute.xlu0 %1973 }
 0x255   : > { %13316 = vst [vmem:[#allocation209_spill] sm:$0xff] %v8351_v47  ;;  %13317 = vst [vmem:[#allocation210_spill] sm:$0xff] %v8353_v42  ;;  %v859_v47 = vld [vmem:[%s8337_s13 + $0x30] sm:$0xff] }
 0x256   : > { %2235 = vrot.lane.b32.xlu1 %v856_v41, %s7032_s14  ;;  %2233 = vrot.lane.b32.xlu0 %v855_v49, %s7032_s14  ;;  %v862_v49 = vld [vmem:[%s8337_s13 + $0x48] sm:$0xff] }
 0x258   : > { %v8359_v40 = vpop.permute.xlu1 %1979  ;;  %v8361_v39 = vpop.permute.xlu0 %1977 }
 0x259   : > { %13318 = vst [vmem:[#allocation211_spill] sm:$0xff] %v8359_v40  ;;  %13319 = vst [vmem:[#allocation212_spill] sm:$0xff] %v8361_v39  ;;  %v861_v40 = vld [vmem:[%s8337_s13 + $0x40] sm:$0xff] }
 0x25a   : > { %2239 = vrot.lane.b32.xlu1 %v858_v44, %s7032_s14  ;;  %2237 = vrot.lane.b32.xlu0 %v857_v46, %s7032_s14  ;;  %v864_v46 = vld [vmem:[%s8337_s13 + $0x58] sm:$0xff] }
 0x25c   : > { %v8367_v42 = vpop.permute.xlu1 %1983  ;;  %v8369_v41 = vpop.permute.xlu0 %1981 }
 0x25d   : > { %13320 = vst [vmem:[#allocation213_spill] sm:$0xff] %v8367_v42  ;;  %13321 = vst [vmem:[#allocation214_spill] sm:$0xff] %v8369_v41  ;;  %v863_v42 = vld [vmem:[%s8337_s13 + $0x50] sm:$0xff] }
 0x25e   : > { %2243 = vrot.lane.b32.xlu1 %v860_v38, %s7032_s14  ;;  %2241 = vrot.lane.b32.xlu0 %v859_v47, %s7032_s14  ;;  %v866_v47 = vld [vmem:[%s8337_s13 + $0x68] sm:$0xff] }
 0x260   : > { %v8375_v39 = vpop.permute.xlu1 %1987  ;;  %v8377_v44 = vpop.permute.xlu0 %1985 }
 0x261   : > { %13322 = vst [vmem:[#allocation215_spill] sm:$0xff] %v8375_v39  ;;  %13323 = vst [vmem:[#allocation216_spill] sm:$0xff] %v8377_v44  ;;  %v865_v39 = vld [vmem:[%s8337_s13 + $0x60] sm:$0xff] }
 0x262   : > { %2247 = vrot.lane.b32.xlu1 %v862_v49, %s7032_s14  ;;  %2245 = vrot.lane.b32.xlu0 %v861_v40, %s7032_s14  ;;  %v868_v40 = vld [vmem:[%s8337_s13 + $0x78] sm:$0xff] }
 0x264   : > { %v8383_v41 = vpop.permute.xlu1 %1991  ;;  %v8385_v38 = vpop.permute.xlu0 %1989 }
 0x265   : > { %13324 = vst [vmem:[#allocation217_spill] sm:$0xff] %v8383_v41  ;;  %13325 = vst [vmem:[#allocation218_spill] sm:$0xff] %v8385_v38  ;;  %v867_v41 = vld [vmem:[%s8337_s13 + $0x70] sm:$0xff] }
 0x266   : > { %2251 = vrot.lane.b32.xlu1 %v864_v46, %s7032_s14  ;;  %2249 = vrot.lane.b32.xlu0 %v863_v42, %s7032_s14  ;;  %v870_v42 = vld [vmem:[%s8337_s13 + $0x88] sm:$0xff] }
 0x268   : > { %v8391_v44 = vpop.permute.xlu1 %1995  ;;  %v8393_v49 = vpop.permute.xlu0 %1993 }
 0x269   : > { %13326 = vst [vmem:[#allocation219_spill] sm:$0xff] %v8391_v44  ;;  %13327 = vst [vmem:[#allocation220_spill] sm:$0xff] %v8393_v49  ;;  %v869_v44 = vld [vmem:[%s8337_s13 + $0x80] sm:$0xff] }
 0x26a   : > { %2255 = vrot.lane.b32.xlu1 %v866_v47, %s7032_s14  ;;  %2253 = vrot.lane.b32.xlu0 %v865_v39, %s7032_s14  ;;  %v872_v39 = vld [vmem:[%s8337_s13 + $0x98] sm:$0xff] }
 0x26c   : > { %v8399_v38 = vpop.permute.xlu1 %1999  ;;  %v8401_v46 = vpop.permute.xlu0 %1997 }
 0x26d   : > { %13328 = vst [vmem:[#allocation221_spill] sm:$0xff] %v8399_v38  ;;  %13329 = vst [vmem:[#allocation222_spill] sm:$0xff] %v8401_v46  ;;  %v871_v38 = vld [vmem:[%s8337_s13 + $0x90] sm:$0xff] }
 0x26e   : > { %2259 = vrot.lane.b32.xlu1 %v868_v40, %s7032_s14  ;;  %2257 = vrot.lane.b32.xlu0 %v867_v41, %s7032_s14  ;;  %v874_v41 = vld [vmem:[%s8337_s13 + $0xa8] sm:$0xff] }
 0x270   : > { %v8407_v49 = vpop.permute.xlu1 %2003  ;;  %v8409_v47 = vpop.permute.xlu0 %2001 }
 0x271   : > { %13330 = vst [vmem:[#allocation223_spill] sm:$0xff] %v8407_v49  ;;  %13331 = vst [vmem:[#allocation224_spill] sm:$0xff] %v8409_v47  ;;  %v873_v49 = vld [vmem:[%s8337_s13 + $0xa0] sm:$0xff] }
 0x272   : > { %2263 = vrot.lane.b32.xlu1 %v870_v42, %s7032_s14  ;;  %2261 = vrot.lane.b32.xlu0 %v869_v44, %s7032_s14  ;;  %v876_v44 = vld [vmem:[%s8337_s13 + $0xb8] sm:$0xff] }
 0x274   : > { %v8415_v46 = vpop.permute.xlu1 %2007  ;;  %v8417_v40 = vpop.permute.xlu0 %2005 }
 0x275   : > { %13332 = vst [vmem:[#allocation225_spill] sm:$0xff] %v8415_v46  ;;  %13333 = vst [vmem:[#allocation226_spill] sm:$0xff] %v8417_v40  ;;  %v875_v46 = vld [vmem:[%s8337_s13 + $0xb0] sm:$0xff] }
 0x276   : > { %2267 = vrot.lane.b32.xlu1 %v872_v39, %s7032_s14  ;;  %2265 = vrot.lane.b32.xlu0 %v871_v38, %s7032_s14  ;;  %v878_v38 = vld [vmem:[%s8337_s13 + $0xc8] sm:$0xff] }
 0x278   : > { %v8423_v47 = vpop.permute.xlu1 %2011  ;;  %v8425_v42 = vpop.permute.xlu0 %2009 }
 0x279   : > { %13334 = vst [vmem:[#allocation227_spill] sm:$0xff] %v8423_v47  ;;  %13335 = vst [vmem:[#allocation228_spill] sm:$0xff] %v8425_v42  ;;  %v877_v47 = vld [vmem:[%s8337_s13 + $0xc0] sm:$0xff] }
 0x27a   : > { %2271 = vrot.lane.b32.xlu1 %v874_v41, %s7032_s14  ;;  %2269 = vrot.lane.b32.xlu0 %v873_v49, %s7032_s14  ;;  %v880_v49 = vld [vmem:[%s8337_s13 + $0xd8] sm:$0xff] }
 0x27c   : > { %v8431_v40 = vpop.permute.xlu1 %2087  ;;  %v8433_v39 = vpop.permute.xlu0 %2085 }
 0x27d   : > { %13336 = vst [vmem:[#allocation229_spill] sm:$0xff] %v8431_v40  ;;  %13337 = vst [vmem:[#allocation230_spill] sm:$0xff] %v8433_v39  ;;  %v879_v40 = vld [vmem:[%s8337_s13 + $0xd0] sm:$0xff] }
 0x27e   : > { %2275 = vrot.lane.b32.xlu1 %v876_v44, %s7032_s14  ;;  %2273 = vrot.lane.b32.xlu0 %v875_v46, %s7032_s14  ;;  %v882_v46 = vld [vmem:[%s8337_s13 + $0xe8] sm:$0xff] }
 0x280   : > { %v8439_v42 = vpop.permute.xlu1 %2091  ;;  %v8441_v41 = vpop.permute.xlu0 %2089 }
 0x281   : > { %13338 = vst [vmem:[#allocation231_spill] sm:$0xff] %v8439_v42  ;;  %13339 = vst [vmem:[#allocation232_spill] sm:$0xff] %v8441_v41  ;;  %v881_v42 = vld [vmem:[%s8337_s13 + $0xe0] sm:$0xff] }
 0x282   : > { %2279 = vrot.lane.b32.xlu1 %v878_v38, %s7032_s14  ;;  %2277 = vrot.lane.b32.xlu0 %v877_v47, %s7032_s14  ;;  %v884_v47 = vld [vmem:[%s8337_s13 + $0xf8] sm:$0xff] }
 0x284   : > { %v8447_v39 = vpop.permute.xlu1 %2095  ;;  %v8449_v44 = vpop.permute.xlu0 %2093 }
 0x285   : > { %13340 = vst [vmem:[#allocation233_spill] sm:$0xff] %v8447_v39  ;;  %13341 = vst [vmem:[#allocation234_spill] sm:$0xff] %v8449_v44  ;;  %v883_v39 = vld [vmem:[%s8337_s13 + $0xf0] sm:$0xff] }
 0x286   : > { %2283 = vrot.lane.b32.xlu1 %v880_v49, %s7032_s14  ;;  %2281 = vrot.lane.b32.xlu0 %v879_v40, %s7032_s14  ;;  %v886_v40 = vld [vmem:[%s8337_s13 + $0x108] sm:$0xff] }
 0x288   : > { %v8455_v41 = vpop.permute.xlu1 %2099  ;;  %v8457_v38 = vpop.permute.xlu0 %2097 }
 0x289   : > { %13342 = vst [vmem:[#allocation235_spill] sm:$0xff] %v8455_v41  ;;  %13343 = vst [vmem:[#allocation236_spill] sm:$0xff] %v8457_v38  ;;  %v885_v41 = vld [vmem:[%s8337_s13 + $0x100] sm:$0xff] }
 0x28a   : > { %2287 = vrot.lane.b32.xlu1 %v882_v46, %s7032_s14  ;;  %2285 = vrot.lane.b32.xlu0 %v881_v42, %s7032_s14  ;;  %v888_v42 = vld [vmem:[%s8337_s13 + $0x118] sm:$0xff]  ;;  %v887_v46 = vld [vmem:[%s8337_s13 + $0x110] sm:$0xff] }
 0x28c   : > { %v8463_v44 = vpop.permute.xlu1 %2103  ;;  %v8465_v49 = vpop.permute.xlu0 %2101 }
 0x28d   : > { %13344 = vst [vmem:[#allocation237_spill] sm:$0xff] %v8463_v44  ;;  %13345 = vst [vmem:[#allocation238_spill] sm:$0xff] %v8465_v49 }
 0x28e   : > { %2291 = vrot.lane.b32.xlu1 %v884_v47, %s7032_s14  ;;  %2289 = vrot.lane.b32.xlu0 %v883_v39, %s7032_s14  ;;  %v890_v39 = vld [vmem:[%s8337_s13 + $0x9] sm:$0xff]  ;;  %v889_v47 = vld [vmem:[%s8337_s13 + $0x1] sm:$0xff] }
 0x290   : > { %v8471_v38 = vpop.permute.xlu1 %2107  ;;  %v8473_v45 = vpop.permute.xlu0 %2105 }
 0x291   : > { %13346 = vst [vmem:[#allocation239_spill] sm:$0xff] %v8471_v38  ;;  %13347 = vst [vmem:[#allocation240_spill] sm:$0xff] %v8473_v45 }
 0x292   : > { %2295 = vrot.lane.b32.xlu1 %v886_v40, %s7032_s14  ;;  %2293 = vrot.lane.b32.xlu0 %v885_v41, %s7032_s14  ;;  %v892_v41 = vld [vmem:[%s8337_s13 + $0x19] sm:$0xff] }
 0x294   : > { %v8479_v49 = vpop.permute.xlu1 %2111  ;;  %v8481_v44 = vpop.permute.xlu0 %2109 }
 0x295   : > { %13348 = vst [vmem:[#allocation241_spill] sm:$0xff] %v8479_v49  ;;  %13349 = vst [vmem:[#allocation242_spill] sm:$0xff] %v8481_v44  ;;  %v891_v44 = vld [vmem:[%s8337_s13 + $0x11] sm:$0xff] }
 0x296   : > { %2299 = vrot.lane.b32.xlu1 %v888_v42, %s7032_s14  ;;  %2297 = vrot.lane.b32.xlu0 %v887_v46, %s7032_s14  ;;  %v894_v46 = vld [vmem:[%s8337_s13 + $0x29] sm:$0xff] }
 0x298   : > { %v8487_v45 = vpop.permute.xlu1 %2115  ;;  %v8489_v40 = vpop.permute.xlu0 %2113 }
 0x299   : > { %13350 = vst [vmem:[#allocation243_spill] sm:$0xff] %v8487_v45  ;;  %13351 = vst [vmem:[#allocation244_spill] sm:$0xff] %v8489_v40  ;;  %v893_v40 = vld [vmem:[%s8337_s13 + $0x21] sm:$0xff] }
 0x29a   : > { %2375 = vrot.lane.b32.xlu1 %v890_v39, %s7033_s15  ;;  %2373 = vrot.lane.b32.xlu0 %v889_v47, %s7033_s15  ;;  %v896_v47 = vld [vmem:[%s8337_s13 + $0x39] sm:$0xff] }
 0x29c   : > { %v8495_v49 = vpop.permute.xlu1 %2119  ;;  %v8497_v42 = vpop.permute.xlu0 %2117 }
 0x29d   : > { %13352 = vst [vmem:[#allocation245_spill] sm:$0xff] %v8495_v49  ;;  %13353 = vst [vmem:[#allocation246_spill] sm:$0xff] %v8497_v42  ;;  %v895_v49 = vld [vmem:[%s8337_s13 + $0x31] sm:$0xff] }
 0x29e   : > { %2379 = vrot.lane.b32.xlu1 %v892_v41, %s7033_s15  ;;  %2377 = vrot.lane.b32.xlu0 %v891_v44, %s7033_s15  ;;  %v898_v44 = vld [vmem:[%s8337_s13 + $0x49] sm:$0xff] }
 0x2a0   : > { %v8503_v45 = vpop.permute.xlu1 %2123  ;;  %v8505_v39 = vpop.permute.xlu0 %2121 }
 0x2a1   : > { %13354 = vst [vmem:[#allocation247_spill] sm:$0xff] %v8503_v45  ;;  %13355 = vst [vmem:[#allocation248_spill] sm:$0xff] %v8505_v39  ;;  %v897_v45 = vld [vmem:[%s8337_s13 + $0x41] sm:$0xff] }
 0x2a2   : > { %2383 = vrot.lane.b32.xlu1 %v894_v46, %s7033_s15  ;;  %2381 = vrot.lane.b32.xlu0 %v893_v40, %s7033_s15  ;;  %v900_v40 = vld [vmem:[%s8337_s13 + $0x59] sm:$0xff] }
 0x2a4   : > { %v8511_v42 = vpop.permute.xlu1 %2127  ;;  %v8513_v41 = vpop.permute.xlu0 %2125 }
 0x2a5   : > { %13356 = vst [vmem:[#allocation249_spill] sm:$0xff] %v8511_v42  ;;  %13357 = vst [vmem:[#allocation250_spill] sm:$0xff] %v8513_v41  ;;  %v899_v42 = vld [vmem:[%s8337_s13 + $0x51] sm:$0xff] }
 0x2a6   : > { %2387 = vrot.lane.b32.xlu1 %v896_v47, %s7033_s15  ;;  %2385 = vrot.lane.b32.xlu0 %v895_v49, %s7033_s15  ;;  %v902_v49 = vld [vmem:[%s8337_s13 + $0x69] sm:$0xff] }
 0x2a8   : > { %v8519_v39 = vpop.permute.xlu1 %2131  ;;  %v8521_v46 = vpop.permute.xlu0 %2129 }
 0x2a9   : > { %13358 = vst [vmem:[#allocation251_spill] sm:$0xff] %v8519_v39  ;;  %13359 = vst [vmem:[#allocation252_spill] sm:$0xff] %v8521_v46  ;;  %v901_v39 = vld [vmem:[%s8337_s13 + $0x61] sm:$0xff] }
 0x2aa   : > { %2391 = vrot.lane.b32.xlu1 %v898_v44, %s7033_s15  ;;  %2389 = vrot.lane.b32.xlu0 %v897_v45, %s7033_s15  ;;  %v904_v45 = vld [vmem:[%s8337_s13 + $0x79] sm:$0xff] }
 0x2ac   : > { %v8527_v41 = vpop.permute.xlu1 %2135  ;;  %v8529_v47 = vpop.permute.xlu0 %2133 }
 0x2ad   : > { %13360 = vst [vmem:[#allocation253_spill] sm:$0xff] %v8527_v41  ;;  %13361 = vst [vmem:[#allocation254_spill] sm:$0xff] %v8529_v47  ;;  %v903_v41 = vld [vmem:[%s8337_s13 + $0x71] sm:$0xff] }
 0x2ae   : > { %2395 = vrot.lane.b32.xlu1 %v900_v40, %s7033_s15  ;;  %2393 = vrot.lane.b32.xlu0 %v899_v42, %s7033_s15  ;;  %v906_v42 = vld [vmem:[%s8337_s13 + $0x89] sm:$0xff] }
 0x2b0   : > { %v8535_v46 = vpop.permute.xlu1 %2139  ;;  %v8537_v44 = vpop.permute.xlu0 %2137 }
 0x2b1   : > { %13362 = vst [vmem:[#allocation255_spill] sm:$0xff] %v8535_v46  ;;  %13363 = vst [vmem:[#allocation256_spill] sm:$0xff] %v8537_v44  ;;  %v905_v46 = vld [vmem:[%s8337_s13 + $0x81] sm:$0xff] }
 0x2b2   : > { %2399 = vrot.lane.b32.xlu1 %v902_v49, %s7033_s15  ;;  %2397 = vrot.lane.b32.xlu0 %v901_v39, %s7033_s15  ;;  %v908_v39 = vld [vmem:[%s8337_s13 + $0x99] sm:$0xff] }
 0x2b4   : > { %v8543_v47 = vpop.permute.xlu1 %2143  ;;  %v8545_v40 = vpop.permute.xlu0 %2141 }
 0x2b5   : > { %13364 = vst [vmem:[#allocation257_spill] sm:$0xff] %v8543_v47  ;;  %13365 = vst [vmem:[#allocation258_spill] sm:$0xff] %v8545_v40  ;;  %v907_v47 = vld [vmem:[%s8337_s13 + $0x91] sm:$0xff] }
 0x2b6   : > { %2403 = vrot.lane.b32.xlu1 %v904_v45, %s7033_s15  ;;  %2401 = vrot.lane.b32.xlu0 %v903_v41, %s7033_s15  ;;  %v910_v41 = vld [vmem:[%s8337_s13 + $0xa9] sm:$0xff] }
 0x2b8   : > { %v8551_v44 = vpop.permute.xlu1 %2147  ;;  %v8553_v49 = vpop.permute.xlu0 %2145 }
 0x2b9   : > { %13366 = vst [vmem:[#allocation259_spill] sm:$0xff] %v8551_v44  ;;  %13367 = vst [vmem:[#allocation260_spill] sm:$0xff] %v8553_v49  ;;  %v909_v44 = vld [vmem:[%s8337_s13 + $0xa1] sm:$0xff] }
 0x2ba   : > { %2407 = vrot.lane.b32.xlu1 %v906_v42, %s7033_s15  ;;  %2405 = vrot.lane.b32.xlu0 %v905_v46, %s7033_s15  ;;  %v912_v46 = vld [vmem:[%s8337_s13 + $0xb9] sm:$0xff] }
 0x2bc   : > { %v8559_v40 = vpop.permute.xlu1 %2151  ;;  %v8561_v45 = vpop.permute.xlu0 %2149 }
 0x2bd   : > { %13368 = vst [vmem:[#allocation261_spill] sm:$0xff] %v8559_v40  ;;  %13369 = vst [vmem:[#allocation262_spill] sm:$0xff] %v8561_v45  ;;  %v911_v40 = vld [vmem:[%s8337_s13 + $0xb1] sm:$0xff] }
 0x2be   : > { %2411 = vrot.lane.b32.xlu1 %v908_v39, %s7033_s15  ;;  %2409 = vrot.lane.b32.xlu0 %v907_v47, %s7033_s15  ;;  %v914_v47 = vld [vmem:[%s8337_s13 + $0xc9] sm:$0xff] }
 0x2c0   : > { %v8567_v49 = vpop.permute.xlu1 %2155  ;;  %v8569_v42 = vpop.permute.xlu0 %2153 }
 0x2c1   : > { %13370 = vst [vmem:[#allocation263_spill] sm:$0xff] %v8567_v49  ;;  %13371 = vst [vmem:[#allocation264_spill] sm:$0xff] %v8569_v42  ;;  %v913_v49 = vld [vmem:[%s8337_s13 + $0xc1] sm:$0xff] }
 0x2c2   : > { %2415 = vrot.lane.b32.xlu1 %v910_v41, %s7033_s15  ;;  %2413 = vrot.lane.b32.xlu0 %v909_v44, %s7033_s15  ;;  %v916_v44 = vld [vmem:[%s8337_s13 + $0xd9] sm:$0xff] }
 0x2c4   : > { %v8575_v45 = vpop.permute.xlu1 %2231  ;;  %v8577_v39 = vpop.permute.xlu0 %2229 }
 0x2c5   : > { %13372 = vst [vmem:[#allocation265_spill] sm:$0xff] %v8575_v45  ;;  %13373 = vst [vmem:[#allocation266_spill] sm:$0xff] %v8577_v39  ;;  %v915_v45 = vld [vmem:[%s8337_s13 + $0xd1] sm:$0xff] }
 0x2c6   : > { %2419 = vrot.lane.b32.xlu1 %v912_v46, %s7033_s15  ;;  %2417 = vrot.lane.b32.xlu0 %v911_v40, %s7033_s15  ;;  %v918_v40 = vld [vmem:[%s8337_s13 + $0xe9] sm:$0xff] }
 0x2c8   : > { %v8583_v42 = vpop.permute.xlu1 %2235  ;;  %v8585_v41 = vpop.permute.xlu0 %2233 }
 0x2c9   : > { %13374 = vst [vmem:[#allocation267_spill] sm:$0xff] %v8583_v42  ;;  %13375 = vst [vmem:[#allocation268_spill] sm:$0xff] %v8585_v41  ;;  %v917_v42 = vld [vmem:[%s8337_s13 + $0xe1] sm:$0xff] }
 0x2ca   : > { %2423 = vrot.lane.b32.xlu1 %v914_v47, %s7033_s15  ;;  %2421 = vrot.lane.b32.xlu0 %v913_v49, %s7033_s15  ;;  %v920_v49 = vld [vmem:[%s8337_s13 + $0xf9] sm:$0xff] }
 0x2cc   : > { %v8591_v39 = vpop.permute.xlu1 %2239  ;;  %v8593_v46 = vpop.permute.xlu0 %2237 }
 0x2cd   : > { %13376 = vst [vmem:[#allocation269_spill] sm:$0xff] %v8591_v39  ;;  %13377 = vst [vmem:[#allocation270_spill] sm:$0xff] %v8593_v46  ;;  %v919_v39 = vld [vmem:[%s8337_s13 + $0xf1] sm:$0xff] }
 0x2ce   : > { %2427 = vrot.lane.b32.xlu1 %v916_v44, %s7033_s15  ;;  %2425 = vrot.lane.b32.xlu0 %v915_v45, %s7033_s15  ;;  %v922_v45 = vld [vmem:[%s8337_s13 + $0x109] sm:$0xff] }
 0x2d0   : > { %v8599_v41 = vpop.permute.xlu1 %2243  ;;  %v8601_v47 = vpop.permute.xlu0 %2241 }
 0x2d1   : > { %13378 = vst [vmem:[#allocation271_spill] sm:$0xff] %v8599_v41  ;;  %13379 = vst [vmem:[#allocation272_spill] sm:$0xff] %v8601_v47  ;;  %v921_v41 = vld [vmem:[%s8337_s13 + $0x101] sm:$0xff] }
 0x2d2   : > { %2431 = vrot.lane.b32.xlu1 %v918_v40, %s7033_s15  ;;  %2429 = vrot.lane.b32.xlu0 %v917_v42, %s7033_s15  ;;  %v924_v42 = vld [vmem:[%s8337_s13 + $0x119] sm:$0xff]  ;;  %v923_v40 = vld [vmem:[%s8337_s13 + $0x111] sm:$0xff] }
 0x2d4   : > { %v8607_v46 = vpop.permute.xlu1 %2247  ;;  %v8609_v44 = vpop.permute.xlu0 %2245 }
 0x2d5   : > { %13380 = vst [vmem:[#allocation273_spill] sm:$0xff] %v8607_v46  ;;  %13381 = vst [vmem:[#allocation274_spill] sm:$0xff] %v8609_v44 }
 0x2d6   : > { %2435 = vrot.lane.b32.xlu1 %v920_v49, %s7033_s15  ;;  %2433 = vrot.lane.b32.xlu0 %v919_v39, %s7033_s15  ;;  %v926_v39 = vld [vmem:[%s8337_s13 + $0xa] sm:$0xff]  ;;  %v925_v49 = vld [vmem:[%s8337_s13 + $0x2] sm:$0xff] }
 0x2d8   : > { %v8615_v47 = vpop.permute.xlu1 %2251  ;;  %v8617_v38 = vpop.permute.xlu0 %2249 }
 0x2d9   : > { %13382 = vst [vmem:[#allocation275_spill] sm:$0xff] %v8615_v47  ;;  %13383 = vst [vmem:[#allocation276_spill] sm:$0xff] %v8617_v38 }
 0x2da   : > { %2439 = vrot.lane.b32.xlu1 %v922_v45, %s7033_s15  ;;  %2437 = vrot.lane.b32.xlu0 %v921_v41, %s7033_s15  ;;  %v8638_v41 = vld [vmem:[%s8337_s13 + $0x1a] sm:$0xff] }
 0x2dc   : > { %v8623_v44 = vpop.permute.xlu1 %2255  ;;  %v8625_v46 = vpop.permute.xlu0 %2253 }
 0x2dd   : > { %13384 = vst [vmem:[#allocation277_spill] sm:$0xff] %v8623_v44  ;;  %13385 = vst [vmem:[#allocation278_spill] sm:$0xff] %v8625_v46  ;;  %v8641_v46 = vld [vmem:[%s8337_s13 + $0x12] sm:$0xff] }
 0x2de   : > { %2443 = vrot.lane.b32.xlu1 %v924_v42, %s7033_s15  ;;  %2441 = vrot.lane.b32.xlu0 %v923_v40, %s7033_s15 }
 0x2e0   : > { %v8631_v38 = vpop.permute.xlu1 %2259  ;;  %v8633_v45 = vpop.permute.xlu0 %2257 }
 0x2e1   : > { %13386 = vst [vmem:[#allocation279_spill] sm:$0xff] %v8631_v38  ;;  %13387 = vst [vmem:[#allocation280_spill] sm:$0xff] %v8633_v45  ;;  %v8652_v45 = vld [vmem:[%s8337_s13 + $0x2a] sm:$0xff] }
 0x2e2   : > { %2519 = vrot.lane.b32.xlu1 %v926_v39, %s7034_s16  ;;  %2517 = vrot.lane.b32.xlu0 %v925_v49, %s7034_s16  ;;  %v8655_v39 = vld [vmem:[%s8337_s13 + $0x22] sm:$0xff] }
 0x2e4   : > { %v8643_v42 = vpop.permute.xlu1 %2263  ;;  %v8645_v40 = vpop.permute.xlu0 %2261 }
 0x2e5   : > { %13388 = vst [vmem:[#allocation281_spill] sm:$0xff] %v8643_v42  ;;  %13389 = vst [vmem:[#allocation282_spill] sm:$0xff] %v8645_v40  ;;  %v8666_v40 = vld [vmem:[%s8337_s13 + $0x3a] sm:$0xff]  ;;  %v8669_v42 = vld [vmem:[%s8337_s13 + $0x32] sm:$0xff] }
 0x2e6   : > { %2523 = vrot.lane.b32.xlu1 %v8638_v41, %s7034_s16  ;;  %2521 = vrot.lane.b32.xlu0 %v8641_v46, %s7034_s16 }
 0x2e8   : > { %v8657_v49 = vpop.permute.xlu1 %2267  ;;  %v8659_v38 = vpop.permute.xlu0 %2265 }
 0x2e9   : > { %13390 = vst [vmem:[#allocation283_spill] sm:$0xff] %v8657_v49  ;;  %13391 = vst [vmem:[#allocation284_spill] sm:$0xff] %v8659_v38  ;;  %v8680_v38 = vld [vmem:[%s8337_s13 + $0x4a] sm:$0xff]  ;;  %v8683_v49 = vld [vmem:[%s8337_s13 + $0x42] sm:$0xff] }
 0x2ea   : > { %2527 = vrot.lane.b32.xlu1 %v8652_v45, %s7034_s16  ;;  %2525 = vrot.lane.b32.xlu0 %v8655_v39, %s7034_s16 }
 0x2ec   : > { %v8671_v44 = vpop.permute.xlu1 %2271  ;;  %v8673_v47 = vpop.permute.xlu0 %2269 }
 0x2ed   : > { %13392 = vst [vmem:[#allocation285_spill] sm:$0xff] %v8671_v44  ;;  %13393 = vst [vmem:[#allocation286_spill] sm:$0xff] %v8673_v47  ;;  %v8694_v47 = vld [vmem:[%s8337_s13 + $0x5a] sm:$0xff]  ;;  %v8697_v44 = vld [vmem:[%s8337_s13 + $0x52] sm:$0xff] }
 0x2ee   : > { %2531 = vrot.lane.b32.xlu1 %v8666_v40, %s7034_s16  ;;  %2529 = vrot.lane.b32.xlu0 %v8669_v42, %s7034_s16 }
 0x2f0   : > { %v8685_v43 = vpop.permute.xlu1 %2275  ;;  %v8687_v48 = vpop.permute.xlu0 %2273 }
 0x2f1   : > { %13394 = vst [vmem:[#allocation287_spill] sm:$0xff] %v8685_v43  ;;  %13395 = vst [vmem:[#allocation288_spill] sm:$0xff] %v8687_v48  ;;  %v8708_v48 = vld [vmem:[%s8337_s13 + $0x6a] sm:$0xff]  ;;  %v8711_v43 = vld [vmem:[%s8337_s13 + $0x62] sm:$0xff] }
 0x2f2   : > { %2535 = vrot.lane.b32.xlu1 %v8680_v38, %s7034_s16  ;;  %2533 = vrot.lane.b32.xlu0 %v8683_v49, %s7034_s16 }
 0x2f4   : > { %v8699_v51 = vpop.permute.xlu1 %2279  ;;  %v8701_v50 = vpop.permute.xlu0 %2277 }
 0x2f5   : > { %13396 = vst [vmem:[#allocation289_spill] sm:$0xff] %v8699_v51  ;;  %13397 = vst [vmem:[#allocation290_spill] sm:$0xff] %v8701_v50  ;;  %v8722_v50 = vld [vmem:[%s8337_s13 + $0x7a] sm:$0xff]  ;;  %v8725_v51 = vld [vmem:[%s8337_s13 + $0x72] sm:$0xff] }
 0x2f6   : > { %2539 = vrot.lane.b32.xlu1 %v8694_v47, %s7034_s16  ;;  %2537 = vrot.lane.b32.xlu0 %v8697_v44, %s7034_s16 }
 0x2f8   : > { %v8713_v53 = vpop.permute.xlu1 %2283  ;;  %v8715_v52 = vpop.permute.xlu0 %2281 }
 0x2f9   : > { %13398 = vst [vmem:[#allocation291_spill] sm:$0xff] %v8713_v53  ;;  %13399 = vst [vmem:[#allocation292_spill] sm:$0xff] %v8715_v52  ;;  %v8736_v52 = vld [vmem:[%s8337_s13 + $0x8a] sm:$0xff]  ;;  %v8739_v53 = vld [vmem:[%s8337_s13 + $0x82] sm:$0xff] }
 0x2fa   : > { %2543 = vrot.lane.b32.xlu1 %v8708_v48, %s7034_s16  ;;  %2541 = vrot.lane.b32.xlu0 %v8711_v43, %s7034_s16 }
 0x2fc   : > { %v8727_v55 = vpop.permute.xlu1 %2287  ;;  %v8729_v54 = vpop.permute.xlu0 %2285 }
 0x2fd   : > { %13400 = vst [vmem:[#allocation293_spill] sm:$0xff] %v8727_v55  ;;  %13401 = vst [vmem:[#allocation294_spill] sm:$0xff] %v8729_v54  ;;  %v8750_v54 = vld [vmem:[%s8337_s13 + $0x9a] sm:$0xff]  ;;  %v8753_v55 = vld [vmem:[%s8337_s13 + $0x92] sm:$0xff] }
 0x2fe   : > { %2547 = vrot.lane.b32.xlu1 %v8722_v50, %s7034_s16  ;;  %2545 = vrot.lane.b32.xlu0 %v8725_v51, %s7034_s16 }
 0x300   : > { %v8741_v59 = vpop.permute.xlu1 %2291  ;;  %v8743_v58 = vpop.permute.xlu0 %2289 }
 0x301   : > { %13402 = vst [vmem:[#allocation295_spill] sm:$0xff] %v8741_v59  ;;  %13403 = vst [vmem:[#allocation296_spill] sm:$0xff] %v8743_v58  ;;  %v8764_v58 = vld [vmem:[%s8337_s13 + $0xaa] sm:$0xff]  ;;  %v8767_v59 = vld [vmem:[%s8337_s13 + $0xa2] sm:$0xff] }
 0x302   : > { %2551 = vrot.lane.b32.xlu1 %v8736_v52, %s7034_s16  ;;  %2549 = vrot.lane.b32.xlu0 %v8739_v53, %s7034_s16 }
 0x304   : > { %v8755_v3 = vpop.permute.xlu1 %2295  ;;  %v8757_v2 = vpop.permute.xlu0 %2293 }
 0x305   : > { %13404 = vst [vmem:[#allocation297_spill] sm:$0xff] %v8755_v3  ;;  %13405 = vst [vmem:[#allocation298_spill] sm:$0xff] %v8757_v2  ;;  %v8778_v2 = vld [vmem:[%s8337_s13 + $0xba] sm:$0xff]  ;;  %v8781_v3 = vld [vmem:[%s8337_s13 + $0xb2] sm:$0xff] }
 0x306   : > { %2555 = vrot.lane.b32.xlu1 %v8750_v54, %s7034_s16  ;;  %2553 = vrot.lane.b32.xlu0 %v8753_v55, %s7034_s16 }
 0x308   : > { %v8769_v11 = vpop.permute.xlu1 %2299  ;;  %v8771_v10 = vpop.permute.xlu0 %2297 }
 0x309   : > { %13406 = vst [vmem:[#allocation299_spill] sm:$0xff] %v8769_v11  ;;  %13407 = vst [vmem:[#allocation300_spill] sm:$0xff] %v8771_v10  ;;  %v8792_v10 = vld [vmem:[%s8337_s13 + $0xca] sm:$0xff]  ;;  %v8795_v11 = vld [vmem:[%s8337_s13 + $0xc2] sm:$0xff] }
 0x30a   : > { %2559 = vrot.lane.b32.xlu1 %v8764_v58, %s7034_s16  ;;  %2557 = vrot.lane.b32.xlu0 %v8767_v59, %s7034_s16 }
 0x30c   : > { %v8783_v6 = vpop.permute.xlu1 %2375  ;;  %v8785_v56 = vpop.permute.xlu0 %2373 }
 0x30d   : > { %13408 = vst [vmem:[#allocation301_spill] sm:$0xff] %v8783_v6  ;;  %13409 = vst [vmem:[#allocation302_spill] sm:$0xff] %v8785_v56  ;;  %v8806_v56 = vld [vmem:[%s8337_s13 + $0xda] sm:$0xff]  ;;  %v8809_v6 = vld [vmem:[%s8337_s13 + $0xd2] sm:$0xff] }
 0x30e   : > { %2563 = vrot.lane.b32.xlu1 %v8778_v2, %s7034_s16  ;;  %2561 = vrot.lane.b32.xlu0 %v8781_v3, %s7034_s16 }
 0x310   : > { %v8797_v57 = vpop.permute.xlu1 %2379  ;;  %v8799_v18 = vpop.permute.xlu0 %2377 }
 0x311   : > { %13410 = vst [vmem:[#allocation303_spill] sm:$0xff] %v8797_v57  ;;  %13411 = vst [vmem:[#allocation304_spill] sm:$0xff] %v8799_v18  ;;  %v8820_v18 = vld [vmem:[%s8337_s13 + $0xea] sm:$0xff]  ;;  %v8823_v57 = vld [vmem:[%s8337_s13 + $0xe2] sm:$0xff] }
 0x312   : > { %2567 = vrot.lane.b32.xlu1 %v8792_v10, %s7034_s16  ;;  %2565 = vrot.lane.b32.xlu0 %v8795_v11, %s7034_s16 }
 0x314   : > { %v8811_v15 = vpop.permute.xlu1 %2383  ;;  %v8813_v62 = vpop.permute.xlu0 %2381 }
 0x315   : > { %13412 = vst [vmem:[#allocation305_spill] sm:$0xff] %v8811_v15  ;;  %13413 = vst [vmem:[#allocation306_spill] sm:$0xff] %v8813_v62  ;;  %v8834_v62 = vld [vmem:[%s8337_s13 + $0xfa] sm:$0xff]  ;;  %v8837_v15 = vld [vmem:[%s8337_s13 + $0xf2] sm:$0xff] }
 0x316   : > { %2571 = vrot.lane.b32.xlu1 %v8806_v56, %s7034_s16  ;;  %2569 = vrot.lane.b32.xlu0 %v8809_v6, %s7034_s16 }
 0x318   : > { %v8825_v19 = vpop.permute.xlu1 %2387  ;;  %v8827_v7 = vpop.permute.xlu0 %2385 }
 0x319   : > { %13414 = vst [vmem:[#allocation307_spill] sm:$0xff] %v8825_v19  ;;  %13415 = vst [vmem:[#allocation308_spill] sm:$0xff] %v8827_v7  ;;  %v8848_v7 = vld [vmem:[%s8337_s13 + $0x10a] sm:$0xff]  ;;  %v8851_v19 = vld [vmem:[%s8337_s13 + $0x102] sm:$0xff] }
 0x31a   : > { %2575 = vrot.lane.b32.xlu1 %v8820_v18, %s7034_s16  ;;  %2573 = vrot.lane.b32.xlu0 %v8823_v57, %s7034_s16 }
 0x31c   : > { %v8839_v63 = vpop.permute.xlu1 %2391  ;;  %v8841_v14 = vpop.permute.xlu0 %2389 }
 0x31d   : > { %13416 = vst [vmem:[#allocation309_spill] sm:$0xff] %v8839_v63  ;;  %13417 = vst [vmem:[#allocation310_spill] sm:$0xff] %v8841_v14  ;;  %v8862_v14 = vld [vmem:[%s8337_s13 + $0x11a] sm:$0xff]  ;;  %v8865_v63 = vld [vmem:[%s8337_s13 + $0x112] sm:$0xff] }
 0x31e   : > { %2579 = vrot.lane.b32.xlu1 %v8834_v62, %s7034_s16  ;;  %2577 = vrot.lane.b32.xlu0 %v8837_v15, %s7034_s16 }
 0x320   : > { %v8853_v37 = vpop.permute.xlu1 %2395  ;;  %v8855_v36 = vpop.permute.xlu0 %2393 }
 0x321   : > { %13418 = vst [vmem:[#allocation311_spill] sm:$0xff] %v8853_v37  ;;  %13419 = vst [vmem:[#allocation312_spill] sm:$0xff] %v8855_v36 }
 0x322   : > { %2583 = vrot.lane.b32.xlu1 %v8848_v7, %s7034_s16  ;;  %2581 = vrot.lane.b32.xlu0 %v8851_v19, %s7034_s16 }
 0x324   : > { %v8867_v34 = vpop.permute.xlu1 %2399  ;;  %v8869_v35 = vpop.permute.xlu0 %2397 }
 0x325   : > { %13420 = vst [vmem:[#allocation313_spill] sm:$0xff] %v8867_v34  ;;  %13421 = vst [vmem:[#allocation314_spill] sm:$0xff] %v8869_v35 }
 0x326   : > { %2587 = vrot.lane.b32.xlu1 %v8862_v14, %s7034_s16  ;;  %2585 = vrot.lane.b32.xlu0 %v8865_v63, %s7034_s16 }
 0x328   : > { %v8875_v36 = vpop.permute.xlu1 %2403  ;;  %v8877_v37 = vpop.permute.xlu0 %2401 }
 0x329   : > { %13422 = vst [vmem:[#allocation315_spill] sm:$0xff] %v8875_v36  ;;  %13423 = vst [vmem:[#allocation316_spill] sm:$0xff] %v8877_v37 }
 0x32a   : > { %2629 = vrot.lane.b32.xlu1 %v8638_v41, %s7035_s17  ;;  %2627 = vrot.lane.b32.xlu0 %v8641_v46, %s7035_s17 }
 0x32c   : > { %v8883_v34 = vpop.permute.xlu1 %2407  ;;  %v8885_v35 = vpop.permute.xlu0 %2405 }
 0x32d   : > { %13424 = vst [vmem:[#allocation317_spill] sm:$0xff] %v8883_v34  ;;  %13425 = vst [vmem:[#allocation318_spill] sm:$0xff] %v8885_v35  ;;  %v9175_v34 = vld [vmem:[%s8337_s13 + $0x24] sm:$0xff] }
 0x32e   : > { %2633 = vrot.lane.b32.xlu1 %v8652_v45, %s7035_s17  ;;  %2631 = vrot.lane.b32.xlu0 %v8655_v39, %s7035_s17 }
 0x330   : > { %v8891_v36 = vpop.permute.xlu1 %2411  ;;  %v8893_v37 = vpop.permute.xlu0 %2409 }
 0x331   : > { %13426 = vst [vmem:[#allocation319_spill] sm:$0xff] %v8891_v36  ;;  %13427 = vst [vmem:[#allocation320_spill] sm:$0xff] %v8893_v37 }
 0x332   : > { %2637 = vrot.lane.b32.xlu1 %v8666_v40, %s7035_s17  ;;  %2635 = vrot.lane.b32.xlu0 %v8669_v42, %s7035_s17 }
 0x334   : > { %v8899_v46 = vpop.permute.xlu1 %2415  ;;  %v8901_v41 = vpop.permute.xlu0 %2413 }
 0x335   : > { %13428 = vst [vmem:[#allocation321_spill] sm:$0xff] %v8899_v46  ;;  %13429 = vst [vmem:[#allocation322_spill] sm:$0xff] %v8901_v41  ;;  %v993_v46 = vld [vmem:[%s8337_s13 + $0x103] sm:$0xff] }
 0x336   : > { %2641 = vrot.lane.b32.xlu1 %v8680_v38, %s7035_s17  ;;  %2639 = vrot.lane.b32.xlu0 %v8683_v49, %s7035_s17 }
 0x338   : > { %v8907_v45 = vpop.permute.xlu1 %2419  ;;  %v8909_v39 = vpop.permute.xlu0 %2417 }
 0x339   : > { %13430 = vst [vmem:[#allocation323_spill] sm:$0xff] %v8907_v45  ;;  %13431 = vst [vmem:[#allocation324_spill] sm:$0xff] %v8909_v39  ;;  %v989_v45 = vld [vmem:[%s8337_s13 + $0xe3] sm:$0xff] }
 0x33a   : > { %2645 = vrot.lane.b32.xlu1 %v8694_v47, %s7035_s17  ;;  %2643 = vrot.lane.b32.xlu0 %v8697_v44, %s7035_s17 }
 0x33c   : > { %v8915_v42 = vpop.permute.xlu1 %2423  ;;  %v8917_v40 = vpop.permute.xlu0 %2421 }
 0x33d   : > { %13432 = vst [vmem:[#allocation325_spill] sm:$0xff] %v8915_v42  ;;  %13433 = vst [vmem:[#allocation326_spill] sm:$0xff] %v8917_v40  ;;  %v973_v42 = vld [vmem:[%s8337_s13 + $0x63] sm:$0xff] }
 0x33e   : > { %2649 = vrot.lane.b32.xlu1 %v8708_v48, %s7035_s17  ;;  %2647 = vrot.lane.b32.xlu0 %v8711_v43, %s7035_s17 }
 0x340   : > { %v8923_v38 = vpop.permute.xlu1 %2427  ;;  %v8925_v49 = vpop.permute.xlu0 %2425 }
 0x341   : > { %13434 = vst [vmem:[#allocation327_spill] sm:$0xff] %v8923_v38  ;;  %13435 = vst [vmem:[#allocation328_spill] sm:$0xff] %v8925_v49  ;;  %v971_v38 = vld [vmem:[%s8337_s13 + $0x53] sm:$0xff] }
 0x342   : > { %2653 = vrot.lane.b32.xlu1 %v8722_v50, %s7035_s17  ;;  %2651 = vrot.lane.b32.xlu0 %v8725_v51, %s7035_s17 }
 0x344   : > { %v8931_v47 = vpop.permute.xlu1 %2431  ;;  %v8933_v44 = vpop.permute.xlu0 %2429 }
 0x345   : > { %13436 = vst [vmem:[#allocation329_spill] sm:$0xff] %v8931_v47  ;;  %13437 = vst [vmem:[#allocation330_spill] sm:$0xff] %v8933_v44  ;;  %v969_v47 = vld [vmem:[%s8337_s13 + $0x43] sm:$0xff] }
 0x346   : > { %2657 = vrot.lane.b32.xlu1 %v8736_v52, %s7035_s17  ;;  %2655 = vrot.lane.b32.xlu0 %v8739_v53, %s7035_s17 }
 0x348   : > { %v8939_v48 = vpop.permute.xlu1 %2435  ;;  %v8941_v43 = vpop.permute.xlu0 %2433 }
 0x349   : > { %13438 = vst [vmem:[#allocation331_spill] sm:$0xff] %v8939_v48  ;;  %13439 = vst [vmem:[#allocation332_spill] sm:$0xff] %v8941_v43  ;;  %v967_v48 = vld [vmem:[%s8337_s13 + $0x33] sm:$0xff] }
 0x34a   : > { %2661 = vrot.lane.b32.xlu1 %v8750_v54, %s7035_s17  ;;  %2659 = vrot.lane.b32.xlu0 %v8753_v55, %s7035_s17 }
 0x34c   : > { %v8947_v50 = vpop.permute.xlu1 %2439  ;;  %v8949_v51 = vpop.permute.xlu0 %2437 }
 0x34d   : > { %13440 = vst [vmem:[#allocation333_spill] sm:$0xff] %v8947_v50  ;;  %13441 = vst [vmem:[#allocation334_spill] sm:$0xff] %v8949_v51  ;;  %v965_v50 = vld [vmem:[%s8337_s13 + $0x23] sm:$0xff] }
 0x34e   : > { %2665 = vrot.lane.b32.xlu1 %v8764_v58, %s7035_s17  ;;  %2663 = vrot.lane.b32.xlu0 %v8767_v59, %s7035_s17 }
 0x350   : > { %v8955_v52 = vpop.permute.xlu1 %2443  ;;  %v8957_v53 = vpop.permute.xlu0 %2441 }
 0x351   : > { %13442 = vst [vmem:[#allocation335_spill] sm:$0xff] %v8955_v52  ;;  %13443 = vst [vmem:[#allocation336_spill] sm:$0xff] %v8957_v53  ;;  %v963_v52 = vld [vmem:[%s8337_s13 + $0x13] sm:$0xff] }
 0x352   : > { %2669 = vrot.lane.b32.xlu1 %v8778_v2, %s7035_s17  ;;  %2667 = vrot.lane.b32.xlu0 %v8781_v3, %s7035_s17 }
 0x354   : > { %v8963_v54 = vpop.permute.xlu1 %2519  ;;  %v8965_v55 = vpop.permute.xlu0 %2517 }
 0x355   : > { %13444 = vst [vmem:[#allocation337_spill] sm:$0xff] %v8963_v54  ;;  %13445 = vst [vmem:[#allocation338_spill] sm:$0xff] %v8965_v55 }
 0x356   : > { %2673 = vrot.lane.b32.xlu1 %v8792_v10, %s7035_s17  ;;  %2671 = vrot.lane.b32.xlu0 %v8795_v11, %s7035_s17 }
 0x358   : > { %v8971_v58 = vpop.permute.xlu1 %2523  ;;  %v8973_v59 = vpop.permute.xlu0 %2521 }
 0x359   : > { %13446 = vst [vmem:[#allocation339_spill] sm:$0xff] %v8971_v58  ;;  %13447 = vst [vmem:[#allocation340_spill] sm:$0xff] %v8973_v59 }
 0x35a   : > { %2677 = vrot.lane.b32.xlu1 %v8806_v56, %s7035_s17  ;;  %2675 = vrot.lane.b32.xlu0 %v8809_v6, %s7035_s17 }
 0x35c   : > { %v8979_v2 = vpop.permute.xlu1 %2527  ;;  %v8981_v3 = vpop.permute.xlu0 %2525 }
 0x35d   : > { %13448 = vst [vmem:[#allocation341_spill] sm:$0xff] %v8979_v2  ;;  %13449 = vst [vmem:[#allocation342_spill] sm:$0xff] %v8981_v3  ;;  %v9340_v3 = vld [vmem:[%s8337_s13 + $0xec] sm:$0xff]  ;;  %v9343_v2 = vld [vmem:[%s8337_s13 + $0xe4] sm:$0xff] }
 0x35e   : > { %2681 = vrot.lane.b32.xlu1 %v8820_v18, %s7035_s17  ;;  %2679 = vrot.lane.b32.xlu0 %v8823_v57, %s7035_s17 }
 0x360   : > { %v8987_v10 = vpop.permute.xlu1 %2531  ;;  %v8989_v11 = vpop.permute.xlu0 %2529 }
 0x361   : > { %13450 = vst [vmem:[#allocation343_spill] sm:$0xff] %v8987_v10  ;;  %13451 = vst [vmem:[#allocation344_spill] sm:$0xff] %v8989_v11 }
 0x362   : > { %2685 = vrot.lane.b32.xlu1 %v8834_v62, %s7035_s17  ;;  %2683 = vrot.lane.b32.xlu0 %v8837_v15, %s7035_s17  ;;  %v962_v62 = vld [vmem:[%s8337_s13 + $0x12a] sm:$0xff]  ;;  %v961_v15 = vld [vmem:[%s8337_s13 + $0x122] sm:$0xff] }
 0x364   : > { %v8995_v56 = vpop.permute.xlu1 %2535  ;;  %v8997_v6 = vpop.permute.xlu0 %2533 }
 0x365   : > { %13452 = vst [vmem:[#allocation345_spill] sm:$0xff] %v8995_v56  ;;  %13453 = vst [vmem:[#allocation346_spill] sm:$0xff] %v8997_v6 }
 0x366   : > { %2689 = vrot.lane.b32.xlu1 %v8848_v7, %s7035_s17  ;;  %2687 = vrot.lane.b32.xlu0 %v8851_v19, %s7035_s17  ;;  %v964_v19 = vld [vmem:[%s8337_s13 + $0x1b] sm:$0xff] }
 0x368   : > { %v9003_v18 = vpop.permute.xlu1 %2539  ;;  %v9005_v57 = vpop.permute.xlu0 %2537 }
 0x369   : > { %13454 = vst [vmem:[#allocation347_spill] sm:$0xff] %v9003_v18  ;;  %13455 = vst [vmem:[#allocation348_spill] sm:$0xff] %v9005_v57 }
 0x36a   : > { %2693 = vrot.lane.b32.xlu1 %v8862_v14, %s7035_s17  ;;  %2691 = vrot.lane.b32.xlu0 %v8865_v63, %s7035_s17  ;;  %v966_v63 = vld [vmem:[%s8337_s13 + $0x2b] sm:$0xff] }
 0x36c   : > { %v9013_v53 = vpop.permute.xlu1 %2543  ;;  %v9015_v7 = vpop.permute.xlu0 %2541 }
 0x36d   : > { %13456 = vst [vmem:[#allocation349_spill] sm:$0xff] %v9013_v53  ;;  %13457 = vst [vmem:[#allocation350_spill] sm:$0xff] %v9015_v7 }
 0x36e   : > { %2697 = vrot.lane.b32.xlu1 %v962_v62, %s7035_s17  ;;  %2695 = vrot.lane.b32.xlu0 %v961_v15, %s7035_s17  ;;  %v968_v15 = vld [vmem:[%s8337_s13 + $0x3b] sm:$0xff] }
 0x370   : > { %v9021_v51 = vpop.permute.xlu1 %2547  ;;  %v9023_v14 = vpop.permute.xlu0 %2545 }
 0x371   : > { %13458 = vst [vmem:[#allocation351_spill] sm:$0xff] %v9021_v51  ;;  %13459 = vst [vmem:[#allocation352_spill] sm:$0xff] %v9023_v14 }
 0x372   : > { %2773 = vrot.lane.b32.xlu1 %v964_v19, %s7036_s18  ;;  %2771 = vrot.lane.b32.xlu0 %v963_v52, %s7036_s18  ;;  %v970_v52 = vld [vmem:[%s8337_s13 + $0x4b] sm:$0xff] }
 0x374   : > { %v9029_v43 = vpop.permute.xlu1 %2551  ;;  %v9031_v62 = vpop.permute.xlu0 %2549 }
 0x375   : > { %13460 = vst [vmem:[#allocation353_spill] sm:$0xff] %v9029_v43  ;;  %13461 = vst [vmem:[#allocation354_spill] sm:$0xff] %v9031_v62 }
 0x376   : > { %2777 = vrot.lane.b32.xlu1 %v966_v63, %s7036_s18  ;;  %2775 = vrot.lane.b32.xlu0 %v965_v50, %s7036_s18  ;;  %v972_v50 = vld [vmem:[%s8337_s13 + $0x5b] sm:$0xff] }
 0x378   : > { %v9037_v44 = vpop.permute.xlu1 %2555  ;;  %v9039_v19 = vpop.permute.xlu0 %2553 }
 0x379   : > { %13462 = vst [vmem:[#allocation355_spill] sm:$0xff] %v9037_v44  ;;  %13463 = vst [vmem:[#allocation356_spill] sm:$0xff] %v9039_v19  ;;  %v995_v44 = vld [vmem:[%s8337_s13 + $0x113] sm:$0xff] }
 0x37a   : > { %2781 = vrot.lane.b32.xlu1 %v968_v15, %s7036_s18  ;;  %2779 = vrot.lane.b32.xlu0 %v967_v48, %s7036_s18  ;;  %v974_v48 = vld [vmem:[%s8337_s13 + $0x6b] sm:$0xff] }
 0x37c   : > { %v9045_v49 = vpop.permute.xlu1 %2559  ;;  %v9047_v63 = vpop.permute.xlu0 %2557 }
 0x37d   : > { %13464 = vst [vmem:[#allocation357_spill] sm:$0xff] %v9045_v49  ;;  %13465 = vst [vmem:[#allocation358_spill] sm:$0xff] %v9047_v63  ;;  %v991_v49 = vld [vmem:[%s8337_s13 + $0xf3] sm:$0xff] }
 0x37e   : > { %2785 = vrot.lane.b32.xlu1 %v970_v52, %s7036_s18  ;;  %2783 = vrot.lane.b32.xlu0 %v969_v47, %s7036_s18  ;;  %v976_v47 = vld [vmem:[%s8337_s13 + $0x7b] sm:$0xff] }
 0x380   : > { %v9053_v40 = vpop.permute.xlu1 %2563  ;;  %v9055_v15 = vpop.permute.xlu0 %2561 }
 0x381   : > { %13466 = vst [vmem:[#allocation359_spill] sm:$0xff] %v9053_v40  ;;  %13467 = vst [vmem:[#allocation360_spill] sm:$0xff] %v9055_v15  ;;  %v975_v40 = vld [vmem:[%s8337_s13 + $0x73] sm:$0xff] }
 0x382   : > { %2789 = vrot.lane.b32.xlu1 %v972_v50, %s7036_s18  ;;  %2787 = vrot.lane.b32.xlu0 %v971_v38, %s7036_s18  ;;  %v978_v38 = vld [vmem:[%s8337_s13 + $0x8b] sm:$0xff] }
 0x384   : > { %v9061_v39 = vpop.permute.xlu1 %2567  ;;  %v9063_v52 = vpop.permute.xlu0 %2565 }
 0x385   : > { %13468 = vst [vmem:[#allocation361_spill] sm:$0xff] %v9061_v39  ;;  %13469 = vst [vmem:[#allocation362_spill] sm:$0xff] %v9063_v52  ;;  %v977_v39 = vld [vmem:[%s8337_s13 + $0x83] sm:$0xff] }
 0x386   : > { %2793 = vrot.lane.b32.xlu1 %v974_v48, %s7036_s18  ;;  %2791 = vrot.lane.b32.xlu0 %v973_v42, %s7036_s18  ;;  %v980_v42 = vld [vmem:[%s8337_s13 + $0x9b] sm:$0xff] }
 0x388   : > { %v9069_v15 = vpop.permute.xlu1 %2571  ;;  %v9071_v50 = vpop.permute.xlu0 %2569 }
 0x389   : > { %13470 = vst [vmem:[#allocation363_spill] sm:$0xff] %v9069_v15  ;;  %13471 = vst [vmem:[#allocation364_spill] sm:$0xff] %v9071_v50  ;;  %v979_v15 = vld [vmem:[%s8337_s13 + $0x93] sm:$0xff] }
 0x38a   : > { %2797 = vrot.lane.b32.xlu1 %v976_v47, %s7036_s18  ;;  %2795 = vrot.lane.b32.xlu0 %v975_v40, %s7036_s18  ;;  %v982_v40 = vld [vmem:[%s8337_s13 + $0xab] sm:$0xff] }
 0x38c   : > { %v9077_v52 = vpop.permute.xlu1 %2575  ;;  %v9079_v48 = vpop.permute.xlu0 %2573 }
 0x38d   : > { %13472 = vst [vmem:[#allocation365_spill] sm:$0xff] %v9077_v52  ;;  %13473 = vst [vmem:[#allocation366_spill] sm:$0xff] %v9079_v48  ;;  %v981_v52 = vld [vmem:[%s8337_s13 + $0xa3] sm:$0xff] }
 0x38e   : > { %2801 = vrot.lane.b32.xlu1 %v978_v38, %s7036_s18  ;;  %2799 = vrot.lane.b32.xlu0 %v977_v39, %s7036_s18  ;;  %v984_v39 = vld [vmem:[%s8337_s13 + $0xbb] sm:$0xff] }
 0x390   : > { %v9085_v50 = vpop.permute.xlu1 %2579  ;;  %v9087_v47 = vpop.permute.xlu0 %2577 }
 0x391   : > { %13474 = vst [vmem:[#allocation367_spill] sm:$0xff] %v9085_v50  ;;  %13475 = vst [vmem:[#allocation368_spill] sm:$0xff] %v9087_v47  ;;  %v983_v50 = vld [vmem:[%s8337_s13 + $0xb3] sm:$0xff] }
 0x392   : > { %2805 = vrot.lane.b32.xlu1 %v980_v42, %s7036_s18  ;;  %2803 = vrot.lane.b32.xlu0 %v979_v15, %s7036_s18  ;;  %v986_v15 = vld [vmem:[%s8337_s13 + $0xcb] sm:$0xff] }
 0x394   : > { %v9093_v48 = vpop.permute.xlu1 %2583  ;;  %v9095_v38 = vpop.permute.xlu0 %2581 }
 0x395   : > { %13476 = vst [vmem:[#allocation369_spill] sm:$0xff] %v9093_v48  ;;  %13477 = vst [vmem:[#allocation370_spill] sm:$0xff] %v9095_v38  ;;  %v985_v48 = vld [vmem:[%s8337_s13 + $0xc3] sm:$0xff] }
 0x396   : > { %2809 = vrot.lane.b32.xlu1 %v982_v40, %s7036_s18  ;;  %2807 = vrot.lane.b32.xlu0 %v981_v52, %s7036_s18  ;;  %v988_v52 = vld [vmem:[%s8337_s13 + $0xdb] sm:$0xff] }
 0x398   : > { %v9101_v47 = vpop.permute.xlu1 %2587  ;;  %v9103_v42 = vpop.permute.xlu0 %2585 }
 0x399   : > { %13478 = vst [vmem:[#allocation371_spill] sm:$0xff] %v9101_v47  ;;  %13479 = vst [vmem:[#allocation372_spill] sm:$0xff] %v9103_v42  ;;  %v987_v47 = vld [vmem:[%s8337_s13 + $0xd3] sm:$0xff] }
 0x39a   : > { %2813 = vrot.lane.b32.xlu1 %v984_v39, %s7036_s18  ;;  %2811 = vrot.lane.b32.xlu0 %v983_v50, %s7036_s18  ;;  %v990_v50 = vld [vmem:[%s8337_s13 + $0xeb] sm:$0xff] }
 0x39c   : > { %v9109_v38 = vpop.permute.xlu1 %2629  ;;  %v9111_v40 = vpop.permute.xlu0 %2627 }
 0x39d   : > { %13480 = vst [vmem:[#allocation373_spill] sm:$0xff] %v9109_v38  ;;  %13481 = vst [vmem:[#allocation374_spill] sm:$0xff] %v9111_v40 }
 0x39e   : > { %2817 = vrot.lane.b32.xlu1 %v986_v15, %s7036_s18  ;;  %2815 = vrot.lane.b32.xlu0 %v985_v48, %s7036_s18  ;;  %v992_v48 = vld [vmem:[%s8337_s13 + $0xfb] sm:$0xff] }
 0x3a0   : > { %v9117_v42 = vpop.permute.xlu1 %2633  ;;  %v9119_v39 = vpop.permute.xlu0 %2631 }
 0x3a1   : > { %13482 = vst [vmem:[#allocation375_spill] sm:$0xff] %v9117_v42  ;;  %13483 = vst [vmem:[#allocation376_spill] sm:$0xff] %v9119_v39 }
 0x3a2   : > { %2821 = vrot.lane.b32.xlu1 %v988_v52, %s7036_s18  ;;  %2819 = vrot.lane.b32.xlu0 %v987_v47, %s7036_s18  ;;  %v994_v47 = vld [vmem:[%s8337_s13 + $0x10b] sm:$0xff] }
 0x3a4   : > { %v9125_v63 = vpop.permute.xlu1 %2637  ;;  %v9127_v15 = vpop.permute.xlu0 %2635 }
 0x3a5   : > { %13484 = vst [vmem:[#allocation377_spill] sm:$0xff] %v9125_v63  ;;  %13485 = vst [vmem:[#allocation378_spill] sm:$0xff] %v9127_v15 }
 0x3a6   : > { %2825 = vrot.lane.b32.xlu1 %v990_v50, %s7036_s18  ;;  %2823 = vrot.lane.b32.xlu0 %v989_v45, %s7036_s18  ;;  %v996_v45 = vld [vmem:[%s8337_s13 + $0x11b] sm:$0xff] }
 0x3a8   : > { %v9133_v41 = vpop.permute.xlu1 %2641  ;;  %v9135_v52 = vpop.permute.xlu0 %2639 }
 0x3a9   : > { %13486 = vst [vmem:[#allocation379_spill] sm:$0xff] %v9133_v41  ;;  %13487 = vst [vmem:[#allocation380_spill] sm:$0xff] %v9135_v52 }
 0x3aa   : > { %2829 = vrot.lane.b32.xlu1 %v992_v48, %s7036_s18  ;;  %2827 = vrot.lane.b32.xlu0 %v991_v49, %s7036_s18  ;;  %v998_v49 = vld [vmem:[%s8337_s13 + $0x12b] sm:$0xff]  ;;  %v997_v48 = vld [vmem:[%s8337_s13 + $0x123] sm:$0xff] }
 0x3ac   : > { %v9141_v19 = vpop.permute.xlu1 %2645  ;;  %v9143_v50 = vpop.permute.xlu0 %2643 }
 0x3ad   : > { %13488 = vst [vmem:[#allocation381_spill] sm:$0xff] %v9141_v19  ;;  %13489 = vst [vmem:[#allocation382_spill] sm:$0xff] %v9143_v50 }
 0x3ae   : > { %2833 = vrot.lane.b32.xlu1 %v994_v47, %s7036_s18  ;;  %2831 = vrot.lane.b32.xlu0 %v993_v46, %s7036_s18  ;;  %v1000_v46 = vld [vmem:[%s8337_s13 + $0x1c] sm:$0xff]  ;;  %v999_v47 = vld [vmem:[%s8337_s13 + $0x14] sm:$0xff] }
 0x3b0   : > { %v9149_v37 = vpop.permute.xlu1 %2649  ;;  %v9151_v36 = vpop.permute.xlu0 %2647 }
 0x3b1   : > { %13490 = vst [vmem:[#allocation383_spill] sm:$0xff] %v9149_v37  ;;  %13491 = vst [vmem:[#allocation384_spill] sm:$0xff] %v9151_v36 }
 0x3b2   : > { %2837 = vrot.lane.b32.xlu1 %v996_v45, %s7036_s18  ;;  %2835 = vrot.lane.b32.xlu0 %v995_v44, %s7036_s18  ;;  %v9172_v44 = vld [vmem:[%s8337_s13 + $0x2c] sm:$0xff] }
 0x3b4   : > { %v9157_v62 = vpop.permute.xlu1 %2653  ;;  %v9159_v43 = vpop.permute.xlu0 %2651 }
 0x3b5   : > { %13492 = vst [vmem:[#allocation385_spill] sm:$0xff] %v9157_v62  ;;  %13493 = vst [vmem:[#allocation386_spill] sm:$0xff] %v9159_v43 }
 0x3b6   : > { %2841 = vrot.lane.b32.xlu1 %v998_v49, %s7036_s18  ;;  %2839 = vrot.lane.b32.xlu0 %v997_v48, %s7036_s18 }
 0x3b8   : > { %v9165_v35 = vpop.permute.xlu1 %2657  ;;  %v9167_v45 = vpop.permute.xlu0 %2655 }
 0x3b9   : > { %13494 = vst [vmem:[#allocation387_spill] sm:$0xff] %v9165_v35  ;;  %13495 = vst [vmem:[#allocation388_spill] sm:$0xff] %v9167_v45  ;;  %v9186_v45 = vld [vmem:[%s8337_s13 + $0x3c] sm:$0xff] }
 0x3ba   : > { %2917 = vrot.lane.b32.xlu1 %v1000_v46, %s7037_s19  ;;  %2915 = vrot.lane.b32.xlu0 %v999_v47, %s7037_s19  ;;  %v9189_v46 = vld [vmem:[%s8337_s13 + $0x34] sm:$0xff] }
 0x3bc   : > { %v9177_v49 = vpop.permute.xlu1 %2661  ;;  %v9179_v48 = vpop.permute.xlu0 %2659 }
 0x3bd   : > { %13496 = vst [vmem:[#allocation389_spill] sm:$0xff] %v9177_v49  ;;  %13497 = vst [vmem:[#allocation390_spill] sm:$0xff] %v9179_v48  ;;  %v9200_v48 = vld [vmem:[%s8337_s13 + $0x4c] sm:$0xff]  ;;  %v9203_v49 = vld [vmem:[%s8337_s13 + $0x44] sm:$0xff] }
 0x3be   : > { %2921 = vrot.lane.b32.xlu1 %v9172_v44, %s7037_s19  ;;  %2919 = vrot.lane.b32.xlu0 %v9175_v34, %s7037_s19 }
 0x3c0   : > { %v9191_v47 = vpop.permute.xlu1 %2665  ;;  %v9193_v35 = vpop.permute.xlu0 %2663 }
 0x3c1   : > { %13498 = vst [vmem:[#allocation391_spill] sm:$0xff] %v9191_v47  ;;  %13499 = vst [vmem:[#allocation392_spill] sm:$0xff] %v9193_v35  ;;  %v9214_v35 = vld [vmem:[%s8337_s13 + $0x5c] sm:$0xff]  ;;  %v9217_v47 = vld [vmem:[%s8337_s13 + $0x54] sm:$0xff] }
 0x3c2   : > { %2925 = vrot.lane.b32.xlu1 %v9186_v45, %s7037_s19  ;;  %2923 = vrot.lane.b32.xlu0 %v9189_v46, %s7037_s19 }
 0x3c4   : > { %v9205_v14 = vpop.permute.xlu1 %2669  ;;  %v9207_v51 = vpop.permute.xlu0 %2667 }
 0x3c5   : > { %13500 = vst [vmem:[#allocation393_spill] sm:$0xff] %v9205_v14  ;;  %13501 = vst [vmem:[#allocation394_spill] sm:$0xff] %v9207_v51  ;;  %v9228_v51 = vld [vmem:[%s8337_s13 + $0x6c] sm:$0xff]  ;;  %v9231_v14 = vld [vmem:[%s8337_s13 + $0x64] sm:$0xff] }
 0x3c6   : > { %2929 = vrot.lane.b32.xlu1 %v9200_v48, %s7037_s19  ;;  %2927 = vrot.lane.b32.xlu0 %v9203_v49, %s7037_s19 }
 0x3c8   : > { %v9219_v43 = vpop.permute.xlu1 %2673  ;;  %v9221_v62 = vpop.permute.xlu0 %2671 }
 0x3c9   : > { %13502 = vst [vmem:[#allocation395_spill] sm:$0xff] %v9219_v43  ;;  %13503 = vst [vmem:[#allocation396_spill] sm:$0xff] %v9221_v62  ;;  %v9242_v62 = vld [vmem:[%s8337_s13 + $0x7c] sm:$0xff]  ;;  %v9245_v43 = vld [vmem:[%s8337_s13 + $0x74] sm:$0xff] }
 0x3ca   : > { %2933 = vrot.lane.b32.xlu1 %v9214_v35, %s7037_s19  ;;  %2931 = vrot.lane.b32.xlu0 %v9217_v47, %s7037_s19 }
 0x3cc   : > { %v9233_v7 = vpop.permute.xlu1 %2677  ;;  %v9235_v53 = vpop.permute.xlu0 %2675 }
 0x3cd   : > { %13504 = vst [vmem:[#allocation397_spill] sm:$0xff] %v9233_v7  ;;  %13505 = vst [vmem:[#allocation398_spill] sm:$0xff] %v9235_v53  ;;  %v9256_v53 = vld [vmem:[%s8337_s13 + $0x8c] sm:$0xff]  ;;  %v9259_v7 = vld [vmem:[%s8337_s13 + $0x84] sm:$0xff] }
 0x3ce   : > { %2937 = vrot.lane.b32.xlu1 %v9228_v51, %s7037_s19  ;;  %2935 = vrot.lane.b32.xlu0 %v9231_v14, %s7037_s19 }
 0x3d0   : > { %v9247_v36 = vpop.permute.xlu1 %2681  ;;  %v9249_v37 = vpop.permute.xlu0 %2679 }
 0x3d1   : > { %13506 = vst [vmem:[#allocation399_spill] sm:$0xff] %v9247_v36  ;;  %13507 = vst [vmem:[#allocation400_spill] sm:$0xff] %v9249_v37  ;;  %v9270_v37 = vld [vmem:[%s8337_s13 + $0x9c] sm:$0xff]  ;;  %v9273_v36 = vld [vmem:[%s8337_s13 + $0x94] sm:$0xff] }
 0x3d2   : > { %2941 = vrot.lane.b32.xlu1 %v9242_v62, %s7037_s19  ;;  %2939 = vrot.lane.b32.xlu0 %v9245_v43, %s7037_s19 }
 0x3d4   : > { %v9261_v57 = vpop.permute.xlu1 %2685  ;;  %v9263_v18 = vpop.permute.xlu0 %2683 }
 0x3d5   : > { %13508 = vst [vmem:[#allocation401_spill] sm:$0xff] %v9261_v57  ;;  %13509 = vst [vmem:[#allocation402_spill] sm:$0xff] %v9263_v18  ;;  %v9284_v18 = vld [vmem:[%s8337_s13 + $0xac] sm:$0xff]  ;;  %v9287_v57 = vld [vmem:[%s8337_s13 + $0xa4] sm:$0xff] }
 0x3d6   : > { %2945 = vrot.lane.b32.xlu1 %v9256_v53, %s7037_s19  ;;  %2943 = vrot.lane.b32.xlu0 %v9259_v7, %s7037_s19 }
 0x3d8   : > { %v9275_v50 = vpop.permute.xlu1 %2689  ;;  %v9277_v19 = vpop.permute.xlu0 %2687 }
 0x3d9   : > { %13510 = vst [vmem:[#allocation403_spill] sm:$0xff] %v9275_v50  ;;  %13511 = vst [vmem:[#allocation404_spill] sm:$0xff] %v9277_v19  ;;  %v9298_v19 = vld [vmem:[%s8337_s13 + $0xbc] sm:$0xff]  ;;  %v9301_v50 = vld [vmem:[%s8337_s13 + $0xb4] sm:$0xff] }
 0x3da   : > { %2949 = vrot.lane.b32.xlu1 %v9270_v37, %s7037_s19  ;;  %2947 = vrot.lane.b32.xlu0 %v9273_v36, %s7037_s19 }
 0x3dc   : > { %v9289_v6 = vpop.permute.xlu1 %2693  ;;  %v9291_v56 = vpop.permute.xlu0 %2691 }
 0x3dd   : > { %13512 = vst [vmem:[#allocation405_spill] sm:$0xff] %v9289_v6  ;;  %13513 = vst [vmem:[#allocation406_spill] sm:$0xff] %v9291_v56  ;;  %v9312_v56 = vld [vmem:[%s8337_s13 + $0xcc] sm:$0xff]  ;;  %v9315_v6 = vld [vmem:[%s8337_s13 + $0xc4] sm:$0xff] }
 0x3de   : > { %2953 = vrot.lane.b32.xlu1 %v9284_v18, %s7037_s19  ;;  %2951 = vrot.lane.b32.xlu0 %v9287_v57, %s7037_s19 }
 0x3e0   : > { %v9303_v52 = vpop.permute.xlu1 %2697  ;;  %v9305_v41 = vpop.permute.xlu0 %2695 }
 0x3e1   : > { %13514 = vst [vmem:[#allocation407_spill] sm:$0xff] %v9303_v52  ;;  %13515 = vst [vmem:[#allocation408_spill] sm:$0xff] %v9305_v41  ;;  %v9326_v41 = vld [vmem:[%s8337_s13 + $0xdc] sm:$0xff]  ;;  %v9329_v52 = vld [vmem:[%s8337_s13 + $0xd4] sm:$0xff] }
 0x3e2   : > { %2957 = vrot.lane.b32.xlu1 %v9298_v19, %s7037_s19  ;;  %2955 = vrot.lane.b32.xlu0 %v9301_v50, %s7037_s19 }
 0x3e4   : > { %v9317_v11 = vpop.permute.xlu1 %2773  ;;  %v9319_v10 = vpop.permute.xlu0 %2771 }
 0x3e5   : > { %13516 = vst [vmem:[#allocation409_spill] sm:$0xff] %v9317_v11  ;;  %13517 = vst [vmem:[#allocation410_spill] sm:$0xff] %v9319_v10 }
 0x3e6   : > { %2961 = vrot.lane.b32.xlu1 %v9312_v56, %s7037_s19  ;;  %2959 = vrot.lane.b32.xlu0 %v9315_v6, %s7037_s19 }
 0x3e8   : > { %v9331_v15 = vpop.permute.xlu1 %2777  ;;  %v9333_v63 = vpop.permute.xlu0 %2775 }
 0x3e9   : > { %13518 = vst [vmem:[#allocation411_spill] sm:$0xff] %v9331_v15  ;;  %13519 = vst [vmem:[#allocation412_spill] sm:$0xff] %v9333_v63  ;;  %v9354_v63 = vld [vmem:[%s8337_s13 + $0xfc] sm:$0xff]  ;;  %v9357_v15 = vld [vmem:[%s8337_s13 + $0xf4] sm:$0xff] }
 0x3ea   : > { %2965 = vrot.lane.b32.xlu1 %v9326_v41, %s7037_s19  ;;  %2963 = vrot.lane.b32.xlu0 %v9329_v52, %s7037_s19 }
 0x3ec   : > { %v9345_v39 = vpop.permute.xlu1 %2781  ;;  %v9347_v42 = vpop.permute.xlu0 %2779 }
 0x3ed   : > { %13520 = vst [vmem:[#allocation413_spill] sm:$0xff] %v9345_v39  ;;  %13521 = vst [vmem:[#allocation414_spill] sm:$0xff] %v9347_v42  ;;  %v9368_v42 = vld [vmem:[%s8337_s13 + $0x10c] sm:$0xff]  ;;  %v9371_v39 = vld [vmem:[%s8337_s13 + $0x104] sm:$0xff] }
 0x3ee   : > { %2969 = vrot.lane.b32.xlu1 %v9340_v3, %s7037_s19  ;;  %2967 = vrot.lane.b32.xlu0 %v9343_v2, %s7037_s19 }
 0x3f0   : > { %v9359_v59 = vpop.permute.xlu1 %2785  ;;  %v9361_v58 = vpop.permute.xlu0 %2783 }
 0x3f1   : > { %13522 = vst [vmem:[#allocation415_spill] sm:$0xff] %v9359_v59  ;;  %13523 = vst [vmem:[#allocation416_spill] sm:$0xff] %v9361_v58  ;;  %v9382_v58 = vld [vmem:[%s8337_s13 + $0x11c] sm:$0xff]  ;;  %v9385_v59 = vld [vmem:[%s8337_s13 + $0x114] sm:$0xff] }
 0x3f2   : > { %2973 = vrot.lane.b32.xlu1 %v9354_v63, %s7037_s19  ;;  %2971 = vrot.lane.b32.xlu0 %v9357_v15, %s7037_s19 }
 0x3f4   : > { %v9373_v10 = vpop.permute.xlu1 %2789  ;;  %v9375_v11 = vpop.permute.xlu0 %2787 }
 0x3f5   : > { %13524 = vst [vmem:[#allocation417_spill] sm:$0xff] %v9373_v10  ;;  %13525 = vst [vmem:[#allocation418_spill] sm:$0xff] %v9375_v11  ;;  %v9396_v11 = vld [vmem:[%s8337_s13 + $0x12c] sm:$0xff]  ;;  %v9399_v10 = vld [vmem:[%s8337_s13 + $0x124] sm:$0xff] }
 0x3f6   : > { %2977 = vrot.lane.b32.xlu1 %v9368_v42, %s7037_s19  ;;  %2975 = vrot.lane.b32.xlu0 %v9371_v39, %s7037_s19 }
 0x3f8   : > { %v9387_v40 = vpop.permute.xlu1 %2793  ;;  %v9389_v38 = vpop.permute.xlu0 %2791 }
 0x3f9   : > { %13526 = vst [vmem:[#allocation419_spill] sm:$0xff] %v9387_v40  ;;  %13527 = vst [vmem:[#allocation420_spill] sm:$0xff] %v9389_v38 }
 0x3fa   : > { %2981 = vrot.lane.b32.xlu1 %v9382_v58, %s7037_s19  ;;  %2979 = vrot.lane.b32.xlu0 %v9385_v59, %s7037_s19 }
 0x3fc   : > { %v9401_v55 = vpop.permute.xlu1 %2797  ;;  %v9403_v54 = vpop.permute.xlu0 %2795 }
 0x3fd   : > { %13528 = vst [vmem:[#allocation421_spill] sm:$0xff] %v9401_v55  ;;  %13529 = vst [vmem:[#allocation422_spill] sm:$0xff] %v9403_v54 }
 0x3fe   : > { %2985 = vrot.lane.b32.xlu1 %v9396_v11, %s7037_s19  ;;  %2983 = vrot.lane.b32.xlu0 %v9399_v10, %s7037_s19 }
 0x400   : > { %v9409_v38 = vpop.permute.xlu1 %2801  ;;  %v9411_v40 = vpop.permute.xlu0 %2799 }
 0x401   : > { %13530 = vst [vmem:[#allocation423_spill] sm:$0xff] %v9409_v38  ;;  %13531 = vst [vmem:[#allocation424_spill] sm:$0xff] %v9411_v40 }
 0x402   : > { %3027 = vrot.lane.b32.xlu1 %v9172_v44, %s7038_s20  ;;  %3025 = vrot.lane.b32.xlu0 %v9175_v34, %s7038_s20 }
 0x404   : > { %v9417_v55 = vpop.permute.xlu1 %2805  ;;  %v9419_v54 = vpop.permute.xlu0 %2803 }
 0x405   : > { %13532 = vst [vmem:[#allocation425_spill] sm:$0xff] %v9417_v55  ;;  %13533 = vst [vmem:[#allocation426_spill] sm:$0xff] %v9419_v54 }
 0x406   : > { %3031 = vrot.lane.b32.xlu1 %v9186_v45, %s7038_s20  ;;  %3029 = vrot.lane.b32.xlu0 %v9189_v46, %s7038_s20 }
 0x408   : > { %v9425_v38 = vpop.permute.xlu1 %2809  ;;  %v9427_v40 = vpop.permute.xlu0 %2807 }
 0x409   : > { %13534 = vst [vmem:[#allocation427_spill] sm:$0xff] %v9425_v38  ;;  %13535 = vst [vmem:[#allocation428_spill] sm:$0xff] %v9427_v40  ;;  %v1105_v40 = vld [vmem:[%s8337_s13 + $0x126] sm:$0xff] }
 0x40a   : > { %3035 = vrot.lane.b32.xlu1 %v9200_v48, %s7038_s20  ;;  %3033 = vrot.lane.b32.xlu0 %v9203_v49, %s7038_s20 }
 0x40c   : > { %v9433_v34 = vpop.permute.xlu1 %2813  ;;  %v9435_v44 = vpop.permute.xlu0 %2811 }
 0x40d   : > { %13536 = vst [vmem:[#allocation429_spill] sm:$0xff] %v9433_v34  ;;  %13537 = vst [vmem:[#allocation430_spill] sm:$0xff] %v9435_v44  ;;  %v1103_v34 = vld [vmem:[%s8337_s13 + $0x116] sm:$0xff] }
 0x40e   : > { %3039 = vrot.lane.b32.xlu1 %v9214_v35, %s7038_s20  ;;  %3037 = vrot.lane.b32.xlu0 %v9217_v47, %s7038_s20 }
 0x410   : > { %v9441_v45 = vpop.permute.xlu1 %2817  ;;  %v9443_v46 = vpop.permute.xlu0 %2815 }
 0x411   : > { %13538 = vst [vmem:[#allocation431_spill] sm:$0xff] %v9441_v45  ;;  %13539 = vst [vmem:[#allocation432_spill] sm:$0xff] %v9443_v46 }
 0x412   : > { %3043 = vrot.lane.b32.xlu1 %v9228_v51, %s7038_s20  ;;  %3041 = vrot.lane.b32.xlu0 %v9231_v14, %s7038_s20 }
 0x414   : > { %v9449_v49 = vpop.permute.xlu1 %2821  ;;  %v9451_v48 = vpop.permute.xlu0 %2819 }
 0x415   : > { %13540 = vst [vmem:[#allocation433_spill] sm:$0xff] %v9449_v49  ;;  %13541 = vst [vmem:[#allocation434_spill] sm:$0xff] %v9451_v48  ;;  %v1083_v49 = vld [vmem:[%s8337_s13 + $0x76] sm:$0xff] }
 0x416   : > { %3047 = vrot.lane.b32.xlu1 %v9242_v62, %s7038_s20  ;;  %3045 = vrot.lane.b32.xlu0 %v9245_v43, %s7038_s20 }
 0x418   : > { %v9457_v35 = vpop.permute.xlu1 %2825  ;;  %v9459_v47 = vpop.permute.xlu0 %2823 }
 0x419   : > { %13542 = vst [vmem:[#allocation435_spill] sm:$0xff] %v9457_v35  ;;  %13543 = vst [vmem:[#allocation436_spill] sm:$0xff] %v9459_v47  ;;  %v1081_v35 = vld [vmem:[%s8337_s13 + $0x66] sm:$0xff] }
 0x41a   : > { %3051 = vrot.lane.b32.xlu1 %v9256_v53, %s7038_s20  ;;  %3049 = vrot.lane.b32.xlu0 %v9259_v7, %s7038_s20 }
 0x41c   : > { %v9465_v51 = vpop.permute.xlu1 %2829  ;;  %v9467_v14 = vpop.permute.xlu0 %2827 }
 0x41d   : > { %13544 = vst [vmem:[#allocation437_spill] sm:$0xff] %v9465_v51  ;;  %13545 = vst [vmem:[#allocation438_spill] sm:$0xff] %v9467_v14  ;;  %v1079_v51 = vld [vmem:[%s8337_s13 + $0x56] sm:$0xff] }
 0x41e   : > { %3055 = vrot.lane.b32.xlu1 %v9270_v37, %s7038_s20  ;;  %3053 = vrot.lane.b32.xlu0 %v9273_v36, %s7038_s20 }
 0x420   : > { %v9473_v43 = vpop.permute.xlu1 %2833  ;;  %v9475_v62 = vpop.permute.xlu0 %2831 }
 0x421   : > { %13546 = vst [vmem:[#allocation439_spill] sm:$0xff] %v9473_v43  ;;  %13547 = vst [vmem:[#allocation440_spill] sm:$0xff] %v9475_v62  ;;  %v1077_v43 = vld [vmem:[%s8337_s13 + $0x46] sm:$0xff] }
 0x422   : > { %3059 = vrot.lane.b32.xlu1 %v9284_v18, %s7038_s20  ;;  %3057 = vrot.lane.b32.xlu0 %v9287_v57, %s7038_s20 }
 0x424   : > { %v9481_v53 = vpop.permute.xlu1 %2837  ;;  %v9483_v7 = vpop.permute.xlu0 %2835 }
 0x425   : > { %13548 = vst [vmem:[#allocation441_spill] sm:$0xff] %v9481_v53  ;;  %13549 = vst [vmem:[#allocation442_spill] sm:$0xff] %v9483_v7  ;;  %v1075_v53 = vld [vmem:[%s8337_s13 + $0x36] sm:$0xff] }
 0x426   : > { %3063 = vrot.lane.b32.xlu1 %v9298_v19, %s7038_s20  ;;  %3061 = vrot.lane.b32.xlu0 %v9301_v50, %s7038_s20 }
 0x428   : > { %v9489_v36 = vpop.permute.xlu1 %2841  ;;  %v9491_v37 = vpop.permute.xlu0 %2839 }
 0x429   : > { %13550 = vst [vmem:[#allocation443_spill] sm:$0xff] %v9489_v36  ;;  %13551 = vst [vmem:[#allocation444_spill] sm:$0xff] %v9491_v37  ;;  %v1073_v36 = vld [vmem:[%s8337_s13 + $0x26] sm:$0xff] }
 0x42a   : > { %3067 = vrot.lane.b32.xlu1 %v9312_v56, %s7038_s20  ;;  %3065 = vrot.lane.b32.xlu0 %v9315_v6, %s7038_s20 }
 0x42c   : > { %v9497_v18 = vpop.permute.xlu1 %2917  ;;  %v9499_v57 = vpop.permute.xlu0 %2915 }
 0x42e   : > { %3071 = vrot.lane.b32.xlu1 %v9326_v41, %s7038_s20  ;;  %3069 = vrot.lane.b32.xlu0 %v9329_v52, %s7038_s20 }
 0x430   : > { %v9505_v19 = vpop.permute.xlu1 %2921  ;;  %v9507_v50 = vpop.permute.xlu0 %2919 }
 0x432   : > { %3075 = vrot.lane.b32.xlu1 %v9340_v3, %s7038_s20  ;;  %3073 = vrot.lane.b32.xlu0 %v9343_v2, %s7038_s20 }
 0x434   : > { %v9513_v56 = vpop.permute.xlu1 %2925  ;;  %v9515_v6 = vpop.permute.xlu0 %2923 }
 0x436   : > { %3079 = vrot.lane.b32.xlu1 %v9354_v63, %s7038_s20  ;;  %3077 = vrot.lane.b32.xlu0 %v9357_v15, %s7038_s20 }
 0x438   : > { %v9521_v41 = vpop.permute.xlu1 %2929  ;;  %v9523_v52 = vpop.permute.xlu0 %2927 }
 0x439   : > { %13552 = vst [vmem:[#allocation445_spill] sm:$0xff] %v9521_v41  ;;  %13553 = vst [vmem:[#allocation446_spill] sm:$0xff] %v9523_v52  ;;  %v614_v41 = vld [vmem:[%s7092_s26 + $0x88] sm:$0xff] }
 0x43a   : > { %3083 = vrot.lane.b32.xlu1 %v9368_v42, %s7038_s20  ;;  %3081 = vrot.lane.b32.xlu0 %v9371_v39, %s7038_s20  ;;  %v1036_v42 = vld [vmem:[%s8337_s13 + $0x13c] sm:$0xff]  ;;  %v1035_v39 = vld [vmem:[%s8337_s13 + $0x134] sm:$0xff] }
 0x43c   : > { %v9529_v2 = vpop.permute.xlu1 %2933  ;;  %v9531_v3 = vpop.permute.xlu0 %2931 }
 0x43d   : > { %13554 = vst [vmem:[#allocation447_spill] sm:$0xff] %v9529_v2  ;;  %13555 = vst [vmem:[#allocation448_spill] sm:$0xff] %v9531_v3  ;;  %v612_v3 = vld [vmem:[%s7092_s26 + $0x78] sm:$0xff]  ;;  %v611_v2 = vld [vmem:[%s7092_s26 + $0x70] sm:$0xff] }
 0x43e   : > { %3087 = vrot.lane.b32.xlu1 %v9382_v58, %s7038_s20  ;;  %3085 = vrot.lane.b32.xlu0 %v9385_v59, %s7038_s20  ;;  %v1074_v59 = vld [vmem:[%s8337_s13 + $0x2e] sm:$0xff] }
 0x440   : > { %v9537_v63 = vpop.permute.xlu1 %2937  ;;  %v9539_v15 = vpop.permute.xlu0 %2935 }
 0x441   : > { %13556 = vst [vmem:[#allocation449_spill] sm:$0xff] %v9537_v63  ;;  %13557 = vst [vmem:[#allocation450_spill] sm:$0xff] %v9539_v15  ;;  %v606_v15 = vld [vmem:[%s7092_s26 + $0x48] sm:$0xff] }
 0x442   : > { %3091 = vrot.lane.b32.xlu1 %v9396_v11, %s7038_s20  ;;  %3089 = vrot.lane.b32.xlu0 %v9399_v10, %s7038_s20  ;;  %v1076_v10 = vld [vmem:[%s8337_s13 + $0x3e] sm:$0xff] }
 0x444   : > { %v9547_v37 = vpop.permute.xlu1 %2941  ;;  %v9549_v58 = vpop.permute.xlu0 %2939 }
 0x445   : > { %13558 = vst [vmem:[#allocation451_spill] sm:$0xff] %v9547_v37  ;;  %13559 = vst [vmem:[#allocation452_spill] sm:$0xff] %v9549_v58  ;;  %v604_v58 = vld [vmem:[%s7092_s26 + $0x38] sm:$0xff] }
 0x446   : > { %3095 = vrot.lane.b32.xlu1 %v1036_v42, %s7038_s20  ;;  %3093 = vrot.lane.b32.xlu0 %v1035_v39, %s7038_s20  ;;  %v1078_v39 = vld [vmem:[%s8337_s13 + $0x4e] sm:$0xff]  ;;  %v1052_v37 = vld [vmem:[%s8337_s13 + $0x9d] sm:$0xff] }
 0x448   : > { %v9555_v7 = vpop.permute.xlu1 %2945  ;;  %v9557_v11 = vpop.permute.xlu0 %2943 }
 0x449   : > { %13560 = vst [vmem:[#allocation453_spill] sm:$0xff] %v9555_v7  ;;  %13561 = vst [vmem:[#allocation454_spill] sm:$0xff] %v9557_v11 }
 0x44a   : > { %3726 = vrot.lane.b32.xlu1 %v1074_v59, %s7024_s27  ;;  %3724 = vrot.lane.b32.xlu0 %v1073_v36, %s7024_s27  ;;  %v1080_v36 = vld [vmem:[%s8337_s13 + $0x5e] sm:$0xff] }
 0x44c   : > { %v9563_v62 = vpop.permute.xlu1 %2949  ;;  %v9565_v42 = vpop.permute.xlu0 %2947 }
 0x44d   : > { %13562 = vst [vmem:[#allocation455_spill] sm:$0xff] %v9563_v62  ;;  %13563 = vst [vmem:[#allocation456_spill] sm:$0xff] %v9565_v42 }
 0x44e   : > { %3730 = vrot.lane.b32.xlu1 %v1076_v10, %s7024_s27  ;;  %3728 = vrot.lane.b32.xlu0 %v1075_v53, %s7024_s27  ;;  %v1082_v53 = vld [vmem:[%s8337_s13 + $0x6e] sm:$0xff] }
 0x450   : > { %v9571_v14 = vpop.permute.xlu1 %2953  ;;  %v9573_v59 = vpop.permute.xlu0 %2951 }
 0x451   : > { %13564 = vst [vmem:[#allocation457_spill] sm:$0xff] %v9571_v14  ;;  %13565 = vst [vmem:[#allocation458_spill] sm:$0xff] %v9573_v59 }
 0x452   : > { %3734 = vrot.lane.b32.xlu1 %v1078_v39, %s7024_s27  ;;  %3732 = vrot.lane.b32.xlu0 %v1077_v43, %s7024_s27  ;;  %v1084_v43 = vld [vmem:[%s8337_s13 + $0x7e] sm:$0xff] }
 0x454   : > { %v9579_v47 = vpop.permute.xlu1 %2957  ;;  %v9581_v10 = vpop.permute.xlu0 %2955 }
 0x455   : > { %13566 = vst [vmem:[#allocation459_spill] sm:$0xff] %v9579_v47  ;;  %13567 = vst [vmem:[#allocation460_spill] sm:$0xff] %v9581_v10 }
 0x456   : > { %3738 = vrot.lane.b32.xlu1 %v1080_v36, %s7024_s27  ;;  %3736 = vrot.lane.b32.xlu0 %v1079_v51, %s7024_s27  ;;  %v1086_v51 = vld [vmem:[%s8337_s13 + $0x8e] sm:$0xff] }
 0x458   : > { %v9587_v48 = vpop.permute.xlu1 %2961  ;;  %v9589_v39 = vpop.permute.xlu0 %2959 }
 0x459   : > { %13568 = vst [vmem:[#allocation461_spill] sm:$0xff] %v9587_v48  ;;  %13569 = vst [vmem:[#allocation462_spill] sm:$0xff] %v9589_v39  ;;  %v1085_v48 = vld [vmem:[%s8337_s13 + $0x86] sm:$0xff] }
 0x45a   : > { %3742 = vrot.lane.b32.xlu1 %v1082_v53, %s7024_s27  ;;  %3740 = vrot.lane.b32.xlu0 %v1081_v35, %s7024_s27  ;;  %v1088_v35 = vld [vmem:[%s8337_s13 + $0x9e] sm:$0xff] }
 0x45c   : > { %v9595_v46 = vpop.permute.xlu1 %2965  ;;  %v9597_v36 = vpop.permute.xlu0 %2963 }
 0x45d   : > { %13570 = vst [vmem:[#allocation463_spill] sm:$0xff] %v9595_v46  ;;  %13571 = vst [vmem:[#allocation464_spill] sm:$0xff] %v9597_v36  ;;  %v1087_v46 = vld [vmem:[%s8337_s13 + $0x96] sm:$0xff] }
 0x45e   : > { %3746 = vrot.lane.b32.xlu1 %v1084_v43, %s7024_s27  ;;  %3744 = vrot.lane.b32.xlu0 %v1083_v49, %s7024_s27  ;;  %v1090_v49 = vld [vmem:[%s8337_s13 + $0xae] sm:$0xff] }
 0x460   : > { %v9603_v39 = vpop.permute.xlu1 %2969  ;;  %v9605_v53 = vpop.permute.xlu0 %2967 }
 0x461   : > { %13572 = vst [vmem:[#allocation465_spill] sm:$0xff] %v9603_v39  ;;  %13573 = vst [vmem:[#allocation466_spill] sm:$0xff] %v9605_v53  ;;  %v1089_v39 = vld [vmem:[%s8337_s13 + $0xa6] sm:$0xff] }
 0x462   : > { %3750 = vrot.lane.b32.xlu1 %v1086_v51, %s7024_s27  ;;  %3748 = vrot.lane.b32.xlu0 %v1085_v48, %s7024_s27  ;;  %v1092_v48 = vld [vmem:[%s8337_s13 + $0xbe] sm:$0xff] }
 0x464   : > { %v9611_v36 = vpop.permute.xlu1 %2973  ;;  %v9613_v43 = vpop.permute.xlu0 %2971 }
 0x465   : > { %13574 = vst [vmem:[#allocation467_spill] sm:$0xff] %v9611_v36  ;;  %13575 = vst [vmem:[#allocation468_spill] sm:$0xff] %v9613_v43  ;;  %v1091_v36 = vld [vmem:[%s8337_s13 + $0xb6] sm:$0xff] }
 0x466   : > { %3754 = vrot.lane.b32.xlu1 %v1088_v35, %s7024_s27  ;;  %3752 = vrot.lane.b32.xlu0 %v1087_v46, %s7024_s27  ;;  %v1094_v46 = vld [vmem:[%s8337_s13 + $0xce] sm:$0xff] }
 0x468   : > { %v9619_v53 = vpop.permute.xlu1 %2977  ;;  %v9621_v51 = vpop.permute.xlu0 %2975 }
 0x469   : > { %13576 = vst [vmem:[#allocation469_spill] sm:$0xff] %v9619_v53  ;;  %13577 = vst [vmem:[#allocation470_spill] sm:$0xff] %v9621_v51  ;;  %v1093_v53 = vld [vmem:[%s8337_s13 + $0xc6] sm:$0xff] }
 0x46a   : > { %3758 = vrot.lane.b32.xlu1 %v1090_v49, %s7024_s27  ;;  %3756 = vrot.lane.b32.xlu0 %v1089_v39, %s7024_s27  ;;  %v1096_v39 = vld [vmem:[%s8337_s13 + $0xde] sm:$0xff] }
 0x46c   : > { %v9627_v43 = vpop.permute.xlu1 %2981  ;;  %v9629_v35 = vpop.permute.xlu0 %2979 }
 0x46d   : > { %13578 = vst [vmem:[#allocation471_spill] sm:$0xff] %v9627_v43  ;;  %13579 = vst [vmem:[#allocation472_spill] sm:$0xff] %v9629_v35  ;;  %v1095_v43 = vld [vmem:[%s8337_s13 + $0xd6] sm:$0xff] }
 0x46e   : > { %3762 = vrot.lane.b32.xlu1 %v1092_v48, %s7024_s27  ;;  %3760 = vrot.lane.b32.xlu0 %v1091_v36, %s7024_s27  ;;  %v1098_v36 = vld [vmem:[%s8337_s13 + $0xee] sm:$0xff] }
 0x470   : > { %v9635_v51 = vpop.permute.xlu1 %2985  ;;  %v9637_v49 = vpop.permute.xlu0 %2983 }
 0x471   : > { %13580 = vst [vmem:[#allocation473_spill] sm:$0xff] %v9635_v51  ;;  %13581 = vst [vmem:[#allocation474_spill] sm:$0xff] %v9637_v49  ;;  %v1097_v51 = vld [vmem:[%s8337_s13 + $0xe6] sm:$0xff] }
 0x472   : > { %3766 = vrot.lane.b32.xlu1 %v1094_v46, %s7024_s27  ;;  %3764 = vrot.lane.b32.xlu0 %v1093_v53, %s7024_s27  ;;  %v1100_v53 = vld [vmem:[%s8337_s13 + $0xfe] sm:$0xff]  ;;  %v1099_v46 = vld [vmem:[%s8337_s13 + $0xf6] sm:$0xff] }
 0x474   : > { %v9643_v35 = vpop.permute.xlu1 %3027  ;;  %v9645_v48 = vpop.permute.xlu0 %3025 }
 0x476   : > { %3770 = vrot.lane.b32.xlu1 %v1096_v39, %s7024_s27  ;;  %3768 = vrot.lane.b32.xlu0 %v1095_v43, %s7024_s27  ;;  %v1102_v43 = vld [vmem:[%s8337_s13 + $0x10e] sm:$0xff]  ;;  %v1101_v39 = vld [vmem:[%s8337_s13 + $0x106] sm:$0xff] }
 0x478   : > { %v9651_v49 = vpop.permute.xlu1 %3031  ;;  %v9653_v45 = vpop.permute.xlu0 %3029 }
 0x47a   : > { %3774 = vrot.lane.b32.xlu1 %v1098_v36, %s7024_s27  ;;  %3772 = vrot.lane.b32.xlu0 %v1097_v51, %s7024_s27  ;;  %v4057_v51 = vld [vmem:[%s13104_s2 + $0x40] sm:$0xff] }
 0x47b   : > { %6845 = vmatprep.subr.mxu0 %v4057_v51 }
 0x47c   : > { %v9659_v10 = vpop.permute.xlu1 %3035  ;;  %v9661_v47 = vpop.permute.xlu0 %3033  ;;  %6846 = vmatpush3.msra.mxu0 %v4057_v51  ;;  %v4054_v51 = vld [vmem:[%s13104_s2 + $0x28] sm:$0xff] }
 0x47d   : > { %13582 = vst [vmem:[#allocation475_spill] sm:$0xff] %v9661_v47  ;;  %v613_v47 = vld [vmem:[%s7092_s26 + $0x80] sm:$0xff] }
 0x47e   : > { %3778 = vrot.lane.b32.xlu1 %v1100_v53, %s7024_s27  ;;  %3776 = vrot.lane.b32.xlu0 %v1099_v46, %s7024_s27  ;;  %v4056_v53 = vld [vmem:[%s13104_s2 + $0x38] sm:$0xff] }
 0x47f   : > { %v1104_v46 = vld [vmem:[%s8337_s13 + $0x11e] sm:$0xff]  ;;  %6847 = vmatprep.subr.mxu0 %v4056_v53 }
 0x480   : > { %v9667_v44 = vpop.permute.xlu1 %3039  ;;  %v9669_v36 = vpop.permute.xlu0 %3037  ;;  %6848 = vmatpush3.msra.mxu0 %v4056_v53  ;;  %v1107_v53 = vld [vmem:[%s8337_s13 + $0x136] sm:$0xff] }
 0x481   : > { %13583 = vst [vmem:[#allocation476_spill] sm:$0xff] %v9667_v44  ;;  %13584 = vst [vmem:[#allocation477_spill] sm:$0xff] %v9669_v36 }
 0x482   : > { %3782 = vrot.lane.b32.xlu1 %v1102_v43, %s7024_s27  ;;  %3780 = vrot.lane.b32.xlu0 %v1101_v39, %s7024_s27  ;;  %v4055_v43 = vld [vmem:[%s13104_s2 + $0x30] sm:$0xff] }
 0x483   : > { %v1106_v39 = vld [vmem:[%s8337_s13 + $0x12e] sm:$0xff]  ;;  %6849 = vmatprep.subr.mxu0 %v4055_v43 }
 0x484   : > { %v9681_v59 = vpop.permute.xlu1 %3043  ;;  %v9683_v14 = vpop.permute.xlu0 %3041  ;;  %6850 = vmatpush3.msra.mxu0 %v4055_v43  ;;  %v4052_v43 = vld [vmem:[%s13104_s2 + $0x18] sm:$0xff] }
 0x485   : > { %13585 = vst [vmem:[#allocation478_spill] sm:$0xff] %v9681_v59  ;;  %13586 = vst [vmem:[#allocation479_spill] sm:$0xff] %v9683_v14  ;;  %6851 = vmatprep.subr.mxu0 %v4054_v51  ;;  %v609_v59 = vld [vmem:[%s7092_s26 + $0x60] sm:$0xff] }
 0x486   : > { %3786 = vrot.lane.b32.xlu1 %v1104_v46, %s7024_s27  ;;  %3784 = vrot.lane.b32.xlu0 %v1103_v34, %s7024_s27  ;;  %v4053_v34 = vld [vmem:[%s13104_s2 + $0x20] sm:$0xff] }
 0x487   : > { %v1108_v46 = vld [vmem:[%s8337_s13 + $0x13e] sm:$0xff]  ;;  %6852 = vmatpush3.msra.mxu0 %v4054_v51  ;;  %v4050_v51 = vld [vmem:[%s13104_s2 + $0x8] sm:$0xff] }
 0x488   : > { %v9692_v38 = vpop.permute.xlu1 %3047  ;;  %v9694_v42 = vpop.permute.xlu0 %3045  ;;  %6853 = vmatprep.subr.mxu0 %v4053_v34 }
 0x489   : > { %13587 = vst [vmem:[#allocation480_spill] sm:$0xff] %v9692_v38  ;;  %13588 = vst [vmem:[#allocation481_spill] sm:$0xff] %v9694_v42  ;;  %6854 = vmatpush3.msra.mxu0 %v4053_v34  ;;  %v1051_v42 = vld [vmem:[%s8337_s13 + $0x95] sm:$0xff] }
 0x48a   : > { %3790 = vrot.lane.b32.xlu1 %v1106_v39, %s7024_s27  ;;  %3788 = vrot.lane.b32.xlu0 %v1105_v40, %s7024_s27  ;;  %v4051_v40 = vld [vmem:[%s13104_s2 + $0x10] sm:$0xff] }
 0x48b   : > { %6855 = vmatprep.subr.mxu0 %v4052_v43  ;;  %v603_v38 = vld [vmem:[%s7092_s26 + $0x30] sm:$0xff] }
 0x48c   : > { %v9706_v62 = vpop.permute.xlu1 %3051  ;;  %v9708_v54 = vpop.permute.xlu0 %3049  ;;  %6856 = vmatpush3.msra.mxu0 %v4052_v43 }
 0x48d   : > { %13589 = vst [vmem:[#allocation482_spill] sm:$0xff] %v9706_v62  ;;  %13590 = vst [vmem:[#allocation483_spill] sm:$0xff] %v9708_v54  ;;  %6857 = vmatprep.subr.mxu0 %v4051_v40 }
 0x48e   : > { %3794 = vrot.lane.b32.xlu1 %v1108_v46, %s7024_s27  ;;  %3792 = vrot.lane.b32.xlu0 %v1107_v53, %s7024_s27 }
 0x48f   : > { %6858 = vmatpush3.msra.mxu0 %v4051_v40 }
 0x490   : > { %v9718_v39 = vpop.permute.xlu1 %3055  ;;  %v9720_v55 = vpop.permute.xlu0 %3053  ;;  %6859 = vmatprep.subr.mxu0 %v4050_v51 }
 0x491   : > { %13591 = vst [vmem:[#allocation484_spill] sm:$0xff] %v9718_v39  ;;  %13592 = vst [vmem:[#allocation485_spill] sm:$0xff] %v9720_v55  ;;  %6860 = vmatpush3.msra.mxu0 %v4050_v51 }
 0x494   : > { %v9725_v46 = vpop.permute.xlu1 %3059  ;;  %v9727_v53 = vpop.permute.xlu0 %3057 }
 0x495   : > { %13593 = vst [vmem:[#allocation486_spill] sm:$0xff] %v9725_v46  ;;  %13594 = vst [vmem:[#allocation487_spill] sm:$0xff] %v9727_v53 }
 0x498   : > { %v9729_v34 = vpop.permute.xlu1 %3063  ;;  %v9731_v11 = vpop.permute.xlu0 %3061 }
 0x499   : > { %13595 = vst [vmem:[#allocation488_spill] sm:$0xff] %v9729_v34  ;;  %13596 = vst [vmem:[#allocation489_spill] sm:$0xff] %v9731_v11 }
 0x49c   : > { %v9733_v39 = vpop.permute.xlu1 %3067  ;;  %v9735_v55 = vpop.permute.xlu0 %3065 }
 0x49d   : > { %13597 = vst [vmem:[#allocation490_spill] sm:$0xff] %v9733_v39  ;;  %13598 = vst [vmem:[#allocation491_spill] sm:$0xff] %v9735_v55 }
 0x4a0   : > { %v9737_v43 = vpop.permute.xlu1 %3071  ;;  %v9739_v7 = vpop.permute.xlu0 %3069 }
 0x4a1   : > { %13599 = vst [vmem:[#allocation492_spill] sm:$0xff] %v9737_v43  ;;  %13600 = vst [vmem:[#allocation493_spill] sm:$0xff] %v9739_v7  ;;  %v4049_v7 = vld [vmem:[%s13104_s2] sm:$0xff] }
 0x4a2   : > { %6861 = vmatprep.subr.mxu0 %v4049_v7 }
 0x4a3   : > { %6862 = vmatpush3.msra.mxu0 %v4049_v7 }
 0x4a4   : > { %v9741_v40 = vpop.permute.xlu1 %3075  ;;  %v9743_v46 = vpop.permute.xlu0 %3073 }
 0x4a5   : > { %13601 = vst [vmem:[#allocation494_spill] sm:$0xff] %v9741_v40  ;;  %13602 = vst [vmem:[#allocation495_spill] sm:$0xff] %v9743_v46 }
 0x4a8   : > { %v9745_v53 = vpop.permute.xlu1 %3079  ;;  %v9747_v51 = vpop.permute.xlu0 %3077 }
 0x4a9   : > { %13603 = vst [vmem:[#allocation496_spill] sm:$0xff] %v9745_v53  ;;  %13604 = vst [vmem:[#allocation497_spill] sm:$0xff] %v9747_v51 }
 0x4ac   : > { %v9749_v34 = vpop.permute.xlu1 %3083  ;;  %v9751_v11 = vpop.permute.xlu0 %3081 }
 0x4ad   : > { %13605 = vst [vmem:[#allocation498_spill] sm:$0xff] %v9749_v34  ;;  %13606 = vst [vmem:[#allocation499_spill] sm:$0xff] %v9751_v11  ;;  %v1038_v11 = vld [vmem:[%s8337_s13 + $0x2d] sm:$0xff] }
 0x4b0   : > { %v9753_v39 = vpop.permute.xlu1 %3087  ;;  %v9755_v55 = vpop.permute.xlu0 %3085 }
 0x4b1   : > { %13607 = vst [vmem:[#allocation500_spill] sm:$0xff] %v9753_v39  ;;  %13608 = vst [vmem:[#allocation501_spill] sm:$0xff] %v9755_v55  ;;  %v1037_v39 = vld [vmem:[%s8337_s13 + $0x25] sm:$0xff] }
 0x4b4   : > { %v9760_v46 = vpop.permute.xlu1 %3091  ;;  %v9762_v53 = vpop.permute.xlu0 %3089 }
 0x4b5   : > { %13609 = vst [vmem:[#allocation502_spill] sm:$0xff] %v9760_v46  ;;  %13610 = vst [vmem:[#allocation503_spill] sm:$0xff] %v9762_v53  ;;  %v1040_v53 = vld [vmem:[%s8337_s13 + $0x3d] sm:$0xff] }
 0x4b8   : > { %v9764_v51 = vpop.permute.xlu1 %3095  ;;  %v9766_v34 = vpop.permute.xlu0 %3093 }
 0x4b9   : > { %13611 = vst [vmem:[#allocation504_spill] sm:$0xff] %v9764_v51  ;;  %13612 = vst [vmem:[#allocation505_spill] sm:$0xff] %v9766_v34  ;;  %v1039_v51 = vld [vmem:[%s8337_s13 + $0x35] sm:$0xff] }
 0x4bc   : > { %v3727_v55 = vpop.permute.xlu1 %3726  ;;  %v3725_v40 = vpop.permute.xlu0 %3724 }
 0x4bd   : > { %v3833_v43 = vsel %vm3133_vm0, %v1038_v11, %v3727_v55  ;;  %v3832_v7 = vsel %vm3133_vm0, %v1037_v39, %v3725_v40  ;;  %v1042_v55 = vld [vmem:[%s8337_s13 + $0x4d] sm:$0xff]  ;;  %v1041_v11 = vld [vmem:[%s8337_s13 + $0x45] sm:$0xff] }
 0x4be   : > { %3906 = vrot.lane.b32.xlu1 %v3833_v43, %s7039_s9  ;;  %3904 = vrot.lane.b32.xlu0 %v3832_v7, %s7039_s9 }
 0x4c0   : > { %v3731_v34 = vpop.permute.xlu1 %3730  ;;  %v3729_v46 = vpop.permute.xlu0 %3728 }
 0x4c1   : > { %v3835_v54 = vsel %vm3133_vm0, %v1040_v53, %v3731_v34  ;;  %v3834_v62 = vsel %vm3133_vm0, %v1039_v51, %v3729_v46  ;;  %v1044_v53 = vld [vmem:[%s8337_s13 + $0x5d] sm:$0xff]  ;;  %v1043_v46 = vld [vmem:[%s8337_s13 + $0x55] sm:$0xff] }
 0x4c2   : > { %3910 = vrot.lane.b32.xlu1 %v3835_v54, %s7039_s9  ;;  %3908 = vrot.lane.b32.xlu0 %v3834_v62, %s7039_s9 }
 0x4c4   : > { %v3735_v39 = vpop.permute.xlu1 %3734  ;;  %v3733_v43 = vpop.permute.xlu0 %3732 }
 0x4c5   : > { %v3837_v40 = vsel %vm3133_vm0, %v1042_v55, %v3735_v39  ;;  %v3836_v7 = vsel %vm3133_vm0, %v1041_v11, %v3733_v43  ;;  %v1046_v55 = vld [vmem:[%s8337_s13 + $0x6d] sm:$0xff]  ;;  %v1045_v11 = vld [vmem:[%s8337_s13 + $0x65] sm:$0xff] }
 0x4c6   : > { %3914 = vrot.lane.b32.xlu1 %v3837_v40, %s7039_s9  ;;  %3912 = vrot.lane.b32.xlu0 %v3836_v7, %s7039_s9 }
 0x4c8   : > { %v3739_v54 = vpop.permute.xlu1 %3738  ;;  %v3737_v62 = vpop.permute.xlu0 %3736 }
 0x4c9   : > { %v3839_v34 = vsel %vm3133_vm0, %v1044_v53, %v3739_v54  ;;  %v3838_v51 = vsel %vm3133_vm0, %v1043_v46, %v3737_v62  ;;  %v1048_v53 = vld [vmem:[%s8337_s13 + $0x7d] sm:$0xff]  ;;  %v1047_v46 = vld [vmem:[%s8337_s13 + $0x75] sm:$0xff] }
 0x4ca   : > { %3918 = vrot.lane.b32.xlu1 %v3839_v34, %s7039_s9  ;;  %3916 = vrot.lane.b32.xlu0 %v3838_v51, %s7039_s9 }
 0x4cc   : > { %v3743_v39 = vpop.permute.xlu1 %3742  ;;  %v3741_v43 = vpop.permute.xlu0 %3740 }
 0x4cd   : > { %v3841_v40 = vsel %vm3133_vm0, %v1046_v55, %v3743_v39  ;;  %v3840_v7 = vsel %vm3133_vm0, %v1045_v11, %v3741_v43  ;;  %v1050_v55 = vld [vmem:[%s8337_s13 + $0x8d] sm:$0xff]  ;;  %v1049_v11 = vld [vmem:[%s8337_s13 + $0x85] sm:$0xff] }
 0x4ce   : > { %3922 = vrot.lane.b32.xlu1 %v3841_v40, %s7039_s9  ;;  %3920 = vrot.lane.b32.xlu0 %v3840_v7, %s7039_s9  ;;  %v599_v40 = vld [vmem:[%s7092_s26 + $0x10] sm:$0xff]  ;;  %v597_v7 = vld [vmem:[%s7092_s26] sm:$0xff] }
 0x4cf   : > { %v9832_v36 = vsel %vm3133_vm0, %v599_v40, %v7276_v60  ;;  %v9836_v44 = vsel %vm3133_vm0, %v597_v7, %v7278_v61  ;;  %v1053_v60 = vld [vmem:[%s8337_s13 + $0xa5] sm:$0xff]  ;;  %v615_v40 = vld [vmem:[%s7092_s26 + $0x90] sm:$0xff] }
 0x4d0   : > { %v3747_v54 = vpop.permute.xlu1 %3746  ;;  %v3745_v62 = vpop.permute.xlu0 %3744  ;;  %v618_v7 = vld [vmem:[%s7092_s26 + $0xa8] sm:$0xff] }
 0x4d1   : > { %v3843_v34 = vsel %vm3133_vm0, %v1048_v53, %v3747_v54  ;;  %v3842_v51 = vsel %vm3133_vm0, %v1047_v46, %v3745_v62  ;;  %v600_v53 = vld [vmem:[%s7092_s26 + $0x18] sm:$0xff]  ;;  %v598_v62 = vld [vmem:[%s7092_s26 + $0x8] sm:$0xff] }
 0x4d2   : > { %3926 = vrot.lane.b32.xlu1 %v3843_v34, %s7039_s9  ;;  %3924 = vrot.lane.b32.xlu0 %v3842_v51, %s7039_s9  ;;  %v602_v34 = vld [vmem:[%s7092_s26 + $0x28] sm:$0xff]  ;;  %v601_v51 = vld [vmem:[%s7092_s26 + $0x20] sm:$0xff]  ;;  %v9840_v52 = vsel %vm3133_vm0, %v600_v53, %v7290_v0 }
 0x4d3   : > { %v9854_v61 = vsel %vm3133_vm0, %v602_v34, %v7304_v4  ;;  %v9858_v0 = vsel %vm3133_vm0, %v601_v51, %v7306_v5  ;;  %v9873_v4 = vsel %vm3133_vm0, %v606_v15, %v7332_v12  ;;  %v620_v53 = vld [vmem:[%s7092_s26 + $0xb8] sm:$0xff]  ;;  %v621_v15 = vld [vmem:[%s7092_s26 + $0xc0] sm:$0xff] }
 0x4d4   : > { %v3751_v39 = vpop.permute.xlu1 %3750  ;;  %v3749_v43 = vpop.permute.xlu0 %3748 }
 0x4d5   : > { %v3845_v46 = vsel %vm3133_vm0, %v1050_v55, %v3751_v39  ;;  %v3844_v54 = vsel %vm3133_vm0, %v1049_v11, %v3749_v43  ;;  %v605_v55 = vld [vmem:[%s7092_s26 + $0x40] sm:$0xff]  ;;  %v608_v39 = vld [vmem:[%s7092_s26 + $0x58] sm:$0xff]  ;;  %v607_v11 = vld [vmem:[%s7092_s26 + $0x50] sm:$0xff] }
 0x4d6   : > { %3930 = vrot.lane.b32.xlu1 %v3845_v46, %s7039_s9  ;;  %3928 = vrot.lane.b32.xlu0 %v3844_v54, %s7039_s9  ;;  %v610_v43 = vld [vmem:[%s7092_s26 + $0x68] sm:$0xff]  ;;  %v9877_v5 = vsel %vm3133_vm0, %v605_v55, %v7334_v13 }
 0x4d7   : > { %v9892_v12 = vsel %vm3133_vm0, %v610_v43, %v7360_v20  ;;  %v622_v13 = vld [vmem:[%s7092_s26 + $0xc8] sm:$0xff]  ;;  %v9909_v20 = vsel %vm3133_vm0, %v611_v2, %v7370_v23  ;;  %v1055_v43 = vld [vmem:[%s8337_s13 + $0xb5] sm:$0xff]  ;;  %v9929_v2 = vsel %vm3133_vm0, %v615_v40, %v7386_v27 }
 0x4d8   : > { %v3755_v63 = vpop.permute.xlu1 %3754  ;;  %v3753_v14 = vpop.permute.xlu0 %3752  ;;  %v631_v40 = vld [vmem:[%s7092_s26 + $0x110] sm:$0xff] }
 0x4d9   : > { %v3847_v46 = vsel %vm3133_vm0, %v1052_v37, %v3755_v63  ;;  %v3846_v54 = vsel %vm3133_vm0, %v1051_v42, %v3753_v14  ;;  %v1054_v14 = vld [vmem:[%s8337_s13 + $0xad] sm:$0xff]  ;;  %v9850_v37 = vsel %vm3133_vm0, %v598_v62, %v7292_v1  ;;  %v9862_v63 = vsel %vm3133_vm0, %v604_v58, %v7318_v8  ;;  %v616_v42 = vld [vmem:[%s7092_s26 + $0x98] sm:$0xff]  ;;  %v617_v58 = vld [vmem:[%s7092_s26 + $0xa0] sm:$0xff] }
 0x4da   : > { %3934 = vrot.lane.b32.xlu1 %v3847_v46, %s7039_s9  ;;  %3932 = vrot.lane.b32.xlu0 %v3846_v54, %s7039_s9  ;;  %v9869_v1 = vsel %vm3133_vm0, %v603_v38, %v7320_v9  ;;  %v9881_v8 = vsel %vm3133_vm0, %v608_v39, %v7346_v16  ;;  %v619_v62 = vld [vmem:[%s7092_s26 + $0xb0] sm:$0xff]  ;;  %v9888_v38 = vsel %vm3133_vm0, %v607_v11, %v7348_v17  ;;  %v624_v16 = vld [vmem:[%s7092_s26 + $0xd8] sm:$0xff] }
 0x4db   : > { %v9901_v39 = vsel %vm3133_vm0, %v609_v59, %v7362_v21  ;;  %v9905_v17 = vsel %vm3133_vm0, %v612_v3, %v7368_v22  ;;  %v1056_v11 = vld [vmem:[%s8337_s13 + $0xbd] sm:$0xff]  ;;  %v9917_v21 = vsel %vm3133_vm0, %v614_v41, %v7376_v24  ;;  %v9921_v22 = vsel %vm3133_vm0, %v613_v47, %v7378_v25  ;;  %v623_v3 = vld [vmem:[%s7092_s26 + $0xd0] sm:$0xff]  ;;  %v626_v59 = vld [vmem:[%s7092_s26 + $0xe8] sm:$0xff] }
 0x4dc   : > { %v3759_v34 = vpop.permute.xlu1 %3758  ;;  %v3757_v9 = vpop.permute.xlu0 %3756  ;;  %v9925_v23 = vsel %vm3133_vm0, %v616_v42, %v7384_v26  ;;  %v625_v46 = vld [vmem:[%s7092_s26 + $0xe0] sm:$0xff]  ;;  %v9936_v24 = vsel %vm3133_vm0, %v618_v7, %v7392_v28  ;;  %v9940_v25 = vsel %vm3133_vm0, %v617_v58, %v7394_v29  ;;  %v9944_v26 = vsel %vm3133_vm0, %v620_v53, %v7400_v30  ;;  %v628_v47 = vld [vmem:[%s7092_s26 + $0xf8] sm:$0xff]  ;;  %v627_v41 = vld [vmem:[%s7092_s26 + $0xf0] sm:$0xff] }
 0x4dd   : > { %v3849_v51 = vsel %vm3133_vm0, %v1054_v14, %v3759_v34  ;;  %v3848_v55 = vsel %vm3133_vm0, %v1053_v60, %v3757_v9  ;;  %v9948_v27 = vsel %vm3133_vm0, %v619_v62, %v7402_v31  ;;  %v630_v54 = vld [vmem:[%s7092_s26 + $0x108] sm:$0xff]  ;;  %v9955_v60 = vsel %vm3133_vm0, %v622_v13, %v7408_v32  ;;  %v629_v30 = vld [vmem:[%s7092_s26 + $0x100] sm:$0xff]  ;;  %v632_v42 = vld [vmem:[%s7092_s26 + $0x118] sm:$0xff] }
 0x4de   : > { %3938 = vrot.lane.b32.xlu1 %v3849_v51, %s7039_s9  ;;  %3936 = vrot.lane.b32.xlu0 %v3848_v55, %s7039_s9  ;;  %v9959_v29 = vsel %vm3133_vm0, %v621_v15, %v7410_v33  ;;  %v13613_v58 = vld [vmem:[#allocation3_spill] sm:$0xff]  ;;  %v13614_v62 = vld [vmem:[#allocation4_spill] sm:$0xff]  ;;  %v13615_v9 = vld [vmem:[#allocation5_spill] sm:$0xff] }
 0x4df   : > { %v3161_v53 = vsel %vm3133_vm0, %v624_v16, %v13613_v58  ;;  %v3160_v34 = vsel %vm3133_vm0, %v623_v3, %v13614_v62  ;;  %v3163_v32 = vsel %vm3133_vm0, %v626_v59, %v13615_v9  ;;  %v1058_v33 = vld [vmem:[%s8337_s13 + $0xcd] sm:$0xff]  ;;  %v1057_v13 = vld [vmem:[%s8337_s13 + $0xc5] sm:$0xff]  ;;  %v13623_v62 = vld [vmem:[#allocation13_spill] sm:$0xff] }
 0x4e0   : > { %v3763_v14 = vpop.permute.xlu1 %3762  ;;  %v3761_v28 = vpop.permute.xlu0 %3760  ;;  %v13616_v15 = vld [vmem:[#allocation6_spill] sm:$0xff]  ;;  %v13617_v55 = vld [vmem:[#allocation7_spill] sm:$0xff]  ;;  %v13622_v58 = vld [vmem:[#allocation12_spill] sm:$0xff] }
 0x4e1   : > { %v3851_v31 = vsel %vm3133_vm0, %v1056_v11, %v3763_v14  ;;  %v3850_v7 = vsel %vm3133_vm0, %v1055_v43, %v3761_v28  ;;  %v3162_v51 = vsel %vm3133_vm0, %v625_v46, %v13616_v15  ;;  %v3165_v11 = vsel %vm3133_vm0, %v628_v47, %v13617_v55  ;;  %v13618_v43 = vld [vmem:[#allocation8_spill] sm:$0xff]  ;;  %v13619_v14 = vld [vmem:[#allocation9_spill] sm:$0xff]  ;;  %v13620_v28 = vld [vmem:[#allocation10_spill] sm:$0xff] }
 0x4e2   : > { %3942 = vrot.lane.b32.xlu1 %v3851_v31, %s7039_s9  ;;  %3940 = vrot.lane.b32.xlu0 %v3850_v7, %s7039_s9  ;;  %v3164_v16 = vsel %vm3133_vm0, %v627_v41, %v13618_v43  ;;  %v3167_v3 = vsel %vm3133_vm0, %v630_v54, %v13619_v14  ;;  %v3166_v59 = vsel %vm3133_vm0, %v629_v30, %v13620_v28  ;;  %v13621_v31 = vld [vmem:[#allocation11_spill] sm:$0xff]  ;;  %v13624_v15 = vld [vmem:[#allocation14_spill] sm:$0xff]  ;;  %v13626_v14 = vld [vmem:[#allocation16_spill] sm:$0xff] }
 0x4e3   : > { %v3169_v7 = vsel %vm3133_vm0, %v632_v42, %v13621_v31  ;;  %v3168_v46 = vsel %vm3133_vm0, %v631_v40, %v13622_v58  ;;  %v3172_v47 = vsel %vm3170_vm1, %v9850_v37, %v13623_v62  ;;  %v3171_v54 = vsel %vm3170_vm1, %v9836_v44, %v13624_v15  ;;  %v13625_v55 = vld [vmem:[#allocation15_spill] sm:$0xff]  ;;  %v13627_v28 = vld [vmem:[#allocation17_spill] sm:$0xff]  ;;  %v13628_v31 = vld [vmem:[#allocation18_spill] sm:$0xff] }
 0x4e4   : > { %v3767_v9 = vpop.permute.xlu1 %3766  ;;  %v3765_v41 = vpop.permute.xlu0 %3764  ;;  %v3174_v30 = vsel %vm3170_vm1, %v9840_v52, %v13625_v55  ;;  %v3173_v40 = vsel %vm3170_vm1, %v9832_v36, %v13626_v14  ;;  %v3176_v37 = vsel %vm3170_vm1, %v9854_v61, %v13627_v28  ;;  %v3175_v44 = vsel %vm3170_vm1, %v9858_v0, %v13628_v31  ;;  %v1060_v52 = vld [vmem:[%s8337_s13 + $0xdd] sm:$0xff]  ;;  %v13629_v58 = vld [vmem:[#allocation19_spill] sm:$0xff]  ;;  %v13630_v62 = vld [vmem:[#allocation20_spill] sm:$0xff] }
 0x4e5   : > { %v3853_v43 = vsel %vm3133_vm0, %v1058_v33, %v3767_v9  ;;  %v3852_v42 = vsel %vm3133_vm0, %v1057_v13, %v3765_v41  ;;  %v1059_v33 = vld [vmem:[%s8337_s13 + $0xd5] sm:$0xff]  ;;  %v3178_v13 = vsel %vm3170_vm1, %v9862_v63, %v13629_v58  ;;  %v3177_v36 = vsel %vm3170_vm1, %v9869_v1, %v13630_v62  ;;  %v13632_v41 = vld [vmem:[#allocation22_spill] sm:$0xff]  ;;  %v13633_v15 = vld [vmem:[#allocation23_spill] sm:$0xff] }
 0x4e6   : > { %3946 = vrot.lane.b32.xlu1 %v3853_v43, %s7039_s9  ;;  %3944 = vrot.lane.b32.xlu0 %v3852_v42, %s7039_s9  ;;  %v13631_v9 = vld [vmem:[#allocation21_spill] sm:$0xff]  ;;  %v3179_v0 = vsel %vm3170_vm1, %v9877_v5, %v13632_v41  ;;  %v3182_v55 = vsel %vm3170_vm1, %v9881_v8, %v13633_v15  ;;  %v13634_v43 = vld [vmem:[#allocation24_spill] sm:$0xff]  ;;  %v13636_v14 = vld [vmem:[#allocation26_spill] sm:$0xff] }
 0x4e7   : > { %v3180_v61 = vsel %vm3170_vm1, %v9873_v4, %v13631_v9  ;;  %v3181_v63 = vsel %vm3170_vm1, %v9888_v38, %v13634_v43  ;;  %v13635_v42 = vld [vmem:[#allocation25_spill] sm:$0xff]  ;;  %v3183_v4 = vsel %vm3170_vm1, %v9901_v39, %v13636_v14  ;;  %v13637_v31 = vld [vmem:[#allocation27_spill] sm:$0xff]  ;;  %v13638_v58 = vld [vmem:[#allocation28_spill] sm:$0xff] }
 0x4e8   : > { %v3184_v1 = vsel %vm3170_vm1, %v9892_v12, %v13635_v42  ;;  %v3771_v28 = vpop.permute.xlu1 %3770  ;;  %v3769_v5 = vpop.permute.xlu0 %3768  ;;  %v3186_v8 = vsel %vm3170_vm1, %v9905_v17, %v13637_v31  ;;  %v3185_v62 = vsel %vm3170_vm1, %v9909_v20, %v13638_v58  ;;  %v13639_v41 = vld [vmem:[#allocation29_spill] sm:$0xff]  ;;  %v13640_v15 = vld [vmem:[#allocation30_spill] sm:$0xff]  ;;  %v13641_v43 = vld [vmem:[#allocation31_spill] sm:$0xff] }
 0x4e9   : > { %v3855_v38 = vsel %vm3133_vm0, %v1060_v52, %v3771_v28  ;;  %v3854_v9 = vsel %vm3133_vm0, %v1059_v33, %v3769_v5  ;;  %v3188_v12 = vsel %vm3170_vm1, %v9917_v21, %v13639_v41  ;;  %v3187_v39 = vsel %vm3170_vm1, %v9921_v22, %v13640_v15  ;;  %v1062_v20 = vld [vmem:[%s8337_s13 + $0xed] sm:$0xff]  ;;  %v1061_v52 = vld [vmem:[%s8337_s13 + $0xe5] sm:$0xff]  ;;  %v13643_v21 = vld [vmem:[#allocation33_spill] sm:$0xff] }
 0x4ea   : > { %v3190_v17 = vsel %vm3170_vm1, %v9925_v23, %v13641_v43  ;;  %3950 = vrot.lane.b32.xlu1 %v3855_v38, %s7039_s9  ;;  %3948 = vrot.lane.b32.xlu0 %v3854_v9, %s7039_s9  ;;  %v13642_v33 = vld [vmem:[#allocation32_spill] sm:$0xff]  ;;  %v3192_v14 = vsel %vm3170_vm1, %v9936_v24, %v13643_v21  ;;  %v13644_v22 = vld [vmem:[#allocation34_spill] sm:$0xff]  ;;  %v13645_v23 = vld [vmem:[#allocation35_spill] sm:$0xff] }
 0x4eb   : > { %v3189_v42 = vsel %vm3170_vm1, %v9929_v2, %v13642_v33  ;;  %v3191_v28 = vsel %vm3170_vm1, %v9940_v25, %v13644_v22  ;;  %v3194_v5 = vsel %vm3170_vm1, %v9944_v26, %v13645_v23  ;;  %v13646_v31 = vld [vmem:[#allocation36_spill] sm:$0xff]  ;;  %v13647_v38 = vld [vmem:[#allocation37_spill] sm:$0xff]  ;;  %v13648_v9 = vld [vmem:[#allocation38_spill] sm:$0xff] }
 0x4ec   : > { %v3193_v58 = vsel %vm3170_vm1, %v9948_v27, %v13646_v31  ;;  %v3196_v2 = vsel %vm3170_vm1, %v9955_v60, %v13647_v38  ;;  %v3195_v24 = vsel %vm3170_vm1, %v9959_v29, %v13648_v9  ;;  %v13649_v41 = vld [vmem:[#allocation39_spill] sm:$0xff]  ;;  %v3775_v15 = vpop.permute.xlu1 %3774  ;;  %v3773_v43 = vpop.permute.xlu0 %3772  ;;  %v13650_v26 = vld [vmem:[#allocation40_spill] sm:$0xff]  ;;  %v13651_v21 = vld [vmem:[#allocation41_spill] sm:$0xff] }
 0x4ed   : > { %v3198_v25 = vsel %vm3170_vm1, %v3161_v53, %v13649_v41  ;;  %v3197_v33 = vsel %vm3170_vm1, %v3160_v34, %v13650_v26  ;;  %v3200_v27 = vsel %vm3170_vm1, %v3163_v32, %v13651_v21  ;;  %v3857_v22 = vsel %vm3133_vm0, %v1062_v20, %v3775_v15  ;;  %v13652_v60 = vld [vmem:[#allocation42_spill] sm:$0xff]  ;;  %v13653_v29 = vld [vmem:[#allocation43_spill] sm:$0xff]  ;;  %v13654_v53 = vld [vmem:[#allocation44_spill] sm:$0xff] }
 0x4ee   : > { %v3856_v23 = vsel %vm3133_vm0, %v1061_v52, %v3773_v43  ;;  %v10090_v31 = vsel %vm3170_vm1, %v3162_v51, %v13652_v60  ;;  %v10094_v38 = vsel %vm3170_vm1, %v3165_v11, %v13653_v29  ;;  %v10098_v9 = vsel %vm3170_vm1, %v3164_v16, %v13654_v53  ;;  %3954 = vrot.lane.b32.xlu1 %v3857_v22, %s7039_s9  ;;  %v1064_v34 = vld [vmem:[%s8337_s13 + $0xfd] sm:$0xff]  ;;  %v1063_v32 = vld [vmem:[%s8337_s13 + $0xf5] sm:$0xff]  ;;  %v13657_v11 = vld [vmem:[#allocation47_spill] sm:$0xff] }
 0x4ef   : > { %3952 = vrot.lane.b32.xlu0 %v3856_v23, %s7039_s9  ;;  %v13655_v20 = vld [vmem:[#allocation45_spill] sm:$0xff]  ;;  %v13656_v51 = vld [vmem:[#allocation46_spill] sm:$0xff]  ;;  %v10114_v15 = vsel %vm3170_vm1, %v3169_v7, %v13657_v11  ;;  %v13658_v16 = vld [vmem:[#allocation48_spill] sm:$0xff] }
 0x4f0   : > { %v10106_v52 = vsel %vm3170_vm1, %v3167_v3, %v13655_v20  ;;  %v10110_v41 = vsel %vm3170_vm1, %v3166_v59, %v13656_v51  ;;  %v10118_v43 = vsel %vm3170_vm1, %v3168_v46, %v13658_v16  ;;  %v13659_v26 = vld [vmem:[#allocation49_spill] sm:$0xff]  ;;  %v13660_v22 = vld [vmem:[#allocation50_spill] sm:$0xff]  ;;  %v13661_v59 = vld [vmem:[#allocation51_spill] sm:$0xff]  ;;  %v3779_v46 = vpop.permute.xlu1 %3778  ;;  %v3777_v29 = vpop.permute.xlu0 %3776 }
 0x4f1   : > { %v10122_v21 = vsel %vm3207_vm2, %v3172_v47, %v13659_v26  ;;  %v10126_v3 = vsel %vm3207_vm2, %v3171_v54, %v13660_v22  ;;  %v10130_v23 = vsel %vm3207_vm2, %v3174_v30, %v13661_v59  ;;  %v13662_v7 = vld [vmem:[#allocation52_spill] sm:$0xff]  ;;  %v13663_v53 = vld [vmem:[#allocation53_spill] sm:$0xff]  ;;  %v13664_v47 = vld [vmem:[#allocation54_spill] sm:$0xff]  ;;  %v3859_v54 = vsel %vm3133_vm0, %v1064_v34, %v3779_v46 }
 0x4f2   : > { %v10134_v60 = vsel %vm3207_vm2, %v3173_v40, %v13662_v7  ;;  %v10138_v20 = vsel %vm3207_vm2, %v3176_v37, %v13663_v53  ;;  %v10142_v51 = vsel %vm3207_vm2, %v3175_v44, %v13664_v47  ;;  %v3858_v11 = vsel %vm3133_vm0, %v1063_v32, %v3777_v29  ;;  %v13665_v30 = vld [vmem:[#allocation55_spill] sm:$0xff]  ;;  %v13666_v40 = vld [vmem:[#allocation56_spill] sm:$0xff]  ;;  %v13667_v22 = vld [vmem:[#allocation57_spill] sm:$0xff]  ;;  %3958 = vrot.lane.b32.xlu1 %v3859_v54, %s7039_s9 }
 0x4f3   : > { %v10148_v16 = vsel %vm3207_vm2, %v3178_v13, %v13665_v30  ;;  %v10152_v26 = vsel %vm3207_vm2, %v3177_v36, %v13666_v40  ;;  %v10156_v37 = vsel %vm3207_vm2, %v3180_v61, %v13667_v22  ;;  %3956 = vrot.lane.b32.xlu0 %v3858_v11, %s7039_s9  ;;  %v1066_v44 = vld [vmem:[%s8337_s13 + $0x10d] sm:$0xff]  ;;  %v1065_v34 = vld [vmem:[%s8337_s13 + $0x105] sm:$0xff]  ;;  %v13671_v61 = vld [vmem:[#allocation61_spill] sm:$0xff] }
 0x4f4   : > { %v13668_v59 = vld [vmem:[#allocation58_spill] sm:$0xff]  ;;  %v13669_v13 = vld [vmem:[#allocation59_spill] sm:$0xff]  ;;  %v13670_v36 = vld [vmem:[#allocation60_spill] sm:$0xff]  ;;  %v10176_v29 = vsel %vm3207_vm2, %v3184_v1, %v13671_v61  ;;  %v3783_v1 = vpop.permute.xlu1 %3782  ;;  %v3781_v40 = vpop.permute.xlu0 %3780 }
 0x4f5   : > { %v10164_v32 = vsel %vm3207_vm2, %v3179_v0, %v13668_v59  ;;  %v10168_v7 = vsel %vm3207_vm2, %v3182_v55, %v13669_v13  ;;  %v10172_v46 = vsel %vm3207_vm2, %v3181_v63, %v13670_v36  ;;  %v13672_v53 = vld [vmem:[#allocation62_spill] sm:$0xff]  ;;  %v13673_v54 = vld [vmem:[#allocation63_spill] sm:$0xff]  ;;  %v13674_v11 = vld [vmem:[#allocation64_spill] sm:$0xff]  ;;  %v3860_v36 = vsel %vm3133_vm0, %v1065_v34, %v3781_v40 }
 0x4f6   : > { %v10180_v47 = vsel %vm3207_vm2, %v3183_v4, %v13672_v53  ;;  %v10184_v0 = vsel %vm3207_vm2, %v3186_v8, %v13673_v54  ;;  %v10188_v55 = vsel %vm3207_vm2, %v3185_v62, %v13674_v11  ;;  %v13675_v63 = vld [vmem:[#allocation65_spill] sm:$0xff]  ;;  %v13676_v22 = vld [vmem:[#allocation66_spill] sm:$0xff]  ;;  %v13677_v59 = vld [vmem:[#allocation67_spill] sm:$0xff]  ;;  %v3861_v8 = vsel %vm3133_vm0, %v1066_v44, %v3783_v1 }
 0x4f7   : > { %v10192_v30 = vsel %vm3207_vm2, %v3188_v12, %v13675_v63  ;;  %v10196_v4 = vsel %vm3207_vm2, %v3187_v39, %v13676_v22  ;;  %v10200_v13 = vsel %vm3207_vm2, %v3190_v17, %v13677_v59  ;;  %v13678_v62 = vld [vmem:[#allocation68_spill] sm:$0xff]  ;;  %v13679_v12 = vld [vmem:[#allocation69_spill] sm:$0xff]  ;;  %v13680_v54 = vld [vmem:[#allocation70_spill] sm:$0xff]  ;;  %3962 = vrot.lane.b32.xlu1 %v3861_v8, %s7039_s9  ;;  %3960 = vrot.lane.b32.xlu0 %v3860_v36, %s7039_s9 }
 0x4f8   : > { %v10206_v61 = vsel %vm3207_vm2, %v3189_v42, %v13678_v62  ;;  %v10210_v53 = vsel %vm3207_vm2, %v3192_v14, %v13679_v12  ;;  %v10214_v39 = vsel %vm3207_vm2, %v3191_v28, %v13680_v54  ;;  %v1068_v17 = vld [vmem:[%s8337_s13 + $0x11d] sm:$0xff]  ;;  %v1067_v44 = vld [vmem:[%s8337_s13 + $0x115] sm:$0xff]  ;;  %v13681_v34 = vld [vmem:[#allocation71_spill] sm:$0xff]  ;;  %v13109_v12 = vmov 0.0  }
 0x4f9   : > { %v3231_v11 = vsel %vm3207_vm2, %v3194_v5, %v13681_v34  ;;  %v13682_v42 = vld [vmem:[#allocation72_spill] sm:$0xff]  ;;  %v13683_v1 = vld [vmem:[#allocation73_spill] sm:$0xff]  ;;  %v13684_v40 = vld [vmem:[#allocation74_spill] sm:$0xff]  ;;  %4491 = vst.msk [vmem:[#allocation2] sm:$0xff] %vm3170_vm1, %v13109_v12 }
 0x4fa   : > { %v3230_v63 = vsel %vm3207_vm2, %v3193_v58, %v13682_v42  ;;  %v10226_v14 = vsel %vm3207_vm2, %v3196_v2, %v13683_v1  ;;  %v10230_v28 = vsel %vm3207_vm2, %v3195_v24, %v13684_v40  ;;  %v13685_v22 = vld [vmem:[#allocation75_spill] sm:$0xff]  ;;  %v13686_v8 = vld [vmem:[#allocation76_spill] sm:$0xff]  ;;  %v13687_v5 = vld [vmem:[#allocation77_spill] sm:$0xff]  ;;  %v3787_v58 = vpop.permute.xlu1 %3786  ;;  %v3785_v2 = vpop.permute.xlu0 %3784  ;;  %4492 = vst.msk [vmem:[#allocation2 + $0x8] sm:$0xff] %vm3170_vm1, %v13109_v12 }
 0x4fb   : > { %v10234_v59 = vsel %vm3207_vm2, %v3198_v25, %v13685_v22  ;;  %v10238_v36 = vsel %vm3207_vm2, %v3197_v33, %v13686_v8  ;;  %v10242_v62 = vsel %vm3207_vm2, %v3200_v27, %v13687_v5  ;;  %4495 = vst.msk [vmem:[#allocation2 + $0x133] sm:$0xff] %vm3170_vm1, %v13109_v12  ;;  %4496 = vst.msk [vmem:[#allocation2 + $0x13b] sm:$0xff] %vm3170_vm1, %v13109_v12  ;;  %v13688_v24 = vld [vmem:[#allocation78_spill] sm:$0xff]  ;;  %v13689_v33 = vld [vmem:[#allocation79_spill] sm:$0xff] }
 0x4fc   : > { %v3236_v25 = vsel %vm3207_vm2, %v10090_v31, %v13688_v24  ;;  %v3239_v27 = vsel %vm3207_vm2, %v10094_v38, %v13689_v33  ;;  %v3863_v54 = vsel %vm3133_vm0, %v1068_v17, %v3787_v58  ;;  %v3862_v34 = vsel %vm3133_vm0, %v1067_v44, %v3785_v2  ;;  %v13690_v42 = vld [vmem:[#allocation80_spill] sm:$0xff]  ;;  %v13691_v40 = vld [vmem:[#allocation81_spill] sm:$0xff]  ;;  %v13692_v8 = vld [vmem:[#allocation82_spill] sm:$0xff] }
 0x4fd   : > { %v3238_v1 = vsel %vm3207_vm2, %v10098_v9, %v13690_v42  ;;  %v3241_v22 = vsel %vm3207_vm2, %v10106_v52, %v13691_v40  ;;  %v3240_v31 = vsel %vm3207_vm2, %v10110_v41, %v13692_v8  ;;  %3966 = vrot.lane.b32.xlu1 %v3863_v54, %s7039_s9  ;;  %3964 = vrot.lane.b32.xlu0 %v3862_v34, %s7039_s9  ;;  %v1070_v38 = vld [vmem:[%s8337_s13 + $0x12d] sm:$0xff]  ;;  %v1069_v17 = vld [vmem:[%s8337_s13 + $0x125] sm:$0xff]  ;;  %v13695_v2 = vld [vmem:[#allocation85_spill] sm:$0xff] }
 0x4fe   : > { %v13693_v5 = vld [vmem:[#allocation83_spill] sm:$0xff]  ;;  %v13694_v58 = vld [vmem:[#allocation84_spill] sm:$0xff]  ;;  %v3246_v52 = vsel %vm3244_vm3, %v10122_v21, %v13695_v2  ;;  %v13696_v24 = vld [vmem:[#allocation86_spill] sm:$0xff]  ;;  %v3791_v8 = vpop.permute.xlu1 %3790 }
 0x4ff   : > { %v3243_v44 = vsel %vm3207_vm2, %v10114_v15, %v13693_v5  ;;  %v3242_v9 = vsel %vm3207_vm2, %v10118_v43, %v13694_v58  ;;  %v3245_v41 = vsel %vm3244_vm3, %v10126_v3, %v13696_v24  ;;  %v13697_v33 = vld [vmem:[#allocation87_spill] sm:$0xff]  ;;  %v13698_v34 = vld [vmem:[#allocation88_spill] sm:$0xff]  ;;  %v13699_v42 = vld [vmem:[#allocation89_spill] sm:$0xff]  ;;  %v3789_v3 = vpop.permute.xlu0 %3788  ;;  %vm4493_vm2 = vcmask 59392  }
 0x500   : > { %v3248_v54 = vsel %vm3244_vm3, %v10130_v23, %v13697_v33  ;;  %v3247_v15 = vsel %vm3244_vm3, %v10134_v60, %v13698_v34  ;;  %v3250_v43 = vsel %vm3244_vm3, %v10138_v20, %v13699_v42  ;;  %v13700_v40 = vld [vmem:[#allocation90_spill] sm:$0xff]  ;;  %v13701_v5 = vld [vmem:[#allocation91_spill] sm:$0xff]  ;;  %v13702_v23 = vld [vmem:[#allocation92_spill] sm:$0xff]  ;;  %v3865_v60 = vsel %vm3133_vm0, %v1070_v38, %v3791_v8  ;;  %4494 = vst.msk [vmem:[#allocation2 + $0x10] sm:$0x7] %vm4493_vm2, %v13109_v12 }
 0x501   : > { %v3249_v21 = vsel %vm3244_vm3, %v10142_v51, %v13700_v40  ;;  %v3252_v58 = vsel %vm3244_vm3, %v10148_v16, %v13701_v5  ;;  %v3251_v2 = vsel %vm3244_vm3, %v10152_v26, %v13702_v23  ;;  %v3864_v24 = vsel %vm3133_vm0, %v1069_v17, %v3789_v3  ;;  %v13703_v33 = vld [vmem:[#allocation93_spill] sm:$0xff]  ;;  %v13704_v34 = vld [vmem:[#allocation94_spill] sm:$0xff]  ;;  %v13705_v42 = vld [vmem:[#allocation95_spill] sm:$0xff]  ;;  %3970 = vrot.lane.b32.xlu1 %v3865_v60, %s7039_s9 }
 0x502   : > { %v3254_v20 = vsel %vm3244_vm3, %v10156_v37, %v13703_v33  ;;  %v3253_v51 = vsel %vm3244_vm3, %v10164_v32, %v13704_v34  ;;  %v3256_v16 = vsel %vm3244_vm3, %v10168_v7, %v13705_v42  ;;  %3968 = vrot.lane.b32.xlu0 %v3864_v24, %s7039_s9  ;;  %v1072_v26 = vld [vmem:[%s8337_s13 + $0x13d] sm:$0xff]  ;;  %v1071_v38 = vld [vmem:[%s8337_s13 + $0x135] sm:$0xff]  ;;  %v13709_v5 = vld [vmem:[#allocation99_spill] sm:$0xff]  ;;  %v3795_v42 = vpop.permute.xlu1 %3794 }
 0x503   : > { %v13706_v40 = vld [vmem:[#allocation96_spill] sm:$0xff]  ;;  %v13707_v8 = vld [vmem:[#allocation97_spill] sm:$0xff]  ;;  %v13708_v3 = vld [vmem:[#allocation98_spill] sm:$0xff]  ;;  %v3260_v7 = vsel %vm3244_vm3, %v10184_v0, %v13709_v5 }
 0x504   : > { %v3255_v17 = vsel %vm3244_vm3, %v10172_v46, %v13706_v40  ;;  %v3258_v37 = vsel %vm3244_vm3, %v10176_v29, %v13707_v8  ;;  %v3257_v32 = vsel %vm3244_vm3, %v10180_v47, %v13708_v3  ;;  %v13710_v23 = vld [vmem:[#allocation100_spill] sm:$0xff]  ;;  %v13711_v24 = vld [vmem:[#allocation101_spill] sm:$0xff]  ;;  %v13712_v33 = vld [vmem:[#allocation102_spill] sm:$0xff]  ;;  %v3793_v40 = vpop.permute.xlu0 %3792 }
 0x505   : > { %v3259_v60 = vsel %vm3244_vm3, %v10188_v55, %v13710_v23  ;;  %v3262_v46 = vsel %vm3244_vm3, %v10192_v30, %v13711_v24  ;;  %v3261_v29 = vsel %vm3244_vm3, %v10196_v4, %v13712_v33  ;;  %v13713_v34 = vld [vmem:[#allocation103_spill] sm:$0xff]  ;;  %v13714_v8 = vld [vmem:[#allocation104_spill] sm:$0xff]  ;;  %v13715_v3 = vld [vmem:[#allocation105_spill] sm:$0xff]  ;;  %v3867_v30 = vsel %vm3133_vm0, %v1072_v26, %v3795_v42 }
 0x506   : > { %v3264_v47 = vsel %vm3244_vm3, %v10200_v13, %v13713_v34  ;;  %v3263_v0 = vsel %vm3244_vm3, %v10206_v61, %v13714_v8  ;;  %v3266_v55 = vsel %vm3244_vm3, %v10210_v53, %v13715_v3  ;;  %v3866_v5 = vsel %vm3133_vm0, %v1071_v38, %v3793_v40  ;;  %v13716_v23 = vld [vmem:[#allocation106_spill] sm:$0xff]  ;;  %v13717_v24 = vld [vmem:[#allocation107_spill] sm:$0xff]  ;;  %v13718_v33 = vld [vmem:[#allocation108_spill] sm:$0xff]  ;;  %3974 = vrot.lane.b32.xlu1 %v3867_v30, %s7039_s9 }
 0x507   : > { %v3265_v4 = vsel %vm3244_vm3, %v10214_v39, %v13716_v23  ;;  %v3268_v13 = vsel %vm3244_vm3, %v3231_v11, %v13717_v24  ;;  %v3267_v34 = vsel %vm3244_vm3, %v3230_v63, %v13718_v33  ;;  %3972 = vrot.lane.b32.xlu0 %v3866_v5, %s7039_s9  ;;  %v13719_v61 = vld [vmem:[#allocation109_spill] sm:$0xff]  ;;  %v13720_v26 = vld [vmem:[#allocation110_spill] sm:$0xff]  ;;  %v13721_v39 = vld [vmem:[#allocation111_spill] sm:$0xff]  ;;  %vm4065_vm0 = vcmask 588800  }
 0x508   : > { %v3270_v53 = vsel %vm3244_vm3, %v10226_v14, %v13719_v61  ;;  %v3269_v38 = vsel %vm3244_vm3, %v10230_v28, %v13720_v26  ;;  %v3272_v11 = vsel %vm3244_vm3, %v10234_v59, %v13721_v39  ;;  %v13722_v42 = vld [vmem:[#allocation112_spill] sm:$0xff]  ;;  %v13723_v40 = vld [vmem:[#allocation113_spill] sm:$0xff]  ;;  %v13724_v3 = vld [vmem:[#allocation114_spill] sm:$0xff] }
 0x509   : > { %v3271_v63 = vsel %vm3244_vm3, %v10238_v36, %v13722_v42  ;;  %v3274_v8 = vsel %vm3244_vm3, %v10242_v62, %v13723_v40  ;;  %v3273_v30 = vsel %vm3244_vm3, %v3236_v25, %v13724_v3  ;;  %v13725_v14 = vld [vmem:[#allocation115_spill] sm:$0xff]  ;;  %v13726_v23 = vld [vmem:[#allocation116_spill] sm:$0xff]  ;;  %v13727_v24 = vld [vmem:[#allocation117_spill] sm:$0xff] }
 0x50a   : > { %v3276_v5 = vsel %vm3244_vm3, %v3239_v27, %v13725_v14  ;;  %v3275_v28 = vsel %vm3244_vm3, %v3238_v1, %v13726_v23  ;;  %v3278_v59 = vsel %vm3244_vm3, %v3241_v22, %v13727_v24  ;;  %v13728_v33 = vld [vmem:[#allocation118_spill] sm:$0xff]  ;;  %v13729_v61 = vld [vmem:[#allocation119_spill] sm:$0xff]  ;;  %v13730_v62 = vld [vmem:[#allocation120_spill] sm:$0xff] }
 0x50b   : > { %v3277_v36 = vsel %vm3244_vm3, %v3240_v31, %v13728_v33  ;;  %v3280_v26 = vsel %vm3244_vm3, %v3243_v44, %v13729_v61  ;;  %v3279_v39 = vsel %vm3244_vm3, %v3242_v9, %v13730_v62  ;;  %v13731_v25 = vld [vmem:[#allocation121_spill] sm:$0xff]  ;;  %v13732_v27 = vld [vmem:[#allocation122_spill] sm:$0xff]  ;;  %v13733_v1 = vld [vmem:[#allocation123_spill] sm:$0xff] }
 0x50c   : > { %v3283_v42 = vsel %vm3281_vm4, %v3246_v52, %v13731_v25  ;;  %v3282_v40 = vsel %vm3281_vm4, %v3245_v41, %v13732_v27  ;;  %v3285_v3 = vsel %vm3281_vm4, %v3248_v54, %v13733_v1  ;;  %v13734_v14 = vld [vmem:[#allocation124_spill] sm:$0xff]  ;;  %v13735_v23 = vld [vmem:[#allocation125_spill] sm:$0xff]  ;;  %v13736_v24 = vld [vmem:[#allocation126_spill] sm:$0xff] }
 0x50d   : > { %v3284_v22 = vsel %vm3281_vm4, %v3247_v15, %v13734_v14  ;;  %v3287_v31 = vsel %vm3281_vm4, %v3250_v43, %v13735_v23  ;;  %v3286_v44 = vsel %vm3281_vm4, %v3249_v21, %v13736_v24  ;;  %v13737_v33 = vld [vmem:[#allocation127_spill] sm:$0xff]  ;;  %v13738_v61 = vld [vmem:[#allocation128_spill] sm:$0xff]  ;;  %v13739_v62 = vld [vmem:[#allocation129_spill] sm:$0xff] }
 0x50e   : > { %v3289_v9 = vsel %vm3281_vm4, %v3252_v58, %v13737_v33  ;;  %v3288_v52 = vsel %vm3281_vm4, %v3251_v2, %v13738_v61  ;;  %v3291_v41 = vsel %vm3281_vm4, %v3254_v20, %v13739_v62  ;;  %v13740_v25 = vld [vmem:[#allocation130_spill] sm:$0xff]  ;;  %v13741_v27 = vld [vmem:[#allocation131_spill] sm:$0xff]  ;;  %v13742_v1 = vld [vmem:[#allocation132_spill] sm:$0xff] }
 0x50f   : > { %v3290_v54 = vsel %vm3281_vm4, %v3253_v51, %v13740_v25  ;;  %v3293_v15 = vsel %vm3281_vm4, %v3256_v16, %v13741_v27  ;;  %v3292_v43 = vsel %vm3281_vm4, %v3255_v17, %v13742_v1  ;;  %v13743_v14 = vld [vmem:[#allocation133_spill] sm:$0xff]  ;;  %v13744_v23 = vld [vmem:[#allocation134_spill] sm:$0xff]  ;;  %v13745_v24 = vld [vmem:[#allocation135_spill] sm:$0xff] }
 0x510   : > { %v3295_v21 = vsel %vm3281_vm4, %v3258_v37, %v13743_v14  ;;  %v3294_v58 = vsel %vm3281_vm4, %v3257_v32, %v13744_v23  ;;  %v3297_v2 = vsel %vm3281_vm4, %v3260_v7, %v13745_v24  ;;  %v13746_v33 = vld [vmem:[#allocation136_spill] sm:$0xff]  ;;  %v13747_v61 = vld [vmem:[#allocation137_spill] sm:$0xff]  ;;  %v13748_v62 = vld [vmem:[#allocation138_spill] sm:$0xff] }
 0x511   : > { %v3296_v20 = vsel %vm3281_vm4, %v3259_v60, %v13746_v33  ;;  %v3299_v51 = vsel %vm3281_vm4, %v3262_v46, %v13747_v61  ;;  %v3298_v16 = vsel %vm3281_vm4, %v3261_v29, %v13748_v62  ;;  %v13749_v25 = vld [vmem:[#allocation139_spill] sm:$0xff]  ;;  %v13750_v27 = vld [vmem:[#allocation140_spill] sm:$0xff]  ;;  %v13751_v1 = vld [vmem:[#allocation141_spill] sm:$0xff] }
 0x512   : > { %v3301_v17 = vsel %vm3281_vm4, %v3264_v47, %v13749_v25  ;;  %v3300_v37 = vsel %vm3281_vm4, %v3263_v0, %v13750_v27  ;;  %v3303_v32 = vsel %vm3281_vm4, %v3266_v55, %v13751_v1  ;;  %v13752_v14 = vld [vmem:[#allocation142_spill] sm:$0xff]  ;;  %v13753_v23 = vld [vmem:[#allocation143_spill] sm:$0xff]  ;;  %v13754_v24 = vld [vmem:[#allocation144_spill] sm:$0xff] }
 0x513   : > { %v3302_v7 = vsel %vm3281_vm4, %v3265_v4, %v13752_v14  ;;  %v3305_v60 = vsel %vm3281_vm4, %v3268_v13, %v13753_v23  ;;  %v3304_v46 = vsel %vm3281_vm4, %v3267_v34, %v13754_v24  ;;  %v13755_v33 = vld [vmem:[#allocation145_spill] sm:$0xff]  ;;  %v13756_v61 = vld [vmem:[#allocation146_spill] sm:$0xff]  ;;  %v13757_v62 = vld [vmem:[#allocation147_spill] sm:$0xff] }
 0x514   : > { %v3307_v29 = vsel %vm3281_vm4, %v3270_v53, %v13755_v33  ;;  %v3306_v47 = vsel %vm3281_vm4, %v3269_v38, %v13756_v61  ;;  %v3309_v0 = vsel %vm3281_vm4, %v3272_v11, %v13757_v62  ;;  %v13758_v25 = vld [vmem:[#allocation148_spill] sm:$0xff]  ;;  %v13759_v27 = vld [vmem:[#allocation149_spill] sm:$0xff]  ;;  %v13760_v1 = vld [vmem:[#allocation150_spill] sm:$0xff] }
 0x515   : > { %v3308_v55 = vsel %vm3281_vm4, %v3271_v63, %v13758_v25  ;;  %v3311_v4 = vsel %vm3281_vm4, %v3274_v8, %v13759_v27  ;;  %v3310_v13 = vsel %vm3281_vm4, %v3273_v30, %v13760_v1  ;;  %v13761_v14 = vld [vmem:[#allocation151_spill] sm:$0xff]  ;;  %v13762_v23 = vld [vmem:[#allocation152_spill] sm:$0xff]  ;;  %v13763_v38 = vld [vmem:[#allocation153_spill] sm:$0xff] }
 0x516   : > { %v3313_v34 = vsel %vm3281_vm4, %v3276_v5, %v13761_v14  ;;  %v3312_v53 = vsel %vm3281_vm4, %v3275_v28, %v13762_v23  ;;  %v3315_v24 = vsel %vm3281_vm4, %v3278_v59, %v13763_v38  ;;  %v13764_v11 = vld [vmem:[#allocation154_spill] sm:$0xff]  ;;  %v13765_v63 = vld [vmem:[#allocation155_spill] sm:$0xff]  ;;  %v13766_v8 = vld [vmem:[#allocation156_spill] sm:$0xff] }
 0x517   : > { %v3314_v33 = vsel %vm3281_vm4, %v3277_v36, %v13764_v11  ;;  %v3317_v61 = vsel %vm3281_vm4, %v3280_v26, %v13765_v63  ;;  %v3316_v62 = vsel %vm3281_vm4, %v3279_v39, %v13766_v8  ;;  %v13767_v30 = vld [vmem:[#allocation157_spill] sm:$0xff]  ;;  %v13768_v5 = vld [vmem:[#allocation158_spill] sm:$0xff]  ;;  %v13769_v28 = vld [vmem:[#allocation159_spill] sm:$0xff] }
 0x518   : > { %v3320_v25 = vsel %vm3318_vm5, %v3283_v42, %v13767_v30  ;;  %v3319_v27 = vsel %vm3318_vm5, %v3282_v40, %v13768_v5  ;;  %v3322_v1 = vsel %vm3318_vm5, %v3285_v3, %v13769_v28  ;;  %v13770_v14 = vld [vmem:[#allocation160_spill] sm:$0xff]  ;;  %v13771_v23 = vld [vmem:[#allocation161_spill] sm:$0xff]  ;;  %v13772_v38 = vld [vmem:[#allocation162_spill] sm:$0xff] }
 0x519   : > { %v3321_v59 = vsel %vm3318_vm5, %v3284_v22, %v13770_v14  ;;  %v3324_v36 = vsel %vm3318_vm5, %v3287_v31, %v13771_v23  ;;  %v3323_v26 = vsel %vm3318_vm5, %v3286_v44, %v13772_v38  ;;  %v13773_v11 = vld [vmem:[#allocation163_spill] sm:$0xff]  ;;  %v13774_v63 = vld [vmem:[#allocation164_spill] sm:$0xff]  ;;  %v13775_v8 = vld [vmem:[#allocation165_spill] sm:$0xff] }
 0x51a   : > { %v3326_v39 = vsel %vm3318_vm5, %v3289_v9, %v13773_v11  ;;  %v3325_v42 = vsel %vm3318_vm5, %v3288_v52, %v13774_v63  ;;  %v3328_v40 = vsel %vm3318_vm5, %v3291_v41, %v13775_v8  ;;  %v13776_v30 = vld [vmem:[#allocation166_spill] sm:$0xff]  ;;  %v13777_v5 = vld [vmem:[#allocation167_spill] sm:$0xff]  ;;  %v13778_v28 = vld [vmem:[#allocation168_spill] sm:$0xff] }
 0x51b   : > { %v3327_v3 = vsel %vm3318_vm5, %v3290_v54, %v13776_v30  ;;  %v3330_v22 = vsel %vm3318_vm5, %v3293_v15, %v13777_v5  ;;  %v3329_v31 = vsel %vm3318_vm5, %v3292_v43, %v13778_v28  ;;  %v13779_v14 = vld [vmem:[#allocation169_spill] sm:$0xff]  ;;  %v13780_v23 = vld [vmem:[#allocation170_spill] sm:$0xff]  ;;  %v13781_v38 = vld [vmem:[#allocation171_spill] sm:$0xff] }
 0x51c   : > { %v3332_v44 = vsel %vm3318_vm5, %v3295_v21, %v13779_v14  ;;  %v3331_v9 = vsel %vm3318_vm5, %v3294_v58, %v13780_v23  ;;  %v3334_v52 = vsel %vm3318_vm5, %v3297_v2, %v13781_v38  ;;  %v13782_v11 = vld [vmem:[#allocation172_spill] sm:$0xff]  ;;  %v13783_v63 = vld [vmem:[#allocation173_spill] sm:$0xff]  ;;  %v13784_v8 = vld [vmem:[#allocation174_spill] sm:$0xff] }
 0x51d   : > { %v3333_v41 = vsel %vm3318_vm5, %v3296_v20, %v13782_v11  ;;  %v3336_v54 = vsel %vm3318_vm5, %v3299_v51, %v13783_v63  ;;  %v3335_v15 = vsel %vm3318_vm5, %v3298_v16, %v13784_v8  ;;  %v13785_v30 = vld [vmem:[#allocation175_spill] sm:$0xff]  ;;  %v13786_v5 = vld [vmem:[#allocation176_spill] sm:$0xff]  ;;  %v13787_v28 = vld [vmem:[#allocation177_spill] sm:$0xff] }
 0x51e   : > { %v3338_v43 = vsel %vm3318_vm5, %v3301_v17, %v13785_v30  ;;  %v3337_v21 = vsel %vm3318_vm5, %v3300_v37, %v13786_v5  ;;  %v3340_v58 = vsel %vm3318_vm5, %v3303_v32, %v13787_v28  ;;  %v13788_v14 = vld [vmem:[#allocation178_spill] sm:$0xff]  ;;  %v13789_v23 = vld [vmem:[#allocation179_spill] sm:$0xff]  ;;  %v13790_v38 = vld [vmem:[#allocation180_spill] sm:$0xff] }
 0x51f   : > { %v3339_v2 = vsel %vm3318_vm5, %v3302_v7, %v13788_v14  ;;  %v3342_v20 = vsel %vm3318_vm5, %v3305_v60, %v13789_v23  ;;  %v3341_v51 = vsel %vm3318_vm5, %v3304_v46, %v13790_v38  ;;  %v13791_v11 = vld [vmem:[#allocation181_spill] sm:$0xff]  ;;  %v13792_v63 = vld [vmem:[#allocation182_spill] sm:$0xff]  ;;  %v13793_v8 = vld [vmem:[#allocation183_spill] sm:$0xff] }
 0x520   : > { %v3344_v16 = vsel %vm3318_vm5, %v3307_v29, %v13791_v11  ;;  %v3343_v17 = vsel %vm3318_vm5, %v3306_v47, %v13792_v63  ;;  %v3346_v37 = vsel %vm3318_vm5, %v3309_v0, %v13793_v8  ;;  %v13794_v30 = vld [vmem:[#allocation184_spill] sm:$0xff]  ;;  %v13795_v5 = vld [vmem:[#allocation185_spill] sm:$0xff]  ;;  %v13796_v28 = vld [vmem:[#allocation186_spill] sm:$0xff] }
 0x521   : > { %v3345_v32 = vsel %vm3318_vm5, %v3308_v55, %v13794_v30  ;;  %v3348_v7 = vsel %vm3318_vm5, %v3311_v4, %v13795_v5  ;;  %v3347_v60 = vsel %vm3318_vm5, %v3310_v13, %v13796_v28  ;;  %v13797_v14 = vld [vmem:[#allocation187_spill] sm:$0xff]  ;;  %v13798_v23 = vld [vmem:[#allocation188_spill] sm:$0xff]  ;;  %v13799_v47 = vld [vmem:[#allocation189_spill] sm:$0xff] }
 0x522   : > { %v3350_v46 = vsel %vm3318_vm5, %v3313_v34, %v13797_v14  ;;  %v3349_v29 = vsel %vm3318_vm5, %v3312_v53, %v13798_v23  ;;  %v3352_v38 = vsel %vm3318_vm5, %v3315_v24, %v13799_v47  ;;  %v13800_v0 = vld [vmem:[#allocation190_spill] sm:$0xff]  ;;  %v13801_v55 = vld [vmem:[#allocation191_spill] sm:$0xff]  ;;  %v13802_v4 = vld [vmem:[#allocation192_spill] sm:$0xff] }
 0x523   : > { %v3351_v11 = vsel %vm3318_vm5, %v3314_v33, %v13800_v0  ;;  %v3354_v63 = vsel %vm3318_vm5, %v3317_v61, %v13801_v55  ;;  %v3353_v8 = vsel %vm3318_vm5, %v3316_v62, %v13802_v4  ;;  %v13803_v13 = vld [vmem:[#allocation193_spill] sm:$0xff]  ;;  %v13804_v34 = vld [vmem:[#allocation194_spill] sm:$0xff]  ;;  %v13805_v53 = vld [vmem:[#allocation195_spill] sm:$0xff] }
 0x524   : > { %v3357_v30 = vsel %vm3355_vm6, %v3320_v25, %v13803_v13  ;;  %v3356_v5 = vsel %vm3355_vm6, %v3319_v27, %v13804_v34  ;;  %v3359_v28 = vsel %vm3355_vm6, %v3322_v1, %v13805_v53  ;;  %v13806_v14 = vld [vmem:[#allocation196_spill] sm:$0xff]  ;;  %v13807_v23 = vld [vmem:[#allocation197_spill] sm:$0xff]  ;;  %v13808_v47 = vld [vmem:[#allocation198_spill] sm:$0xff] }
 0x525   : > { %v3358_v24 = vsel %vm3355_vm6, %v3321_v59, %v13806_v14  ;;  %v3361_v33 = vsel %vm3355_vm6, %v3324_v36, %v13807_v23  ;;  %v3360_v61 = vsel %vm3355_vm6, %v3323_v26, %v13808_v47  ;;  %v13809_v0 = vld [vmem:[#allocation199_spill] sm:$0xff]  ;;  %v13810_v55 = vld [vmem:[#allocation200_spill] sm:$0xff]  ;;  %v13811_v4 = vld [vmem:[#allocation201_spill] sm:$0xff] }
 0x526   : > { %v3363_v62 = vsel %vm3355_vm6, %v3326_v39, %v13809_v0  ;;  %v3362_v25 = vsel %vm3355_vm6, %v3325_v42, %v13810_v55  ;;  %v3365_v27 = vsel %vm3355_vm6, %v3328_v40, %v13811_v4  ;;  %v13812_v13 = vld [vmem:[#allocation202_spill] sm:$0xff]  ;;  %v13813_v34 = vld [vmem:[#allocation203_spill] sm:$0xff]  ;;  %v13814_v53 = vld [vmem:[#allocation204_spill] sm:$0xff] }
 0x527   : > { %v3364_v1 = vsel %vm3355_vm6, %v3327_v3, %v13812_v13  ;;  %v3367_v59 = vsel %vm3355_vm6, %v3330_v22, %v13813_v34  ;;  %v3366_v36 = vsel %vm3355_vm6, %v3329_v31, %v13814_v53  ;;  %v13815_v14 = vld [vmem:[#allocation205_spill] sm:$0xff]  ;;  %v13816_v23 = vld [vmem:[#allocation206_spill] sm:$0xff]  ;;  %v13817_v47 = vld [vmem:[#allocation207_spill] sm:$0xff] }
 0x528   : > { %v3369_v26 = vsel %vm3355_vm6, %v3332_v44, %v13815_v14  ;;  %v3368_v39 = vsel %vm3355_vm6, %v3331_v9, %v13816_v23  ;;  %v3371_v42 = vsel %vm3355_vm6, %v3334_v52, %v13817_v47  ;;  %v13818_v0 = vld [vmem:[#allocation208_spill] sm:$0xff]  ;;  %v13819_v55 = vld [vmem:[#allocation209_spill] sm:$0xff]  ;;  %v13820_v4 = vld [vmem:[#allocation210_spill] sm:$0xff] }
 0x529   : > { %v3370_v40 = vsel %vm3355_vm6, %v3333_v41, %v13818_v0  ;;  %v3373_v3 = vsel %vm3355_vm6, %v3336_v54, %v13819_v55  ;;  %v3372_v22 = vsel %vm3355_vm6, %v3335_v15, %v13820_v4  ;;  %v13821_v13 = vld [vmem:[#allocation211_spill] sm:$0xff]  ;;  %v13822_v34 = vld [vmem:[#allocation212_spill] sm:$0xff]  ;;  %v13823_v53 = vld [vmem:[#allocation213_spill] sm:$0xff] }
 0x52a   : > { %v3375_v31 = vsel %vm3355_vm6, %v3338_v43, %v13821_v13  ;;  %v3374_v44 = vsel %vm3355_vm6, %v3337_v21, %v13822_v34  ;;  %v3377_v9 = vsel %vm3355_vm6, %v3340_v58, %v13823_v53  ;;  %v13824_v14 = vld [vmem:[#allocation214_spill] sm:$0xff]  ;;  %v13825_v23 = vld [vmem:[#allocation215_spill] sm:$0xff]  ;;  %v13826_v47 = vld [vmem:[#allocation216_spill] sm:$0xff] }
 0x52b   : > { %v3376_v52 = vsel %vm3355_vm6, %v3339_v2, %v13824_v14  ;;  %v3379_v41 = vsel %vm3355_vm6, %v3342_v20, %v13825_v23  ;;  %v3378_v54 = vsel %vm3355_vm6, %v3341_v51, %v13826_v47  ;;  %v13827_v0 = vld [vmem:[#allocation217_spill] sm:$0xff]  ;;  %v13828_v55 = vld [vmem:[#allocation218_spill] sm:$0xff]  ;;  %v13829_v4 = vld [vmem:[#allocation219_spill] sm:$0xff] }
 0x52c   : > { %v3381_v15 = vsel %vm3355_vm6, %v3344_v16, %v13827_v0  ;;  %v3380_v43 = vsel %vm3355_vm6, %v3343_v17, %v13828_v55  ;;  %v3383_v21 = vsel %vm3355_vm6, %v3346_v37, %v13829_v4  ;;  %v13830_v13 = vld [vmem:[#allocation220_spill] sm:$0xff]  ;;  %v13831_v34 = vld [vmem:[#allocation221_spill] sm:$0xff]  ;;  %v13832_v53 = vld [vmem:[#allocation222_spill] sm:$0xff] }
 0x52d   : > { %v3382_v58 = vsel %vm3355_vm6, %v3345_v32, %v13830_v13  ;;  %v3385_v2 = vsel %vm3355_vm6, %v3348_v7, %v13831_v34  ;;  %v3384_v20 = vsel %vm3355_vm6, %v3347_v60, %v13832_v53  ;;  %v13833_v14 = vld [vmem:[#allocation223_spill] sm:$0xff]  ;;  %v13834_v23 = vld [vmem:[#allocation224_spill] sm:$0xff]  ;;  %v13835_v17 = vld [vmem:[#allocation225_spill] sm:$0xff] }
 0x52e   : > { %v3387_v51 = vsel %vm3355_vm6, %v3350_v46, %v13833_v14  ;;  %v3386_v16 = vsel %vm3355_vm6, %v3349_v29, %v13834_v23  ;;  %v3389_v47 = vsel %vm3355_vm6, %v3352_v38, %v13835_v17  ;;  %v13836_v37 = vld [vmem:[#allocation226_spill] sm:$0xff]  ;;  %v13837_v32 = vld [vmem:[#allocation227_spill] sm:$0xff]  ;;  %v13838_v7 = vld [vmem:[#allocation228_spill] sm:$0xff] }
 0x52f   : > { %v3388_v0 = vsel %vm3355_vm6, %v3351_v11, %v13836_v37  ;;  %v3391_v55 = vsel %vm3355_vm6, %v3354_v63, %v13837_v32  ;;  %v3390_v4 = vsel %vm3355_vm6, %v3353_v8, %v13838_v7  ;;  %v13839_v60 = vld [vmem:[#allocation229_spill] sm:$0xff]  ;;  %v13840_v46 = vld [vmem:[#allocation230_spill] sm:$0xff]  ;;  %v13841_v29 = vld [vmem:[#allocation231_spill] sm:$0xff] }
 0x530   : > { %v3394_v13 = vsel %vm3392_vm7, %v3357_v30, %v13839_v60  ;;  %v3393_v34 = vsel %vm3392_vm7, %v3356_v5, %v13840_v46  ;;  %v3396_v53 = vsel %vm3392_vm7, %v3359_v28, %v13841_v29  ;;  %v13842_v14 = vld [vmem:[#allocation232_spill] sm:$0xff]  ;;  %v13843_v23 = vld [vmem:[#allocation233_spill] sm:$0xff]  ;;  %v13844_v63 = vld [vmem:[#allocation234_spill] sm:$0xff] }
 0x531   : > { %v3395_v38 = vsel %vm3392_vm7, %v3358_v24, %v13842_v14  ;;  %v10614_v11 = vsel %vm3392_vm7, %v3361_v33, %v13843_v23  ;;  %v10618_v17 = vsel %vm3392_vm7, %v3360_v61, %v13844_v63  ;;  %v13845_v8 = vld [vmem:[#allocation235_spill] sm:$0xff]  ;;  %v13846_v37 = vld [vmem:[#allocation236_spill] sm:$0xff]  ;;  %v13847_v28 = vld [vmem:[#allocation237_spill] sm:$0xff] }
 0x532   : > { %v10622_v30 = vsel %vm3392_vm7, %v3363_v62, %v13845_v8  ;;  %v10626_v5 = vsel %vm3392_vm7, %v3362_v25, %v13846_v37  ;;  %v10630_v32 = vsel %vm3392_vm7, %v3365_v27, %v13847_v28  ;;  %v13848_v24 = vld [vmem:[#allocation238_spill] sm:$0xff]  ;;  %v13849_v7 = vld [vmem:[#allocation239_spill] sm:$0xff]  ;;  %v13850_v60 = vld [vmem:[#allocation240_spill] sm:$0xff] }
 0x533   : > { %v10634_v33 = vsel %vm3392_vm7, %v3364_v1, %v13848_v24  ;;  %v10638_v61 = vsel %vm3392_vm7, %v3367_v59, %v13849_v7  ;;  %v10642_v62 = vsel %vm3392_vm7, %v3366_v36, %v13850_v60  ;;  %v13851_v46 = vld [vmem:[#allocation241_spill] sm:$0xff]  ;;  %v13852_v29 = vld [vmem:[#allocation242_spill] sm:$0xff]  ;;  %v13853_v14 = vld [vmem:[#allocation243_spill] sm:$0xff] }
 0x534   : > { %v10646_v25 = vsel %vm3392_vm7, %v3369_v26, %v13851_v46  ;;  %v10650_v27 = vsel %vm3392_vm7, %v3368_v39, %v13852_v29  ;;  %v10654_v1 = vsel %vm3392_vm7, %v3371_v42, %v13853_v14  ;;  %v13854_v23 = vld [vmem:[#allocation244_spill] sm:$0xff]  ;;  %v13855_v63 = vld [vmem:[#allocation245_spill] sm:$0xff]  ;;  %v13856_v8 = vld [vmem:[#allocation246_spill] sm:$0xff] }
 0x535   : > { %v10658_v59 = vsel %vm3392_vm7, %v3370_v40, %v13854_v23  ;;  %v10662_v36 = vsel %vm3392_vm7, %v3373_v3, %v13855_v63  ;;  %v10666_v26 = vsel %vm3392_vm7, %v3372_v22, %v13856_v8  ;;  %v13857_v37 = vld [vmem:[#allocation247_spill] sm:$0xff]  ;;  %v13858_v28 = vld [vmem:[#allocation248_spill] sm:$0xff]  ;;  %v13859_v24 = vld [vmem:[#allocation249_spill] sm:$0xff] }
 0x536   : > { %v10670_v39 = vsel %vm3392_vm7, %v3375_v31, %v13857_v37  ;;  %v10674_v42 = vsel %vm3392_vm7, %v3374_v44, %v13858_v28  ;;  %v10678_v40 = vsel %vm3392_vm7, %v3377_v9, %v13859_v24  ;;  %v13860_v7 = vld [vmem:[#allocation250_spill] sm:$0xff]  ;;  %v13861_v60 = vld [vmem:[#allocation251_spill] sm:$0xff]  ;;  %v13862_v46 = vld [vmem:[#allocation252_spill] sm:$0xff] }
 0x537   : > { %v10682_v3 = vsel %vm3392_vm7, %v3376_v52, %v13860_v7  ;;  %v10686_v22 = vsel %vm3392_vm7, %v3379_v41, %v13861_v60  ;;  %v10690_v31 = vsel %vm3392_vm7, %v3378_v54, %v13862_v46  ;;  %v13863_v29 = vld [vmem:[#allocation253_spill] sm:$0xff]  ;;  %v13864_v14 = vld [vmem:[#allocation254_spill] sm:$0xff]  ;;  %v13865_v23 = vld [vmem:[#allocation255_spill] sm:$0xff] }
 0x538   : > { %v10694_v44 = vsel %vm3392_vm7, %v3381_v15, %v13863_v29  ;;  %v10698_v9 = vsel %vm3392_vm7, %v3380_v43, %v13864_v14  ;;  %v10702_v52 = vsel %vm3392_vm7, %v3383_v21, %v13865_v23  ;;  %v13866_v63 = vld [vmem:[#allocation256_spill] sm:$0xff]  ;;  %v13867_v8 = vld [vmem:[#allocation257_spill] sm:$0xff]  ;;  %v13868_v37 = vld [vmem:[#allocation258_spill] sm:$0xff] }
 0x539   : > { %v10706_v41 = vsel %vm3392_vm7, %v3382_v58, %v13866_v63  ;;  %v10710_v54 = vsel %vm3392_vm7, %v3385_v2, %v13867_v8  ;;  %v10714_v15 = vsel %vm3392_vm7, %v3384_v20, %v13868_v37  ;;  %v13869_v28 = vld [vmem:[#allocation259_spill] sm:$0xff]  ;;  %v13870_v24 = vld [vmem:[#allocation260_spill] sm:$0xff]  ;;  %v13871_v7 = vld [vmem:[#allocation261_spill] sm:$0xff] }
 0x53a   : > { %v10718_v43 = vsel %vm3392_vm7, %v3387_v51, %v13869_v28  ;;  %v10722_v21 = vsel %vm3392_vm7, %v3386_v16, %v13870_v24  ;;  %v10726_v58 = vsel %vm3392_vm7, %v3389_v47, %v13871_v7  ;;  %v13872_v60 = vld [vmem:[#allocation262_spill] sm:$0xff]  ;;  %v13873_v46 = vld [vmem:[#allocation263_spill] sm:$0xff]  ;;  %v13874_v29 = vld [vmem:[#allocation265_spill] sm:$0xff] }
 0x53b   : > { %v10730_v2 = vsel %vm3392_vm7, %v3388_v0, %v13872_v60  ;;  %v10734_v20 = vsel %vm3392_vm7, %v3391_v55, %v13873_v46  ;;  %v3431_v51 = vsel %vm3429_vm8, %v3394_v13, %v13874_v29  ;;  %v13875_v14 = vld [vmem:[#allocation266_spill] sm:$0xff]  ;;  %v13876_v23 = vld [vmem:[#allocation264_spill] sm:$0xff]  ;;  %v13877_v63 = vld [vmem:[#allocation301_spill] sm:$0xff] }
 0x53c   : > { %v3430_v16 = vsel %vm3429_vm8, %v3393_v34, %v13875_v14  ;;  %v10742_v47 = vsel %vm3392_vm7, %v3390_v4, %v13876_v23  ;;  %v3468_v0 = vsel %vm3466_vm9, %v3431_v51, %v13877_v63  ;;  %v13878_v8 = vld [vmem:[#allocation302_spill] sm:$0xff]  ;;  %v13879_v55 = vld [vmem:[#allocation267_spill] sm:$0xff]  ;;  %v13880_v24 = vld [vmem:[#allocation337_spill] sm:$0xff] }
 0x53d   : > { %v3467_v37 = vsel %vm3466_vm9, %v3430_v16, %v13878_v8  ;;  %v3433_v28 = vsel %vm3429_vm8, %v3396_v53, %v13879_v55  ;;  %v3505_v13 = vsel %vm3503_vm10, %v3468_v0, %v13880_v24  ;;  %v13881_v7 = vld [vmem:[#allocation338_spill] sm:$0xff]  ;;  %v13882_v60 = vld [vmem:[#allocation268_spill] sm:$0xff]  ;;  %v13883_v46 = vld [vmem:[#allocation373_spill] sm:$0xff] }
 0x53e   : > { %v3504_v34 = vsel %vm3503_vm10, %v3467_v37, %v13881_v7  ;;  %v3432_v4 = vsel %vm3429_vm8, %v3395_v38, %v13882_v60  ;;  %v3542_v29 = vsel %vm3540_vm11, %v3505_v13, %v13883_v46  ;;  %v13884_v51 = vld [vmem:[#allocation374_spill] sm:$0xff]  ;;  %v13885_v16 = vld [vmem:[#allocation303_spill] sm:$0xff]  ;;  %v13886_v23 = vld [vmem:[#allocation409_spill] sm:$0xff] }
 0x53f   : > { %v3541_v14 = vsel %vm3540_vm11, %v3504_v34, %v13884_v51  ;;  %v3470_v53 = vsel %vm3466_vm9, %v3433_v28, %v13885_v16  ;;  %v3579_v63 = vsel %vm3577_vm12, %v3542_v29, %v13886_v23  ;;  %v13887_v0 = vld [vmem:[#allocation410_spill] sm:$0xff]  ;;  %v13888_v37 = vld [vmem:[#allocation304_spill] sm:$0xff]  ;;  %v13889_v13 = vld [vmem:[#allocation339_spill] sm:$0xff]  ;;  %v3905_v29 = vpop.permute.xlu0 %3904 }
 0x540   : > { %v3578_v8 = vsel %vm3577_vm12, %v3541_v14, %v13887_v0  ;;  %v3469_v38 = vsel %vm3466_vm9, %v3432_v4, %v13888_v37  ;;  %v3616_v55 = vsel %vm3614_vm13, %v3579_v63, %v9497_v18  ;;  %v3507_v28 = vsel %vm3503_vm10, %v3470_v53, %v13889_v13  ;;  %v13890_v7 = vld [vmem:[#allocation340_spill] sm:$0xff]  ;;  %v3907_v4 = vpop.permute.xlu1 %3906  ;;  %v13891_v51 = vld [vmem:[#allocation375_spill] sm:$0xff]  ;;  %v13893_v23 = vld [vmem:[#allocation269_spill] sm:$0xff] }
 0x541   : > { %v3615_v24 = vsel %vm3614_vm13, %v3578_v8, %v9499_v57  ;;  %v3506_v34 = vsel %vm3503_vm10, %v3469_v38, %v13890_v7  ;;  %v3653_v60 = vsel %vm3651_vm14, %v3616_v55, %v9643_v35  ;;  %v3544_v18 = vsel %vm3540_vm11, %v3507_v28, %v13891_v51  ;;  %v13892_v14 = vld [vmem:[#allocation376_spill] sm:$0xff]  ;;  %v13894_v35 = vld [vmem:[#allocation270_spill] sm:$0xff]  ;;  %v13895_v0 = vld [vmem:[#allocation411_spill] sm:$0xff] }
 0x542   : > { %v3652_v46 = vsel %vm3651_vm14, %v3615_v24, %v9645_v48  ;;  %v3543_v57 = vsel %vm3540_vm11, %v3506_v34, %v13892_v14  ;;  %v4014_v16 = vsel %vm4012_vm15, %v3653_v60, %v3907_v4  ;;  %v3435_v63 = vsel %vm3429_vm8, %v10614_v11, %v13893_v23  ;;  %v13896_v37 = vld [vmem:[#allocation412_spill] sm:$0xff]  ;;  %v13897_v55 = vld [vmem:[#allocation305_spill] sm:$0xff]  ;;  %v13898_v13 = vld [vmem:[#allocation306_spill] sm:$0xff] }
 0x543   : > { %v4013_v53 = vsel %vm4012_vm15, %v3652_v46, %v3905_v29  ;;  %v3434_v48 = vsel %vm3429_vm8, %v10618_v17, %v13894_v35  ;;  %v3581_v8 = vsel %vm3577_vm12, %v3544_v18, %v13895_v0  ;;  %v3580_v38 = vsel %vm3577_vm12, %v3543_v57, %v13896_v37  ;;  %v13899_v7 = vld [vmem:[#allocation341_spill] sm:$0xff]  ;;  %v13900_v60 = vld [vmem:[#allocation342_spill] sm:$0xff]  ;;  %v3909_v18 = vpop.permute.xlu0 %3908  ;;  %v13903_v23 = vld [vmem:[#allocation271_spill] sm:$0xff] }
 0x544   : > { %6863 = vmatprep.mubr.msk.f32.mxu0 %vm4065_vm0, %v4013_v53  ;;  %v3472_v24 = vsel %vm3466_vm9, %v3435_v63, %v13897_v55  ;;  %v3471_v28 = vsel %vm3466_vm9, %v3434_v48, %v13898_v13  ;;  %v3618_v11 = vsel %vm3614_vm13, %v3581_v8, %v9505_v19  ;;  %v3617_v17 = vsel %vm3614_vm13, %v3580_v38, %v9507_v50  ;;  %v3911_v51 = vpop.permute.xlu1 %3910  ;;  %v13901_v19 = vld [vmem:[#allocation377_spill] sm:$0xff]  ;;  %v13902_v50 = vld [vmem:[#allocation378_spill] sm:$0xff]  ;;  %v13907_v37 = vld [vmem:[#allocation307_spill] sm:$0xff] }
 0x545   : > { %6864 = vmatmul.mubr.msk.f32.vlgmr.msra.gmra.mxu0 %vm4065_vm0, %v4014_v16  ;;  %v3509_v34 = vsel %vm3503_vm10, %v3472_v24, %v13899_v7  ;;  %v3508_v46 = vsel %vm3503_vm10, %v3471_v28, %v13900_v60  ;;  %v3655_v4 = vsel %vm3651_vm14, %v3618_v11, %v9651_v49  ;;  %v3654_v29 = vsel %vm3651_vm14, %v3617_v17, %v9653_v45  ;;  %v13904_v49 = vld [vmem:[#allocation272_spill] sm:$0xff]  ;;  %v13905_v35 = vld [vmem:[#allocation413_spill] sm:$0xff]  ;;  %v13906_v0 = vld [vmem:[#allocation414_spill] sm:$0xff] }
 0x546   : > { %v3546_v14 = vsel %vm3540_vm11, %v3509_v34, %v13901_v19  ;;  %v3545_v57 = vsel %vm3540_vm11, %v3508_v46, %v13902_v50  ;;  %v4016_v16 = vsel %vm4012_vm15, %v3655_v4, %v3911_v51  ;;  %v4015_v53 = vsel %vm4012_vm15, %v3654_v29, %v3909_v18  ;;  %v13908_v55 = vld [vmem:[#allocation308_spill] sm:$0xff]  ;;  %v13909_v13 = vld [vmem:[#allocation343_spill] sm:$0xff] }
 0x547   : > { %v3437_v63 = vsel %vm3429_vm8, %v10622_v30, %v13903_v23  ;;  %v3436_v45 = vsel %vm3429_vm8, %v10626_v5, %v13904_v49  ;;  %v3583_v48 = vsel %vm3577_vm12, %v3546_v14, %v13905_v35  ;;  %v3582_v8 = vsel %vm3577_vm12, %v3545_v57, %v13906_v0  ;;  %6866 = vmatprep.mubr.msk.f32.mxu0 %vm4065_vm0, %v4015_v53  ;;  %v13910_v11 = vld [vmem:[#allocation344_spill] sm:$0xff]  ;;  %v13911_v34 = vld [vmem:[#allocation475_spill] sm:$0xff]  ;;  %v3913_v4 = vpop.permute.xlu0 %3912  ;;  %v13914_v14 = vld [vmem:[#allocation273_spill] sm:$0xff] }
 0x548   : > { %v3474_v38 = vsel %vm3466_vm9, %v3437_v63, %v13907_v37  ;;  %v3473_v24 = vsel %vm3466_vm9, %v3436_v45, %v13908_v55  ;;  %v3620_v30 = vsel %vm3614_vm13, %v3583_v48, %v9513_v56  ;;  %v3619_v5 = vsel %vm3614_vm13, %v3582_v8, %v9515_v6  ;;  %v3915_v46 = vpop.permute.xlu1 %3914  ;;  %v13912_v56 = vld [vmem:[#allocation379_spill] sm:$0xff]  ;;  %v13913_v6 = vld [vmem:[#allocation380_spill] sm:$0xff]  ;;  %v13918_v49 = vld [vmem:[#allocation309_spill] sm:$0xff] }
 0x549   : > { %6867 = vmatmul.mubr.msk.f32.gmra.mxu0 %vm4065_vm0, %v4016_v16  ;;  %v3511_v28 = vsel %vm3503_vm10, %v3474_v38, %v13909_v13  ;;  %v3510_v17 = vsel %vm3503_vm10, %v3473_v24, %v13910_v11  ;;  %v3657_v7 = vsel %vm3651_vm14, %v3620_v30, %v9659_v10  ;;  %v3656_v60 = vsel %vm3651_vm14, %v3619_v5, %v13911_v34  ;;  %v13915_v10 = vld [vmem:[#allocation274_spill] sm:$0xff]  ;;  %v13916_v16 = vld [vmem:[#allocation415_spill] sm:$0xff]  ;;  %v13917_v23 = vld [vmem:[#allocation416_spill] sm:$0xff] }
 0x54a   : > { %v3548_v29 = vsel %vm3540_vm11, %v3511_v28, %v13912_v56  ;;  %v3547_v51 = vsel %vm3540_vm11, %v3510_v17, %v13913_v6  ;;  %v4018_v18 = vsel %vm4012_vm15, %v3657_v7, %v3915_v46  ;;  %v4017_v19 = vsel %vm4012_vm15, %v3656_v60, %v3913_v4  ;;  %v13919_v35 = vld [vmem:[#allocation310_spill] sm:$0xff]  ;;  %v13920_v0 = vld [vmem:[#allocation445_spill] sm:$0xff]  ;;  %v13924_v30 = vld [vmem:[#allocation476_spill] sm:$0xff] }
 0x54b   : > { %v3439_v50 = vsel %vm3429_vm8, %v10630_v32, %v13914_v14  ;;  %v3438_v57 = vsel %vm3429_vm8, %v10634_v33, %v13915_v10  ;;  %v3585_v53 = vsel %vm3577_vm12, %v3548_v29, %v13916_v16  ;;  %v3584_v63 = vsel %vm3577_vm12, %v3547_v51, %v13917_v23  ;;  %6869 = vmatprep.mubr.msk.f32.mxu0 %vm4065_vm0, %v4017_v19  ;;  %v13921_v8 = vld [vmem:[#allocation446_spill] sm:$0xff]  ;;  %v13922_v37 = vld [vmem:[#allocation345_spill] sm:$0xff]  ;;  %v3917_v17 = vpop.permute.xlu0 %3916  ;;  %v13928_v29 = vld [vmem:[#allocation275_spill] sm:$0xff] }
 0x54c   : > { %v3476_v45 = vsel %vm3466_vm9, %v3439_v50, %v13918_v49  ;;  %v3475_v48 = vsel %vm3466_vm9, %v3438_v57, %v13919_v35  ;;  %v3622_v32 = vsel %vm3614_vm13, %v3585_v53, %v13920_v0  ;;  %v3621_v33 = vsel %vm3614_vm13, %v3584_v63, %v13921_v8  ;;  %v13923_v55 = vld [vmem:[#allocation346_spill] sm:$0xff]  ;;  %v13925_v13 = vld [vmem:[#allocation477_spill] sm:$0xff]  ;;  %v3919_v11 = vpop.permute.xlu1 %3918  ;;  %v13929_v51 = vld [vmem:[#allocation276_spill] sm:$0xff] }
 0x54d   : > { %6870 = vmatmul.mubr.msk.f32.gmra.mxu0 %vm4065_vm0, %v4018_v18  ;;  %v3513_v38 = vsel %vm3503_vm10, %v3476_v45, %v13922_v37  ;;  %v3512_v24 = vsel %vm3503_vm10, %v3475_v48, %v13923_v55  ;;  %v3659_v5 = vsel %vm3651_vm14, %v3622_v32, %v13924_v30  ;;  %v3658_v28 = vsel %vm3651_vm14, %v3621_v33, %v13925_v13  ;;  %v13926_v7 = vld [vmem:[#allocation381_spill] sm:$0xff]  ;;  %v13927_v60 = vld [vmem:[#allocation382_spill] sm:$0xff]  ;;  %v13932_v57 = vld [vmem:[#allocation311_spill] sm:$0xff] }
 0x54e   : > { %v3550_v34 = vsel %vm3540_vm11, %v3513_v38, %v13926_v7  ;;  %v3549_v46 = vsel %vm3540_vm11, %v3512_v24, %v13927_v60  ;;  %v4020_v4 = vsel %vm4012_vm15, %v3659_v5, %v3919_v11  ;;  %v4019_v56 = vsel %vm4012_vm15, %v3658_v28, %v3917_v17  ;;  %v13930_v19 = vld [vmem:[#allocation417_spill] sm:$0xff]  ;;  %v13931_v50 = vld [vmem:[#allocation418_spill] sm:$0xff]  ;;  %v13933_v53 = vld [vmem:[#allocation312_spill] sm:$0xff] }
 0x54f   : > { %v3441_v6 = vsel %vm3429_vm8, %v10638_v61, %v13928_v29  ;;  %v3440_v18 = vsel %vm3429_vm8, %v10642_v62, %v13929_v51  ;;  %v3587_v14 = vsel %vm3577_vm12, %v3550_v34, %v13930_v19  ;;  %v3586_v10 = vsel %vm3577_vm12, %v3549_v46, %v13931_v50  ;;  %6872 = vmatprep.mubr.msk.f32.mxu0 %vm4065_vm0, %v4019_v56  ;;  %v13934_v63 = vld [vmem:[#allocation447_spill] sm:$0xff]  ;;  %v13935_v49 = vld [vmem:[#allocation448_spill] sm:$0xff]  ;;  %v13938_v32 = vld [vmem:[#allocation478_spill] sm:$0xff]  ;;  %v3921_v55 = vpop.permute.xlu0 %3920 }
 0x550   : > { %v3478_v16 = vsel %vm3466_vm9, %v3441_v6, %v13932_v57  ;;  %v3477_v23 = vsel %vm3466_vm9, %v3440_v18, %v13933_v53  ;;  %v3624_v61 = vsel %vm3614_vm13, %v3587_v14, %v13934_v63  ;;  %v3623_v62 = vsel %vm3614_vm13, %v3586_v10, %v13935_v49  ;;  %v13936_v45 = vld [vmem:[#allocation347_spill] sm:$0xff]  ;;  %v13937_v48 = vld [vmem:[#allocation348_spill] sm:$0xff]  ;;  %v3923_v38 = vpop.permute.xlu1 %3922  ;;  %v13942_v17 = vld [vmem:[#allocation277_spill] sm:$0xff] }
 0x551   : > { %6873 = vmatmul.mubr.msk.f32.gmra.mxu0 %vm4065_vm0, %v4020_v4  ;;  %v3515_v35 = vsel %vm3503_vm10, %v3478_v16, %v13936_v45  ;;  %v3514_v0 = vsel %vm3503_vm10, %v3477_v23, %v13937_v48  ;;  %v3661_v8 = vsel %vm3651_vm14, %v3624_v61, %v13938_v32  ;;  %v13939_v33 = vld [vmem:[#allocation479_spill] sm:$0xff]  ;;  %v13941_v5 = vld [vmem:[#allocation384_spill] sm:$0xff]  ;;  %v3443_v7 = vsel %vm3429_vm8, %v10646_v25, %v13942_v17  ;;  %v13943_v34 = vld [vmem:[#allocation278_spill] sm:$0xff] }
 0x552   : > { %v3660_v37 = vsel %vm3651_vm14, %v3623_v62, %v13939_v33  ;;  %v13940_v24 = vld [vmem:[#allocation383_spill] sm:$0xff]  ;;  %v3551_v13 = vsel %vm3540_vm11, %v3514_v0, %v13941_v5  ;;  %v4022_v28 = vsel %vm4012_vm15, %v3661_v8, %v3923_v38  ;;  %v3442_v60 = vsel %vm3429_vm8, %v10650_v27, %v13943_v34  ;;  %v13945_v56 = vld [vmem:[#allocation420_spill] sm:$0xff]  ;;  %v13946_v6 = vld [vmem:[#allocation313_spill] sm:$0xff] }
 0x553   : > { %v3552_v30 = vsel %vm3540_vm11, %v3515_v35, %v13940_v24  ;;  %v4021_v11 = vsel %vm4012_vm15, %v3660_v37, %v3921_v55  ;;  %v13944_v46 = vld [vmem:[#allocation419_spill] sm:$0xff]  ;;  %v3588_v29 = vsel %vm3577_vm12, %v3551_v13, %v13945_v56  ;;  %v3480_v51 = vsel %vm3466_vm9, %v3443_v7, %v13946_v6  ;;  %v13947_v18 = vld [vmem:[#allocation314_spill] sm:$0xff]  ;;  %v13948_v14 = vld [vmem:[#allocation449_spill] sm:$0xff]  ;;  %v3925_v45 = vpop.permute.xlu0 %3924 }
 0x554   : > { %v3589_v4 = vsel %vm3577_vm12, %v3552_v30, %v13944_v46  ;;  %6875 = vmatprep.mubr.msk.f32.mxu0 %vm4065_vm0, %v4021_v11  ;;  %v3479_v19 = vsel %vm3466_vm9, %v3442_v60, %v13947_v18  ;;  %v13949_v50 = vld [vmem:[#allocation450_spill] sm:$0xff]  ;;  %v13950_v10 = vld [vmem:[#allocation349_spill] sm:$0xff]  ;;  %v13952_v23 = vld [vmem:[#allocation480_spill] sm:$0xff]  ;;  %v3927_v62 = vpop.permute.xlu1 %3926 }
 0x555   : > { %v3626_v25 = vsel %vm3614_vm13, %v3589_v4, %v13948_v14  ;;  %v3625_v27 = vsel %vm3614_vm13, %v3588_v29, %v13949_v50  ;;  %6876 = vmatmul.mubr.msk.f32.gmra.mxu0 %vm4065_vm0, %v4022_v28  ;;  %v3517_v57 = vsel %vm3503_vm10, %v3480_v51, %v13950_v10  ;;  %v13951_v16 = vld [vmem:[#allocation350_spill] sm:$0xff]  ;;  %v13953_v61 = vld [vmem:[#allocation481_spill] sm:$0xff]  ;;  %v13956_v37 = vld [vmem:[#allocation279_spill] sm:$0xff] }
 0x556   : > { %v3516_v53 = vsel %vm3503_vm10, %v3479_v19, %v13951_v16  ;;  %v3663_v63 = vsel %vm3651_vm14, %v3626_v25, %v13952_v23  ;;  %v3662_v49 = vsel %vm3651_vm14, %v3625_v27, %v13953_v61  ;;  %v13954_v35 = vld [vmem:[#allocation385_spill] sm:$0xff]  ;;  %v13955_v0 = vld [vmem:[#allocation386_spill] sm:$0xff]  ;;  %v3445_v38 = vsel %vm3429_vm8, %v10654_v1, %v13956_v37  ;;  %v13957_v55 = vld [vmem:[#allocation280_spill] sm:$0xff] }
 0x557   : > { %v3554_v48 = vsel %vm3540_vm11, %v3517_v57, %v13954_v35  ;;  %v3553_v32 = vsel %vm3540_vm11, %v3516_v53, %v13955_v0  ;;  %v4024_v8 = vsel %vm4012_vm15, %v3663_v63, %v3927_v62  ;;  %v4023_v33 = vsel %vm4012_vm15, %v3662_v49, %v3925_v45  ;;  %v13958_v30 = vld [vmem:[#allocation421_spill] sm:$0xff]  ;;  %v13959_v13 = vld [vmem:[#allocation422_spill] sm:$0xff]  ;;  %v13960_v11 = vld [vmem:[#allocation315_spill] sm:$0xff]  ;;  %v3929_v50 = vpop.permute.xlu0 %3928 }
 0x558   : > { %v3444_v24 = vsel %vm3429_vm8, %v10658_v59, %v13957_v55  ;;  %v3591_v5 = vsel %vm3577_vm12, %v3554_v48, %v13958_v30  ;;  %v3590_v28 = vsel %vm3577_vm12, %v3553_v32, %v13959_v13  ;;  %6878 = vmatprep.mubr.msk.f32.mxu0 %vm4065_vm0, %v4023_v33  ;;  %v3482_v17 = vsel %vm3466_vm9, %v3445_v38, %v13960_v11  ;;  %v13961_v7 = vld [vmem:[#allocation316_spill] sm:$0xff]  ;;  %v13962_v60 = vld [vmem:[#allocation451_spill] sm:$0xff]  ;;  %v13966_v51 = vld [vmem:[#allocation482_spill] sm:$0xff]  ;;  %v3931_v25 = vpop.permute.xlu1 %3930 }
 0x559   : > { %v3481_v34 = vsel %vm3466_vm9, %v3444_v24, %v13961_v7  ;;  %v3628_v1 = vsel %vm3614_vm13, %v3591_v5, %v13962_v60  ;;  %v13963_v46 = vld [vmem:[#allocation452_spill] sm:$0xff]  ;;  %6879 = vmatmul.mubr.msk.f32.gmra.mxu0 %vm4065_vm0, %v4024_v8  ;;  %v13964_v4 = vld [vmem:[#allocation351_spill] sm:$0xff]  ;;  %v13970_v63 = vld [vmem:[#allocation281_spill] sm:$0xff] }
 0x55a   : > { %v3627_v59 = vsel %vm3614_vm13, %v3590_v28, %v13963_v46  ;;  %v3519_v56 = vsel %vm3503_vm10, %v3482_v17, %v13964_v4  ;;  %v13965_v29 = vld [vmem:[#allocation352_spill] sm:$0xff]  ;;  %v3665_v18 = vsel %vm3651_vm14, %v3628_v1, %v13966_v51  ;;  %v13967_v19 = vld [vmem:[#allocation483_spill] sm:$0xff]  ;;  %v3447_v61 = vsel %vm3429_vm8, %v10662_v36, %v13970_v63  ;;  %v13971_v49 = vld [vmem:[#allocation282_spill] sm:$0xff] }
 0x55b   : > { %v3518_v6 = vsel %vm3503_vm10, %v3481_v34, %v13965_v29  ;;  %v3664_v14 = vsel %vm3651_vm14, %v3627_v59, %v13967_v19  ;;  %v13968_v27 = vld [vmem:[#allocation387_spill] sm:$0xff]  ;;  %v13969_v57 = vld [vmem:[#allocation388_spill] sm:$0xff]  ;;  %v4026_v53 = vsel %vm4012_vm15, %v3665_v18, %v3931_v25  ;;  %v3446_v62 = vsel %vm3429_vm8, %v10666_v26, %v13971_v49  ;;  %v13974_v32 = vld [vmem:[#allocation317_spill] sm:$0xff]  ;;  %v3933_v60 = vpop.permute.xlu0 %3932 }
 0x55c   : > { %v3556_v10 = vsel %vm3540_vm11, %v3519_v56, %v13968_v27  ;;  %v3555_v16 = vsel %vm3540_vm11, %v3518_v6, %v13969_v57  ;;  %v4025_v23 = vsel %vm4012_vm15, %v3664_v14, %v3929_v50  ;;  %v13972_v45 = vld [vmem:[#allocation423_spill] sm:$0xff]  ;;  %v13973_v48 = vld [vmem:[#allocation424_spill] sm:$0xff]  ;;  %v3484_v8 = vsel %vm3466_vm9, %v3447_v61, %v13974_v32  ;;  %v13975_v33 = vld [vmem:[#allocation318_spill] sm:$0xff]  ;;  %v3935_v34 = vpop.permute.xlu1 %3934 }
 0x55d   : > { %v3593_v35 = vsel %vm3577_vm12, %v3556_v10, %v13972_v45  ;;  %v3592_v0 = vsel %vm3577_vm12, %v3555_v16, %v13973_v48  ;;  %6881 = vmatprep.mubr.msk.f32.mxu0 %vm4065_vm0, %v4025_v23  ;;  %v3483_v37 = vsel %vm3466_vm9, %v3446_v62, %v13975_v33  ;;  %v13976_v38 = vld [vmem:[#allocation453_spill] sm:$0xff]  ;;  %v13977_v55 = vld [vmem:[#allocation454_spill] sm:$0xff]  ;;  %v13980_v28 = vld [vmem:[#allocation484_spill] sm:$0xff] }
 0x55e   : > { %v3630_v36 = vsel %vm3614_vm13, %v3593_v35, %v13976_v38  ;;  %v3629_v26 = vsel %vm3614_vm13, %v3592_v0, %v13977_v55  ;;  %6882 = vmatmul.mubr.msk.f32.gmra.mxu0 %vm4065_vm0, %v4026_v53  ;;  %v13978_v24 = vld [vmem:[#allocation353_spill] sm:$0xff]  ;;  %v13979_v5 = vld [vmem:[#allocation354_spill] sm:$0xff]  ;;  %v13984_v6 = vld [vmem:[#allocation283_spill] sm:$0xff] }
 0x55f   : > { %v3521_v30 = vsel %vm3503_vm10, %v3484_v8, %v13978_v24  ;;  %v3520_v13 = vsel %vm3503_vm10, %v3483_v37, %v13979_v5  ;;  %v3667_v11 = vsel %vm3651_vm14, %v3630_v36, %v13980_v28  ;;  %v13981_v17 = vld [vmem:[#allocation485_spill] sm:$0xff]  ;;  %v13983_v59 = vld [vmem:[#allocation390_spill] sm:$0xff]  ;;  %v3449_v51 = vsel %vm3429_vm8, %v10670_v39, %v13984_v6  ;;  %v13985_v18 = vld [vmem:[#allocation284_spill] sm:$0xff]  ;;  %v3937_v33 = vpop.permute.xlu0 %3936 }
 0x560   : > { %v3666_v7 = vsel %vm3651_vm14, %v3629_v26, %v13981_v17  ;;  %v13982_v1 = vld [vmem:[#allocation389_spill] sm:$0xff]  ;;  %v3557_v4 = vsel %vm3540_vm11, %v3520_v13, %v13983_v59  ;;  %v4028_v56 = vsel %vm4012_vm15, %v3667_v11, %v3935_v34  ;;  %v3448_v19 = vsel %vm3429_vm8, %v10674_v42, %v13985_v18  ;;  %v13987_v50 = vld [vmem:[#allocation426_spill] sm:$0xff]  ;;  %v13988_v10 = vld [vmem:[#allocation319_spill] sm:$0xff]  ;;  %v3939_v8 = vpop.permute.xlu1 %3938 }
 0x561   : > { %v3558_v46 = vsel %vm3540_vm11, %v3521_v30, %v13982_v1  ;;  %v4027_v29 = vsel %vm4012_vm15, %v3666_v7, %v3933_v60  ;;  %v13986_v14 = vld [vmem:[#allocation425_spill] sm:$0xff]  ;;  %v3594_v27 = vsel %vm3577_vm12, %v3557_v4, %v13987_v50  ;;  %v3486_v57 = vsel %vm3466_vm9, %v3449_v51, %v13988_v10  ;;  %v13989_v16 = vld [vmem:[#allocation320_spill] sm:$0xff]  ;;  %v13990_v23 = vld [vmem:[#allocation455_spill] sm:$0xff] }
 0x562   : > { %v3595_v25 = vsel %vm3577_vm12, %v3558_v46, %v13986_v14  ;;  %6884 = vmatprep.mubr.msk.f32.mxu0 %vm4065_vm0, %v4027_v29  ;;  %v3485_v53 = vsel %vm3466_vm9, %v3448_v19, %v13989_v16  ;;  %v13991_v63 = vld [vmem:[#allocation456_spill] sm:$0xff]  ;;  %v13992_v61 = vld [vmem:[#allocation355_spill] sm:$0xff]  ;;  %v13994_v35 = vld [vmem:[#allocation486_spill] sm:$0xff] }
 0x563   : > { %v3632_v39 = vsel %vm3614_vm13, %v3595_v25, %v13990_v23  ;;  %v3631_v42 = vsel %vm3614_vm13, %v3594_v27, %v13991_v63  ;;  %6885 = vmatmul.mubr.msk.f32.gmra.mxu0 %vm4065_vm0, %v4028_v56  ;;  %v3523_v49 = vsel %vm3503_vm10, %v3486_v57, %v13992_v61  ;;  %v13993_v62 = vld [vmem:[#allocation356_spill] sm:$0xff]  ;;  %v13995_v0 = vld [vmem:[#allocation487_spill] sm:$0xff]  ;;  %v13998_v30 = vld [vmem:[#allocation285_spill] sm:$0xff]  ;;  %v3941_v10 = vpop.permute.xlu0 %3940 }
 0x564   : > { %v3522_v45 = vsel %vm3503_vm10, %v3485_v53, %v13993_v62  ;;  %v3669_v48 = vsel %vm3651_vm14, %v3632_v39, %v13994_v35  ;;  %v3668_v32 = vsel %vm3651_vm14, %v3631_v42, %v13995_v0  ;;  %v13996_v37 = vld [vmem:[#allocation391_spill] sm:$0xff]  ;;  %v13997_v36 = vld [vmem:[#allocation392_spill] sm:$0xff]  ;;  %v3451_v5 = vsel %vm3429_vm8, %v10678_v40, %v13998_v30  ;;  %v13999_v13 = vld [vmem:[#allocation286_spill] sm:$0xff]  ;;  %v3943_v27 = vpop.permute.xlu1 %3942 }
 0x565   : > { %v3560_v38 = vsel %vm3540_vm11, %v3523_v49, %v13996_v37  ;;  %v3559_v55 = vsel %vm3540_vm11, %v3522_v45, %v13997_v36  ;;  %v4030_v26 = vsel %vm4012_vm15, %v3669_v48, %v3939_v8  ;;  %v4029_v24 = vsel %vm4012_vm15, %v3668_v32, %v3937_v33  ;;  %v14000_v11 = vld [vmem:[#allocation427_spill] sm:$0xff]  ;;  %v14001_v7 = vld [vmem:[#allocation428_spill] sm:$0xff]  ;;  %v14002_v60 = vld [vmem:[#allocation321_spill] sm:$0xff] }
 0x566   : > { %v3450_v28 = vsel %vm3429_vm8, %v10682_v3, %v13999_v13  ;;  %v3597_v17 = vsel %vm3577_vm12, %v3560_v38, %v14000_v11  ;;  %v3596_v34 = vsel %vm3577_vm12, %v3559_v55, %v14001_v7  ;;  %6887 = vmatprep.mubr.msk.f32.mxu0 %vm4065_vm0, %v4029_v24  ;;  %v3488_v1 = vsel %vm3466_vm9, %v3451_v5, %v14002_v60  ;;  %v14003_v46 = vld [vmem:[#allocation322_spill] sm:$0xff]  ;;  %v14004_v4 = vld [vmem:[#allocation457_spill] sm:$0xff]  ;;  %v14008_v19 = vld [vmem:[#allocation488_spill] sm:$0xff] }
 0x567   : > { %v3487_v59 = vsel %vm3466_vm9, %v3450_v28, %v14003_v46  ;;  %v3634_v40 = vsel %vm3614_vm13, %v3597_v17, %v14004_v4  ;;  %v14005_v56 = vld [vmem:[#allocation458_spill] sm:$0xff]  ;;  %6888 = vmatmul.mubr.msk.f32.gmra.mxu0 %vm4065_vm0, %v4030_v26  ;;  %v14006_v29 = vld [vmem:[#allocation357_spill] sm:$0xff]  ;;  %v14012_v42 = vld [vmem:[#allocation287_spill] sm:$0xff]  ;;  %v3945_v7 = vpop.permute.xlu0 %3944 }
 0x568   : > { %v3633_v3 = vsel %vm3614_vm13, %v3596_v34, %v14005_v56  ;;  %v3525_v6 = vsel %vm3503_vm10, %v3488_v1, %v14006_v29  ;;  %v14007_v51 = vld [vmem:[#allocation358_spill] sm:$0xff]  ;;  %v3671_v14 = vsel %vm3651_vm14, %v3634_v40, %v14008_v19  ;;  %v14009_v25 = vld [vmem:[#allocation489_spill] sm:$0xff]  ;;  %v3453_v61 = vsel %vm3429_vm8, %v10686_v22, %v14012_v42  ;;  %v14013_v49 = vld [vmem:[#allocation288_spill] sm:$0xff]  ;;  %v3947_v17 = vpop.permute.xlu1 %3946 }
 0x569   : > { %v3524_v18 = vsel %vm3503_vm10, %v3487_v59, %v14007_v51  ;;  %v3670_v50 = vsel %vm3651_vm14, %v3633_v3, %v14009_v25  ;;  %v14010_v57 = vld [vmem:[#allocation393_spill] sm:$0xff]  ;;  %v14011_v53 = vld [vmem:[#allocation394_spill] sm:$0xff]  ;;  %v4032_v39 = vsel %vm4012_vm15, %v3671_v14, %v3943_v27  ;;  %v3452_v62 = vsel %vm3429_vm8, %v10690_v31, %v14013_v49  ;;  %v14016_v32 = vld [vmem:[#allocation323_spill] sm:$0xff] }
 0x56a   : > { %v3562_v16 = vsel %vm3540_vm11, %v3525_v6, %v14010_v57  ;;  %v3561_v23 = vsel %vm3540_vm11, %v3524_v18, %v14011_v53  ;;  %v4031_v63 = vsel %vm4012_vm15, %v3670_v50, %v3941_v10  ;;  %v14014_v45 = vld [vmem:[#allocation429_spill] sm:$0xff]  ;;  %v14015_v48 = vld [vmem:[#allocation430_spill] sm:$0xff]  ;;  %v3490_v8 = vsel %vm3466_vm9, %v3453_v61, %v14016_v32  ;;  %v14017_v33 = vld [vmem:[#allocation324_spill] sm:$0xff] }
 0x56b   : > { %v3599_v35 = vsel %vm3577_vm12, %v3562_v16, %v14014_v45  ;;  %v3598_v0 = vsel %vm3577_vm12, %v3561_v23, %v14015_v48  ;;  %6890 = vmatprep.mubr.msk.f32.mxu0 %vm4065_vm0, %v4031_v63  ;;  %v3489_v37 = vsel %vm3466_vm9, %v3452_v62, %v14017_v33  ;;  %v14018_v38 = vld [vmem:[#allocation459_spill] sm:$0xff]  ;;  %v14019_v36 = vld [vmem:[#allocation460_spill] sm:$0xff]  ;;  %v14022_v5 = vld [vmem:[#allocation490_spill] sm:$0xff]  ;;  %v3949_v45 = vpop.permute.xlu0 %3948 }
 0x56c   : > { %v3636_v22 = vsel %vm3614_vm13, %v3599_v35, %v14018_v38  ;;  %v3635_v31 = vsel %vm3614_vm13, %v3598_v0, %v14019_v36  ;;  %6891 = vmatmul.mubr.msk.f32.gmra.mxu0 %vm4065_vm0, %v4032_v39  ;;  %v14020_v55 = vld [vmem:[#allocation359_spill] sm:$0xff]  ;;  %v14021_v24 = vld [vmem:[#allocation360_spill] sm:$0xff]  ;;  %v14026_v40 = vld [vmem:[#allocation289_spill] sm:$0xff]  ;;  %v3951_v62 = vpop.permute.xlu1 %3950 }
 0x56d   : > { %v3527_v26 = vsel %vm3503_vm10, %v3490_v8, %v14020_v55  ;;  %v3526_v30 = vsel %vm3503_vm10, %v3489_v37, %v14021_v24  ;;  %v3673_v13 = vsel %vm3651_vm14, %v3636_v22, %v14022_v5  ;;  %v14023_v28 = vld [vmem:[#allocation491_spill] sm:$0xff]  ;;  %v14025_v1 = vld [vmem:[#allocation396_spill] sm:$0xff]  ;;  %v3455_v56 = vsel %vm3429_vm8, %v10694_v44, %v14026_v40  ;;  %v14027_v3 = vld [vmem:[#allocation290_spill] sm:$0xff] }
 0x56e   : > { %v3672_v11 = vsel %vm3651_vm14, %v3635_v31, %v14023_v28  ;;  %v14024_v34 = vld [vmem:[#allocation395_spill] sm:$0xff]  ;;  %v3563_v46 = vsel %vm3540_vm11, %v3526_v30, %v14025_v1  ;;  %v4034_v59 = vsel %vm4012_vm15, %v3673_v13, %v3947_v17  ;;  %v3454_v29 = vsel %vm3429_vm8, %v10698_v9, %v14027_v3  ;;  %v14029_v18 = vld [vmem:[#allocation432_spill] sm:$0xff]  ;;  %v14030_v14 = vld [vmem:[#allocation325_spill] sm:$0xff] }
 0x56f   : > { %v3564_v60 = vsel %vm3540_vm11, %v3527_v26, %v14024_v34  ;;  %v4033_v4 = vsel %vm4012_vm15, %v3672_v11, %v3945_v7  ;;  %v14028_v6 = vld [vmem:[#allocation431_spill] sm:$0xff]  ;;  %v3600_v19 = vsel %vm3577_vm12, %v3563_v46, %v14029_v18  ;;  %v3492_v25 = vsel %vm3466_vm9, %v3455_v56, %v14030_v14  ;;  %v14031_v50 = vld [vmem:[#allocation326_spill] sm:$0xff]  ;;  %v14032_v10 = vld [vmem:[#allocation461_spill] sm:$0xff]  ;;  %v3953_v3 = vpop.permute.xlu0 %3952 }
 0x570   : > { %v3601_v51 = vsel %vm3577_vm12, %v3564_v60, %v14028_v6  ;;  %6893 = vmatprep.mubr.msk.f32.mxu0 %vm4065_vm0, %v4033_v4  ;;  %v3491_v27 = vsel %vm3466_vm9, %v3454_v29, %v14031_v50  ;;  %v14033_v57 = vld [vmem:[#allocation462_spill] sm:$0xff]  ;;  %v14034_v16 = vld [vmem:[#allocation361_spill] sm:$0xff]  ;;  %v14036_v63 = vld [vmem:[#allocation492_spill] sm:$0xff]  ;;  %v3955_v56 = vpop.permute.xlu1 %3954 }
 0x571   : > { %v3638_v44 = vsel %vm3614_vm13, %v3601_v51, %v14032_v10  ;;  %v3637_v9 = vsel %vm3614_vm13, %v3600_v19, %v14033_v57  ;;  %6894 = vmatmul.mubr.msk.f32.gmra.mxu0 %vm4065_vm0, %v4034_v59  ;;  %v3529_v53 = vsel %vm3503_vm10, %v3492_v25, %v14034_v16  ;;  %v14035_v23 = vld [vmem:[#allocation362_spill] sm:$0xff]  ;;  %v14037_v61 = vld [vmem:[#allocation493_spill] sm:$0xff]  ;;  %v14040_v37 = vld [vmem:[#allocation291_spill] sm:$0xff] }
 0x572   : > { %v3528_v39 = vsel %vm3503_vm10, %v3491_v27, %v14035_v23  ;;  %v3675_v42 = vsel %vm3651_vm14, %v3638_v44, %v14036_v63  ;;  %v3674_v49 = vsel %vm3651_vm14, %v3637_v9, %v14037_v61  ;;  %v14038_v35 = vld [vmem:[#allocation397_spill] sm:$0xff]  ;;  %v14039_v0 = vld [vmem:[#allocation398_spill] sm:$0xff]  ;;  %v3457_v38 = vsel %vm3429_vm8, %v10702_v52, %v14040_v37  ;;  %v14041_v22 = vld [vmem:[#allocation292_spill] sm:$0xff] }
 0x573   : > { %v3566_v48 = vsel %vm3540_vm11, %v3529_v53, %v14038_v35  ;;  %v3565_v32 = vsel %vm3540_vm11, %v3528_v39, %v14039_v0  ;;  %v4036_v8 = vsel %vm4012_vm15, %v3675_v42, %v3951_v62  ;;  %v4035_v33 = vsel %vm4012_vm15, %v3674_v49, %v3949_v45  ;;  %v14042_v31 = vld [vmem:[#allocation433_spill] sm:$0xff]  ;;  %v14043_v26 = vld [vmem:[#allocation434_spill] sm:$0xff]  ;;  %v14044_v30 = vld [vmem:[#allocation327_spill] sm:$0xff]  ;;  %v3957_v37 = vpop.permute.xlu0 %3956 }
 0x574   : > { %v3456_v36 = vsel %vm3429_vm8, %v10706_v41, %v14041_v22  ;;  %v3603_v55 = vsel %vm3577_vm12, %v3566_v48, %v14042_v31  ;;  %v3602_v24 = vsel %vm3577_vm12, %v3565_v32, %v14043_v26  ;;  %6896 = vmatprep.mubr.msk.f32.mxu0 %vm4065_vm0, %v4035_v33  ;;  %v3494_v5 = vsel %vm3466_vm9, %v3457_v38, %v14044_v30  ;;  %v14045_v13 = vld [vmem:[#allocation328_spill] sm:$0xff]  ;;  %v14046_v11 = vld [vmem:[#allocation463_spill] sm:$0xff]  ;;  %v14050_v46 = vld [vmem:[#allocation494_spill] sm:$0xff]  ;;  %v3959_v33 = vpop.permute.xlu1 %3958 }
 0x575   : > { %v3493_v28 = vsel %vm3466_vm9, %v3456_v36, %v14045_v13  ;;  %v3640_v52 = vsel %vm3614_vm13, %v3603_v55, %v14046_v11  ;;  %v14047_v17 = vld [vmem:[#allocation464_spill] sm:$0xff]  ;;  %6897 = vmatmul.mubr.msk.f32.gmra.mxu0 %vm4065_vm0, %v4036_v8  ;;  %v14048_v7 = vld [vmem:[#allocation363_spill] sm:$0xff]  ;;  %v14054_v25 = vld [vmem:[#allocation293_spill] sm:$0xff] }
 0x576   : > { %v3639_v41 = vsel %vm3614_vm13, %v3602_v24, %v14047_v17  ;;  %v3531_v34 = vsel %vm3503_vm10, %v3494_v5, %v14048_v7  ;;  %v14049_v60 = vld [vmem:[#allocation364_spill] sm:$0xff]  ;;  %v3677_v59 = vsel %vm3651_vm14, %v3640_v52, %v14050_v46  ;;  %v14051_v4 = vld [vmem:[#allocation495_spill] sm:$0xff]  ;;  %v3459_v50 = vsel %vm3429_vm8, %v10710_v54, %v14054_v25  ;;  %v14055_v27 = vld [vmem:[#allocation294_spill] sm:$0xff] }
 0x577   : > { %v3530_v1 = vsel %vm3503_vm10, %v3493_v28, %v14049_v60  ;;  %v3676_v40 = vsel %vm3651_vm14, %v3639_v41, %v14051_v4  ;;  %v14052_v29 = vld [vmem:[#allocation399_spill] sm:$0xff]  ;;  %v14053_v51 = vld [vmem:[#allocation400_spill] sm:$0xff]  ;;  %v4038_v19 = vsel %vm4012_vm15, %v3677_v59, %v3955_v56  ;;  %v3458_v10 = vsel %vm3429_vm8, %v10714_v15, %v14055_v27  ;;  %v14058_v53 = vld [vmem:[#allocation329_spill] sm:$0xff] }
 0x578   : > { %v3568_v6 = vsel %vm3540_vm11, %v3531_v34, %v14052_v29  ;;  %v3567_v18 = vsel %vm3540_vm11, %v3530_v1, %v14053_v51  ;;  %v4037_v14 = vsel %vm4012_vm15, %v3676_v40, %v3953_v3  ;;  %v14056_v44 = vld [vmem:[#allocation435_spill] sm:$0xff]  ;;  %v14057_v9 = vld [vmem:[#allocation436_spill] sm:$0xff]  ;;  %v3496_v23 = vsel %vm3466_vm9, %v3459_v50, %v14058_v53  ;;  %v14059_v39 = vld [vmem:[#allocation330_spill] sm:$0xff] }
 0x579   : > { %v3605_v57 = vsel %vm3577_vm12, %v3568_v6, %v14056_v44  ;;  %v3604_v16 = vsel %vm3577_vm12, %v3567_v18, %v14057_v9  ;;  %6899 = vmatprep.mubr.msk.f32.mxu0 %vm4065_vm0, %v4037_v14  ;;  %v3495_v63 = vsel %vm3466_vm9, %v3458_v10, %v14059_v39  ;;  %v14060_v42 = vld [vmem:[#allocation465_spill] sm:$0xff]  ;;  %v14061_v61 = vld [vmem:[#allocation466_spill] sm:$0xff]  ;;  %v14064_v48 = vld [vmem:[#allocation496_spill] sm:$0xff]  ;;  %v3963_v18 = vpop.permute.xlu1 %3962 }
 0x57a   : > { %v3642_v54 = vsel %vm3614_vm13, %v3605_v57, %v14060_v42  ;;  %v3641_v15 = vsel %vm3614_vm13, %v3604_v16, %v14061_v61  ;;  %6900 = vmatmul.mubr.msk.f32.gmra.mxu0 %vm4065_vm0, %v4038_v19  ;;  %v14062_v49 = vld [vmem:[#allocation365_spill] sm:$0xff]  ;;  %v14063_v45 = vld [vmem:[#allocation366_spill] sm:$0xff]  ;;  %v14068_v24 = vld [vmem:[#allocation295_spill] sm:$0xff]  ;;  %v3961_v19 = vpop.permute.xlu0 %3960 }
 0x57b   : > { %v3533_v62 = vsel %vm3503_vm10, %v3496_v23, %v14062_v49  ;;  %v3532_v35 = vsel %vm3503_vm10, %v3495_v63, %v14063_v45  ;;  %v3679_v0 = vsel %vm3651_vm14, %v3642_v54, %v14064_v48  ;;  %v14065_v32 = vld [vmem:[#allocation497_spill] sm:$0xff]  ;;  %v14067_v36 = vld [vmem:[#allocation402_spill] sm:$0xff]  ;;  %v3461_v30 = vsel %vm3429_vm8, %v10718_v43, %v14068_v24  ;;  %v14069_v5 = vld [vmem:[#allocation296_spill] sm:$0xff] }
 0x57c   : > { %v3678_v8 = vsel %vm3651_vm14, %v3641_v15, %v14065_v32  ;;  %v14066_v38 = vld [vmem:[#allocation401_spill] sm:$0xff]  ;;  %v3569_v31 = vsel %vm3540_vm11, %v3532_v35, %v14067_v36  ;;  %v4040_v55 = vsel %vm4012_vm15, %v3679_v0, %v3959_v33  ;;  %v3460_v13 = vsel %vm3429_vm8, %v10722_v21, %v14069_v5  ;;  %v14071_v52 = vld [vmem:[#allocation438_spill] sm:$0xff]  ;;  %v14072_v41 = vld [vmem:[#allocation331_spill] sm:$0xff] }
 0x57d   : > { %v3570_v22 = vsel %vm3540_vm11, %v3533_v62, %v14066_v38  ;;  %v4039_v26 = vsel %vm4012_vm15, %v3678_v8, %v3957_v37  ;;  %v14070_v28 = vld [vmem:[#allocation437_spill] sm:$0xff]  ;;  %v3606_v17 = vsel %vm3577_vm12, %v3569_v31, %v14071_v52  ;;  %v3498_v7 = vsel %vm3466_vm9, %v3461_v30, %v14072_v41  ;;  %v14073_v34 = vld [vmem:[#allocation332_spill] sm:$0xff]  ;;  %v14074_v1 = vld [vmem:[#allocation467_spill] sm:$0xff] }
 0x57e   : > { %v3607_v11 = vsel %vm3577_vm12, %v3570_v22, %v14070_v28  ;;  %6902 = vmatprep.mubr.msk.f32.mxu0 %vm4065_vm0, %v4039_v26  ;;  %v3497_v60 = vsel %vm3466_vm9, %v3460_v13, %v14073_v34  ;;  %v14075_v46 = vld [vmem:[#allocation468_spill] sm:$0xff]  ;;  %v14076_v59 = vld [vmem:[#allocation367_spill] sm:$0xff]  ;;  %v14078_v3 = vld [vmem:[#allocation498_spill] sm:$0xff]  ;;  %v3967_v22 = vpop.permute.xlu1 %3966  ;;  %v3965_v36 = vpop.permute.xlu0 %3964 }
 0x57f   : > { %v3644_v43 = vsel %vm3614_vm13, %v3607_v11, %v14074_v1  ;;  %v3643_v21 = vsel %vm3614_vm13, %v3606_v17, %v14075_v46  ;;  %6903 = vmatmul.mubr.msk.f32.gmra.mxu0 %vm4065_vm0, %v4040_v55  ;;  %v3535_v4 = vsel %vm3503_vm10, %v3498_v7, %v14076_v59  ;;  %v14077_v40 = vld [vmem:[#allocation368_spill] sm:$0xff]  ;;  %v14079_v6 = vld [vmem:[#allocation499_spill] sm:$0xff]  ;;  %v14082_v57 = vld [vmem:[#allocation297_spill] sm:$0xff] }
 0x580   : > { %v3534_v56 = vsel %vm3503_vm10, %v3497_v60, %v14077_v40  ;;  %v3681_v29 = vsel %vm3651_vm14, %v3644_v43, %v14078_v3  ;;  %v3680_v51 = vsel %vm3651_vm14, %v3643_v21, %v14079_v6  ;;  %v14080_v14 = vld [vmem:[#allocation403_spill] sm:$0xff]  ;;  %v14081_v50 = vld [vmem:[#allocation404_spill] sm:$0xff]  ;;  %v3463_v9 = vsel %vm3429_vm8, %v10726_v58, %v14082_v57  ;;  %v14083_v16 = vld [vmem:[#allocation298_spill] sm:$0xff] }
 0x581   : > { %v3572_v25 = vsel %vm3540_vm11, %v3535_v4, %v14080_v14  ;;  %v3571_v27 = vsel %vm3540_vm11, %v3534_v56, %v14081_v50  ;;  %v4042_v10 = vsel %vm4012_vm15, %v3681_v29, %v3963_v18  ;;  %v4041_v44 = vsel %vm4012_vm15, %v3680_v51, %v3961_v19  ;;  %v14084_v23 = vld [vmem:[#allocation439_spill] sm:$0xff]  ;;  %v14085_v63 = vld [vmem:[#allocation440_spill] sm:$0xff]  ;;  %v14086_v54 = vld [vmem:[#allocation333_spill] sm:$0xff] }
 0x582   : > { %v3462_v53 = vsel %vm3429_vm8, %v10730_v2, %v14083_v16  ;;  %v3609_v39 = vsel %vm3577_vm12, %v3572_v25, %v14084_v23  ;;  %v3608_v42 = vsel %vm3577_vm12, %v3571_v27, %v14085_v63  ;;  %6905 = vmatprep.mubr.msk.f32.mxu0 %vm4065_vm0, %v4041_v44  ;;  %v3500_v61 = vsel %vm3466_vm9, %v3463_v9, %v14086_v54  ;;  %v14087_v15 = vld [vmem:[#allocation334_spill] sm:$0xff]  ;;  %v14088_v62 = vld [vmem:[#allocation469_spill] sm:$0xff]  ;;  %v14092_v8 = vld [vmem:[#allocation500_spill] sm:$0xff]  ;;  %v3971_v19 = vpop.permute.xlu1 %3970  ;;  %v3969_v14 = vpop.permute.xlu0 %3968 }
 0x583   : > { %v3499_v49 = vsel %vm3466_vm9, %v3462_v53, %v14087_v15  ;;  %v3646_v58 = vsel %vm3614_vm13, %v3609_v39, %v14088_v62  ;;  %v14089_v45 = vld [vmem:[#allocation470_spill] sm:$0xff]  ;;  %6906 = vmatmul.mubr.msk.f32.gmra.mxu0 %vm4065_vm0, %v4042_v10  ;;  %v14090_v35 = vld [vmem:[#allocation369_spill] sm:$0xff]  ;;  %v14096_v13 = vld [vmem:[#allocation299_spill] sm:$0xff] }
 0x584   : > { %v3645_v2 = vsel %vm3614_vm13, %v3608_v42, %v14089_v45  ;;  %v3537_v48 = vsel %vm3503_vm10, %v3500_v61, %v14090_v35  ;;  %v14091_v0 = vld [vmem:[#allocation370_spill] sm:$0xff]  ;;  %v3683_v33 = vsel %vm3651_vm14, %v3646_v58, %v14092_v8  ;;  %v14093_v37 = vld [vmem:[#allocation501_spill] sm:$0xff]  ;;  %v3465_v28 = vsel %vm3429_vm8, %v10734_v20, %v14096_v13  ;;  %v14097_v11 = vld [vmem:[#allocation300_spill] sm:$0xff] }
 0x585   : > { %v3536_v32 = vsel %vm3503_vm10, %v3499_v49, %v14091_v0  ;;  %v3682_v38 = vsel %vm3651_vm14, %v3645_v2, %v14093_v37  ;;  %v14094_v31 = vld [vmem:[#allocation405_spill] sm:$0xff]  ;;  %v14095_v26 = vld [vmem:[#allocation406_spill] sm:$0xff]  ;;  %v4044_v30 = vsel %vm4012_vm15, %v3683_v33, %v3967_v22  ;;  %v3464_v52 = vsel %vm3429_vm8, %v10742_v47, %v14097_v11  ;;  %v14100_v60 = vld [vmem:[#allocation335_spill] sm:$0xff] }
 0x586   : > { %v3574_v55 = vsel %vm3540_vm11, %v3537_v48, %v14094_v31  ;;  %v3573_v24 = vsel %vm3540_vm11, %v3536_v32, %v14095_v26  ;;  %v4043_v5 = vsel %vm4012_vm15, %v3682_v38, %v3965_v36  ;;  %v14098_v17 = vld [vmem:[#allocation441_spill] sm:$0xff]  ;;  %v14099_v7 = vld [vmem:[#allocation442_spill] sm:$0xff]  ;;  %v3502_v1 = vsel %vm3466_vm9, %v3465_v28, %v14100_v60  ;;  %v14101_v43 = vld [vmem:[#allocation336_spill] sm:$0xff]  ;;  %v3975_v58 = vpop.permute.xlu1 %3974  ;;  %v3973_v45 = vpop.permute.xlu0 %3972 }
 0x587   : > { %v3611_v41 = vsel %vm3577_vm12, %v3574_v55, %v14098_v17  ;;  %v3610_v34 = vsel %vm3577_vm12, %v3573_v24, %v14099_v7  ;;  %6908 = vmatprep.mubr.msk.f32.mxu0 %vm4065_vm0, %v4043_v5  ;;  %v3501_v46 = vsel %vm3466_vm9, %v3464_v52, %v14101_v43  ;;  %v14102_v21 = vld [vmem:[#allocation471_spill] sm:$0xff]  ;;  %v14103_v59 = vld [vmem:[#allocation472_spill] sm:$0xff]  ;;  %v14106_v29 = vld [vmem:[#allocation502_spill] sm:$0xff]  ;;  %v272_v32 = vlaneseq }
 0x588   : > { %v3648_v20 = vsel %vm3614_vm13, %v3611_v41, %v14102_v21  ;;  %v3647_v47 = vsel %vm3614_vm13, %v3610_v34, %v14103_v59  ;;  %6909 = vmatmul.mubr.msk.f32.gmra.mxu0 %vm4065_vm0, %v4044_v30  ;;  %v14104_v4 = vld [vmem:[#allocation371_spill] sm:$0xff]  ;;  %v14105_v56 = vld [vmem:[#allocation372_spill] sm:$0xff]  ;;  %v14112_v39 = vld [vmem:[#allocation473_spill] sm:$0xff] }
 0x589   : > { %v3539_v40 = vsel %vm3503_vm10, %v3502_v1, %v14104_v4  ;;  %v3538_v3 = vsel %vm3503_vm10, %v3501_v46, %v14105_v56  ;;  %v3685_v6 = vsel %vm3651_vm14, %v3648_v20, %v14106_v29  ;;  %v14107_v51 = vld [vmem:[#allocation503_spill] sm:$0xff]  ;;  %v14109_v27 = vld [vmem:[#allocation408_spill] sm:$0xff]  ;;  %v14113_v42 = vld [vmem:[#allocation474_spill] sm:$0xff]  ;;  %v11351_v8 = vshrl.u32 %v272_v32, 7 }
 0x58a   : > { %v3684_v18 = vsel %vm3651_vm14, %v3647_v47, %v14107_v51  ;;  %v14108_v25 = vld [vmem:[#allocation407_spill] sm:$0xff]  ;;  %v3575_v10 = vsel %vm3540_vm11, %v3538_v3, %v14109_v27  ;;  %v4046_v44 = vsel %vm4012_vm15, %v3685_v6, %v3971_v19  ;;  %v14111_v53 = vld [vmem:[#allocation444_spill] sm:$0xff]  ;;  %v14115_v49 = vld [vmem:[#allocation505_spill] sm:$0xff] }
 0x58b   : > { %v3576_v50 = vsel %vm3540_vm11, %v3539_v40, %v14108_v25  ;;  %v4045_v57 = vsel %vm4012_vm15, %v3684_v18, %v3969_v14  ;;  %v14110_v9 = vld [vmem:[#allocation443_spill] sm:$0xff]  ;;  %v3612_v23 = vsel %vm3577_vm12, %v3575_v10, %v14111_v53  ;;  %v14114_v61 = vld [vmem:[#allocation504_spill] sm:$0xff]  ;;  %v274_v33 = vadd.s32 8, %v11351_v8 }
 0x58c   : > { %v3613_v16 = vsel %vm3577_vm12, %v3576_v50, %v14110_v9  ;;  %6911 = vmatprep.mubr.msk.f32.mxu0 %vm4065_vm0, %v4045_v57  ;;  %v3649_v54 = vsel %vm3614_vm13, %v3612_v23, %v14113_v42  ;;  %v4572_v48 = vld [vmem:[#allocation2 + $0x9] sm:$0xff]  ;;  %v4571_v0 = vld [vmem:[#allocation2 + $0x1] sm:$0xff]  ;;  %v276_v38 = vadd.s32 24, %v11351_v8  ;;  %v309_v36 = vcvt.s32.f32 %v11351_v8 }
 0x58d   : > { %v3650_v63 = vsel %vm3614_vm13, %v3613_v16, %v14112_v39  ;;  %6912 = vmatmul.mubr.msk.f32.gmra.mxu0 %vm4065_vm0, %v4046_v44  ;;  %v3686_v62 = vsel %vm3651_vm14, %v3649_v54, %v14115_v49  ;;  %4829 = vrot.lane.b32.xlu1 %v4572_v48, %s7025_s28  ;;  %v310_v37 = vcvt.s32.f32 %v274_v33  ;;  %v11357_v26 = vadd.s32 16, %v11351_v8 }
 0x58e   : > { %v3687_v15 = vsel %vm3651_vm14, %v3650_v63, %v14114_v61  ;;  %v4047_v35 = vsel %vm4012_vm15, %v3686_v62, %v3973_v45  ;;  %4827 = vrot.lane.b32.xlu0 %v4571_v0, %s7025_s28  ;;  %v312_v31 = vcvt.s32.f32 %v276_v38  ;;  %v11360_v24 = vadd.s32 40, %v11351_v8 }
 0x58f   : > { %v4048_v2 = vsel %vm4012_vm15, %v3687_v15, %v3975_v58  ;;  %6914 = vmatprep.mubr.msk.f32.mxu0 %vm4065_vm0, %v4047_v35  ;;  %v346_v22 = vadd.f32 0.5, %v310_v37  ;;  %v345_v30 = vadd.f32 0.5, %v309_v36  ;;  %v11363_v5 = vadd.s32 32, %v11351_v8 }
 0x590   : > { %v348_v13 = vadd.f32 0.5, %v312_v31  ;;  %v311_v11 = vcvt.s32.f32 %v11357_v26  ;;  %v314_v52 = vcvt.s32.f32 %v11360_v24  ;;  %v11369_v7 = vadd.s32 56, %v11351_v8 }
 0x591   : > { %6915 = vmatmul.mubr.msk.f32.gmra.mxu0 %vm4065_vm0, %v4048_v2  ;;  %v382_v55 = vmul.f32 0.055555556, %v346_v22  ;;  %v381_v17 = vmul.f32 0.055555556, %v345_v30  ;;  %v313_v41 = vcvt.s32.f32 %v11363_v5  ;;  %v11372_v60 = vadd.s32 48, %v11351_v8 }
 0x592   : > { %v384_v34 = vmul.f32 0.055555556, %v348_v13  ;;  %v347_v43 = vadd.f32 0.5, %v311_v11  ;;  %v350_v46 = vadd.f32 0.5, %v314_v52  ;;  %v11381_v59 = vadd.s32 72, %v11351_v8 }
 0x593   : > { %v418_v28 = vfloor.f32 %v382_v55  ;;  %v417_v21 = vfloor.f32 %v381_v17  ;;  %v349_v20 = vadd.f32 0.5, %v313_v41  ;;  %v316_v47 = vcvt.s32.f32 %v11369_v7 }
 0x594   : > { %v11385_v4 = vadd.s32 64, %v11351_v8  ;;  %v420_v40 = vfloor.f32 %v384_v34  ;;  %v315_v56 = vcvt.s32.f32 %v11372_v60  ;;  %v383_v29 = vmul.f32 0.055555556, %v347_v43 }
 0x595   : > { %v454_v1 = vmul.f32 18.0, %v418_v28  ;;  %v386_v6 = vmul.f32 0.055555556, %v350_v46  ;;  %v11389_v51 = vadd.s32 88, %v11351_v8  ;;  %v453_v18 = vmul.f32 18.0, %v417_v21 }
 0x596   : > { %v385_v19 = vmul.f32 0.055555556, %v349_v20  ;;  %v318_v14 = vcvt.s32.f32 %v11381_v59  ;;  %v11393_v25 = vadd.s32 80, %v11351_v8  ;;  %v352_v50 = vadd.f32 0.5, %v316_v47 }
 0x597   : > { %v490_v3 = vsub.f32 %v310_v37, %v454_v1  ;;  %v317_v27 = vcvt.s32.f32 %v11385_v4  ;;  %v11399_v10 = vadd.s32 104, %v11351_v8  ;;  %v456_v44 = vmul.f32 18.0, %v420_v40 }
 0x598   : > { %v351_v57 = vadd.f32 0.5, %v315_v56  ;;  %v11404_v9 = vadd.s32 96, %v11351_v8  ;;  %v419_v16 = vfloor.f32 %v383_v29  ;;  %v422_v53 = vfloor.f32 %v386_v6 }
 0x599   : > { %vm526_vm4 = vcmp.lt.f32.partialorder %v490_v3, 16.0  ;;  %v320_v23 = vcvt.s32.f32 %v11389_v51  ;;  %v489_v39 = vsub.f32 %v309_v36, %v453_v18  ;;  %v421_v63 = vfloor.f32 %v385_v19 }
 0x59a   : > { %v354_v42 = vadd.f32 0.5, %v318_v14  ;;  %v319_v54 = vcvt.s32.f32 %v11393_v25  ;;  %v388_v61 = vmul.f32 0.055555556, %v352_v50  ;;  %v353_v15 = vadd.f32 0.5, %v317_v27 }
 0x59b   : > { %v322_v49 = vcvt.s32.f32 %v11399_v10  ;;  %v11414_v62 = vadd.s32 120, %v11351_v8  ;;  %v492_v58 = vsub.f32 %v312_v31, %v456_v44  ;;  %v387_v45 = vmul.f32 0.055555556, %v351_v57 }
 0x59c   : > { %v321_v2 = vcvt.s32.f32 %v11404_v9  ;;  %v11418_v35 = vadd.s32 112, %v11351_v8  ;;  %v11422_v48 = vsel %vm526_vm4, 1.0, %v13109_v12  ;;  %v455_v0 = vmul.f32 18.0, %v419_v16  ;;  %v11525_v9 = vld [vmem:[%s13105_s3] ss:$0 sm:$0xff] }
 0x59d   : > { %v458_v32 = vmul.f32 18.0, %v422_v53  ;;  %v356_v33 = vadd.f32 0.5, %v320_v23  ;;  %vm525_vm6 = vcmp.lt.f32.partialorder %v489_v39, 16.0  ;;  %v457_v37 = vmul.f32 18.0, %v421_v63 }
 0x59e   : > { %v390_v38 = vmul.f32 0.055555556, %v354_v42  ;;  %v355_v22 = vadd.f32 0.5, %v319_v54  ;;  %v424_v36 = vfloor.f32 %v388_v61  ;;  %v389_v31 = vmul.f32 0.055555556, %v353_v15 }
 0x59f   : > { %v358_v55 = vadd.f32 0.5, %v322_v49  ;;  %v324_v30 = vcvt.s32.f32 %v11414_v62  ;;  %vm528_vm8 = vcmp.lt.f32.partialorder %v492_v58, 16.0  ;;  %v423_v13 = vfloor.f32 %v387_v45 }
 0x5a0   : > { %v357_v28 = vadd.f32 0.5, %v321_v2  ;;  %v323_v17 = vcvt.s32.f32 %v11418_v35  ;;  %v491_v34 = vsub.f32 %v311_v11, %v455_v0  ;;  %v494_v1 = vsub.f32 %v314_v52, %v458_v32 }
 0x5a1   : > { %v392_v43 = vmul.f32 0.055555556, %v356_v33  ;;  %v11439_v46 = vadd.s32 136, %v11351_v8  ;;  %v11443_v21 = vsel %vm525_vm6, 1.0, %v13109_v12  ;;  %v493_v20 = vsub.f32 %v313_v41, %v457_v37 }
 0x5a2   : > { %v426_v40 = vfloor.f32 %v390_v38  ;;  %v391_v3 = vmul.f32 0.055555556, %v355_v22  ;;  %v460_v29 = vmul.f32 18.0, %v424_v36  ;;  %v425_v6 = vfloor.f32 %v389_v31 }
 0x5a3   : > { %v394_v26 = vmul.f32 0.055555556, %v358_v55  ;;  %v360_v24 = vadd.f32 0.5, %v324_v30  ;;  %v11451_v11 = vsel %vm528_vm8, 1.0, %v13109_v12  ;;  %v459_v52 = vmul.f32 18.0, %v423_v13 }
 0x5a4   : > { %v393_v18 = vmul.f32 0.055555556, %v357_v28  ;;  %v359_v19 = vadd.f32 0.5, %v323_v17  ;;  %vm527_vm10 = vcmp.lt.f32.partialorder %v491_v34, 16.0  ;;  %vm530_vm12 = vcmp.lt.f32.partialorder %v494_v1, 16.0 }
 0x5a5   : > { %v428_v5 = vfloor.f32 %v392_v43  ;;  %v326_v41 = vcvt.s32.f32 %v11439_v46  ;;  %vm529_vm14 = vcmp.lt.f32.partialorder %v493_v20, 16.0  ;;  %v462_v50 = vmul.f32 18.0, %v426_v40 }
 0x5a6   : > { %v427_v44 = vfloor.f32 %v391_v3  ;;  %v11457_v57 = vadd.s32 128, %v11351_v8  ;;  %v496_v16 = vsub.f32 %v316_v47, %v460_v29  ;;  %v461_v53 = vmul.f32 18.0, %v425_v6 }
 0x5a7   : > { %v430_v39 = vfloor.f32 %v394_v26  ;;  %v396_v63 = vmul.f32 0.055555556, %v360_v24  ;;  %v495_v42 = vsub.f32 %v315_v56, %v459_v52  ;;  %v429_v61 = vfloor.f32 %v393_v18 }
 0x5a8   : > { %v395_v15 = vmul.f32 0.055555556, %v359_v19  ;;  %v11464_v58 = vadd.s32 152, %v11351_v8  ;;  %v11468_v45 = vsel %vm527_vm10, 1.0, %v13109_v12  ;;  %v11472_v0 = vsel %vm530_vm12, 1.0, %v13109_v12 }
 0x5a9   : > { %v464_v7 = vmul.f32 18.0, %v428_v5  ;;  %v362_v47 = vadd.f32 0.5, %v326_v41  ;;  %v11478_v60 = vsel %vm529_vm14, 1.0, %v13109_v12  ;;  %v498_v56 = vsub.f32 %v318_v14, %v462_v50 }
 0x5aa   : > { %v463_v32 = vmul.f32 18.0, %v427_v44  ;;  %v325_v33 = vcvt.s32.f32 %v11457_v57  ;;  %vm532_vm2 = vcmp.lt.f32.partialorder %v496_v16, 16.0  ;;  %v497_v37 = vsub.f32 %v317_v27, %v461_v53 }
 0x5ab   : > { %v466_v38 = vmul.f32 18.0, %v430_v39  ;;  %v432_v22 = vfloor.f32 %v396_v63  ;;  %vm531_vm4 = vcmp.lt.f32.partialorder %v495_v42, 16.0  ;;  %v465_v36 = vmul.f32 18.0, %v429_v61 }
 0x5ac   : > { %v431_v31 = vfloor.f32 %v395_v15  ;;  %v328_v55 = vcvt.s32.f32 %v11464_v58  ;;  %v500_v13 = vsub.f32 %v320_v23, %v464_v7  ;;  %v398_v28 = vmul.f32 0.055555556, %v362_v47 }
 0x5ad   : > { %v11489_v59 = vadd.s32 144, %v11351_v8  ;;  %v11492_v14 = vadd.s32 168, %v11351_v8  ;;  %v11495_v4 = vsel %vm532_vm2, 1.0, %v13109_v12  ;;  %vm534_vm6 = vcmp.lt.f32.partialorder %v498_v56, 16.0 }
 0x5ae   : > { %v499_v27 = vsub.f32 %v319_v54, %v463_v32  ;;  %v361_v34 = vadd.f32 0.5, %v325_v33  ;;  %vm533_vm8 = vcmp.lt.f32.partialorder %v497_v37, 16.0  ;;  %v502_v51 = vsub.f32 %v322_v49, %v466_v38 }
 0x5af   : > { %v468_v23 = vmul.f32 18.0, %v432_v22  ;;  %v11504_v1 = vadd.s32 160, %v11351_v8  ;;  %v11508_v43 = vsel %vm531_vm4, 1.0, %v13109_v12  ;;  %v501_v20 = vsub.f32 %v321_v2, %v465_v36 }
 0x5b0   : > { %v467_v25 = vmul.f32 18.0, %v431_v31  ;;  %v364_v54 = vadd.f32 0.5, %v328_v55  ;;  %vm536_vm10 = vcmp.lt.f32.partialorder %v500_v13, 16.0  ;;  %v434_v40 = vfloor.f32 %v398_v28 }
 0x5b1   : > { %v327_v10 = vcvt.s32.f32 %v11489_v59  ;;  %v330_v49 = vcvt.s32.f32 %v11492_v14  ;;  %v11517_v3 = vsel %vm534_vm6, 1.0, %v13109_v12  ;;  %v11520_v29 = vsel %vm533_vm8, 1.0, %v13109_v12 }
 0x5b2   : > { %vm535_vm12 = vcmp.lt.f32.partialorder %v499_v27, 16.0  ;;  %v397_v6 = vmul.f32 0.055555556, %v361_v34  ;;  %vm538_vm14 = vcmp.lt.f32.partialorder %v502_v51, 16.0  ;;  %v504_v2 = vsub.f32 %v324_v30, %v468_v23 }
 0x5b3   : > { %v329_v26 = vcvt.s32.f32 %v11504_v1  ;;  %v11531_v24 = vadd.s32 184, %v11351_v8  ;;  %v11534_v52 = vsel %vm536_vm10, 1.0, %v13109_v12  ;;  %vm537_vm2 = vcmp.lt.f32.partialorder %v501_v20, 16.0 }
 0x5b4   : > { %v503_v18 = vsub.f32 %v323_v17, %v467_v25  ;;  %v400_v19 = vmul.f32 0.055555556, %v364_v54  ;;  %v470_v50 = vmul.f32 18.0, %v434_v40  ;;  %v363_v44 = vadd.f32 0.5, %v327_v10 }
 0x5b5   : > { %v366_v62 = vadd.f32 0.5, %v330_v49  ;;  %v11543_v30 = vadd.s32 176, %v11351_v8  ;;  %v11548_v53 = vsel %vm535_vm12, 1.0, %v13109_v12  ;;  %v11551_v35 = vsel %vm538_vm14, 1.0, %v13109_v12 }
 0x5b6   : > { %v433_v17 = vfloor.f32 %v397_v6  ;;  %v11554_v63 = vsel %vm537_vm2, 1.0, %v13109_v12  ;;  %vm540_vm4 = vcmp.lt.f32.partialorder %v504_v2, 16.0  ;;  %v365_v42 = vadd.f32 0.5, %v329_v26 }
 0x5b7   : > { %v332_v61 = vcvt.s32.f32 %v11531_v24  ;;  %vm539_vm6 = vcmp.lt.f32.partialorder %v503_v18, 16.0  ;;  %v436_v47 = vfloor.f32 %v400_v19  ;;  %v506_v32 = vsub.f32 %v326_v41, %v470_v50 }
 0x5b8   : > { %v399_v37 = vmul.f32 0.055555556, %v363_v44  ;;  %v402_v38 = vmul.f32 0.055555556, %v366_v62  ;;  %v331_v22 = vcvt.s32.f32 %v11543_v30  ;;  %v469_v28 = vmul.f32 18.0, %v433_v17 }
 0x5b9   : > { %v11567_v34 = vsel %vm540_vm4, 1.0, %v13109_v12  ;;  %v11570_v51 = vsel %vm539_vm6, 1.0, %v13109_v12  ;;  %v401_v46 = vmul.f32 0.055555556, %v365_v42  ;;  %v368_v41 = vadd.f32 0.5, %v332_v61 }
 0x5ba   : > { %v472_v25 = vmul.f32 18.0, %v436_v47  ;;  %vm542_vm8 = vcmp.lt.f32.partialorder %v506_v32, 16.0  ;;  %v435_v40 = vfloor.f32 %v399_v37  ;;  %v438_v6 = vfloor.f32 %v402_v38 }
 0x5bb   : > { %v367_v2 = vadd.f32 0.5, %v331_v22  ;;  %v437_v44 = vfloor.f32 %v401_v46  ;;  %v404_v62 = vmul.f32 0.055555556, %v368_v41  ;;  %v11588_v17 = vadd.s32 192, %v11351_v8 }
 0x5bc   : > { %v508_v57 = vsub.f32 %v328_v55, %v472_v25  ;;  %v474_v47 = vmul.f32 18.0, %v438_v6  ;;  %v11612_v25 = vadd.s32 216, %v11351_v8 }
 0x5bd   : > { %v440_v58 = vfloor.f32 %v404_v62  ;;  %v333_v32 = vcvt.s32.f32 %v11588_v17 }
 0x5be   : > { %vm544_vm12 = vcmp.lt.f32.partialorder %v508_v57, 16.0 }
 0x605   : > { %v6865_v5 = vpop.f32.mrf.mxu0 }
 0x606   : > { %v4246_v16 = vadd.f32 %v6865_v5, %v11525_v9 }
 0x607   : > { %v4240_v39 = vpop.f32.mrf.mxu0 }
 0x608   : > { %v4420_v15 = vmax.f32 %v4246_v16, 0.0  ;;  %v4241_v7 = vadd.f32 %v11525_v9, %v4240_v39  ;;  %v11585_v16 = vadd.s32 200, %v11351_v8 }
 0x609   : > { %v6868_v56 = vpop.f32.mrf.mxu0 }
 0x60a   : > { %v4456_v36 = vmul.f32 %v4420_v15, %v11422_v48  ;;  %v4419_v31 = vmax.f32 %v4241_v7, 0.0  ;;  %v4256_v13 = vadd.f32 %v6868_v56, %v11525_v9  ;;  %v11597_v15 = vsel %vm542_vm8, 1.0, %v13109_v12 }
 0x60b   : > { %v4250_v27 = vpop.f32.mrf.mxu0  ;;  %v471_v7 = vmul.f32 18.0, %v435_v40  ;;  %v403_v56 = vmul.f32 0.055555556, %v367_v2  ;;  %v334_v55 = vcvt.s32.f32 %v11585_v16 }
 0x60c   : > { %4500 = vst.msk [vmem:[#allocation2 + $0x1b] sm:$0xff] %vm3170_vm1, %v4456_v36  ;;  %v4455_v48 = vmul.f32 %v4419_v31, %v11443_v21  ;;  %v4422_v23 = vmax.f32 %v4256_v13, 0.0  ;;  %v4251_v20 = vadd.f32 %v11525_v9, %v4250_v27  ;;  %v505_v21 = vsub.f32 %v325_v33, %v469_v28 }
 0x60d   : > { %v6871_v54 = vpop.f32.mrf.mxu0  ;;  %v473_v31 = vmul.f32 18.0, %v437_v44  ;;  %v370_v6 = vadd.f32 0.5, %v334_v55  ;;  %v336_v44 = vcvt.s32.f32 %v11612_v25 }
 0x60e   : > { %4499 = vst.msk [vmem:[#allocation2 + $0x13] sm:$0xff] %vm3170_vm1, %v4455_v48  ;;  %v4458_v18 = vmul.f32 %v4422_v23, %v11451_v11  ;;  %v4421_v19 = vmax.f32 %v4251_v20, 0.0  ;;  %v4266_v5 = vadd.f32 %v6871_v54, %v11525_v9  ;;  %vm541_vm10 = vcmp.lt.f32.partialorder %v505_v21, 16.0 }
 0x60f   : > { %v4260_v50 = vpop.f32.mrf.mxu0  ;;  %v507_v48 = vsub.f32 %v327_v10, %v471_v7  ;;  %v510_v23 = vsub.f32 %v330_v49, %v474_v47  ;;  %v439_v20 = vfloor.f32 %v403_v56  ;;  %v11621_v59 = vsel %vm541_vm10, 1.0, %v13109_v12 }
 0x610   : > { %4502 = vst.msk [vmem:[#allocation2 + $0x2b] sm:$0xff] %vm3170_vm1, %v4458_v18  ;;  %v4457_v39 = vmul.f32 %v4421_v19, %v11468_v45  ;;  %v4424_v11 = vmax.f32 %v4266_v5, 0.0  ;;  %v4261_v42 = vadd.f32 %v11525_v9, %v4260_v50  ;;  %v509_v10 = vsub.f32 %v329_v26, %v473_v31 }
 0x611   : > { %v6874_v33 = vpop.f32.mrf.mxu0  ;;  %v476_v49 = vmul.f32 18.0, %v440_v58  ;;  %v11634_v5 = vsel %vm544_vm12, 1.0, %v13109_v12  ;;  %vm543_vm14 = vcmp.lt.f32.partialorder %v507_v48, 16.0  ;;  %vm546_vm2 = vcmp.lt.f32.partialorder %v510_v23, 16.0 }
 0x612   : > { %4501 = vst.msk [vmem:[#allocation2 + $0x23] sm:$0xff] %vm3170_vm1, %v4457_v39  ;;  %v4460_v37 = vmul.f32 %v4424_v11, %v11472_v0  ;;  %v4423_v38 = vmax.f32 %v4261_v42, 0.0  ;;  %v4276_v45 = vadd.f32 %v6874_v33, %v11525_v9  ;;  %v475_v50 = vmul.f32 18.0, %v439_v20 }
 0x613   : > { %v4270_v36 = vpop.f32.mrf.mxu0  ;;  %v11643_v11 = vadd.s32 208, %v11351_v8  ;;  %vm545_vm4 = vcmp.lt.f32.partialorder %v509_v10, 16.0  ;;  %v512_v57 = vsub.f32 %v332_v61, %v476_v49  ;;  %v406_v33 = vmul.f32 0.055555556, %v370_v6 }
 0x614   : > { %4504 = vst.msk [vmem:[#allocation2 + $0x3b] sm:$0xff] %vm3170_vm1, %v4460_v37  ;;  %v4459_v13 = vmul.f32 %v4423_v38, %v11478_v60  ;;  %v4426_v28 = vmax.f32 %v4276_v45, 0.0  ;;  %v4271_v27 = vadd.f32 %v11525_v9, %v4270_v36  ;;  %v11651_v37 = vadd.s32 232, %v11351_v8 }
 0x615   : > { %v6877_v0 = vpop.f32.mrf.mxu0  ;;  %v4574_v46 = vld [vmem:[#allocation2 + $0x19] sm:$0xff]  ;;  %v4573_v41 = vld [vmem:[#allocation2 + $0x11] sm:$0xff]  ;;  %v11655_v31 = vsel %vm543_vm14, 1.0, %v13109_v12  ;;  %v11659_v24 = vsel %vm546_vm2, 1.0, %v13109_v12  ;;  %v372_v61 = vadd.f32 0.5, %v336_v44  ;;  %v11673_v30 = vsel %vm545_vm4, 1.0, %v13109_v12 }
 0x616   : > { %4503 = vst.msk [vmem:[#allocation2 + $0x33] sm:$0xff] %vm3170_vm1, %v4459_v13  ;;  %v4462_v60 = vmul.f32 %v4426_v28, %v11495_v4  ;;  %v4425_v54 = vmax.f32 %v4271_v27, 0.0  ;;  %v4286_v40 = vadd.f32 %v6877_v0, %v11525_v9  ;;  %4833 = vrot.lane.b32.xlu1 %v4574_v46, %s7025_s28  ;;  %4831 = vrot.lane.b32.xlu0 %v4573_v41, %s7025_s28  ;;  %v369_v4 = vadd.f32 0.5, %v333_v32 }
 0x617   : > { %v4280_v14 = vpop.f32.mrf.mxu0  ;;  %v335_v27 = vcvt.s32.f32 %v11643_v11  ;;  %vm548_vm6 = vcmp.lt.f32.partialorder %v512_v57, 16.0  ;;  %v338_v23 = vcvt.s32.f32 %v11651_v37 }
 0x618   : > { %4506 = vst.msk [vmem:[#allocation2 + $0x4b] sm:$0xff] %vm3170_vm1, %v4462_v60  ;;  %v4461_v2 = vmul.f32 %v4425_v54, %v11508_v43  ;;  %v4428_v18 = vmax.f32 %v4286_v40, 0.0  ;;  %v4281_v19 = vadd.f32 %v11525_v9, %v4280_v14  ;;  %v405_v7 = vmul.f32 0.055555556, %v369_v4 }
 0x619   : > { %v6880_v1 = vpop.f32.mrf.mxu0  ;;  %v4576_v26 = vld [vmem:[#allocation2 + $0x29] sm:$0xff]  ;;  %v4575_v21 = vld [vmem:[#allocation2 + $0x21] sm:$0xff]  ;;  %v408_v40 = vmul.f32 0.055555556, %v372_v61  ;;  %v11680_v14 = vadd.s32 224, %v11351_v8  ;;  %v371_v6 = vadd.f32 0.5, %v335_v27 }
 0x61a   : > { %4505 = vst.msk [vmem:[#allocation2 + $0x43] sm:$0xff] %vm3170_vm1, %v4461_v2  ;;  %v4464_v62 = vmul.f32 %v4428_v18, %v11517_v3  ;;  %v4427_v43 = vmax.f32 %v4281_v19, 0.0  ;;  %v4296_v39 = vadd.f32 %v6880_v1, %v11525_v9  ;;  %4837 = vrot.lane.b32.xlu1 %v4576_v26, %s7025_s28  ;;  %4835 = vrot.lane.b32.xlu0 %v4575_v21, %s7025_s28  ;;  %v441_v46 = vfloor.f32 %v405_v7 }
 0x61b   : > { %v4290_v42 = vpop.f32.mrf.mxu0  ;;  %v11691_v2 = vsel %vm548_vm6, 1.0, %v13109_v12  ;;  %v11694_v1 = vadd.s32 248, %v11351_v8  ;;  %v444_v57 = vfloor.f32 %v408_v40  ;;  %v11707_v7 = vadd.s32 240, %v11351_v8 }
 0x61c   : > { %4508 = vst.msk [vmem:[#allocation2 + $0x5b] sm:$0xff] %vm3170_vm1, %v4464_v62  ;;  %v4463_v3 = vmul.f32 %v4427_v43, %v11520_v29  ;;  %v4430_v47 = vmax.f32 %v4296_v39, 0.0  ;;  %v4291_v56 = vadd.f32 %v11525_v9, %v4290_v42  ;;  %v511_v29 = vsub.f32 %v331_v22, %v475_v50 }
 0x61d   : > { %v4578_v45 = vld [vmem:[#allocation2 + $0x39] sm:$0xff]  ;;  %v4577_v36 = vld [vmem:[#allocation2 + $0x31] sm:$0xff]  ;;  %v442_v22 = vfloor.f32 %v406_v33  ;;  %v477_v19 = vmul.f32 18.0, %v441_v46  ;;  %v374_v50 = vadd.f32 0.5, %v338_v23  ;;  %v337_v33 = vcvt.s32.f32 %v11680_v14 }
 0x61e   : > { %v6883_v38 = vpop.f32.mrf.mxu0  ;;  %4507 = vst.msk [vmem:[#allocation2 + $0x53] sm:$0xff] %vm3170_vm1, %v4463_v3  ;;  %v4466_v58 = vmul.f32 %v4430_v47, %v11534_v52  ;;  %v4429_v13 = vmax.f32 %v4291_v56, 0.0  ;;  %4841 = vrot.lane.b32.xlu1 %v4578_v45, %s7025_s28  ;;  %4839 = vrot.lane.b32.xlu0 %v4577_v36, %s7025_s28  ;;  %vm547_vm8 = vcmp.lt.f32.partialorder %v511_v29, 16.0  ;;  %v407_v56 = vmul.f32 0.055555556, %v371_v6 }
 0x61f   : > { %v4306_v28 = vadd.f32 %v6883_v38, %v11525_v9  ;;  %v478_v18 = vmul.f32 18.0, %v442_v22  ;;  %v11703_v42 = vsel %vm547_vm8, 1.0, %v13109_v12  ;;  %v513_v36 = vsub.f32 %v333_v32, %v477_v19 }
 0x620   : > { %v4300_v0 = vpop.f32.mrf.mxu0  ;;  %4510 = vst.msk [vmem:[#allocation2 + $0x6b] sm:$0xff] %vm3170_vm1, %v4466_v58  ;;  %v4465_v52 = vmul.f32 %v4429_v13, %v11548_v53  ;;  %v340_v29 = vcvt.s32.f32 %v11694_v1  ;;  %v11720_v61 = vadd.s32 264, %v11351_v8  ;;  %v480_v22 = vmul.f32 18.0, %v444_v57 }
 0x621   : > { %v4432_v41 = vmax.f32 %v4306_v28, 0.0  ;;  %v4301_v48 = vadd.f32 %v11525_v9, %v4300_v0  ;;  %v4580_v60 = vld [vmem:[#allocation2 + $0x49] sm:$0xff]  ;;  %v4579_v54 = vld [vmem:[#allocation2 + $0x41] sm:$0xff]  ;;  %v514_v45 = vsub.f32 %v334_v55, %v478_v18  ;;  %v11725_v28 = vmul.f32 0.055555556, %v374_v50 }
 0x622   : > { %4509 = vst.msk [vmem:[#allocation2 + $0x63] sm:$0xff] %vm3170_vm1, %v4465_v52  ;;  %4845 = vrot.lane.b32.xlu1 %v4580_v60, %s7025_s28  ;;  %4843 = vrot.lane.b32.xlu0 %v4579_v54, %s7025_s28  ;;  %v373_v17 = vadd.f32 0.5, %v337_v33  ;;  %v339_v32 = vcvt.s32.f32 %v11707_v7  ;;  %v11731_v46 = vadd.s32 256, %v11351_v8  ;;  %vm549_vm12 = vcmp.lt.f32.partialorder %v513_v36, 16.0 }
 0x623   : > { %v6886_v20 = vpop.f32.mrf.mxu0  ;;  %v4468_v10 = vmul.f32 %v4432_v41, %v11551_v35  ;;  %v4431_v49 = vmax.f32 %v4301_v48, 0.0  ;;  %v443_v48 = vfloor.f32 %v407_v56  ;;  %vm550_vm10 = vcmp.lt.f32.partialorder %v514_v45, 16.0 }
 0x624   : > { %v4316_v53 = vadd.f32 %v6886_v20, %v11525_v9  ;;  %v376_v60 = vadd.f32 0.5, %v340_v29  ;;  %v342_v54 = vcvt.s32.f32 %v11720_v61  ;;  %v446_v18 = vfloor.f32 %v11725_v28 }
 0x625   : > { %v4310_v4 = vpop.f32.mrf.mxu0  ;;  %4512 = vst.msk [vmem:[#allocation2 + $0x7b] sm:$0xff] %vm3170_vm1, %v4468_v10  ;;  %v4467_v35 = vmul.f32 %v4431_v49, %v11554_v63  ;;  %v4582_v43 = vld [vmem:[#allocation2 + $0x59] sm:$0xff]  ;;  %v4581_v39 = vld [vmem:[#allocation2 + $0x51] sm:$0xff]  ;;  %v11745_v49 = vadd.s32 280, %v11351_v8  ;;  %v409_v19 = vmul.f32 0.055555556, %v373_v17 }
 0x626   : > { %v4434_v26 = vmax.f32 %v4316_v53, 0.0  ;;  %v4311_v21 = vadd.f32 %v11525_v9, %v4310_v4  ;;  %4849 = vrot.lane.b32.xlu1 %v4582_v43, %s7025_s28  ;;  %4847 = vrot.lane.b32.xlu0 %v4581_v39, %s7025_s28  ;;  %v11761_v39 = vsel %vm550_vm10, 1.0, %v13109_v12  ;;  %v11765_v57 = vsel %vm549_vm12, 1.0, %v13109_v12 }
 0x627   : > { %v6889_v62 = vpop.f32.mrf.mxu0  ;;  %4511 = vst.msk [vmem:[#allocation2 + $0x73] sm:$0xff] %vm3170_vm1, %v4467_v35  ;;  %v375_v35 = vadd.f32 0.5, %v339_v32  ;;  %v344_v56 = vcvt.s32.f32 %v11745_v49  ;;  %v445_v36 = vfloor.f32 %v409_v19 }
 0x628   : > { %v4470_v63 = vmul.f32 %v4434_v26, %v11567_v34  ;;  %v4433_v3 = vmax.f32 %v4311_v21, 0.0  ;;  %v4326_v47 = vadd.f32 %v6889_v62, %v11525_v9  ;;  %v341_v26 = vcvt.s32.f32 %v11731_v46 }
 0x629   : > { %v4320_v38 = vpop.f32.mrf.mxu0  ;;  %v4584_v16 = vld [vmem:[#allocation2 + $0x69] sm:$0xff]  ;;  %v4583_v55 = vld [vmem:[#allocation2 + $0x61] sm:$0xff]  ;;  %v11757_v62 = vadd.s32 272, %v11351_v8 }
 0x62a   : > { %4514 = vst.msk [vmem:[#allocation2 + $0x8b] sm:$0xff] %vm3170_vm1, %v4470_v63  ;;  %v4469_v34 = vmul.f32 %v4433_v3, %v11570_v51  ;;  %v4436_v58 = vmax.f32 %v4326_v47, 0.0  ;;  %v4321_v13 = vadd.f32 %v11525_v9, %v4320_v38  ;;  %4853 = vrot.lane.b32.xlu1 %v4584_v16, %s7025_s28  ;;  %4851 = vrot.lane.b32.xlu0 %v4583_v55, %s7025_s28  ;;  %v378_v63 = vadd.f32 0.5, %v342_v54 }
 0x62b   : > { %v377_v28 = vadd.f32 0.5, %v341_v26  ;;  %v343_v55 = vcvt.s32.f32 %v11757_v62 }
 0x62c   : > { %v6892_v0 = vpop.f32.mrf.mxu0  ;;  %4513 = vst.msk [vmem:[#allocation2 + $0x83] sm:$0xff] %vm3170_vm1, %v4469_v34  ;;  %v4472_v51 = vmul.f32 %v4436_v58, %v11597_v15  ;;  %v4435_v52 = vmax.f32 %v4321_v13, 0.0  ;;  %v479_v58 = vmul.f32 18.0, %v443_v48  ;;  %v411_v13 = vmul.f32 0.055555556, %v375_v35 }
 0x62d   : > { %v4336_v41 = vadd.f32 %v6892_v0, %v11525_v9  ;;  %v414_v48 = vmul.f32 0.055555556, %v378_v63  ;;  %v379_v19 = vadd.f32 0.5, %v343_v55 }
 0x62e   : > { %v4330_v20 = vpop.f32.mrf.mxu0  ;;  %4516 = vst.msk [vmem:[#allocation2 + $0x9b] sm:$0xff] %vm3170_vm1, %v4472_v51  ;;  %v4471_v15 = vmul.f32 %v4435_v52, %v11621_v59  ;;  %v4586_v6 = vld [vmem:[#allocation2 + $0x79] sm:$0xff]  ;;  %v4585_v4 = vld [vmem:[#allocation2 + $0x71] sm:$0xff]  ;;  %v516_v51 = vsub.f32 %v336_v44, %v480_v22  ;;  %v482_v52 = vmul.f32 18.0, %v446_v18  ;;  %v515_v25 = vsub.f32 %v335_v27, %v479_v58 }
 0x62f   : > { %v4438_v40 = vmax.f32 %v4336_v41, 0.0  ;;  %v4331_v10 = vadd.f32 %v11525_v9, %v4330_v20  ;;  %4857 = vrot.lane.b32.xlu1 %v4586_v6, %s7025_s28  ;;  %4855 = vrot.lane.b32.xlu0 %v4585_v4, %s7025_s28  ;;  %v481_v44 = vmul.f32 18.0, %v445_v36  ;;  %v447_v22 = vfloor.f32 %v411_v13 }
 0x630   : > { %4515 = vst.msk [vmem:[#allocation2 + $0x93] sm:$0xff] %vm3170_vm1, %v4471_v15  ;;  %v380_v15 = vadd.f32 0.5, %v344_v56  ;;  %v413_v6 = vmul.f32 0.055555556, %v377_v28  ;;  %vm552_vm14 = vcmp.lt.f32.partialorder %v516_v51, 16.0  ;;  %v518_v11 = vsub.f32 %v338_v23, %v482_v52 }
 0x631   : > { %v6895_v53 = vpop.f32.mrf.mxu0  ;;  %v4474_v59 = vmul.f32 %v4438_v40, %v11634_v5  ;;  %v4437_v21 = vmax.f32 %v4331_v10, 0.0  ;;  %v412_v5 = vmul.f32 0.055555556, %v376_v60  ;;  %vm551_vm2 = vcmp.lt.f32.partialorder %v515_v25, 16.0 }
 0x632   : > { %v4346_v50 = vadd.f32 %v6895_v53, %v11525_v9  ;;  %v449_v37 = vfloor.f32 %v413_v6  ;;  %vm554_vm4 = vcmp.lt.f32.partialorder %v518_v11, 16.0 }
 0x633   : > { %v4340_v43 = vpop.f32.mrf.mxu0  ;;  %4518 = vst.msk [vmem:[#allocation2 + $0xab] sm:$0xff] %vm3170_vm1, %v4474_v59  ;;  %v4473_v3 = vmul.f32 %v4437_v21, %v11655_v31  ;;  %v4588_v45 = vld [vmem:[#allocation2 + $0x89] sm:$0xff]  ;;  %v4587_v34 = vld [vmem:[#allocation2 + $0x81] sm:$0xff]  ;;  %v448_v41 = vfloor.f32 %v412_v5  ;;  %v450_v59 = vfloor.f32 %v414_v48  ;;  %v590_v48 = vsel %vm554_vm4, 1.0, %v13109_v12 }
 0x634   : > { %v4440_v47 = vmax.f32 %v4346_v50, 0.0  ;;  %v4341_v8 = vadd.f32 %v11525_v9, %v4340_v43  ;;  %4861 = vrot.lane.b32.xlu1 %v4588_v45, %s7025_s28  ;;  %4859 = vrot.lane.b32.xlu0 %v4587_v34, %s7025_s28  ;;  %v416_v43 = vmul.f32 0.055555556, %v380_v15  ;;  %v415_v45 = vmul.f32 0.055555556, %v379_v19 }
 0x635   : > { %v6898_v38 = vpop.f32.mrf.mxu0  ;;  %4517 = vst.msk [vmem:[#allocation2 + $0xa3] sm:$0xff] %vm3170_vm1, %v4473_v3  ;;  %v484_v27 = vmul.f32 18.0, %v448_v41  ;;  %v588_v34 = vsel %vm552_vm14, 1.0, %v13109_v12 }
 0x636   : > { %v4476_v0 = vmul.f32 %v4440_v47, %v11659_v24  ;;  %v4439_v16 = vmax.f32 %v4341_v8, 0.0  ;;  %v4356_v31 = vadd.f32 %v6898_v38, %v11525_v9  ;;  %v517_v47 = vsub.f32 %v337_v33, %v481_v44 }
 0x637   : > { %v4350_v17 = vpop.f32.mrf.mxu0  ;;  %v4590_v10 = vld [vmem:[#allocation2 + $0x99] sm:$0xff]  ;;  %v4589_v53 = vld [vmem:[#allocation2 + $0x91] sm:$0xff]  ;;  %v483_v8 = vmul.f32 18.0, %v447_v22  ;;  %v520_v14 = vsub.f32 %v340_v29, %v484_v27  ;;  %v486_v33 = vmul.f32 18.0, %v450_v59  ;;  %v452_v28 = vfloor.f32 %v416_v43 }
 0x638   : > { %4520 = vst.msk [vmem:[#allocation2 + $0xbb] sm:$0xff] %vm3170_vm1, %v4476_v0  ;;  %v4475_v24 = vmul.f32 %v4439_v16, %v11673_v30  ;;  %v4442_v20 = vmax.f32 %v4356_v31, 0.0  ;;  %v4351_v60 = vadd.f32 %v11525_v9, %v4350_v17  ;;  %4865 = vrot.lane.b32.xlu1 %v4590_v10, %s7025_s28  ;;  %4863 = vrot.lane.b32.xlu0 %v4589_v53, %s7025_s28  ;;  %v587_v0 = vsel %vm551_vm2, 1.0, %v13109_v12 }
 0x639   : > { %vm553_vm6 = vcmp.lt.f32.partialorder %v517_v47, 16.0  ;;  %v519_v1 = vsub.f32 %v339_v32, %v483_v8  ;;  %v485_v29 = vmul.f32 18.0, %v449_v37  ;;  %v451_v41 = vfloor.f32 %v415_v45 }
 0x63a   : > { %v6901_v40 = vpop.f32.mrf.mxu0  ;;  %4519 = vst.msk [vmem:[#allocation2 + $0xb3] sm:$0xff] %vm3170_vm1, %v4475_v24  ;;  %v4478_v4 = vmul.f32 %v4442_v20, %v11691_v2  ;;  %v4441_v30 = vmax.f32 %v4351_v60, 0.0  ;;  %vm556_vm8 = vcmp.lt.f32.partialorder %v520_v14, 16.0  ;;  %v522_v7 = vsub.f32 %v342_v54, %v486_v33 }
 0x63b   : > { %v4366_v18 = vadd.f32 %v6901_v40, %v11525_v9  ;;  %v488_v15 = vmul.f32 18.0, %v452_v28  ;;  %v589_v40 = vsel %vm553_vm6, 1.0, %v13109_v12  ;;  %vm555_vm10 = vcmp.lt.f32.partialorder %v519_v1, 16.0  ;;  %v4608_v1 = vld [vmem:[#allocation2 + $0xa] sm:$0xff] }
 0x63c   : > { %v4360_v35 = vpop.f32.mrf.mxu0  ;;  %4522 = vst.msk [vmem:[#allocation2 + $0xcb] sm:$0xff] %vm3170_vm1, %v4478_v4  ;;  %v4477_v2 = vmul.f32 %v4441_v30, %v11703_v42  ;;  %v4592_v63 = vld [vmem:[#allocation2 + $0xa9] sm:$0xff]  ;;  %v4591_v3 = vld [vmem:[#allocation2 + $0xa1] sm:$0xff]  ;;  %v521_v44 = vsub.f32 %v341_v26, %v485_v29  ;;  %v487_v6 = vmul.f32 18.0, %v451_v41  ;;  %v592_v4 = vsel %vm556_vm8, 1.0, %v13109_v12 }
 0x63d   : > { %v4444_v21 = vmax.f32 %v4366_v18, 0.0  ;;  %v4361_v50 = vadd.f32 %v11525_v9, %v4360_v35  ;;  %4869 = vrot.lane.b32.xlu1 %v4592_v63, %s7025_s28  ;;  %4867 = vrot.lane.b32.xlu0 %v4591_v3, %s7025_s28  ;;  %vm558_vm12 = vcmp.lt.f32.partialorder %v522_v7, 16.0  ;;  %v524_v19 = vsub.f32 %v344_v56, %v488_v15  ;;  %v4607_v29 = vld [vmem:[#allocation2 + $0x2] sm:$0xff]  ;;  %v11900_v7 = vld [vmem:[#allocation2 + $0x4a] sm:$0xff] }
 0x63e   : > { %4521 = vst.msk [vmem:[#allocation2 + $0xc3] sm:$0xff] %vm3170_vm1, %v4477_v2  ;;  %v591_v35 = vsel %vm555_vm10, 1.0, %v13109_v12  ;;  %vm557_vm14 = vcmp.lt.f32.partialorder %v521_v44, 16.0  ;;  %v523_v49 = vsub.f32 %v343_v55, %v487_v6  ;;  %v594_v56 = vsel %vm558_vm12, 1.0, %v13109_v12  ;;  %v11886_v41 = vld [vmem:[#allocation2 + $0x22] sm:$0xff]  ;;  %v11916_v15 = vld [vmem:[#allocation2 + $0x6a] sm:$0xff] }
 0x63f   : > { %v6904_v5 = vpop.f32.mrf.mxu0  ;;  %v4480_v23 = vmul.f32 %v4444_v21, %v11761_v39  ;;  %v4443_v38 = vmax.f32 %v4361_v50, 0.0  ;;  %vm560_vm2 = vcmp.lt.f32.partialorder %v524_v19, 16.0  ;;  %v593_v47 = vsel %vm557_vm14, 1.0, %v13109_v12  ;;  %v11934_v44 = vld [vmem:[#allocation2 + $0x82] sm:$0xff] }
 0x640   : > { %v4376_v42 = vadd.f32 %v6904_v5, %v11525_v9  ;;  %vm559_vm4 = vcmp.lt.f32.partialorder %v523_v49, 16.0  ;;  %v11950_v6 = vld [vmem:[#allocation2 + $0xa2] sm:$0xff]  ;;  %vm4497_vm6 = vcmask 61440  }
 0x641   : > { %v4370_v58 = vpop.f32.mrf.mxu0  ;;  %4524 = vst.msk [vmem:[#allocation2 + $0xdb] sm:$0xff] %vm3170_vm1, %v4480_v23  ;;  %v4479_v39 = vmul.f32 %v4443_v38, %v11765_v57  ;;  %v4594_v31 = vld [vmem:[#allocation2 + $0xb9] sm:$0xff]  ;;  %v4593_v17 = vld [vmem:[#allocation2 + $0xb1] sm:$0xff]  ;;  %v595_v33 = vsel %vm559_vm4, 1.0, %v13109_v12 }
 0x642   : > { %v4446_v36 = vmax.f32 %v4376_v42, 0.0  ;;  %v4371_v13 = vadd.f32 %v11525_v9, %v4370_v58  ;;  %4873 = vrot.lane.b32.xlu1 %v4594_v31, %s7025_s28  ;;  %4871 = vrot.lane.b32.xlu0 %v4593_v17, %s7025_s28  ;;  %v596_v42 = vsel %vm560_vm2, 1.0, %v13109_v12  ;;  %v4651_v12 = vld [vmem:[#allocation2 + $0x43] sm:$0xff] }
 0x643   : > { %v6907_v16 = vpop.f32.mrf.mxu0  ;;  %4523 = vst.msk [vmem:[#allocation2 + $0xd3] sm:$0xff] %vm3170_vm1, %v4479_v39 }
 0x644   : > { %v4482_v51 = vmul.f32 %v4446_v36, %v588_v34  ;;  %v4445_v52 = vmax.f32 %v4371_v13, 0.0  ;;  %v4386_v57 = vadd.f32 %v6907_v16, %v11525_v9 }
 0x645   : > { %v4380_v24 = vpop.f32.mrf.mxu0  ;;  %v4596_v53 = vld [vmem:[#allocation2 + $0xc9] sm:$0xff]  ;;  %v4595_v25 = vld [vmem:[#allocation2 + $0xc1] sm:$0xff] }
 0x646   : > { %4526 = vst.msk [vmem:[#allocation2 + $0xeb] sm:$0xff] %vm3170_vm1, %v4482_v51  ;;  %v4481_v32 = vmul.f32 %v4445_v52, %v587_v0  ;;  %v4448_v20 = vmax.f32 %v4386_v57, 0.0  ;;  %v4381_v60 = vadd.f32 %v11525_v9, %v4380_v24  ;;  %4877 = vrot.lane.b32.xlu1 %v4596_v53, %s7025_s28  ;;  %4875 = vrot.lane.b32.xlu0 %v4595_v25, %s7025_s28  ;;  %v11876_v51 = vld [vmem:[#allocation2 + $0x1a] sm:$0xff]  ;;  %v11878_v52 = vld [vmem:[#allocation2 + $0x12] sm:$0xff]  ;;  %v11884_v57 = vld [vmem:[#allocation2 + $0x2a] sm:$0xff] }
 0x647   : > { %v11894_v24 = vld [vmem:[#allocation2 + $0x32] sm:$0xff]  ;;  %v11932_v25 = vld [vmem:[#allocation2 + $0x8a] sm:$0xff] }
 0x648   : > { %v6910_v10 = vpop.f32.mrf.mxu0  ;;  %4525 = vst.msk [vmem:[#allocation2 + $0xe3] sm:$0xff] %vm3170_vm1, %v4481_v32  ;;  %v4484_v61 = vmul.f32 %v4448_v20, %v590_v48  ;;  %v4447_v54 = vmax.f32 %v4381_v60, 0.0  ;;  %v11892_v48 = vld [vmem:[#allocation2 + $0x3a] sm:$0xff]  ;;  %v11902_v32 = vld [vmem:[#allocation2 + $0x42] sm:$0xff]  ;;  %v11910_v60 = vld [vmem:[#allocation2 + $0x52] sm:$0xff] }
 0x649   : > { %v4396_v22 = vadd.f32 %v6910_v10, %v11525_v9  ;;  %v11908_v20 = vld [vmem:[#allocation2 + $0x5a] sm:$0xff]  ;;  %v11926_v53 = vld [vmem:[#allocation2 + $0x72] sm:$0xff] }
 0x64a   : > { %v4390_v30 = vpop.f32.mrf.mxu0  ;;  %4528 = vst.msk [vmem:[#allocation2 + $0xfb] sm:$0xff] %vm3170_vm1, %v4484_v61  ;;  %v4483_v46 = vmul.f32 %v4447_v54, %v589_v40  ;;  %v4598_v27 = vld [vmem:[#allocation2 + $0xd9] sm:$0xff]  ;;  %v4597_v59 = vld [vmem:[#allocation2 + $0xd1] sm:$0xff]  ;;  %v11918_v40 = vld [vmem:[#allocation2 + $0x62] sm:$0xff] }
 0x64b   : > { %v4450_v26 = vmax.f32 %v4396_v22, 0.0  ;;  %v4391_v18 = vadd.f32 %v11525_v9, %v4390_v30  ;;  %4881 = vrot.lane.b32.xlu1 %v4598_v27, %s7025_s28  ;;  %4879 = vrot.lane.b32.xlu0 %v4597_v59, %s7025_s28  ;;  %v11924_v10 = vld [vmem:[#allocation2 + $0x7a] sm:$0xff]  ;;  %v11942_v54 = vld [vmem:[#allocation2 + $0x92] sm:$0xff]  ;;  %v11948_v22 = vld [vmem:[#allocation2 + $0xaa] sm:$0xff]  ;;  %v11958_v30 = vpop.permute.xlu0 %4827 }
 0x64c   : > { %4527 = vst.msk [vmem:[#allocation2 + $0xf3] sm:$0xff] %vm3170_vm1, %v4483_v46  ;;  %v11940_v61 = vld [vmem:[#allocation2 + $0x9a] sm:$0xff] }
 0x64d   : > { %v6913_v11 = vpop.f32.mrf.mxu0  ;;  %v4486_v2 = vmul.f32 %v4450_v26, %v592_v4  ;;  %v4449_v21 = vmax.f32 %v4391_v18, 0.0  ;;  %v11956_v4 = vpop.permute.xlu1 %4829  ;;  %v11960_v46 = vld [vmem:[#allocation2 + $0xba] sm:$0xff]  ;;  %v11962_v26 = vld [vmem:[#allocation2 + $0xb2] sm:$0xff] }
 0x64e   : > { %v4406_v50 = vadd.f32 %v6913_v11, %v11525_v9  ;;  %v11974_v11 = vld [vmem:[#allocation2 + $0xc2] sm:$0xff] }
 0x64f   : > { %v4400_v43 = vpop.f32.mrf.mxu0  ;;  %4530 = vst.msk [vmem:[#allocation2 + $0x10b] sm:$0xff] %vm3170_vm1, %v4486_v2  ;;  %v4485_v5 = vmul.f32 %v4449_v21, %v591_v35  ;;  %v4600_v37 = vld [vmem:[#allocation2 + $0xe9] sm:$0xff]  ;;  %v4599_v23 = vld [vmem:[#allocation2 + $0xe1] sm:$0xff]  ;;  %v11986_v21 = vld [vmem:[#allocation2 + $0xd2] sm:$0xff] }
 0x650   : > { %v4452_v63 = vmax.f32 %v4406_v50, 0.0  ;;  %v4401_v3 = vadd.f32 %v11525_v9, %v4400_v43  ;;  %4885 = vrot.lane.b32.xlu1 %v4600_v37, %s7025_s28  ;;  %4883 = vrot.lane.b32.xlu0 %v4599_v23, %s7025_s28  ;;  %v11972_v35 = vld [vmem:[#allocation2 + $0xca] sm:$0xff]  ;;  %v11984_v2 = vld [vmem:[#allocation2 + $0xda] sm:$0xff]  ;;  %v11998_v43 = vld [vmem:[#allocation2 + $0xe2] sm:$0xff] }
 0x651   : > { %v6916_v8 = vpop.f32.mrf.mxu0  ;;  %4529 = vst.msk [vmem:[#allocation2 + $0x103] sm:$0xff] %vm3170_vm1, %v4485_v5 }
 0x652   : > { %v4488_v62 = vmul.f32 %v4452_v63, %v594_v56  ;;  %v4451_v55 = vmax.f32 %v4401_v3, 0.0  ;;  %v4416_v38 = vadd.f32 %v6916_v8, %v11525_v9  ;;  %v11996_v56 = vld [vmem:[#allocation2 + $0xea] sm:$0xff] }
 0x653   : > { %v4410_v45 = vpop.f32.mrf.mxu0  ;;  %v4602_v39 = vld [vmem:[#allocation2 + $0xf9] sm:$0xff]  ;;  %v4601_v36 = vld [vmem:[#allocation2 + $0xf1] sm:$0xff] }
 0x654   : > { %4532 = vst.msk [vmem:[#allocation2 + $0x11b] sm:$0xff] %vm3170_vm1, %v4488_v62  ;;  %v4487_v34 = vmul.f32 %v4451_v55, %v593_v47  ;;  %v4454_v58 = vmax.f32 %v4416_v38, 0.0  ;;  %v4411_v14 = vadd.f32 %v11525_v9, %v4410_v45  ;;  %4889 = vrot.lane.b32.xlu1 %v4602_v39, %s7025_s28  ;;  %4887 = vrot.lane.b32.xlu0 %v4601_v36, %s7025_s28  ;;  %v12008_v3 = vld [vmem:[#allocation2 + $0xfa] sm:$0xff]  ;;  %v12010_v47 = vld [vmem:[#allocation2 + $0xf2] sm:$0xff] }
 0x656   : > { %4531 = vst.msk [vmem:[#allocation2 + $0x113] sm:$0xff] %vm3170_vm1, %v4487_v34  ;;  %v4490_v13 = vmul.f32 %v4454_v58, %v596_v42  ;;  %v4453_v28 = vmax.f32 %v4411_v14, 0.0 }
 0x658   : > { %4534 = vst.msk [vmem:[#allocation2 + $0x12b] sm:$0xff] %vm3170_vm1, %v4490_v13  ;;  %v4489_v0 = vmul.f32 %v4453_v28, %v595_v33  ;;  %v4604_v16 = vld [vmem:[#allocation2 + $0x109] sm:$0xff]  ;;  %v4603_v31 = vld [vmem:[#allocation2 + $0x101] sm:$0xff] }
 0x659   : > { %4893 = vrot.lane.b32.xlu1 %v4604_v16, %s7025_s28  ;;  %4891 = vrot.lane.b32.xlu0 %v4603_v31, %s7025_s28  ;;  %v12020_v23 = vld [vmem:[#allocation2 + $0x10a] sm:$0xff]  ;;  %v12022_v62 = vld [vmem:[#allocation2 + $0x102] sm:$0xff] }
 0x65a   : > { %4533 = vst.msk [vmem:[#allocation2 + $0x123] sm:$0xff] %vm3170_vm1, %v4489_v0 }
 0x65d   : > { %v4606_v9 = vld [vmem:[#allocation2 + $0x119] sm:$0xff]  ;;  %v4605_v17 = vld [vmem:[#allocation2 + $0x111] sm:$0xff] }
 0x65e   : > { %4897 = vrot.lane.b32.xlu1 %v4606_v9, %s7025_s28  ;;  %4895 = vrot.lane.b32.xlu0 %v4605_v17, %s7025_s28  ;;  %v12032_v42 = vld [vmem:[#allocation2 + $0x11a] sm:$0xff]  ;;  %v12034_v45 = vld [vmem:[#allocation2 + $0x112] sm:$0xff] }
 0x662   : > { %4973 = vrot.lane.b32.xlu1 %v4608_v1, %s7027_s30  ;;  %4971 = vrot.lane.b32.xlu0 %v4607_v29, %s7027_s30 }
 0x666   : > { %4977 = vrot.lane.b32.xlu1 %v11876_v51, %s7027_s30  ;;  %4975 = vrot.lane.b32.xlu0 %v11878_v52, %s7027_s30 }
 0x66a   : > { %4981 = vrot.lane.b32.xlu1 %v11884_v57, %s7027_s30  ;;  %4979 = vrot.lane.b32.xlu0 %v11886_v41, %s7027_s30 }
 0x66e   : > { %4985 = vrot.lane.b32.xlu1 %v11892_v48, %s7027_s30  ;;  %4983 = vrot.lane.b32.xlu0 %v11894_v24, %s7027_s30 }
 0x672   : > { %4989 = vrot.lane.b32.xlu1 %v11900_v7, %s7027_s30  ;;  %4987 = vrot.lane.b32.xlu0 %v11902_v32, %s7027_s30 }
 0x676   : > { %4993 = vrot.lane.b32.xlu1 %v11908_v20, %s7027_s30  ;;  %4991 = vrot.lane.b32.xlu0 %v11910_v60, %s7027_s30 }
 0x67a   : > { %4997 = vrot.lane.b32.xlu1 %v11916_v15, %s7027_s30  ;;  %4995 = vrot.lane.b32.xlu0 %v11918_v40, %s7027_s30 }
 0x67e   : > { %5001 = vrot.lane.b32.xlu1 %v11924_v10, %s7027_s30  ;;  %4999 = vrot.lane.b32.xlu0 %v11926_v53, %s7027_s30 }
 0x682   : > { %5005 = vrot.lane.b32.xlu1 %v11932_v25, %s7027_s30  ;;  %5003 = vrot.lane.b32.xlu0 %v11934_v44, %s7027_s30 }
 0x686   : > { %5009 = vrot.lane.b32.xlu1 %v11940_v61, %s7027_s30  ;;  %5007 = vrot.lane.b32.xlu0 %v11942_v54, %s7027_s30 }
 0x688   : > { %v11968_v18 = vpop.permute.xlu1 %4833  ;;  %v11970_v19 = vpop.permute.xlu0 %4831 }
 0x68a   : > { %5013 = vrot.lane.b32.xlu1 %v11948_v22, %s7027_s30  ;;  %5011 = vrot.lane.b32.xlu0 %v11950_v6, %s7027_s30 }
 0x68c   : > { %v11980_v27 = vpop.permute.xlu1 %4837  ;;  %v11982_v59 = vpop.permute.xlu0 %4835 }
 0x68e   : > { %5017 = vrot.lane.b32.xlu1 %v11960_v46, %s7027_s30  ;;  %5015 = vrot.lane.b32.xlu0 %v11962_v26, %s7027_s30 }
 0x690   : > { %v11992_v50 = vpop.permute.xlu1 %4841  ;;  %v11994_v49 = vpop.permute.xlu0 %4839 }
 0x692   : > { %5021 = vrot.lane.b32.xlu1 %v11972_v35, %s7027_s30  ;;  %5019 = vrot.lane.b32.xlu0 %v11974_v11, %s7027_s30 }
 0x694   : > { %v12004_v5 = vpop.permute.xlu1 %4845  ;;  %v12006_v63 = vpop.permute.xlu0 %4843 }
 0x696   : > { %5025 = vrot.lane.b32.xlu1 %v11984_v2, %s7027_s30  ;;  %5023 = vrot.lane.b32.xlu0 %v11986_v21, %s7027_s30 }
 0x698   : > { %v12016_v8 = vpop.permute.xlu1 %4849  ;;  %v12018_v37 = vpop.permute.xlu0 %4847 }
 0x69a   : > { %5029 = vrot.lane.b32.xlu1 %v11996_v56, %s7027_s30  ;;  %5027 = vrot.lane.b32.xlu0 %v11998_v43, %s7027_s30 }
 0x69c   : > { %v12028_v55 = vpop.permute.xlu1 %4853  ;;  %v12030_v38 = vpop.permute.xlu0 %4851 }
 0x69d   : > { %14116 = vst [vmem:[#allocation3_spill] sm:$0xff] %v12028_v55 }
 0x69e   : > { %5033 = vrot.lane.b32.xlu1 %v12008_v3, %s7027_s30  ;;  %5031 = vrot.lane.b32.xlu0 %v12010_v47, %s7027_s30 }
 0x6a1   : > { %v12040_v34 = vpop.permute.xlu1 %4857  ;;  %v12042_v58 = vpop.permute.xlu0 %4855 }
 0x6a2   : > { %5037 = vrot.lane.b32.xlu1 %v12020_v23, %s7027_s30  ;;  %5035 = vrot.lane.b32.xlu0 %v12022_v62, %s7027_s30  ;;  %14117 = vst [vmem:[#allocation4_spill] sm:$0xff] %v12040_v34  ;;  %14118 = vst [vmem:[#allocation5_spill] sm:$0xff] %v12042_v58  ;;  %v4768_v58 = vld [vmem:[#allocation2 + $0x8e] sm:$0xff] }
 0x6a6   : > { %5041 = vrot.lane.b32.xlu1 %v12032_v42, %s7027_s30  ;;  %5039 = vrot.lane.b32.xlu0 %v12034_v45, %s7027_s30  ;;  %v12048_v14 = vpop.permute.xlu1 %4861  ;;  %v12050_v33 = vpop.permute.xlu0 %4859 }
 0x6a7   : > { %14119 = vst [vmem:[#allocation6_spill] sm:$0xff] %v12048_v14  ;;  %14120 = vst [vmem:[#allocation7_spill] sm:$0xff] %v12050_v33  ;;  %v4696_v33 = vld [vmem:[#allocation2 + $0x8c] sm:$0xff] }
 0x6aa   : > { %5083 = vrot.lane.b32.xlu1 %v11876_v51, %s7029_s8  ;;  %5081 = vrot.lane.b32.xlu0 %v11878_v52, %s7029_s8  ;;  %v12056_v39 = vpop.permute.xlu1 %4865  ;;  %v12058_v36 = vpop.permute.xlu0 %4863 }
 0x6ab   : > { %14121 = vst [vmem:[#allocation8_spill] sm:$0xff] %v12056_v39  ;;  %14122 = vst [vmem:[#allocation9_spill] sm:$0xff] %v12058_v36  ;;  %v4689_v39 = vld [vmem:[#allocation2 + $0x54] sm:$0xff]  ;;  %v4690_v36 = vld [vmem:[#allocation2 + $0x5c] sm:$0xff] }
 0x6ae   : > { %5087 = vrot.lane.b32.xlu1 %v11884_v57, %s7029_s8  ;;  %5085 = vrot.lane.b32.xlu0 %v11886_v41, %s7029_s8 }
 0x6af   : > { %v12064_v13 = vpop.permute.xlu1 %4869  ;;  %v12066_v28 = vpop.permute.xlu0 %4867 }
 0x6b0   : > { %14123 = vst [vmem:[#allocation10_spill] sm:$0xff] %v12064_v13  ;;  %14124 = vst [vmem:[#allocation11_spill] sm:$0xff] %v12066_v28  ;;  %v4724_v13 = vld [vmem:[#allocation2 + $0x4d] sm:$0xff] }
 0x6b1   : > { %v4760_v28 = vld [vmem:[#allocation2 + $0x4e] sm:$0xff] }
 0x6b2   : > { %5091 = vrot.lane.b32.xlu1 %v11892_v48, %s7029_s8  ;;  %5089 = vrot.lane.b32.xlu0 %v11894_v24, %s7029_s8 }
 0x6b4   : > { %v12072_v0 = vpop.permute.xlu1 %4873  ;;  %v12074_v16 = vpop.permute.xlu0 %4871 }
 0x6b5   : > { %14125 = vst [vmem:[#allocation12_spill] sm:$0xff] %v12072_v0  ;;  %14126 = vst [vmem:[#allocation13_spill] sm:$0xff] %v12074_v16  ;;  %v4687_v0 = vld [vmem:[#allocation2 + $0x44] sm:$0xff]  ;;  %v4688_v16 = vld [vmem:[#allocation2 + $0x4c] sm:$0xff] }
 0x6b6   : > { %5095 = vrot.lane.b32.xlu1 %v11900_v7, %s7029_s8  ;;  %5093 = vrot.lane.b32.xlu0 %v11902_v32, %s7029_s8 }
 0x6b8   : > { %v12080_v31 = vpop.permute.xlu1 %4877  ;;  %v12082_v9 = vpop.permute.xlu0 %4875 }
 0x6b9   : > { %14127 = vst [vmem:[#allocation14_spill] sm:$0xff] %v12080_v31  ;;  %14128 = vst [vmem:[#allocation15_spill] sm:$0xff] %v12082_v9  ;;  %v4722_v31 = vld [vmem:[#allocation2 + $0x3d] sm:$0xff] }
 0x6ba   : > { %5099 = vrot.lane.b32.xlu1 %v11908_v20, %s7029_s8  ;;  %5097 = vrot.lane.b32.xlu0 %v11910_v60, %s7029_s8  ;;  %v4758_v9 = vld [vmem:[#allocation2 + $0x3e] sm:$0xff] }
 0x6bd   : > { %v12088_v17 = vpop.permute.xlu1 %4881  ;;  %v12090_v1 = vpop.permute.xlu0 %4879 }
 0x6be   : > { %5103 = vrot.lane.b32.xlu1 %v11916_v15, %s7029_s8  ;;  %5101 = vrot.lane.b32.xlu0 %v11918_v40, %s7029_s8  ;;  %14129 = vst [vmem:[#allocation16_spill] sm:$0xff] %v12088_v17  ;;  %14130 = vst [vmem:[#allocation17_spill] sm:$0xff] %v12090_v1  ;;  %v4755_v17 = vld [vmem:[#allocation2 + $0x26] sm:$0xff]  ;;  %v4686_v1 = vld [vmem:[#allocation2 + $0x3c] sm:$0xff] }
 0x6c2   : > { %5107 = vrot.lane.b32.xlu1 %v11924_v10, %s7029_s8  ;;  %5105 = vrot.lane.b32.xlu0 %v11926_v53, %s7029_s8  ;;  %v12096_v29 = vpop.permute.xlu1 %4885  ;;  %v12098_v51 = vpop.permute.xlu0 %4883 }
 0x6c3   : > { %14131 = vst [vmem:[#allocation18_spill] sm:$0xff] %v12096_v29  ;;  %14132 = vst [vmem:[#allocation19_spill] sm:$0xff] %v12098_v51  ;;  %v4657_v29 = vld [vmem:[#allocation2 + $0x73] sm:$0xff] }
 0x6c4   : > { %v4681_v51 = vld [vmem:[#allocation2 + $0x14] sm:$0xff] }
 0x6c6   : > { %5111 = vrot.lane.b32.xlu1 %v11932_v25, %s7029_s8  ;;  %5109 = vrot.lane.b32.xlu0 %v11934_v44, %s7029_s8  ;;  %v12104_v52 = vpop.permute.xlu1 %4889  ;;  %v12106_v57 = vpop.permute.xlu0 %4887 }
 0x6c7   : > { %14133 = vst [vmem:[#allocation20_spill] sm:$0xff] %v12104_v52  ;;  %14134 = vst [vmem:[#allocation21_spill] sm:$0xff] %v12106_v57  ;;  %v6168_v52 = vld [vmem:[%s13106_s4 + $0x28] sm:$0xff]  ;;  %v4658_v57 = vld [vmem:[#allocation2 + $0x7b] sm:$0xff] }
 0x6ca   : > { %5115 = vrot.lane.b32.xlu1 %v11940_v61, %s7029_s8  ;;  %5113 = vrot.lane.b32.xlu0 %v11942_v54, %s7029_s8 }
 0x6cb   : > { %v12112_v41 = vpop.permute.xlu1 %4893  ;;  %v12114_v48 = vpop.permute.xlu0 %4891 }
 0x6cc   : > { %14135 = vst [vmem:[#allocation22_spill] sm:$0xff] %v12112_v41  ;;  %14136 = vst [vmem:[#allocation23_spill] sm:$0xff] %v12114_v48  ;;  %v4655_v48 = vld [vmem:[#allocation2 + $0x63] sm:$0xff] }
 0x6ce   : > { %5119 = vrot.lane.b32.xlu1 %v11948_v22, %s7029_s8  ;;  %5117 = vrot.lane.b32.xlu0 %v11950_v6, %s7029_s8 }
 0x6d0   : > { %v12120_v24 = vpop.permute.xlu1 %4897  ;;  %v12122_v7 = vpop.permute.xlu0 %4895 }
 0x6d1   : > { %14137 = vst [vmem:[#allocation24_spill] sm:$0xff] %v12120_v24  ;;  %14138 = vst [vmem:[#allocation25_spill] sm:$0xff] %v12122_v7  ;;  %v4653_v7 = vld [vmem:[#allocation2 + $0x53] sm:$0xff] }
 0x6d2   : > { %5123 = vrot.lane.b32.xlu1 %v11960_v46, %s7029_s8  ;;  %5121 = vrot.lane.b32.xlu0 %v11962_v26, %s7029_s8  ;;  %v4644_v26 = vld [vmem:[#allocation2 + $0x12a] sm:$0xff]  ;;  %v6170_v24 = vld [vmem:[%s13106_s4 + $0x38] sm:$0xff] }
 0x6d4   : > { %v12128_v32 = vpop.permute.xlu1 %4973  ;;  %v12130_v20 = vpop.permute.xlu0 %4971 }
 0x6d6   : > { %5127 = vrot.lane.b32.xlu1 %v11972_v35, %s7029_s8  ;;  %5125 = vrot.lane.b32.xlu0 %v11974_v11, %s7029_s8  ;;  %v4643_v35 = vld [vmem:[#allocation2 + $0x122] sm:$0xff] }
 0x6d8   : > { %v12136_v60 = vpop.permute.xlu1 %4977  ;;  %v12138_v15 = vpop.permute.xlu0 %4975 }
 0x6da   : > { %5131 = vrot.lane.b32.xlu1 %v11984_v2, %s7029_s8  ;;  %5129 = vrot.lane.b32.xlu0 %v11986_v21, %s7029_s8  ;;  %v4646_v21 = vld [vmem:[#allocation2 + $0x1b] sm:$0xff] }
 0x6dc   : > { %v12144_v40 = vpop.permute.xlu1 %4981  ;;  %v12146_v10 = vpop.permute.xlu0 %4979 }
 0x6de   : > { %5135 = vrot.lane.b32.xlu1 %v11996_v56, %s7029_s8  ;;  %5133 = vrot.lane.b32.xlu0 %v11998_v43, %s7029_s8  ;;  %v4645_v56 = vld [vmem:[#allocation2 + $0x13] sm:$0xff] }
 0x6e0   : > { %v12152_v53 = vpop.permute.xlu1 %4985  ;;  %v12154_v25 = vpop.permute.xlu0 %4983 }
 0x6e2   : > { %5139 = vrot.lane.b32.xlu1 %v12008_v3, %s7029_s8  ;;  %5137 = vrot.lane.b32.xlu0 %v12010_v47, %s7029_s8  ;;  %v4648_v47 = vld [vmem:[#allocation2 + $0x2b] sm:$0xff] }
 0x6e4   : > { %v12160_v44 = vpop.permute.xlu1 %4989  ;;  %v12162_v61 = vpop.permute.xlu0 %4987 }
 0x6e6   : > { %5143 = vrot.lane.b32.xlu1 %v12020_v23, %s7029_s8  ;;  %5141 = vrot.lane.b32.xlu0 %v12022_v62, %s7029_s8  ;;  %v4647_v23 = vld [vmem:[#allocation2 + $0x23] sm:$0xff] }
 0x6e8   : > { %v12168_v54 = vpop.permute.xlu1 %4993  ;;  %v12170_v22 = vpop.permute.xlu0 %4991 }
 0x6ea   : > { %5147 = vrot.lane.b32.xlu1 %v12032_v42, %s7029_s8  ;;  %5145 = vrot.lane.b32.xlu0 %v12034_v45, %s7029_s8  ;;  %v4650_v45 = vld [vmem:[#allocation2 + $0x3b] sm:$0xff] }
 0x6ec   : > { %v12176_v6 = vpop.permute.xlu1 %4997  ;;  %v12178_v46 = vpop.permute.xlu0 %4995 }
 0x6ed   : > { %14139 = vst [vmem:[#allocation26_spill] sm:$0xff] %v12176_v6  ;;  %14140 = vst [vmem:[#allocation27_spill] sm:$0xff] %v12178_v46  ;;  %v4698_v6 = vld [vmem:[#allocation2 + $0x9c] sm:$0xff] }
 0x6ee   : > { %5151 = vrot.lane.b32.xlu1 %v4644_v26, %s7029_s8  ;;  %5149 = vrot.lane.b32.xlu0 %v4643_v35, %s7029_s8  ;;  %v4649_v26 = vld [vmem:[#allocation2 + $0x33] sm:$0xff] }
 0x6ef   : > { %v4733_v46 = vld [vmem:[#allocation2 + $0x95] sm:$0xff] }
 0x6f0   : > { %v12182_v11 = vpop.permute.xlu1 %5001  ;;  %v12184_v2 = vpop.permute.xlu0 %4999 }
 0x6f1   : > { %14141 = vst [vmem:[#allocation28_spill] sm:$0xff] %v12182_v11  ;;  %14142 = vst [vmem:[#allocation29_spill] sm:$0xff] %v12184_v2  ;;  %v4732_v11 = vld [vmem:[#allocation2 + $0x8d] sm:$0xff] }
 0x6f2   : > { %5227 = vrot.lane.b32.xlu1 %v4646_v21, %s7031_s10  ;;  %5225 = vrot.lane.b32.xlu0 %v4645_v56, %s7031_s10  ;;  %v4652_v56 = vld [vmem:[#allocation2 + $0x4b] sm:$0xff] }
 0x6f4   : > { %v12188_v43 = vpop.permute.xlu1 %5005  ;;  %v12190_v3 = vpop.permute.xlu0 %5003 }
 0x6f5   : > { %14143 = vst [vmem:[#allocation30_spill] sm:$0xff] %v12188_v43  ;;  %14144 = vst [vmem:[#allocation31_spill] sm:$0xff] %v12190_v3  ;;  %v4766_v43 = vld [vmem:[#allocation2 + $0x7e] sm:$0xff] }
 0x6f6   : > { %5231 = vrot.lane.b32.xlu1 %v4648_v47, %s7031_s10  ;;  %5229 = vrot.lane.b32.xlu0 %v4647_v23, %s7031_s10  ;;  %v6171_v47 = vld [vmem:[%s13106_s4 + $0x40] sm:$0xff] }
 0x6f7   : > { %6917 = vmatprep.subr.mxu1 %v6171_v47  ;;  %v4731_v3 = vld [vmem:[#allocation2 + $0x85] sm:$0xff] }
 0x6f8   : > { %v12194_v62 = vpop.permute.xlu1 %5009  ;;  %v12196_v42 = vpop.permute.xlu0 %5007  ;;  %6918 = vmatpush3.msra.mxu1 %v6171_v47  ;;  %v4656_v47 = vld [vmem:[#allocation2 + $0x6b] sm:$0xff] }
 0x6f9   : > { %14145 = vst [vmem:[#allocation32_spill] sm:$0xff] %v12194_v62  ;;  %14146 = vst [vmem:[#allocation33_spill] sm:$0xff] %v12196_v42  ;;  %6919 = vmatprep.subr.mxu1 %v6170_v24  ;;  %v4725_v42 = vld [vmem:[#allocation2 + $0x55] sm:$0xff] }
 0x6fa   : > { %5235 = vrot.lane.b32.xlu1 %v4650_v45, %s7031_s10  ;;  %5233 = vrot.lane.b32.xlu0 %v4649_v26, %s7031_s10  ;;  %v4654_v26 = vld [vmem:[#allocation2 + $0x5b] sm:$0xff] }
 0x6fb   : > { %6920 = vmatpush3.msra.mxu1 %v6170_v24  ;;  %v6167_v24 = vld [vmem:[%s13106_s4 + $0x20] sm:$0xff] }
 0x6fc   : > { %v12200_v35 = vpop.permute.xlu1 %5013  ;;  %v12202_v21 = vpop.permute.xlu0 %5011 }
 0x6fd   : > { %14147 = vst [vmem:[#allocation34_spill] sm:$0xff] %v12200_v35  ;;  %14148 = vst [vmem:[#allocation35_spill] sm:$0xff] %v12202_v21  ;;  %v4759_v35 = vld [vmem:[#allocation2 + $0x46] sm:$0xff] }
 0x6fe   : > { %5239 = vrot.lane.b32.xlu1 %v4652_v56, %s7031_s10  ;;  %5237 = vrot.lane.b32.xlu0 %v4651_v12, %s7031_s10  ;;  %v6169_v12 = vld [vmem:[%s13106_s4 + $0x30] sm:$0xff] }
 0x6ff   : > { %6921 = vmatprep.subr.mxu1 %v6169_v12 }
 0x700   : > { %v12209_v23 = vpop.permute.xlu1 %5017  ;;  %v12211_v45 = vpop.permute.xlu0 %5015  ;;  %6922 = vmatpush3.msra.mxu1 %v6169_v12 }
 0x701   : > { %14149 = vst [vmem:[#allocation36_spill] sm:$0xff] %v12209_v23  ;;  %14150 = vst [vmem:[#allocation37_spill] sm:$0xff] %v12211_v45  ;;  %6923 = vmatprep.subr.mxu1 %v6168_v52  ;;  %v4723_v45 = vld [vmem:[#allocation2 + $0x45] sm:$0xff] }
 0x702   : > { %5243 = vrot.lane.b32.xlu1 %v4654_v26, %s7031_s10  ;;  %5241 = vrot.lane.b32.xlu0 %v4653_v7, %s7031_s10 }
 0x703   : > { %6924 = vmatpush3.msra.mxu1 %v6168_v52  ;;  %v6165_v52 = vld [vmem:[%s13106_s4 + $0x10] sm:$0xff] }
 0x704   : > { %v12221_v56 = vpop.permute.xlu1 %5021  ;;  %v12223_v41 = vpop.permute.xlu0 %5019  ;;  %6925 = vmatprep.subr.mxu1 %v6167_v24 }
 0x705   : > { %14151 = vst [vmem:[#allocation38_spill] sm:$0xff] %v12221_v56  ;;  %14152 = vst [vmem:[#allocation39_spill] sm:$0xff] %v12223_v41  ;;  %6926 = vmatpush3.msra.mxu1 %v6167_v24  ;;  %v6164_v24 = vld [vmem:[%s13106_s4 + $0x8] sm:$0xff]  ;;  %v4757_v56 = vld [vmem:[#allocation2 + $0x36] sm:$0xff] }
 0x706   : > { %5247 = vrot.lane.b32.xlu1 %v4656_v47, %s7031_s10  ;;  %5245 = vrot.lane.b32.xlu0 %v4655_v48, %s7031_s10  ;;  %v6166_v48 = vld [vmem:[%s13106_s4 + $0x18] sm:$0xff] }
 0x707   : > { %6927 = vmatprep.subr.mxu1 %v6166_v48 }
 0x708   : > { %v12230_v7 = vpop.permute.xlu1 %5025  ;;  %v12232_v26 = vpop.permute.xlu0 %5023  ;;  %6928 = vmatpush3.msra.mxu1 %v6166_v48 }
 0x709   : > { %14153 = vst [vmem:[#allocation40_spill] sm:$0xff] %v12230_v7  ;;  %14154 = vst [vmem:[#allocation41_spill] sm:$0xff] %v12232_v26  ;;  %v4659_v7 = vld [vmem:[#allocation2 + $0x83] sm:$0xff]  ;;  %6929 = vmatprep.subr.mxu1 %v6165_v52  ;;  %v4720_v26 = vld [vmem:[#allocation2 + $0x2d] sm:$0xff] }
 0x70a   : > { %5251 = vrot.lane.b32.xlu1 %v4658_v57, %s7031_s10  ;;  %5249 = vrot.lane.b32.xlu0 %v4657_v29, %s7031_s10 }
 0x70b   : > { %6930 = vmatpush3.msra.mxu1 %v6165_v52 }
 0x70c   : > { %v12242_v12 = vpop.permute.xlu1 %5029  ;;  %v12244_v47 = vpop.permute.xlu0 %5027  ;;  %6931 = vmatprep.subr.mxu1 %v6164_v24 }
 0x70d   : > { %14155 = vst [vmem:[#allocation42_spill] sm:$0xff] %v12242_v12  ;;  %14156 = vst [vmem:[#allocation43_spill] sm:$0xff] %v12244_v47  ;;  %v4683_v12 = vld [vmem:[#allocation2 + $0x24] sm:$0xff]  ;;  %v4682_v47 = vld [vmem:[#allocation2 + $0x1c] sm:$0xff]  ;;  %6932 = vmatpush3.msra.mxu1 %v6164_v24 }
 0x70e   : > { %5369 = vrot.lane.b32.xlu1 %v4681_v51, %s7033_s15  ;;  %5253 = vrot.lane.b32.xlu0 %v4659_v7, %s7031_s10  ;;  %v6163_v51 = vld [vmem:[%s13106_s4] sm:$0xff] }
 0x70f   : > { %6933 = vmatprep.subr.mxu1 %v6163_v51 }
 0x710   : > { %v12251_v29 = vpop.permute.xlu1 %5033  ;;  %v12253_v57 = vpop.permute.xlu0 %5031  ;;  %6934 = vmatpush3.msra.mxu1 %v6163_v51 }
 0x711   : > { %14157 = vst [vmem:[#allocation44_spill] sm:$0xff] %v12251_v29  ;;  %14158 = vst [vmem:[#allocation45_spill] sm:$0xff] %v12253_v57  ;;  %v4719_v29 = vld [vmem:[#allocation2 + $0x25] sm:$0xff] }
 0x712   : > { %5479 = vrot.lane.b32.xlu1 %v4683_v12, %s7035_s17  ;;  %5371 = vrot.lane.b32.xlu0 %v4682_v47, %s7033_s15  ;;  %v4684_v57 = vld [vmem:[#allocation2 + $0x2c] sm:$0xff] }
 0x714   : > { %v12263_v7 = vpop.permute.xlu1 %5037  ;;  %v12265_v48 = vpop.permute.xlu0 %5035 }
 0x715   : > { %14159 = vst [vmem:[#allocation46_spill] sm:$0xff] %v12263_v7  ;;  %14160 = vst [vmem:[#allocation47_spill] sm:$0xff] %v12265_v48  ;;  %v4756_v48 = vld [vmem:[#allocation2 + $0x2e] sm:$0xff] }
 0x716   : > { %5623 = vrot.lane.b32.xlu1 %v4719_v29, %s7037_s19  ;;  %5481 = vrot.lane.b32.xlu0 %v4684_v57, %s7035_s17 }
 0x718   : > { %v12269_v52 = vpop.permute.xlu1 %5041  ;;  %v12271_v47 = vpop.permute.xlu0 %5039 }
 0x719   : > { %14161 = vst [vmem:[#allocation48_spill] sm:$0xff] %v12269_v52  ;;  %14162 = vst [vmem:[#allocation49_spill] sm:$0xff] %v12271_v47  ;;  %v4685_v47 = vld [vmem:[#allocation2 + $0x34] sm:$0xff] }
 0x71a   : > { %5767 = vrot.lane.b32.xlu1 %v4755_v17, %s7039_s9  ;;  %5625 = vrot.lane.b32.xlu0 %v4720_v26, %s7037_s19  ;;  %v4721_v52 = vld [vmem:[#allocation2 + $0x35] sm:$0xff] }
 0x71c   : > { %v12275_v7 = vpop.permute.xlu1 %5083  ;;  %v12277_v24 = vpop.permute.xlu0 %5081 }
 0x71e   : > { %5769 = vrot.lane.b32.xlu1 %v4756_v48, %s7039_s9  ;;  %5373 = vrot.lane.b32.xlu0 %v4683_v12, %s7033_s15 }
 0x720   : > { %v12281_v29 = vpop.permute.xlu1 %5087  ;;  %v12283_v51 = vpop.permute.xlu0 %5085 }
 0x722   : > { %5483 = vrot.lane.b32.xlu1 %v4685_v47, %s7035_s17  ;;  %5375 = vrot.lane.b32.xlu0 %v4684_v57, %s7033_s15 }
 0x724   : > { %v12287_v17 = vpop.permute.xlu1 %5091  ;;  %v12289_v26 = vpop.permute.xlu0 %5089 }
 0x726   : > { %5627 = vrot.lane.b32.xlu1 %v4721_v52, %s7037_s19  ;;  %5485 = vrot.lane.b32.xlu0 %v4686_v1, %s7035_s17 }
 0x728   : > { %v12293_v12 = vpop.permute.xlu1 %5095  ;;  %v12295_v48 = vpop.permute.xlu0 %5093 }
 0x72a   : > { %5771 = vrot.lane.b32.xlu1 %v4757_v56, %s7039_s9  ;;  %5629 = vrot.lane.b32.xlu0 %v4722_v31, %s7037_s19 }
 0x72c   : > { %v12299_v57 = vpop.permute.xlu1 %5099  ;;  %v12301_v41 = vpop.permute.xlu0 %5097 }
 0x72e   : > { %5773 = vrot.lane.b32.xlu1 %v4758_v9, %s7039_s9  ;;  %5377 = vrot.lane.b32.xlu0 %v4685_v47, %s7033_s15 }
 0x730   : > { %v12305_v52 = vpop.permute.xlu1 %5103  ;;  %v12307_v23 = vpop.permute.xlu0 %5101 }
 0x732   : > { %5487 = vrot.lane.b32.xlu1 %v4687_v0, %s7035_s17  ;;  %5379 = vrot.lane.b32.xlu0 %v4686_v1, %s7033_s15 }
 0x734   : > { %v12311_v56 = vpop.permute.xlu1 %5107  ;;  %v12313_v31 = vpop.permute.xlu0 %5105 }
 0x735   : > { %14163 = vst [vmem:[#allocation50_spill] sm:$0xff] %v12311_v56  ;;  %14164 = vst [vmem:[#allocation51_spill] sm:$0xff] %v12313_v31  ;;  %v4661_v31 = vld [vmem:[#allocation2 + $0x93] sm:$0xff] }
 0x736   : > { %5631 = vrot.lane.b32.xlu1 %v4723_v45, %s7037_s19  ;;  %5489 = vrot.lane.b32.xlu0 %v4688_v16, %s7035_s17 }
 0x738   : > { %v12317_v9 = vpop.permute.xlu1 %5111  ;;  %v12319_v47 = vpop.permute.xlu0 %5109 }
 0x739   : > { %14165 = vst [vmem:[#allocation52_spill] sm:$0xff] %v12317_v9  ;;  %14166 = vst [vmem:[#allocation53_spill] sm:$0xff] %v12319_v47  ;;  %v4767_v9 = vld [vmem:[#allocation2 + $0x86] sm:$0xff] }
 0x73a   : > { %5775 = vrot.lane.b32.xlu1 %v4759_v35, %s7039_s9  ;;  %5633 = vrot.lane.b32.xlu0 %v4724_v13, %s7037_s19  ;;  %v4660_v47 = vld [vmem:[#allocation2 + $0x8b] sm:$0xff] }
 0x73c   : > { %v12323_v1 = vpop.permute.xlu1 %5115  ;;  %v12325_v21 = vpop.permute.xlu0 %5113 }
 0x73d   : > { %14167 = vst [vmem:[#allocation54_spill] sm:$0xff] %v12323_v1  ;;  %14168 = vst [vmem:[#allocation55_spill] sm:$0xff] %v12325_v21  ;;  %v4694_v1 = vld [vmem:[#allocation2 + $0x7c] sm:$0xff]  ;;  %v4695_v21 = vld [vmem:[#allocation2 + $0x84] sm:$0xff] }
 0x73e   : > { %5777 = vrot.lane.b32.xlu1 %v4760_v28, %s7039_s9  ;;  %5381 = vrot.lane.b32.xlu0 %v4687_v0, %s7033_s15 }
 0x740   : > { %v12329_v45 = vpop.permute.xlu1 %5119  ;;  %v12331_v62 = vpop.permute.xlu0 %5117 }
 0x741   : > { %14169 = vst [vmem:[#allocation56_spill] sm:$0xff] %v12329_v45  ;;  %14170 = vst [vmem:[#allocation57_spill] sm:$0xff] %v12331_v62  ;;  %v4761_v45 = vld [vmem:[#allocation2 + $0x56] sm:$0xff] }
 0x742   : > { %5491 = vrot.lane.b32.xlu1 %v4689_v39, %s7035_s17  ;;  %5383 = vrot.lane.b32.xlu0 %v4688_v16, %s7033_s15  ;;  %v4726_v62 = vld [vmem:[#allocation2 + $0x5d] sm:$0xff] }
 0x744   : > { %v12335_v35 = vpop.permute.xlu1 %5123  ;;  %v12337_v13 = vpop.permute.xlu0 %5121 }
 0x745   : > { %14171 = vst [vmem:[#allocation58_spill] sm:$0xff] %v12335_v35  ;;  %14172 = vst [vmem:[#allocation59_spill] sm:$0xff] %v12337_v13  ;;  %v4762_v13 = vld [vmem:[#allocation2 + $0x5e] sm:$0xff] }
 0x746   : > { %5635 = vrot.lane.b32.xlu1 %v4725_v42, %s7037_s19  ;;  %5493 = vrot.lane.b32.xlu0 %v4690_v36, %s7035_s17 }
 0x748   : > { %v12341_v28 = vpop.permute.xlu1 %5127  ;;  %v12343_v0 = vpop.permute.xlu0 %5125 }
 0x749   : > { %14173 = vst [vmem:[#allocation60_spill] sm:$0xff] %v12341_v28  ;;  %14174 = vst [vmem:[#allocation61_spill] sm:$0xff] %v12343_v0  ;;  %v4691_v0 = vld [vmem:[#allocation2 + $0x64] sm:$0xff] }
 0x74a   : > { %5779 = vrot.lane.b32.xlu1 %v4761_v45, %s7039_s9  ;;  %5637 = vrot.lane.b32.xlu0 %v4726_v62, %s7037_s19 }
 0x74c   : > { %v12347_v16 = vpop.permute.xlu1 %5131  ;;  %v12349_v35 = vpop.permute.xlu0 %5129 }
 0x74d   : > { %14175 = vst [vmem:[#allocation62_spill] sm:$0xff] %v12347_v16  ;;  %14176 = vst [vmem:[#allocation63_spill] sm:$0xff] %v12349_v35  ;;  %v4727_v16 = vld [vmem:[#allocation2 + $0x65] sm:$0xff] }
 0x74e   : > { %5781 = vrot.lane.b32.xlu1 %v4762_v13, %s7039_s9  ;;  %5385 = vrot.lane.b32.xlu0 %v4689_v39, %s7033_s15  ;;  %v4692_v35 = vld [vmem:[#allocation2 + $0x6c] sm:$0xff] }
 0x750   : > { %v12353_v42 = vpop.permute.xlu1 %5135  ;;  %v12355_v28 = vpop.permute.xlu0 %5133 }
 0x751   : > { %14177 = vst [vmem:[#allocation64_spill] sm:$0xff] %v12353_v42  ;;  %14178 = vst [vmem:[#allocation65_spill] sm:$0xff] %v12355_v28  ;;  %v4763_v42 = vld [vmem:[#allocation2 + $0x66] sm:$0xff] }
 0x752   : > { %5495 = vrot.lane.b32.xlu1 %v4691_v0, %s7035_s17  ;;  %5387 = vrot.lane.b32.xlu0 %v4690_v36, %s7033_s15  ;;  %v4728_v28 = vld [vmem:[#allocation2 + $0x6d] sm:$0xff] }
 0x754   : > { %v12359_v45 = vpop.permute.xlu1 %5139  ;;  %v12361_v62 = vpop.permute.xlu0 %5137 }
 0x755   : > { %14179 = vst [vmem:[#allocation66_spill] sm:$0xff] %v12359_v45  ;;  %14180 = vst [vmem:[#allocation67_spill] sm:$0xff] %v12361_v62  ;;  %v4764_v62 = vld [vmem:[#allocation2 + $0x6e] sm:$0xff] }
 0x756   : > { %5639 = vrot.lane.b32.xlu1 %v4727_v16, %s7037_s19  ;;  %5497 = vrot.lane.b32.xlu0 %v4692_v35, %s7035_s17 }
 0x758   : > { %v12365_v39 = vpop.permute.xlu1 %5143  ;;  %v12367_v13 = vpop.permute.xlu0 %5141 }
 0x759   : > { %14181 = vst [vmem:[#allocation68_spill] sm:$0xff] %v12365_v39  ;;  %14182 = vst [vmem:[#allocation69_spill] sm:$0xff] %v12367_v13  ;;  %v4693_v13 = vld [vmem:[#allocation2 + $0x74] sm:$0xff] }
 0x75a   : > { %5783 = vrot.lane.b32.xlu1 %v4763_v42, %s7039_s9  ;;  %5641 = vrot.lane.b32.xlu0 %v4728_v28, %s7037_s19 }
 0x75c   : > { %v12371_v36 = vpop.permute.xlu1 %5147  ;;  %v12373_v45 = vpop.permute.xlu0 %5145 }
 0x75d   : > { %14183 = vst [vmem:[#allocation70_spill] sm:$0xff] %v12371_v36  ;;  %14184 = vst [vmem:[#allocation71_spill] sm:$0xff] %v12373_v45  ;;  %v4729_v36 = vld [vmem:[#allocation2 + $0x75] sm:$0xff] }
 0x75e   : > { %5785 = vrot.lane.b32.xlu1 %v4764_v62, %s7039_s9  ;;  %5389 = vrot.lane.b32.xlu0 %v4691_v0, %s7033_s15 }
 0x760   : > { %v12377_v16 = vpop.permute.xlu1 %5151  ;;  %v12379_v39 = vpop.permute.xlu0 %5149 }
 0x761   : > { %14185 = vst [vmem:[#allocation72_spill] sm:$0xff] %v12377_v16  ;;  %14186 = vst [vmem:[#allocation73_spill] sm:$0xff] %v12379_v39  ;;  %v4765_v16 = vld [vmem:[#allocation2 + $0x76] sm:$0xff] }
 0x762   : > { %5499 = vrot.lane.b32.xlu1 %v4693_v13, %s7035_s17  ;;  %5391 = vrot.lane.b32.xlu0 %v4692_v35, %s7033_s15  ;;  %v4730_v39 = vld [vmem:[#allocation2 + $0x7d] sm:$0xff] }
 0x764   : > { %v12383_v42 = vpop.permute.xlu1 %5227  ;;  %v5226_v28 = vpop.permute.xlu0 %5225 }
 0x766   : > { %5643 = vrot.lane.b32.xlu1 %v4729_v36, %s7037_s19  ;;  %5501 = vrot.lane.b32.xlu0 %v4694_v1, %s7035_s17 }
 0x768   : > { %v12387_v62 = vpop.permute.xlu1 %5231  ;;  %v12389_v0 = vpop.permute.xlu0 %5229 }
 0x76a   : > { %5787 = vrot.lane.b32.xlu1 %v4765_v16, %s7039_s9  ;;  %5645 = vrot.lane.b32.xlu0 %v4730_v39, %s7037_s19 }
 0x76c   : > { %v12393_v35 = vpop.permute.xlu1 %5235  ;;  %v12395_v45 = vpop.permute.xlu0 %5233 }
 0x76e   : > { %5789 = vrot.lane.b32.xlu1 %v4766_v43, %s7039_s9  ;;  %5393 = vrot.lane.b32.xlu0 %v4693_v13, %s7033_s15 }
 0x770   : > { %v12399_v36 = vpop.permute.xlu1 %5239  ;;  %v12401_v14 = vpop.permute.xlu0 %5237 }
 0x772   : > { %5503 = vrot.lane.b32.xlu1 %v4695_v21, %s7035_s17  ;;  %5395 = vrot.lane.b32.xlu0 %v4694_v1, %s7033_s15 }
 0x774   : > { %v12405_v16 = vpop.permute.xlu1 %5243  ;;  %v12407_v39 = vpop.permute.xlu0 %5241 }
 0x776   : > { %5647 = vrot.lane.b32.xlu1 %v4731_v3, %s7037_s19  ;;  %5505 = vrot.lane.b32.xlu0 %v4696_v33, %s7035_s17 }
 0x778   : > { %v12411_v43 = vpop.permute.xlu1 %5247  ;;  %v12413_v13 = vpop.permute.xlu0 %5245 }
 0x77a   : > { %5791 = vrot.lane.b32.xlu1 %v4767_v9, %s7039_s9  ;;  %5649 = vrot.lane.b32.xlu0 %v4732_v11, %s7037_s19  ;;  %v4535_v9 = vld [vmem:[#allocation2] sm:$0xff] }
 0x77b   : > { %v5875_v55 = vsel %vm3170_vm1, %v4535_v9, %v11958_v30 }
 0x77c   : > { %v12417_v1 = vpop.permute.xlu1 %5251  ;;  %v12419_v34 = vpop.permute.xlu0 %5249 }
 0x77d   : > { %14187 = vst [vmem:[#allocation74_spill] sm:$0xff] %v12417_v1  ;;  %14188 = vst [vmem:[#allocation75_spill] sm:$0xff] %v12419_v34  ;;  %v4697_v1 = vld [vmem:[#allocation2 + $0x94] sm:$0xff] }
 0x77e   : > { %5397 = vrot.lane.b32.xlu1 %v4695_v21, %s7033_s15  ;;  %5255 = vrot.lane.b32.xlu0 %v4660_v47, %s7031_s10  ;;  %v4536_v21 = vld [vmem:[#allocation2 + $0x8] sm:$0xff]  ;;  %v5911_v47 = vsel %vm3244_vm3, %v5875_v55, %v12130_v20 }
 0x77f   : > { %v5876_v30 = vsel %vm3170_vm1, %v4536_v21, %v11956_v4 }
 0x780   : > { %v5370_v3 = vpop.permute.xlu1 %5369  ;;  %v12423_v2 = vpop.permute.xlu0 %5253  ;;  %v5912_v55 = vsel %vm3244_vm3, %v5876_v30, %v12128_v32 }
 0x781   : > { %14189 = vst [vmem:[#allocation76_spill] sm:$0xff] %v12423_v2 }
 0x782   : > { %5399 = vrot.lane.b32.xlu1 %v4696_v33, %s7033_s15  ;;  %5793 = vrot.lane.b32.xlu0 %v4768_v58, %s7039_s9  ;;  %v5947_v33 = vsel %vm3318_vm5, %v5911_v47, %v12277_v24  ;;  %v5948_v24 = vsel %vm3318_vm5, %v5912_v55, %v12275_v7  ;;  %v4770_v55 = vld [vmem:[#allocation2 + $0x9e] sm:$0xff] }
 0x783   : > { %v5983_v34 = vsel %vm3392_vm7, %v5947_v33, %v5226_v28  ;;  %v5984_v4 = vsel %vm3392_vm7, %v5948_v24, %v12383_v42 }
 0x784   : > { %v5480_v56 = vpop.permute.xlu1 %5479  ;;  %v5372_v11 = vpop.permute.xlu0 %5371  ;;  %v6019_v9 = vsel %vm3466_vm9, %v5983_v34, %v5370_v3  ;;  %v4769_v34 = vld [vmem:[#allocation2 + $0x96] sm:$0xff] }
 0x785   : > { %v6055_v20 = vsel %vm3540_vm11, %v6019_v9, %v5480_v56  ;;  %v4734_v3 = vld [vmem:[#allocation2 + $0x9d] sm:$0xff]  ;;  %v4537_v9 = vld [vmem:[#allocation2 + $0x10] sm:$0xff] }
 0x786   : > { %5509 = vrot.lane.b32.xlu1 %v4698_v6, %s7035_s17  ;;  %5507 = vrot.lane.b32.xlu0 %v4697_v1, %s7035_s17 }
 0x788   : > { %v5624_v58 = vpop.permute.xlu1 %5623  ;;  %v5482_v2 = vpop.permute.xlu0 %5481 }
 0x789   : > { %v6091_v28 = vsel %vm3614_vm13, %v6055_v20, %v5624_v58  ;;  %v4662_v58 = vld [vmem:[#allocation2 + $0x9b] sm:$0xff] }
 0x78a   : > { %5257 = vrot.lane.b32.xlu1 %v4661_v31, %s7031_s10  ;;  %5651 = vrot.lane.b32.xlu0 %v4733_v46, %s7037_s19  ;;  %v6020_v46 = vsel %vm3466_vm9, %v5984_v4, %v5372_v11  ;;  %v4700_v4 = vld [vmem:[#allocation2 + $0xac] sm:$0xff] }
 0x78b   : > { %v6056_v32 = vsel %vm3540_vm11, %v6020_v46, %v5482_v2  ;;  %v5877_v2 = vsel %vm3170_vm1, %v4537_v9, %v11970_v19  ;;  %v4736_v9 = vld [vmem:[#allocation2 + $0xad] sm:$0xff] }
 0x78c   : > { %v5768_v47 = vpop.permute.xlu1 %5767  ;;  %v5626_v33 = vpop.permute.xlu0 %5625  ;;  %v5913_v20 = vsel %vm3244_vm3, %v5877_v2, %v12138_v15  ;;  %v4539_v2 = vld [vmem:[#allocation2 + $0x20] sm:$0xff] }
 0x78d   : > { %v6127_v31 = vsel %vm4012_vm15, %v6091_v28, %v5768_v47  ;;  %v6092_v7 = vsel %vm3614_vm13, %v6056_v32, %v5626_v33  ;;  %v4538_v47 = vld [vmem:[#allocation2 + $0x18] sm:$0xff] }
 0x78e   : > { %5795 = vrot.lane.b32.xlu1 %v4769_v34, %s7039_s9  ;;  %5653 = vrot.lane.b32.xlu0 %v4734_v3, %s7037_s19  ;;  %v4699_v34 = vld [vmem:[#allocation2 + $0xa4] sm:$0xff]  ;;  %v5878_v19 = vsel %vm3170_vm1, %v4538_v47, %v11968_v18 }
 0x78f   : > { %6935 = vmatprep.mubr.msk.f32.mxu1 %vm4065_vm0, %v6127_v31  ;;  %v5914_v15 = vsel %vm3244_vm3, %v5878_v19, %v12136_v60  ;;  %v4540_v19 = vld [vmem:[#allocation2 + $0x28] sm:$0xff] }
 0x790   : > { %v5770_v56 = vpop.permute.xlu1 %5769  ;;  %v5374_v21 = vpop.permute.xlu0 %5373  ;;  %v5950_v3 = vsel %vm3318_vm5, %v5914_v15, %v12281_v29  ;;  %v4772_v15 = vld [vmem:[#allocation2 + $0xae] sm:$0xff] }
 0x791   : > { %v6128_v42 = vsel %vm4012_vm15, %v6092_v7, %v5770_v56  ;;  %v5986_v18 = vsel %vm3392_vm7, %v5950_v3, %v12387_v62  ;;  %v4663_v7 = vld [vmem:[#allocation2 + $0xa3] sm:$0xff] }
 0x792   : > { %5401 = vrot.lane.b32.xlu1 %v4697_v1, %s7033_s15  ;;  %5259 = vrot.lane.b32.xlu0 %v4662_v58, %s7031_s10  ;;  %v5949_v1 = vsel %vm3318_vm5, %v5913_v20, %v12283_v51  ;;  %v4735_v56 = vld [vmem:[#allocation2 + $0xa5] sm:$0xff] }
 0x793   : > { %6936 = vmatmul.mubr.msk.f32.vlgmr.msra.gmra.mxu1 %vm4065_vm0, %v6128_v42  ;;  %v5985_v33 = vsel %vm3392_vm7, %v5949_v1, %v12389_v0  ;;  %v4664_v20 = vld [vmem:[#allocation2 + $0xab] sm:$0xff]  ;;  %v5879_v1 = vsel %vm3170_vm1, %v4539_v2, %v11982_v59  ;;  %v5880_v59 = vsel %vm3170_vm1, %v4540_v19, %v11980_v27 }
 0x794   : > { %v5484_v11 = vpop.permute.xlu1 %5483  ;;  %v5376_v30 = vpop.permute.xlu0 %5375 }
 0x796   : > { %5403 = vrot.lane.b32.xlu1 %v4698_v6, %s7033_s15  ;;  %5797 = vrot.lane.b32.xlu0 %v4770_v55, %s7039_s9  ;;  %v6021_v6 = vsel %vm3466_vm9, %v5985_v33, %v5374_v21  ;;  %v6022_v21 = vsel %vm3466_vm9, %v5986_v18, %v5376_v30 }
 0x797   : > { %v6057_v51 = vsel %vm3540_vm11, %v6021_v6, %v5484_v11  ;;  %v4771_v11 = vld [vmem:[#allocation2 + $0xa6] sm:$0xff] }
 0x798   : > { %v5628_v24 = vpop.permute.xlu1 %5627  ;;  %v5486_v28 = vpop.permute.xlu0 %5485 }
 0x799   : > { %v6093_v0 = vsel %vm3614_vm13, %v6057_v51, %v5628_v24  ;;  %v6058_v60 = vsel %vm3540_vm11, %v6022_v21, %v5486_v28  ;;  %v5915_v24 = vsel %vm3244_vm3, %v5879_v1, %v12146_v10  ;;  %v5916_v10 = vsel %vm3244_vm3, %v5880_v59, %v12144_v40  ;;  %v4737_v21 = vld [vmem:[#allocation2 + $0xb5] sm:$0xff] }
 0x79a   : > { %5513 = vrot.lane.b32.xlu1 %v4700_v4, %s7035_s17  ;;  %5511 = vrot.lane.b32.xlu0 %v4699_v34, %s7035_s17  ;;  %v5951_v28 = vsel %vm3318_vm5, %v5915_v24, %v12289_v26  ;;  %v5952_v51 = vsel %vm3318_vm5, %v5916_v10, %v12287_v17  ;;  %v4666_v24 = vld [vmem:[#allocation2 + $0xbb] sm:$0xff] }
 0x79b   : > { %v5987_v6 = vsel %vm3392_vm7, %v5951_v28, %v12395_v45  ;;  %v5988_v27 = vsel %vm3392_vm7, %v5952_v51, %v12393_v35  ;;  %v4703_v51 = vld [vmem:[#allocation2 + $0xc4] sm:$0xff] }
 0x79c   : > { %v5772_v31 = vpop.permute.xlu1 %5771  ;;  %v5630_v46 = vpop.permute.xlu0 %5629 }
 0x79d   : > { %v6129_v32 = vsel %vm4012_vm15, %v6093_v0, %v5772_v31  ;;  %v6094_v29 = vsel %vm3614_vm13, %v6058_v60, %v5630_v46  ;;  %v4701_v46 = vld [vmem:[#allocation2 + $0xb4] sm:$0xff] }
 0x79e   : > { %5261 = vrot.lane.b32.xlu1 %v4663_v7, %s7031_s10  ;;  %5655 = vrot.lane.b32.xlu0 %v4735_v56, %s7037_s19  ;;  %v4665_v56 = vld [vmem:[#allocation2 + $0xb3] sm:$0xff] }
 0x79f   : > { %6938 = vmatprep.mubr.msk.f32.mxu1 %vm4065_vm0, %v6129_v32 }
 0x7a0   : > { %v5774_v42 = vpop.permute.xlu1 %5773  ;;  %v5378_v58 = vpop.permute.xlu0 %5377 }
 0x7a1   : > { %v6130_v62 = vsel %vm4012_vm15, %v6094_v29, %v5774_v42  ;;  %v4541_v42 = vld [vmem:[#allocation2 + $0x30] sm:$0xff] }
 0x7a2   : > { %5799 = vrot.lane.b32.xlu1 %v4771_v11, %s7039_s9  ;;  %5657 = vrot.lane.b32.xlu0 %v4736_v9, %s7037_s19  ;;  %v5881_v11 = vsel %vm3170_vm1, %v4541_v42, %v11994_v49 }
 0x7a3   : > { %6939 = vmatmul.mubr.msk.f32.gmra.mxu1 %vm4065_vm0, %v6130_v62  ;;  %v4738_v62 = vld [vmem:[#allocation2 + $0xbd] sm:$0xff]  ;;  %v5917_v9 = vsel %vm3244_vm3, %v5881_v11, %v12154_v25 }
 0x7a4   : > { %v5488_v30 = vpop.permute.xlu1 %5487  ;;  %v5380_v55 = vpop.permute.xlu0 %5379 }
 0x7a5   : > { %v6024_v18 = vsel %vm3466_vm9, %v5988_v27, %v5380_v55  ;;  %v4667_v27 = vld [vmem:[#allocation2 + $0xc3] sm:$0xff] }
 0x7a6   : > { %5405 = vrot.lane.b32.xlu1 %v4699_v34, %s7033_s15  ;;  %5263 = vrot.lane.b32.xlu0 %v4664_v20, %s7031_s10  ;;  %v6023_v34 = vsel %vm3466_vm9, %v5987_v6, %v5378_v58  ;;  %v4773_v58 = vld [vmem:[#allocation2 + $0xb6] sm:$0xff] }
 0x7a7   : > { %v6059_v26 = vsel %vm3540_vm11, %v6023_v34, %v5488_v30  ;;  %v5953_v30 = vsel %vm3318_vm5, %v5917_v9, %v12295_v48  ;;  %v4542_v20 = vld [vmem:[#allocation2 + $0x38] sm:$0xff] }
 0x7a8   : > { %v5632_v47 = vpop.permute.xlu1 %5631  ;;  %v5490_v33 = vpop.permute.xlu0 %5489  ;;  %v5989_v1 = vsel %vm3392_vm7, %v5953_v30, %v12401_v14  ;;  %v5882_v49 = vsel %vm3170_vm1, %v4542_v20, %v11992_v50 }
 0x7a9   : > { %v6095_v45 = vsel %vm3614_vm13, %v6059_v26, %v5632_v47  ;;  %v6060_v40 = vsel %vm3540_vm11, %v6024_v18, %v5490_v33  ;;  %v5918_v25 = vsel %vm3244_vm3, %v5882_v49, %v12152_v53  ;;  %v4706_v49 = vld [vmem:[#allocation2 + $0xdc] sm:$0xff] }
 0x7aa   : > { %5407 = vrot.lane.b32.xlu1 %v4700_v4, %s7033_s15  ;;  %5801 = vrot.lane.b32.xlu0 %v4772_v15, %s7039_s9  ;;  %v4702_v4 = vld [vmem:[#allocation2 + $0xbc] sm:$0xff]  ;;  %v5954_v47 = vsel %vm3318_vm5, %v5918_v25, %v12293_v12 }
 0x7ab   : > { %v5990_v50 = vsel %vm3392_vm7, %v5954_v47, %v12399_v36  ;;  %v4774_v15 = vld [vmem:[#allocation2 + $0xbe] sm:$0xff]  ;;  %v4704_v36 = vld [vmem:[#allocation2 + $0xcc] sm:$0xff] }
 0x7ac   : > { %v5776_v3 = vpop.permute.xlu1 %5775  ;;  %v5634_v0 = vpop.permute.xlu0 %5633 }
 0x7ad   : > { %v6131_v31 = vsel %vm4012_vm15, %v6095_v45, %v5776_v3  ;;  %v6096_v17 = vsel %vm3614_vm13, %v6060_v40, %v5634_v0  ;;  %v4543_v0 = vld [vmem:[#allocation2 + $0x40] sm:$0xff] }
 0x7ae   : > { %5517 = vrot.lane.b32.xlu1 %v4702_v4, %s7035_s17  ;;  %5515 = vrot.lane.b32.xlu0 %v4701_v46, %s7035_s17 }
 0x7af   : > { %6941 = vmatprep.mubr.msk.f32.mxu1 %vm4065_vm0, %v6131_v31  ;;  %v4739_v31 = vld [vmem:[#allocation2 + $0xc5] sm:$0xff] }
 0x7b0   : > { %v5778_v32 = vpop.permute.xlu1 %5777  ;;  %v5382_v7 = vpop.permute.xlu0 %5381 }
 0x7b1   : > { %v6132_v35 = vsel %vm4012_vm15, %v6096_v17, %v5778_v32  ;;  %v6025_v28 = vsel %vm3466_vm9, %v5989_v1, %v5382_v7  ;;  %v4544_v32 = vld [vmem:[#allocation2 + $0x48] sm:$0xff] }
 0x7b2   : > { %5265 = vrot.lane.b32.xlu1 %v4665_v56, %s7031_s10  ;;  %5659 = vrot.lane.b32.xlu0 %v4737_v21, %s7037_s19  ;;  %v4740_v56 = vld [vmem:[#allocation2 + $0xcd] sm:$0xff] }
 0x7b3   : > { %6942 = vmatmul.mubr.msk.f32.gmra.mxu1 %vm4065_vm0, %v6132_v35  ;;  %v4775_v35 = vld [vmem:[#allocation2 + $0xc6] sm:$0xff] }
 0x7b4   : > { %v5492_v60 = vpop.permute.xlu1 %5491  ;;  %v5384_v29 = vpop.permute.xlu0 %5383 }
 0x7b5   : > { %v6061_v48 = vsel %vm3540_vm11, %v6025_v28, %v5492_v60  ;;  %v6026_v59 = vsel %vm3466_vm9, %v5990_v50, %v5384_v29  ;;  %v4705_v28 = vld [vmem:[#allocation2 + $0xd4] sm:$0xff] }
 0x7b6   : > { %5803 = vrot.lane.b32.xlu1 %v4773_v58, %s7039_s9  ;;  %5661 = vrot.lane.b32.xlu0 %v4738_v62, %s7037_s19  ;;  %v4668_v62 = vld [vmem:[#allocation2 + $0xcb] sm:$0xff] }
 0x7b8   : > { %v5636_v55 = vpop.permute.xlu1 %5635  ;;  %v5494_v2 = vpop.permute.xlu0 %5493 }
 0x7b9   : > { %v6097_v14 = vsel %vm3614_vm13, %v6061_v48, %v5636_v55  ;;  %v6062_v53 = vsel %vm3540_vm11, %v6026_v59, %v5494_v2  ;;  %v4776_v2 = vld [vmem:[#allocation2 + $0xce] sm:$0xff] }
 0x7ba   : > { %5409 = vrot.lane.b32.xlu1 %v4701_v46, %s7033_s15  ;;  %5267 = vrot.lane.b32.xlu0 %v4666_v24, %s7031_s10  ;;  %v4545_v24 = vld [vmem:[#allocation2 + $0x50] sm:$0xff] }
 0x7bb   : > { %v5885_v25 = vsel %vm3170_vm1, %v4545_v24, %v12018_v37 }
 0x7bc   : > { %v5780_v33 = vpop.permute.xlu1 %5779  ;;  %v5638_v19 = vpop.permute.xlu0 %5637  ;;  %v5921_v48 = vsel %vm3244_vm3, %v5885_v25, %v12170_v22 }
 0x7bd   : > { %v6133_v6 = vsel %vm4012_vm15, %v6097_v14, %v5780_v33  ;;  %v6098_v12 = vsel %vm3614_vm13, %v6062_v53, %v5638_v19  ;;  %v5957_v47 = vsel %vm3318_vm5, %v5921_v48, %v12307_v23  ;;  %v4546_v19 = vld [vmem:[#allocation2 + $0x58] sm:$0xff] }
 0x7be   : > { %5411 = vrot.lane.b32.xlu1 %v4702_v4, %s7033_s15  ;;  %5805 = vrot.lane.b32.xlu0 %v4774_v15, %s7039_s9  ;;  %v5883_v4 = vsel %vm3170_vm1, %v4543_v0, %v12006_v63  ;;  %v5884_v63 = vsel %vm3170_vm1, %v4544_v32, %v12004_v5  ;;  %v5993_v50 = vsel %vm3392_vm7, %v5957_v47, %v12413_v13  ;;  %v4741_v15 = vld [vmem:[#allocation2 + $0xd5] sm:$0xff]  ;;  %v14192_v32 = vld [vmem:[#allocation51_spill] sm:$0xff] }
 0x7bf   : > { %6944 = vmatprep.mubr.msk.f32.mxu1 %vm4065_vm0, %v6133_v6  ;;  %v5919_v46 = vsel %vm3244_vm3, %v5883_v4, %v12162_v61  ;;  %v4669_v6 = vld [vmem:[#allocation2 + $0xd3] sm:$0xff]  ;;  %v5886_v37 = vsel %vm3170_vm1, %v4546_v19, %v12016_v8  ;;  %v4670_v0 = vld [vmem:[#allocation2 + $0xdb] sm:$0xff] }
 0x7c0   : > { %v5782_v34 = vpop.permute.xlu1 %5781  ;;  %v5386_v10 = vpop.permute.xlu0 %5385  ;;  %v5955_v18 = vsel %vm3318_vm5, %v5919_v46, %v12301_v41  ;;  %v5920_v41 = vsel %vm3244_vm3, %v5884_v63, %v12160_v44  ;;  %v14190_v44 = vmov 0.0   ;;  %v5922_v22 = vsel %vm3244_vm3, %v5886_v37, %v12168_v54  ;;  %v4547_v4 = vld [vmem:[#allocation2 + $0x60] sm:$0xff]  ;;  %v14193_v63 = vld [vmem:[#allocation75_spill] sm:$0xff]  ;;  %v4549_v37 = vld [vmem:[#allocation2 + $0x70] sm:$0xff] }
 0x7c1   : > { %v6134_v26 = vsel %vm4012_vm15, %v6098_v12, %v5782_v34  ;;  %v5991_v7 = vsel %vm3392_vm7, %v5955_v18, %v12407_v39  ;;  %v5956_v60 = vsel %vm3318_vm5, %v5920_v41, %v12299_v57  ;;  %4498 = vst.msk [vmem:[#allocation2 + $0x143] sm:$0x1f] %vm4497_vm6, %v14190_v44  ;;  %v5958_v53 = vsel %vm3318_vm5, %v5922_v22, %v12305_v52  ;;  %v4778_v46 = vld [vmem:[#allocation2 + $0xde] sm:$0xff]  ;;  %v4708_v41 = vld [vmem:[#allocation2 + $0xec] sm:$0xff] }
 0x7c2   : > { %5521 = vrot.lane.b32.xlu1 %v4704_v36, %s7035_s17  ;;  %5519 = vrot.lane.b32.xlu0 %v4703_v51, %s7035_s17  ;;  %v6027_v21 = vsel %vm3466_vm9, %v5991_v7, %v5386_v10  ;;  %v5992_v5 = vsel %vm3392_vm7, %v5956_v60, %v12405_v16  ;;  %v5994_v8 = vsel %vm3392_vm7, %v5958_v53, %v12411_v43  ;;  %v14194_v44 = vld [vmem:[#allocation3_spill] sm:$0xff]  ;;  %v14198_v22 = vld [vmem:[#allocation5_spill] sm:$0xff] }
 0x7c3   : > { %6945 = vmatmul.mubr.msk.f32.gmra.mxu1 %vm4065_vm0, %v6134_v26  ;;  %v4777_v26 = vld [vmem:[#allocation2 + $0xd6] sm:$0xff]  ;;  %v5887_v18 = vsel %vm3170_vm1, %v4547_v4, %v12030_v38 }
 0x7c4   : > { %v5496_v45 = vpop.permute.xlu1 %5495  ;;  %v5388_v3 = vpop.permute.xlu0 %5387  ;;  %v14199_v53 = vld [vmem:[#allocation29_spill] sm:$0xff] }
 0x7c5   : > { %v6063_v61 = vsel %vm3540_vm11, %v6027_v21, %v5496_v45  ;;  %v6028_v11 = vsel %vm3466_vm9, %v5992_v5, %v5388_v3  ;;  %v4548_v5 = vld [vmem:[#allocation2 + $0x68] sm:$0xff]  ;;  %v4673_v4 = vld [vmem:[#allocation2 + $0xf3] sm:$0xff] }
 0x7c6   : > { %5269 = vrot.lane.b32.xlu1 %v4667_v27, %s7031_s10  ;;  %5663 = vrot.lane.b32.xlu0 %v4739_v31, %s7037_s19 }
 0x7c8   : > { %v5640_v40 = vpop.permute.xlu1 %5639  ;;  %v5498_v17 = vpop.permute.xlu0 %5497 }
 0x7c9   : > { %v6099_v39 = vsel %vm3614_vm13, %v6063_v61, %v5640_v40  ;;  %v6064_v57 = vsel %vm3540_vm11, %v6028_v11, %v5498_v17  ;;  %v14191_v40 = vld [vmem:[#allocation27_spill] sm:$0xff] }
 0x7ca   : > { %5807 = vrot.lane.b32.xlu1 %v4775_v35, %s7039_s9  ;;  %5665 = vrot.lane.b32.xlu0 %v4740_v56, %s7037_s19  ;;  %v5923_v17 = vsel %vm3244_vm3, %v5887_v18, %v14191_v40  ;;  %v4707_v61 = vld [vmem:[#allocation2 + $0xe4] sm:$0xff]  ;;  %v14202_v18 = vld [vmem:[#allocation4_spill] sm:$0xff] }
 0x7cb   : > { %v5959_v7 = vsel %vm3318_vm5, %v5923_v17, %v14192_v32  ;;  %v4743_v11 = vld [vmem:[#allocation2 + $0xe5] sm:$0xff]  ;;  %v14203_v17 = vld [vmem:[#allocation28_spill] sm:$0xff] }
 0x7cc   : > { %v5784_v29 = vpop.permute.xlu1 %5783  ;;  %v5642_v42 = vpop.permute.xlu0 %5641  ;;  %v5995_v21 = vsel %vm3392_vm7, %v5959_v7, %v14193_v63  ;;  %v14204_v7 = vld [vmem:[#allocation52_spill] sm:$0xff] }
 0x7cd   : > { %v6135_v58 = vsel %vm4012_vm15, %v6099_v39, %v5784_v29  ;;  %v6100_v9 = vsel %vm3614_vm13, %v6064_v57, %v5642_v42  ;;  %v5888_v57 = vsel %vm3170_vm1, %v4548_v5, %v14194_v44  ;;  %v4551_v44 = vld [vmem:[#allocation2 + $0x80] sm:$0xff] }
 0x7ce   : > { %5413 = vrot.lane.b32.xlu1 %v4703_v51, %s7033_s15  ;;  %5271 = vrot.lane.b32.xlu0 %v4668_v62, %s7031_s10  ;;  %v4671_v62 = vld [vmem:[#allocation2 + $0xe3] sm:$0xff] }
 0x7cf   : > { %6947 = vmatprep.mubr.msk.f32.mxu1 %vm4065_vm0, %v6135_v58 }
 0x7d0   : > { %v5786_v30 = vpop.permute.xlu1 %5785  ;;  %v5390_v16 = vpop.permute.xlu0 %5389 }
 0x7d1   : > { %v6136_v55 = vsel %vm4012_vm15, %v6100_v9, %v5786_v30  ;;  %v6029_v59 = vsel %vm3466_vm9, %v5993_v50, %v5390_v16  ;;  %v14195_v9 = vld [vmem:[#allocation26_spill] sm:$0xff]  ;;  %v4672_v50 = vld [vmem:[#allocation2 + $0xeb] sm:$0xff] }
 0x7d2   : > { %5415 = vrot.lane.b32.xlu1 %v4704_v36, %s7033_s15  ;;  %5809 = vrot.lane.b32.xlu0 %v4776_v2, %s7039_s9  ;;  %v4742_v36 = vld [vmem:[#allocation2 + $0xdd] sm:$0xff]  ;;  %v5924_v30 = vsel %vm3244_vm3, %v5888_v57, %v14195_v9  ;;  %v14205_v9 = vld [vmem:[#allocation7_spill] sm:$0xff] }
 0x7d3   : > { %6948 = vmatmul.mubr.msk.f32.gmra.mxu1 %vm4065_vm0, %v6136_v55  ;;  %v14196_v16 = vld [vmem:[#allocation50_spill] sm:$0xff] }
 0x7d4   : > { %v5500_v20 = vpop.permute.xlu1 %5499  ;;  %v5392_v1 = vpop.permute.xlu0 %5391  ;;  %v5960_v55 = vsel %vm3318_vm5, %v5924_v30, %v14196_v16  ;;  %v4782_v57 = vld [vmem:[#allocation2 + $0xfe] sm:$0xff]  ;;  %v5891_v30 = vsel %vm3170_vm1, %v4551_v44, %v14205_v9  ;;  %v14206_v16 = vld [vmem:[#allocation31_spill] sm:$0xff]  ;;  %v14214_v44 = vld [vmem:[#allocation8_spill] sm:$0xff] }
 0x7d5   : > { %v6065_v23 = vsel %vm3540_vm11, %v6029_v59, %v5500_v20  ;;  %v6030_v51 = vsel %vm3466_vm9, %v5994_v8, %v5392_v1  ;;  %v14197_v1 = vld [vmem:[#allocation74_spill] sm:$0xff]  ;;  %v4780_v59 = vld [vmem:[#allocation2 + $0xee] sm:$0xff] }
 0x7d6   : > { %5525 = vrot.lane.b32.xlu1 %v4706_v49, %s7035_s17  ;;  %5523 = vrot.lane.b32.xlu0 %v4705_v28, %s7035_s17  ;;  %v5996_v24 = vsel %vm3392_vm7, %v5960_v55, %v14197_v1  ;;  %v5927_v55 = vsel %vm3244_vm3, %v5891_v30, %v14206_v16  ;;  %v14215_v9 = vld [vmem:[#allocation32_spill] sm:$0xff] }
 0x7d7   : > { %v14216_v16 = vld [vmem:[#allocation56_spill] sm:$0xff] }
 0x7d8   : > { %v5644_v14 = vpop.permute.xlu1 %5643  ;;  %v5502_v33 = vpop.permute.xlu0 %5501 }
 0x7d9   : > { %v6101_v13 = vsel %vm3614_vm13, %v6065_v23, %v5644_v14  ;;  %v6066_v54 = vsel %vm3540_vm11, %v6030_v51, %v5502_v33  ;;  %v5889_v23 = vsel %vm3170_vm1, %v4549_v37, %v14198_v22  ;;  %v4710_v51 = vld [vmem:[#allocation2 + $0xfc] sm:$0xff]  ;;  %v4747_v37 = vld [vmem:[#allocation2 + $0x105] sm:$0xff] }
 0x7da   : > { %5273 = vrot.lane.b32.xlu1 %v4669_v6, %s7031_s10  ;;  %5667 = vrot.lane.b32.xlu0 %v4741_v15, %s7037_s19 }
 0x7dc   : > { %v5788_v12 = vpop.permute.xlu1 %5787  ;;  %v5646_v34 = vpop.permute.xlu0 %5645 }
 0x7dd   : > { %v6137_v10 = vsel %vm4012_vm15, %v6101_v13, %v5788_v12  ;;  %v6102_v52 = vsel %vm3614_vm13, %v6066_v54, %v5646_v34  ;;  %v5925_v13 = vsel %vm3244_vm3, %v5889_v23, %v14199_v53  ;;  %v14200_v12 = vld [vmem:[#allocation53_spill] sm:$0xff]  ;;  %v14209_v23 = vld [vmem:[#allocation30_spill] sm:$0xff] }
 0x7de   : > { %5811 = vrot.lane.b32.xlu1 %v4777_v26, %s7039_s9  ;;  %5669 = vrot.lane.b32.xlu0 %v4742_v36, %s7037_s19  ;;  %v5961_v34 = vsel %vm3318_vm5, %v5925_v13, %v14200_v12  ;;  %v14201_v26 = vld [vmem:[#allocation76_spill] sm:$0xff]  ;;  %v14210_v13 = vld [vmem:[#allocation54_spill] sm:$0xff] }
 0x7df   : > { %6950 = vmatprep.mubr.msk.f32.mxu1 %vm4065_vm0, %v6137_v10  ;;  %v5997_v36 = vsel %vm3392_vm7, %v5961_v34, %v14201_v26  ;;  %v4709_v54 = vld [vmem:[#allocation2 + $0xf4] sm:$0xff]  ;;  %v4783_v26 = vld [vmem:[#allocation2 + $0x106] sm:$0xff] }
 0x7e0   : > { %v5790_v45 = vpop.permute.xlu1 %5789  ;;  %v5394_v3 = vpop.permute.xlu0 %5393 }
 0x7e1   : > { %v6138_v43 = vsel %vm4012_vm15, %v6102_v52, %v5790_v45  ;;  %v6031_v60 = vsel %vm3466_vm9, %v5995_v21, %v5394_v3 }
 0x7e2   : > { %5417 = vrot.lane.b32.xlu1 %v4705_v28, %s7033_s15  ;;  %5275 = vrot.lane.b32.xlu0 %v4670_v0, %s7031_s10  ;;  %v4744_v28 = vld [vmem:[#allocation2 + $0xed] sm:$0xff] }
 0x7e3   : > { %6951 = vmatmul.mubr.msk.f32.gmra.mxu1 %vm4065_vm0, %v6138_v43 }
 0x7e4   : > { %v5504_v27 = vpop.permute.xlu1 %5503  ;;  %v5396_v31 = vpop.permute.xlu0 %5395 }
 0x7e5   : > { %v6067_v38 = vsel %vm3540_vm11, %v6031_v60, %v5504_v27  ;;  %v6032_v25 = vsel %vm3466_vm9, %v5996_v24, %v5396_v31  ;;  %v4550_v27 = vld [vmem:[#allocation2 + $0x78] sm:$0xff] }
 0x7e6   : > { %5419 = vrot.lane.b32.xlu1 %v4706_v49, %s7033_s15  ;;  %5813 = vrot.lane.b32.xlu0 %v4778_v46, %s7039_s9  ;;  %v4779_v49 = vld [vmem:[#allocation2 + $0xe6] sm:$0xff]  ;;  %v4745_v46 = vld [vmem:[#allocation2 + $0xf5] sm:$0xff]  ;;  %v5890_v40 = vsel %vm3170_vm1, %v4550_v27, %v14202_v18 }
 0x7e7   : > { %v5926_v32 = vsel %vm3244_vm3, %v5890_v40, %v14203_v17  ;;  %v14211_v18 = vld [vmem:[#allocation9_spill] sm:$0xff] }
 0x7e8   : > { %v5648_v35 = vpop.permute.xlu1 %5647  ;;  %v5506_v56 = vpop.permute.xlu0 %5505  ;;  %v14212_v17 = vld [vmem:[#allocation33_spill] sm:$0xff] }
 0x7e9   : > { %v6103_v39 = vsel %vm3614_vm13, %v6067_v38, %v5648_v35  ;;  %v6068_v48 = vsel %vm3540_vm11, %v6032_v25, %v5506_v56  ;;  %v5962_v35 = vsel %vm3318_vm5, %v5926_v32, %v14204_v7  ;;  %v4711_v25 = vld [vmem:[#allocation2 + $0x104] sm:$0xff]  ;;  %v14213_v7 = vld [vmem:[#allocation57_spill] sm:$0xff] }
 0x7ea   : > { %5529 = vrot.lane.b32.xlu1 %v4708_v41, %s7035_s17  ;;  %5527 = vrot.lane.b32.xlu0 %v4707_v61, %s7035_s17 }
 0x7ec   : > { %v5792_v29 = vpop.permute.xlu1 %5791  ;;  %v5650_v42 = vpop.permute.xlu0 %5649 }
 0x7ed   : > { %v6139_v58 = vsel %vm4012_vm15, %v6103_v39, %v5792_v29  ;;  %v6104_v47 = vsel %vm3614_vm13, %v6068_v48, %v5650_v42 }
 0x7ee   : > { %5277 = vrot.lane.b32.xlu1 %v4671_v62, %s7031_s10  ;;  %5671 = vrot.lane.b32.xlu0 %v4743_v11, %s7037_s19 }
 0x7ef   : > { %6953 = vmatprep.mubr.msk.f32.mxu1 %vm4065_vm0, %v6139_v58  ;;  %v4674_v58 = vld [vmem:[#allocation2 + $0xfb] sm:$0xff] }
 0x7f0   : > { %v5398_v2 = vpop.permute.xlu1 %5397  ;;  %v5256_v20 = vpop.permute.xlu0 %5255 }
 0x7f1   : > { %v6033_v52 = vsel %vm3466_vm9, %v5997_v36, %v5398_v2  ;;  %v5998_v21 = vsel %vm3392_vm7, %v5962_v35, %v5256_v20  ;;  %v14207_v2 = vld [vmem:[#allocation55_spill] sm:$0xff] }
 0x7f2   : > { %5815 = vrot.lane.b32.xlu1 %v4779_v49, %s7039_s9  ;;  %5673 = vrot.lane.b32.xlu0 %v4744_v28, %s7037_s19  ;;  %v5963_v20 = vsel %vm3318_vm5, %v5927_v55, %v14207_v2  ;;  %v4712_v28 = vld [vmem:[#allocation2 + $0x10c] sm:$0xff] }
 0x7f3   : > { %v4748_v36 = vld [vmem:[#allocation2 + $0x10d] sm:$0xff] }
 0x7f4   : > { %v5400_v14 = vpop.permute.xlu1 %5399  ;;  %v5794_v33 = vpop.permute.xlu0 %5793 }
 0x7f5   : > { %v6140_v19 = vsel %vm4012_vm15, %v6104_v47, %v5794_v33  ;;  %v6034_v60 = vsel %vm3466_vm9, %v5998_v21, %v5400_v14 }
 0x7f6   : > { %5421 = vrot.lane.b32.xlu1 %v4707_v61, %s7033_s15  ;;  %5279 = vrot.lane.b32.xlu0 %v4672_v50, %s7031_s10  ;;  %v4746_v61 = vld [vmem:[#allocation2 + $0xfd] sm:$0xff]  ;;  %v4552_v50 = vld [vmem:[#allocation2 + $0x88] sm:$0xff] }
 0x7f7   : > { %6954 = vmatmul.mubr.msk.f32.gmra.mxu1 %vm4065_vm0, %v6140_v19 }
 0x7f8   : > { %v5510_v6 = vpop.permute.xlu1 %5509  ;;  %v5508_v15 = vpop.permute.xlu0 %5507 }
 0x7f9   : > { %v6069_v45 = vsel %vm3540_vm11, %v6033_v52, %v5508_v15  ;;  %v6070_v38 = vsel %vm3540_vm11, %v6034_v60, %v5510_v6  ;;  %v4675_v15 = vld [vmem:[#allocation2 + $0x103] sm:$0xff] }
 0x7fa   : > { %5423 = vrot.lane.b32.xlu1 %v4708_v41, %s7033_s15  ;;  %5817 = vrot.lane.b32.xlu0 %v4780_v59, %s7039_s9  ;;  %v4781_v41 = vld [vmem:[#allocation2 + $0xf6] sm:$0xff]  ;;  %v14208_v59 = vld [vmem:[#allocation6_spill] sm:$0xff] }
 0x7fb   : > { %v5892_v22 = vsel %vm3170_vm1, %v4552_v50, %v14208_v59  ;;  %v14217_v59 = vld [vmem:[#allocation11_spill] sm:$0xff] }
 0x7fc   : > { %v5258_v8 = vpop.permute.xlu1 %5257  ;;  %v5652_v10 = vpop.permute.xlu0 %5651  ;;  %v5928_v53 = vsel %vm3244_vm3, %v5892_v22, %v14209_v23  ;;  %v14218_v23 = vld [vmem:[#allocation35_spill] sm:$0xff] }
 0x7fd   : > { %v6105_v3 = vsel %vm3614_vm13, %v6069_v45, %v5652_v10  ;;  %v5999_v49 = vsel %vm3392_vm7, %v5963_v20, %v5258_v8  ;;  %v5964_v12 = vsel %vm3318_vm5, %v5928_v53, %v14210_v13  ;;  %v14219_v13 = vld [vmem:[#allocation59_spill] sm:$0xff] }
 0x7fe   : > { %5533 = vrot.lane.b32.xlu1 %v4710_v51, %s7035_s17  ;;  %5531 = vrot.lane.b32.xlu0 %v4709_v54, %s7035_s17 }
 0x800   : > { %v5796_v43 = vpop.permute.xlu1 %5795  ;;  %v5654_v0 = vpop.permute.xlu0 %5653 }
 0x801   : > { %v6141_v31 = vsel %vm4012_vm15, %v6105_v3, %v5796_v43  ;;  %v6106_v39 = vsel %vm3614_vm13, %v6070_v38, %v5654_v0  ;;  %v4676_v0 = vld [vmem:[#allocation2 + $0x10b] sm:$0xff] }
 0x802   : > { %5281 = vrot.lane.b32.xlu1 %v4673_v4, %s7031_s10  ;;  %5675 = vrot.lane.b32.xlu0 %v4745_v46, %s7037_s19  ;;  %v4553_v4 = vld [vmem:[#allocation2 + $0x90] sm:$0xff] }
 0x803   : > { %6956 = vmatprep.mubr.msk.f32.mxu1 %vm4065_vm0, %v6141_v31  ;;  %v4784_v46 = vld [vmem:[#allocation2 + $0x10e] sm:$0xff]  ;;  %v5893_v40 = vsel %vm3170_vm1, %v4553_v4, %v14211_v18  ;;  %v14220_v4 = vld [vmem:[#allocation10_spill] sm:$0xff] }
 0x804   : > { %v5402_v56 = vpop.permute.xlu1 %5401  ;;  %v5260_v63 = vpop.permute.xlu0 %5259  ;;  %v5929_v32 = vsel %vm3244_vm3, %v5893_v40, %v14212_v17  ;;  %v14221_v18 = vld [vmem:[#allocation34_spill] sm:$0xff] }
 0x805   : > { %v6035_v48 = vsel %vm3466_vm9, %v5999_v49, %v5402_v56  ;;  %v6000_v10 = vsel %vm3392_vm7, %v5964_v12, %v5260_v63  ;;  %v5965_v35 = vsel %vm3318_vm5, %v5929_v32, %v14213_v7  ;;  %v4750_v49 = vld [vmem:[#allocation2 + $0x11d] sm:$0xff] }
 0x806   : > { %5819 = vrot.lane.b32.xlu1 %v4781_v41, %s7039_s9  ;;  %5677 = vrot.lane.b32.xlu0 %v4746_v61, %s7037_s19  ;;  %v4714_v41 = vld [vmem:[#allocation2 + $0x11c] sm:$0xff]  ;;  %v4713_v61 = vld [vmem:[#allocation2 + $0x114] sm:$0xff] }
 0x807   : > { %v14222_v17 = vld [vmem:[#allocation58_spill] sm:$0xff] }
 0x808   : > { %v5404_v29 = vpop.permute.xlu1 %5403  ;;  %v5798_v42 = vpop.permute.xlu0 %5797 }
 0x809   : > { %v6142_v5 = vsel %vm4012_vm15, %v6106_v39, %v5798_v42 }
 0x80a   : > { %5425 = vrot.lane.b32.xlu1 %v4709_v54, %s7033_s15  ;;  %5283 = vrot.lane.b32.xlu0 %v4674_v58, %s7031_s10 }
 0x80b   : > { %6957 = vmatmul.mubr.msk.f32.gmra.mxu1 %vm4065_vm0, %v6142_v5  ;;  %v4554_v5 = vld [vmem:[#allocation2 + $0x98] sm:$0xff] }
 0x80c   : > { %v5514_v62 = vpop.permute.xlu1 %5513  ;;  %v5512_v11 = vpop.permute.xlu0 %5511 }
 0x80d   : > { %v6071_v47 = vsel %vm3540_vm11, %v6035_v48, %v5512_v11  ;;  %v4749_v11 = vld [vmem:[#allocation2 + $0x115] sm:$0xff] }
 0x80e   : > { %5427 = vrot.lane.b32.xlu1 %v4710_v51, %s7033_s15  ;;  %5821 = vrot.lane.b32.xlu0 %v4782_v57, %s7039_s9  ;;  %v6036_v51 = vsel %vm3466_vm9, %v6000_v10, %v5404_v29  ;;  %v5894_v57 = vsel %vm3170_vm1, %v4554_v5, %v14214_v44  ;;  %v14223_v44 = vld [vmem:[#allocation13_spill] sm:$0xff] }
 0x80f   : > { %v6072_v54 = vsel %vm3540_vm11, %v6036_v51, %v5514_v62  ;;  %v4677_v62 = vld [vmem:[#allocation2 + $0x113] sm:$0xff]  ;;  %v5930_v30 = vsel %vm3244_vm3, %v5894_v57, %v14215_v9 }
 0x810   : > { %v5262_v1 = vpop.permute.xlu1 %5261  ;;  %v5656_v24 = vpop.permute.xlu0 %5655  ;;  %v5966_v55 = vsel %vm3318_vm5, %v5930_v30, %v14216_v16  ;;  %v14224_v9 = vld [vmem:[#allocation37_spill] sm:$0xff] }
 0x811   : > { %v6107_v14 = vsel %vm3614_vm13, %v6071_v47, %v5656_v24  ;;  %v6001_v21 = vsel %vm3392_vm7, %v5965_v35, %v5262_v1  ;;  %v4785_v24 = vld [vmem:[#allocation2 + $0x116] sm:$0xff] }
 0x812   : > { %5537 = vrot.lane.b32.xlu1 %v4712_v28, %s7035_s17  ;;  %5535 = vrot.lane.b32.xlu0 %v4711_v25, %s7035_s17  ;;  %v4718_v16 = vld [vmem:[#allocation2 + $0x13c] sm:$0xff] }
 0x814   : > { %v5800_v33 = vpop.permute.xlu1 %5799  ;;  %v5658_v19 = vpop.permute.xlu0 %5657 }
 0x815   : > { %v6143_v6 = vsel %vm4012_vm15, %v6107_v14, %v5800_v33  ;;  %v6108_v52 = vsel %vm3614_vm13, %v6072_v54, %v5658_v19  ;;  %v4678_v19 = vld [vmem:[#allocation2 + $0x11b] sm:$0xff] }
 0x816   : > { %5285 = vrot.lane.b32.xlu1 %v4675_v15, %s7031_s10  ;;  %5679 = vrot.lane.b32.xlu0 %v4747_v37, %s7037_s19  ;;  %v4555_v15 = vld [vmem:[#allocation2 + $0xa0] sm:$0xff] }
 0x817   : > { %6959 = vmatprep.mubr.msk.f32.mxu1 %vm4065_vm0, %v6143_v6  ;;  %v4786_v37 = vld [vmem:[#allocation2 + $0x11e] sm:$0xff]  ;;  %v5895_v22 = vsel %vm3170_vm1, %v4555_v15, %v14217_v59 }
 0x818   : > { %v5406_v34 = vpop.permute.xlu1 %5405  ;;  %v5264_v8 = vpop.permute.xlu0 %5263  ;;  %v5931_v53 = vsel %vm3244_vm3, %v5895_v22, %v14218_v23  ;;  %v12823_v15 = vld [vmem:[%s13107_s5] ss:$0 sm:$0xff]  ;;  %v14227_v22 = vld [vmem:[#allocation36_spill] sm:$0xff] }
 0x819   : > { %v6037_v60 = vsel %vm3466_vm9, %v6001_v21, %v5406_v34  ;;  %v6002_v1 = vsel %vm3392_vm7, %v5966_v55, %v5264_v8  ;;  %v5967_v12 = vsel %vm3318_vm5, %v5931_v53, %v14219_v13  ;;  %v4752_v21 = vld [vmem:[#allocation2 + $0x12d] sm:$0xff]  ;;  %v4790_v13 = vld [vmem:[#allocation2 + $0x13e] sm:$0xff] }
 0x81a   : > { %5823 = vrot.lane.b32.xlu1 %v4783_v26, %s7039_s9  ;;  %5681 = vrot.lane.b32.xlu0 %v4748_v36, %s7037_s19  ;;  %v4716_v26 = vld [vmem:[#allocation2 + $0x12c] sm:$0xff]  ;;  %v4715_v36 = vld [vmem:[#allocation2 + $0x124] sm:$0xff]  ;;  %v4717_v55 = vld [vmem:[#allocation2 + $0x134] sm:$0xff] }
 0x81c   : > { %v5408_v45 = vpop.permute.xlu1 %5407  ;;  %v5802_v3 = vpop.permute.xlu0 %5801 }
 0x81d   : > { %v6144_v43 = vsel %vm4012_vm15, %v6108_v52, %v5802_v3 }
 0x81e   : > { %5429 = vrot.lane.b32.xlu1 %v4711_v25, %s7033_s15  ;;  %5287 = vrot.lane.b32.xlu0 %v4676_v0, %s7031_s10 }
 0x81f   : > { %6960 = vmatmul.mubr.msk.f32.gmra.mxu1 %vm4065_vm0, %v6144_v43  ;;  %v4556_v43 = vld [vmem:[#allocation2 + $0xa8] sm:$0xff] }
 0x820   : > { %v5518_v27 = vpop.permute.xlu1 %5517  ;;  %v5516_v31 = vpop.permute.xlu0 %5515 }
 0x821   : > { %v6073_v38 = vsel %vm3540_vm11, %v6037_v60, %v5516_v31  ;;  %v4751_v31 = vld [vmem:[#allocation2 + $0x125] sm:$0xff] }
 0x822   : > { %5431 = vrot.lane.b32.xlu1 %v4712_v28, %s7033_s15  ;;  %5825 = vrot.lane.b32.xlu0 %v4784_v46, %s7039_s9  ;;  %v6038_v28 = vsel %vm3466_vm9, %v6002_v1, %v5408_v45  ;;  %v5896_v46 = vsel %vm3170_vm1, %v4556_v43, %v14220_v4 }
 0x823   : > { %v6074_v25 = vsel %vm3540_vm11, %v6038_v28, %v5518_v27  ;;  %v4679_v27 = vld [vmem:[#allocation2 + $0x123] sm:$0xff]  ;;  %v5932_v40 = vsel %vm3244_vm3, %v5896_v46, %v14221_v18 }
 0x824   : > { %v5266_v56 = vpop.permute.xlu1 %5265  ;;  %v5660_v63 = vpop.permute.xlu0 %5659  ;;  %v5968_v32 = vsel %vm3318_vm5, %v5932_v40, %v14222_v17  ;;  %v4559_v17 = vld [vmem:[#allocation2 + $0xc0] sm:$0xff] }
 0x825   : > { %v6109_v39 = vsel %vm3614_vm13, %v6073_v38, %v5660_v63  ;;  %v6003_v10 = vsel %vm3392_vm7, %v5967_v12, %v5266_v56  ;;  %v4787_v63 = vld [vmem:[#allocation2 + $0x126] sm:$0xff]  ;;  %v4789_v12 = vld [vmem:[#allocation2 + $0x136] sm:$0xff] }
 0x826   : > { %5541 = vrot.lane.b32.xlu1 %v4714_v41, %s7035_s17  ;;  %5539 = vrot.lane.b32.xlu0 %v4713_v61, %s7035_s17 }
 0x828   : > { %v5804_v29 = vpop.permute.xlu1 %5803  ;;  %v5662_v42 = vpop.permute.xlu0 %5661 }
 0x829   : > { %v6145_v58 = vsel %vm4012_vm15, %v6109_v39, %v5804_v29  ;;  %v6110_v48 = vsel %vm3614_vm13, %v6074_v25, %v5662_v42  ;;  %v4680_v42 = vld [vmem:[#allocation2 + $0x12b] sm:$0xff] }
 0x82a   : > { %5289 = vrot.lane.b32.xlu1 %v4677_v62, %s7031_s10  ;;  %5683 = vrot.lane.b32.xlu0 %v4749_v11, %s7037_s19  ;;  %v4557_v62 = vld [vmem:[#allocation2 + $0xb0] sm:$0xff] }
 0x82b   : > { %6962 = vmatprep.mubr.msk.f32.mxu1 %vm4065_vm0, %v6145_v58  ;;  %v4788_v11 = vld [vmem:[#allocation2 + $0x12e] sm:$0xff]  ;;  %v5897_v57 = vsel %vm3170_vm1, %v4557_v62, %v14223_v44 }
 0x82c   : > { %v5410_v2 = vpop.permute.xlu1 %5409  ;;  %v5268_v20 = vpop.permute.xlu0 %5267  ;;  %v5933_v30 = vsel %vm3244_vm3, %v5897_v57, %v14224_v9  ;;  %v14232_v9 = vld [vmem:[#allocation14_spill] sm:$0xff] }
 0x82d   : > { %v6039_v51 = vsel %vm3466_vm9, %v6003_v10, %v5410_v2  ;;  %v6004_v56 = vsel %vm3392_vm7, %v5968_v32, %v5268_v20  ;;  %v14225_v2 = vld [vmem:[#allocation61_spill] sm:$0xff]  ;;  %v14229_v32 = vld [vmem:[#allocation15_spill] sm:$0xff] }
 0x82e   : > { %5827 = vrot.lane.b32.xlu1 %v4785_v24, %s7039_s9  ;;  %5685 = vrot.lane.b32.xlu0 %v4750_v49, %s7037_s19  ;;  %v5969_v20 = vsel %vm3318_vm5, %v5933_v30, %v14225_v2  ;;  %v14233_v2 = vld [vmem:[#allocation38_spill] sm:$0xff] }
 0x830   : > { %v5412_v47 = vpop.permute.xlu1 %5411  ;;  %v5806_v14 = vpop.permute.xlu0 %5805 }
 0x831   : > { %v6146_v33 = vsel %vm4012_vm15, %v6110_v48, %v5806_v14  ;;  %v4754_v48 = vld [vmem:[#allocation2 + $0x13d] sm:$0xff] }
 0x832   : > { %5433 = vrot.lane.b32.xlu1 %v4713_v61, %s7033_s15  ;;  %5291 = vrot.lane.b32.xlu0 %v4678_v19, %s7031_s10 }
 0x833   : > { %6963 = vmatmul.mubr.msk.f32.gmra.mxu1 %vm4065_vm0, %v6146_v33 }
 0x834   : > { %v5522_v50 = vpop.permute.xlu1 %5521  ;;  %v5520_v6 = vpop.permute.xlu0 %5519 }
 0x835   : > { %v6075_v54 = vsel %vm3540_vm11, %v6039_v51, %v5520_v6 }
 0x836   : > { %5435 = vrot.lane.b32.xlu1 %v4714_v41, %s7033_s15  ;;  %5829 = vrot.lane.b32.xlu0 %v4786_v37, %s7039_s9  ;;  %v6040_v41 = vsel %vm3466_vm9, %v6004_v56, %v5412_v47  ;;  %v4753_v47 = vld [vmem:[#allocation2 + $0x135] sm:$0xff] }
 0x837   : > { %v6076_v61 = vsel %vm3540_vm11, %v6040_v41, %v5522_v50  ;;  %v4558_v50 = vld [vmem:[#allocation2 + $0xb8] sm:$0xff]  ;;  %v14226_v37 = vld [vmem:[#allocation12_spill] sm:$0xff] }
 0x838   : > { %v5270_v34 = vpop.permute.xlu1 %5269  ;;  %v5664_v8 = vpop.permute.xlu0 %5663  ;;  %v5898_v59 = vsel %vm3170_vm1, %v4558_v50, %v14226_v37 }
 0x839   : > { %v6111_v52 = vsel %vm3614_vm13, %v6075_v54, %v5664_v8  ;;  %v6005_v49 = vsel %vm3392_vm7, %v5969_v20, %v5270_v34  ;;  %v5934_v23 = vsel %vm3244_vm3, %v5898_v59, %v14227_v22  ;;  %v14228_v34 = vld [vmem:[#allocation60_spill] sm:$0xff] }
 0x83a   : > { %5545 = vrot.lane.b32.xlu1 %v4716_v26, %s7035_s17  ;;  %5543 = vrot.lane.b32.xlu0 %v4715_v36, %s7035_s17  ;;  %v5970_v8 = vsel %vm3318_vm5, %v5934_v23, %v14228_v34  ;;  %v4561_v22 = vld [vmem:[#allocation2 + $0xd0] sm:$0xff]  ;;  %v14235_v23 = vld [vmem:[#allocation17_spill] sm:$0xff] }
 0x83c   : > { %v5808_v45 = vpop.permute.xlu1 %5807  ;;  %v5666_v3 = vpop.permute.xlu0 %5665 }
 0x83d   : > { %v6147_v0 = vsel %vm4012_vm15, %v6111_v52, %v5808_v45  ;;  %v6112_v60 = vsel %vm3614_vm13, %v6076_v61, %v5666_v3 }
 0x83e   : > { %5293 = vrot.lane.b32.xlu1 %v4679_v27, %s7031_s10  ;;  %5687 = vrot.lane.b32.xlu0 %v4751_v31, %s7037_s19 }
 0x83f   : > { %6965 = vmatprep.mubr.msk.f32.mxu1 %vm4065_vm0, %v6147_v0 }
 0x840   : > { %v5414_v7 = vpop.permute.xlu1 %5413  ;;  %v5272_v35 = vpop.permute.xlu0 %5271 }
 0x841   : > { %v6041_v28 = vsel %vm3466_vm9, %v6005_v49, %v5414_v7  ;;  %v6006_v51 = vsel %vm3392_vm7, %v5970_v8, %v5272_v35  ;;  %v5899_v7 = vsel %vm3170_vm1, %v4559_v17, %v14229_v32  ;;  %v14230_v35 = vld [vmem:[#allocation39_spill] sm:$0xff]  ;;  %v14237_v8 = vld [vmem:[#allocation65_spill] sm:$0xff]  ;;  %v14238_v17 = vld [vmem:[#allocation16_spill] sm:$0xff] }
 0x842   : > { %5831 = vrot.lane.b32.xlu1 %v4787_v63, %s7039_s9  ;;  %5689 = vrot.lane.b32.xlu0 %v4752_v21, %s7037_s19  ;;  %v5935_v56 = vsel %vm3244_vm3, %v5899_v7, %v14230_v35  ;;  %v14231_v63 = vld [vmem:[#allocation63_spill] sm:$0xff]  ;;  %v14239_v7 = vld [vmem:[#allocation40_spill] sm:$0xff] }
 0x843   : > { %v5971_v21 = vsel %vm3318_vm5, %v5935_v56, %v14231_v63  ;;  %v14240_v56 = vld [vmem:[#allocation64_spill] sm:$0xff] }
 0x844   : > { %v5416_v38 = vpop.permute.xlu1 %5415  ;;  %v5810_v39 = vpop.permute.xlu0 %5809 }
 0x845   : > { %v6148_v29 = vsel %vm4012_vm15, %v6112_v60, %v5810_v39  ;;  %v6042_v52 = vsel %vm3466_vm9, %v6006_v51, %v5416_v38 }
 0x846   : > { %5437 = vrot.lane.b32.xlu1 %v4715_v36, %s7033_s15  ;;  %5295 = vrot.lane.b32.xlu0 %v4680_v42, %s7031_s10  ;;  %s6990_s10 = smul.u32 288, %s14266_s22 }
 0x847   : > { %6966 = vmatmul.mubr.msk.f32.gmra.mxu1 %vm4065_vm0, %v6148_v29 }
 0x848   : > { %v5526_v5 = vpop.permute.xlu1 %5525  ;;  %v5524_v58 = vpop.permute.xlu0 %5523 }
 0x849   : > { %v6077_v25 = vsel %vm3540_vm11, %v6041_v28, %v5524_v58  ;;  %v6078_v43 = vsel %vm3540_vm11, %v6042_v52, %v5526_v5 }
 0x84a   : > { %5439 = vrot.lane.b32.xlu1 %v4716_v26, %s7033_s15  ;;  %5833 = vrot.lane.b32.xlu0 %v4788_v11, %s7039_s9  ;;  %v4560_v11 = vld [vmem:[#allocation2 + $0xc8] sm:$0xff] }
 0x84b   : > { %v5900_v30 = vsel %vm3170_vm1, %v4560_v11, %v14232_v9 }
 0x84c   : > { %v5274_v1 = vpop.permute.xlu1 %5273  ;;  %v5668_v24 = vpop.permute.xlu0 %5667  ;;  %v5936_v20 = vsel %vm3244_vm3, %v5900_v30, %v14233_v2  ;;  %v14241_v30 = vld [vmem:[#allocation19_spill] sm:$0xff] }
 0x84d   : > { %v6113_v14 = vsel %vm3614_vm13, %v6077_v25, %v5668_v24  ;;  %v6007_v60 = vsel %vm3392_vm7, %v5971_v21, %v5274_v1  ;;  %v14234_v1 = vld [vmem:[#allocation62_spill] sm:$0xff] }
 0x84e   : > { %5549 = vrot.lane.b32.xlu1 %v4718_v16, %s7035_s17  ;;  %5547 = vrot.lane.b32.xlu0 %v4717_v55, %s7035_s17  ;;  %v5972_v24 = vsel %vm3318_vm5, %v5936_v20, %v14234_v1  ;;  %v14242_v20 = vld [vmem:[#allocation43_spill] sm:$0xff] }
 0x850   : > { %v5812_v33 = vpop.permute.xlu1 %5811  ;;  %v5670_v19 = vpop.permute.xlu0 %5669 }
 0x851   : > { %v6149_v6 = vsel %vm4012_vm15, %v6113_v14, %v5812_v33  ;;  %v6114_v0 = vsel %vm3614_vm13, %v6078_v43, %v5670_v19 }
 0x852   : > { %5693 = vrot.lane.b32.xlu1 %v4754_v48, %s7037_s19  ;;  %5691 = vrot.lane.b32.xlu0 %v4753_v47, %s7037_s19  ;;  %s12839_s19 = scalar_lea.vmem %s13108_s6, %s6990_s10 }
 0x853   : > { %v6937_v53 = vpop.f32.mrf.mxu1  ;;  %6968 = vmatprep.mubr.msk.f32.mxu1 %vm4065_vm0, %v6149_v6 }
 0x854   : > { %v6359_v10 = vadd.f32 %v6937_v53, %v12823_v15  ;;  %v5418_v26 = vpop.permute.xlu1 %5417  ;;  %v5276_v36 = vpop.permute.xlu0 %5275  ;;  %v5901_v53 = vsel %vm3170_vm1, %v4561_v22, %v14235_v23  ;;  %v14244_v22 = vld [vmem:[#allocation18_spill] sm:$0xff] }
 0x855   : > { %v6353_v54 = vpop.f32.mrf.mxu1  ;;  %v6043_v38 = vsel %vm3466_vm9, %v6007_v60, %v5418_v26  ;;  %v6008_v48 = vsel %vm3392_vm7, %v5972_v24, %v5276_v36  ;;  %v14243_v24 = vld [vmem:[#allocation67_spill] sm:$0xff] }
 0x856   : > { %v6533_v45 = vmax.f32 %v6359_v10, 0.0  ;;  %v6354_v3 = vadd.f32 %v12823_v15, %v6353_v54  ;;  %5837 = vrot.lane.b32.xlu1 %v4790_v13, %s7039_s9  ;;  %5835 = vrot.lane.b32.xlu0 %v4789_v12, %s7039_s9  ;;  %v14236_v13 = vld [vmem:[#allocation41_spill] sm:$0xff] }
 0x857   : > { %v5937_v12 = vsel %vm3244_vm3, %v5901_v53, %v14236_v13  ;;  %v14245_v53 = vld [vmem:[#allocation42_spill] sm:$0xff] }
 0x858   : > { %6569 = vst.msk [vmem:[%s12839_s19 + $0x8] sm:$0xff] %vm3170_vm1, %v6533_v45  ;;  %v6532_v27 = vmax.f32 %v6354_v3, 0.0  ;;  %v5420_v31 = vpop.permute.xlu1 %5419  ;;  %v5814_v4 = vpop.permute.xlu0 %5813  ;;  %v5973_v10 = vsel %vm3318_vm5, %v5937_v12, %v14237_v8  ;;  %v14246_v12 = vld [vmem:[#allocation66_spill] sm:$0xff] }
 0x859   : > { %v6150_v46 = vsel %vm4012_vm15, %v6114_v0, %v5814_v4  ;;  %v6044_v47 = vsel %vm3466_vm9, %v6008_v48, %v5420_v31 }
 0x85a   : > { %6568 = vst.msk [vmem:[%s12839_s19] sm:$0xff] %vm3170_vm1, %v6532_v27  ;;  %6969 = vmatmul.mubr.msk.f32.gmra.mxu1 %vm4065_vm0, %v6150_v46 }
 0x85c   : > { %v5530_v18 = vpop.permute.xlu1 %5529  ;;  %v5528_v40 = vpop.permute.xlu0 %5527 }
 0x85d   : > { %v6079_v39 = vsel %vm3540_vm11, %v6043_v38, %v5528_v40  ;;  %v6080_v14 = vsel %vm3540_vm11, %v6044_v47, %v5530_v18  ;;  %v4562_v18 = vld [vmem:[#allocation2 + $0xd8] sm:$0xff] }
 0x85e   : > { %v5902_v32 = vsel %vm3170_vm1, %v4562_v18, %v14238_v17  ;;  %v4565_v17 = vld [vmem:[#allocation2 + $0xf0] sm:$0xff] }
 0x85f   : > { %v5938_v35 = vsel %vm3244_vm3, %v5902_v32, %v14239_v7  ;;  %v14247_v32 = vld [vmem:[#allocation21_spill] sm:$0xff] }
 0x860   : > { %v5278_v41 = vpop.permute.xlu1 %5277  ;;  %v5672_v61 = vpop.permute.xlu0 %5671  ;;  %v5974_v63 = vsel %vm3318_vm5, %v5938_v35, %v14240_v56  ;;  %v5905_v7 = vsel %vm3170_vm1, %v4565_v17, %v14247_v32  ;;  %v14248_v35 = vld [vmem:[#allocation45_spill] sm:$0xff] }
 0x861   : > { %v6115_v42 = vsel %vm3614_vm13, %v6079_v39, %v5672_v61  ;;  %v6009_v54 = vsel %vm3392_vm7, %v5973_v10, %v5278_v41  ;;  %v5941_v56 = vsel %vm3244_vm3, %v5905_v7, %v14248_v35 }
 0x863   : > { %v6940_v29 = vpop.f32.mrf.mxu1 }
 0x864   : > { %v6369_v5 = vadd.f32 %v6940_v29, %v12823_v15  ;;  %v5816_v58 = vpop.permute.xlu1 %5815  ;;  %v5674_v62 = vpop.permute.xlu0 %5673 }
 0x865   : > { %v6151_v44 = vsel %vm4012_vm15, %v6115_v42, %v5816_v58  ;;  %v6363_v57 = vpop.f32.mrf.mxu1  ;;  %v6116_v33 = vsel %vm3614_vm13, %v6080_v14, %v5674_v62 }
 0x866   : > { %v6535_v16 = vmax.f32 %v6369_v5, 0.0  ;;  %v6364_v55 = vadd.f32 %v12823_v15, %v6363_v57  ;;  %6971 = vmatprep.mubr.msk.f32.mxu1 %vm4065_vm0, %v6151_v44  ;;  %v4563_v57 = vld [vmem:[#allocation2 + $0xe0] sm:$0xff] }
 0x868   : > { %6571 = vst.msk [vmem:[%s12839_s19 + $0x18] sm:$0xff] %vm3170_vm1, %v6535_v16  ;;  %v6534_v49 = vmax.f32 %v6364_v55, 0.0  ;;  %v5422_v28 = vpop.permute.xlu1 %5421  ;;  %v5280_v25 = vpop.permute.xlu0 %5279  ;;  %v5903_v16 = vsel %vm3170_vm1, %v4563_v57, %v14241_v30  ;;  %v14251_v57 = vld [vmem:[#allocation44_spill] sm:$0xff] }
 0x869   : > { %v6045_v45 = vsel %vm3466_vm9, %v6009_v54, %v5422_v28  ;;  %v6010_v61 = vsel %vm3392_vm7, %v5974_v63, %v5280_v25  ;;  %v5939_v1 = vsel %vm3244_vm3, %v5903_v16, %v14242_v20  ;;  %v14249_v63 = vld [vmem:[#allocation69_spill] sm:$0xff]  ;;  %v14252_v16 = vld [vmem:[#allocation68_spill] sm:$0xff] }
 0x86a   : > { %6570 = vst.msk [vmem:[%s12839_s19 + $0x10] sm:$0xff] %vm3170_vm1, %v6534_v49  ;;  %v5975_v49 = vsel %vm3318_vm5, %v5939_v1, %v14243_v24 }
 0x86c   : > { %v5424_v19 = vpop.permute.xlu1 %5423  ;;  %v5818_v50 = vpop.permute.xlu0 %5817 }
 0x86d   : > { %v6152_v6 = vsel %vm4012_vm15, %v6116_v33, %v5818_v50  ;;  %v6046_v60 = vsel %vm3466_vm9, %v6010_v61, %v5424_v19 }
 0x86e   : > { %6972 = vmatmul.mubr.msk.f32.gmra.mxu1 %vm4065_vm0, %v6152_v6 }
 0x870   : > { %v5534_v37 = vpop.permute.xlu1 %5533  ;;  %v5532_v59 = vpop.permute.xlu0 %5531 }
 0x871   : > { %v6081_v0 = vsel %vm3540_vm11, %v6045_v45, %v5532_v59  ;;  %v6082_v38 = vsel %vm3540_vm11, %v6046_v60, %v5534_v37  ;;  %v4564_v37 = vld [vmem:[#allocation2 + $0xe8] sm:$0xff] }
 0x872   : > { %v5904_v23 = vsel %vm3170_vm1, %v4564_v37, %v14244_v22  ;;  %v4567_v22 = vld [vmem:[#allocation2 + $0x100] sm:$0xff] }
 0x873   : > { %v6943_v34 = vpop.f32.mrf.mxu1  ;;  %v5940_v13 = vsel %vm3244_vm3, %v5904_v23, %v14245_v53  ;;  %v14253_v23 = vld [vmem:[#allocation23_spill] sm:$0xff] }
 0x874   : > { %v6379_v26 = vadd.f32 %v6943_v34, %v12823_v15  ;;  %v5282_v36 = vpop.permute.xlu1 %5281  ;;  %v5676_v51 = vpop.permute.xlu0 %5675  ;;  %v5976_v34 = vsel %vm3318_vm5, %v5940_v13, %v14246_v12  ;;  %v5907_v53 = vsel %vm3170_vm1, %v4567_v22, %v14253_v23  ;;  %v14254_v13 = vld [vmem:[#allocation47_spill] sm:$0xff] }
 0x875   : > { %v6373_v52 = vpop.f32.mrf.mxu1  ;;  %v6117_v27 = vsel %vm3614_vm13, %v6081_v0, %v5676_v51  ;;  %v6011_v47 = vsel %vm3392_vm7, %v5975_v49, %v5282_v36  ;;  %v5943_v12 = vsel %vm3244_vm3, %v5907_v53, %v14254_v13 }
 0x876   : > { %v6537_v3 = vmax.f32 %v6379_v26, 0.0  ;;  %v6374_v43 = vadd.f32 %v12823_v15, %v6373_v52 }
 0x878   : > { %6573 = vst.msk [vmem:[%s12839_s19 + $0x28] sm:$0xff] %vm3170_vm1, %v6537_v3  ;;  %v6536_v31 = vmax.f32 %v6374_v43, 0.0  ;;  %v5820_v4 = vpop.permute.xlu1 %5819  ;;  %v5678_v46 = vpop.permute.xlu0 %5677 }
 0x879   : > { %v6153_v40 = vsel %vm4012_vm15, %v6117_v27, %v5820_v4  ;;  %v6118_v39 = vsel %vm3614_vm13, %v6082_v38, %v5678_v46 }
 0x87a   : > { %6572 = vst.msk [vmem:[%s12839_s19 + $0x20] sm:$0xff] %vm3170_vm1, %v6536_v31  ;;  %6974 = vmatprep.mubr.msk.f32.mxu1 %vm4065_vm0, %v6153_v40 }
 0x87c   : > { %v5426_v21 = vpop.permute.xlu1 %5425  ;;  %v5284_v41 = vpop.permute.xlu0 %5283 }
 0x87d   : > { %v6047_v14 = vsel %vm3466_vm9, %v6011_v47, %v5426_v21  ;;  %v6012_v26 = vsel %vm3392_vm7, %v5976_v34, %v5284_v41  ;;  %v5977_v21 = vsel %vm3318_vm5, %v5941_v56, %v14249_v63  ;;  %v14255_v34 = vld [vmem:[#allocation71_spill] sm:$0xff] }
 0x880   : > { %v5428_v29 = vpop.permute.xlu1 %5427  ;;  %v5822_v42 = vpop.permute.xlu0 %5821 }
 0x881   : > { %v6154_v5 = vsel %vm4012_vm15, %v6118_v39, %v5822_v42  ;;  %v6048_v36 = vsel %vm3466_vm9, %v6012_v26, %v5428_v29 }
 0x882   : > { %6975 = vmatmul.mubr.msk.f32.gmra.mxu1 %vm4065_vm0, %v6154_v5 }
 0x883   : > { %v6946_v58 = vpop.f32.mrf.mxu1 }
 0x884   : > { %v6389_v62 = vadd.f32 %v6946_v58, %v12823_v15  ;;  %v5538_v11 = vpop.permute.xlu1 %5537  ;;  %v5536_v44 = vpop.permute.xlu0 %5535  ;;  %v4566_v58 = vld [vmem:[#allocation2 + $0xf8] sm:$0xff] }
 0x885   : > { %v6383_v9 = vpop.f32.mrf.mxu1  ;;  %v6083_v33 = vsel %vm3540_vm11, %v6047_v14, %v5536_v44  ;;  %v6084_v51 = vsel %vm3540_vm11, %v6048_v36, %v5538_v11  ;;  %v14250_v11 = vld [vmem:[#allocation20_spill] sm:$0xff] }
 0x886   : > { %v6539_v55 = vmax.f32 %v6389_v62, 0.0  ;;  %v6384_v2 = vadd.f32 %v12823_v15, %v6383_v9  ;;  %v5906_v44 = vsel %vm3170_vm1, %v4566_v58, %v14250_v11  ;;  %v4570_v11 = vld [vmem:[#allocation2 + $0x118] sm:$0xff] }
 0x887   : > { %v5942_v9 = vsel %vm3244_vm3, %v5906_v44, %v14251_v57  ;;  %v4569_v44 = vld [vmem:[#allocation2 + $0x110] sm:$0xff] }
 0x888   : > { %6575 = vst.msk [vmem:[%s12839_s19 + $0x38] sm:$0xff] %vm3170_vm1, %v6539_v55  ;;  %v6538_v28 = vmax.f32 %v6384_v2, 0.0  ;;  %v5286_v25 = vpop.permute.xlu1 %5285  ;;  %v5680_v48 = vpop.permute.xlu0 %5679  ;;  %v5978_v55 = vsel %vm3318_vm5, %v5942_v9, %v14252_v16  ;;  %v14259_v57 = vld [vmem:[#allocation24_spill] sm:$0xff] }
 0x889   : > { %v6119_v19 = vsel %vm3614_vm13, %v6083_v33, %v5680_v48  ;;  %v6013_v60 = vsel %vm3392_vm7, %v5977_v21, %v5286_v25  ;;  %v5910_v9 = vsel %vm3170_vm1, %v4570_v11, %v14259_v57 }
 0x88a   : > { %6574 = vst.msk [vmem:[%s12839_s19 + $0x30] sm:$0xff] %vm3170_vm1, %v6538_v28 }
 0x88c   : > { %v5824_v50 = vpop.permute.xlu1 %5823  ;;  %v5682_v6 = vpop.permute.xlu0 %5681 }
 0x88d   : > { %v6155_v59 = vsel %vm4012_vm15, %v6119_v19, %v5824_v50  ;;  %v6120_v52 = vsel %vm3614_vm13, %v6084_v51, %v5682_v6 }
 0x88e   : > { %6977 = vmatprep.mubr.msk.f32.mxu1 %vm4065_vm0, %v6155_v59 }
 0x890   : > { %v5430_v8 = vpop.permute.xlu1 %5429  ;;  %v5288_v10 = vpop.permute.xlu0 %5287 }
 0x891   : > { %v6049_v38 = vsel %vm3466_vm9, %v6013_v60, %v5430_v8  ;;  %v6014_v24 = vsel %vm3392_vm7, %v5978_v55, %v5288_v10  ;;  %v5979_v8 = vsel %vm3318_vm5, %v5943_v12, %v14255_v34  ;;  %v14261_v55 = vld [vmem:[#allocation48_spill] sm:$0xff] }
 0x893   : > { %v6949_v54 = vpop.f32.mrf.mxu1 }
 0x894   : > { %v6399_v45 = vadd.f32 %v6949_v54, %v12823_v15  ;;  %v5432_v3 = vpop.permute.xlu1 %5431  ;;  %v5826_v43 = vpop.permute.xlu0 %5825 }
 0x895   : > { %v6156_v0 = vsel %vm4012_vm15, %v6120_v52, %v5826_v43  ;;  %v6393_v27 = vpop.f32.mrf.mxu1  ;;  %v6050_v28 = vsel %vm3466_vm9, %v6014_v24, %v5432_v3  ;;  %v4568_v43 = vld [vmem:[#allocation2 + $0x108] sm:$0xff]  ;;  %v14263_v24 = vld [vmem:[#allocation72_spill] sm:$0xff] }
 0x896   : > { %v6541_v31 = vmax.f32 %v6399_v45, 0.0  ;;  %v6394_v4 = vadd.f32 %v12823_v15, %v6393_v27  ;;  %6978 = vmatmul.mubr.msk.f32.gmra.mxu1 %vm4065_vm0, %v6156_v0  ;;  %v14256_v27 = vld [vmem:[#allocation22_spill] sm:$0xff] }
 0x898   : > { %6577 = vst.msk [vmem:[%s12839_s19 + $0x48] sm:$0xff] %vm3170_vm1, %v6541_v31  ;;  %v6540_v46 = vmax.f32 %v6394_v4, 0.0  ;;  %v5542_v18 = vpop.permute.xlu1 %5541  ;;  %v5540_v40 = vpop.permute.xlu0 %5539  ;;  %v5908_v31 = vsel %vm3170_vm1, %v4568_v43, %v14256_v27  ;;  %v14257_v4 = vld [vmem:[#allocation46_spill] sm:$0xff] }
 0x899   : > { %v6085_v39 = vsel %vm3540_vm11, %v6049_v38, %v5540_v40  ;;  %v6086_v47 = vsel %vm3540_vm11, %v6050_v28, %v5542_v18  ;;  %v14258_v40 = vld [vmem:[#allocation70_spill] sm:$0xff]  ;;  %v14264_v28 = vld [vmem:[#allocation73_spill] sm:$0xff] }
 0x89a   : > { %6576 = vst.msk [vmem:[%s12839_s19 + $0x40] sm:$0xff] %vm3170_vm1, %v6540_v46  ;;  %v5944_v46 = vsel %vm3244_vm3, %v5908_v31, %v14257_v4 }
 0x89b   : > { %v5980_v17 = vsel %vm3318_vm5, %v5944_v46, %v14258_v40 }
 0x89c   : > { %v5290_v41 = vpop.permute.xlu1 %5289  ;;  %v5684_v61 = vpop.permute.xlu0 %5683 }
 0x89d   : > { %v6121_v29 = vsel %vm3614_vm13, %v6085_v39, %v5684_v61  ;;  %v6015_v36 = vsel %vm3392_vm7, %v5979_v8, %v5290_v41 }
 0x8a0   : > { %v5828_v42 = vpop.permute.xlu1 %5827  ;;  %v5686_v5 = vpop.permute.xlu0 %5685 }
 0x8a1   : > { %v6157_v62 = vsel %vm4012_vm15, %v6121_v29, %v5828_v42  ;;  %v6122_v14 = vsel %vm3614_vm13, %v6086_v47, %v5686_v5 }
 0x8a2   : > { %6980 = vmatprep.mubr.msk.f32.mxu1 %vm4065_vm0, %v6157_v62 }
 0x8a3   : > { %v6952_v30 = vpop.f32.mrf.mxu1 }
 0x8a4   : > { %v6409_v2 = vadd.f32 %v6952_v30, %v12823_v15  ;;  %v5434_v20 = vpop.permute.xlu1 %5433  ;;  %v5292_v1 = vpop.permute.xlu0 %5291  ;;  %v14260_v30 = vld [vmem:[#allocation25_spill] sm:$0xff] }
 0x8a5   : > { %v6403_v49 = vpop.f32.mrf.mxu1  ;;  %v6051_v51 = vsel %vm3466_vm9, %v6015_v36, %v5434_v20  ;;  %v6016_v56 = vsel %vm3392_vm7, %v5980_v17, %v5292_v1  ;;  %v5909_v16 = vsel %vm3170_vm1, %v4569_v44, %v14260_v30  ;;  %v14262_v20 = vld [vmem:[#allocation49_spill] sm:$0xff] }
 0x8a6   : > { %v6543_v25 = vmax.f32 %v6409_v2, 0.0  ;;  %v6404_v48 = vadd.f32 %v12823_v15, %v6403_v49  ;;  %v5946_v2 = vsel %vm3244_vm3, %v5910_v9, %v14261_v55  ;;  %v5945_v1 = vsel %vm3244_vm3, %v5909_v16, %v14262_v20 }
 0x8a7   : > { %v5982_v49 = vsel %vm3318_vm5, %v5946_v2, %v14263_v24 }
 0x8a8   : > { %6579 = vst.msk [vmem:[%s12839_s19 + $0x58] sm:$0xff] %vm3170_vm1, %v6543_v25  ;;  %v6542_v33 = vmax.f32 %v6404_v48, 0.0  ;;  %v5436_v19 = vpop.permute.xlu1 %5435  ;;  %v5830_v50 = vpop.permute.xlu0 %5829  ;;  %v5981_v25 = vsel %vm3318_vm5, %v5945_v1, %v14264_v28 }
 0x8a9   : > { %v6158_v6 = vsel %vm4012_vm15, %v6122_v14, %v5830_v50  ;;  %v6052_v21 = vsel %vm3466_vm9, %v6016_v56, %v5436_v19 }
 0x8aa   : > { %6578 = vst.msk [vmem:[%s12839_s19 + $0x50] sm:$0xff] %vm3170_vm1, %v6542_v33  ;;  %6981 = vmatmul.mubr.msk.f32.gmra.mxu1 %vm4065_vm0, %v6158_v6 }
 0x8ac   : > { %v5546_v37 = vpop.permute.xlu1 %5545  ;;  %v5544_v59 = vpop.permute.xlu0 %5543 }
 0x8ad   : > { %v6087_v54 = vsel %vm3540_vm11, %v6051_v51, %v5544_v59  ;;  %v6088_v60 = vsel %vm3540_vm11, %v6052_v21, %v5546_v37 }
 0x8b0   : > { %v5294_v10 = vpop.permute.xlu1 %5293  ;;  %v5688_v26 = vpop.permute.xlu0 %5687 }
 0x8b1   : > { %v6123_v52 = vsel %vm3614_vm13, %v6087_v54, %v5688_v26  ;;  %v6017_v14 = vsel %vm3392_vm7, %v5981_v25, %v5294_v10 }
 0x8b4   : > { %v5832_v45 = vpop.permute.xlu1 %5831  ;;  %v5690_v3 = vpop.permute.xlu0 %5689 }
 0x8b5   : > { %v6159_v0 = vsel %vm4012_vm15, %v6123_v52, %v5832_v45  ;;  %v6124_v38 = vsel %vm3614_vm13, %v6088_v60, %v5690_v3 }
 0x8b6   : > { %6983 = vmatprep.mubr.msk.f32.mxu1 %vm4065_vm0, %v6159_v0 }
 0x8b7   : > { %v6955_v18 = vpop.f32.mrf.mxu1 }
 0x8b8   : > { %v6419_v32 = vadd.f32 %v6955_v18, %v12823_v15  ;;  %v5438_v7 = vpop.permute.xlu1 %5437  ;;  %v5296_v35 = vpop.permute.xlu0 %5295 }
 0x8b9   : > { %v6413_v63 = vpop.f32.mrf.mxu1  ;;  %v6018_v33 = vsel %vm3392_vm7, %v5982_v49, %v5296_v35  ;;  %v6053_v19 = vsel %vm3466_vm9, %v6017_v14, %v5438_v7 }
 0x8ba   : > { %v6545_v41 = vmax.f32 %v6419_v32, 0.0  ;;  %v6414_v61 = vadd.f32 %v12823_v15, %v6413_v63 }
 0x8bc   : > { %6581 = vst.msk [vmem:[%s12839_s19 + $0x68] sm:$0xff] %vm3170_vm1, %v6545_v41  ;;  %v6544_v39 = vmax.f32 %v6414_v61, 0.0  ;;  %v5440_v29 = vpop.permute.xlu1 %5439  ;;  %v5834_v42 = vpop.permute.xlu0 %5833 }
 0x8bd   : > { %v6160_v5 = vsel %vm4012_vm15, %v6124_v38, %v5834_v42  ;;  %v6054_v50 = vsel %vm3466_vm9, %v6018_v33, %v5440_v29 }
 0x8be   : > { %6580 = vst.msk [vmem:[%s12839_s19 + $0x60] sm:$0xff] %vm3170_vm1, %v6544_v39  ;;  %6984 = vmatmul.mubr.msk.f32.gmra.mxu1 %vm4065_vm0, %v6160_v5 }
 0x8c0   : > { %v5550_v58 = vpop.permute.xlu1 %5549  ;;  %v5548_v62 = vpop.permute.xlu0 %5547 }
 0x8c1   : > { %v6090_v6 = vsel %vm3540_vm11, %v6054_v50, %v5550_v58  ;;  %v6089_v37 = vsel %vm3540_vm11, %v6053_v19, %v5548_v62 }
 0x8c4   : > { %v5694_v48 = vpop.permute.xlu1 %5693  ;;  %v5692_v47 = vpop.permute.xlu0 %5691 }
 0x8c5   : > { %v6126_v59 = vsel %vm3614_vm13, %v6090_v6, %v5694_v48  ;;  %v6125_v22 = vsel %vm3614_vm13, %v6089_v37, %v5692_v47 }
 0x8c8   : > { %v5838_v23 = vpop.permute.xlu1 %5837  ;;  %v5836_v53 = vpop.permute.xlu0 %5835 }
 0x8c9   : > { %v6162_v13 = vsel %vm4012_vm15, %v6126_v59, %v5838_v23  ;;  %v6161_v12 = vsel %vm4012_vm15, %v6125_v22, %v5836_v53 }
 0x8ca   : > { %6986 = vmatprep.mubr.msk.f32.mxu1 %vm4065_vm0, %v6161_v12 }
 0x8cb   : > { %v6958_v34 = vpop.f32.mrf.mxu1  ;;  %6987 = vmatmul.mubr.msk.f32.gmra.mxu1 %vm4065_vm0, %v6162_v13 }
 0x8cc   : > { %v6429_v8 = vadd.f32 %v6958_v34, %v12823_v15 }
 0x8cd   : > { %v6423_v10 = vpop.f32.mrf.mxu1 }
 0x8ce   : > { %v6547_v26 = vmax.f32 %v6429_v8, 0.0  ;;  %v6424_v36 = vadd.f32 %v12823_v15, %v6423_v10 }
 0x8d0   : > { %6583 = vst.msk [vmem:[%s12839_s19 + $0x78] sm:$0xff] %vm3170_vm1, %v6547_v26  ;;  %v6546_v51 = vmax.f32 %v6424_v36, 0.0 }
 0x8d2   : > { %6582 = vst.msk [vmem:[%s12839_s19 + $0x70] sm:$0xff] %vm3170_vm1, %v6546_v51 }
 0x8df   : > { %v6961_v54 = vpop.f32.mrf.mxu1 }
 0x8e0   : > { %v6439_v52 = vadd.f32 %v6961_v54, %v12823_v15 }
 0x8e1   : > { %v6433_v45 = vpop.f32.mrf.mxu1 }
 0x8e2   : > { %v6549_v3 = vmax.f32 %v6439_v52, 0.0  ;;  %v6434_v43 = vadd.f32 %v12823_v15, %v6433_v45 }
 0x8e4   : > { %6585 = vst.msk [vmem:[%s12839_s19 + $0x88] sm:$0xff] %vm3170_vm1, %v6549_v3  ;;  %v6548_v0 = vmax.f32 %v6434_v43, 0.0 }
 0x8e6   : > { %6584 = vst.msk [vmem:[%s12839_s19 + $0x80] sm:$0xff] %vm3170_vm1, %v6548_v0 }
 0x8f3   : > { %v6964_v27 = vpop.f32.mrf.mxu1 }
 0x8f4   : > { %v6449_v31 = vadd.f32 %v6964_v27, %v12823_v15 }
 0x8f5   : > { %v6443_v4 = vpop.f32.mrf.mxu1 }
 0x8f6   : > { %v6551_v46 = vmax.f32 %v6449_v31, 0.0  ;;  %v6444_v18 = vadd.f32 %v12823_v15, %v6443_v4 }
 0x8f8   : > { %6587 = vst.msk [vmem:[%s12839_s19 + $0x98] sm:$0xff] %vm3170_vm1, %v6551_v46  ;;  %v6550_v40 = vmax.f32 %v6444_v18, 0.0 }
 0x8fa   : > { %6586 = vst.msk [vmem:[%s12839_s19 + $0x90] sm:$0xff] %vm3170_vm1, %v6550_v40 }
 0x907   : > { %v6967_v17 = vpop.f32.mrf.mxu1 }
 0x908   : > { %v6459_v32 = vadd.f32 %v6967_v17, %v12823_v15 }
 0x909   : > { %v6453_v7 = vpop.f32.mrf.mxu1 }
 0x90a   : > { %v6553_v35 = vmax.f32 %v6459_v32, 0.0  ;;  %v6454_v56 = vadd.f32 %v12823_v15, %v6453_v7 }
 0x90c   : > { %6589 = vst.msk [vmem:[%s12839_s19 + $0xa8] sm:$0xff] %vm3170_vm1, %v6553_v35  ;;  %v6552_v63 = vmax.f32 %v6454_v56, 0.0 }
 0x90e   : > { %6588 = vst.msk [vmem:[%s12839_s19 + $0xa0] sm:$0xff] %vm3170_vm1, %v6552_v63 }
 0x91a   : > { %v6970_v21 = vpop.f32.mrf.mxu1 }
 0x91b   : > { %v6469_v41 = vadd.f32 %v6970_v21, %v12823_v15 }
 0x91c   : > { %v6463_v61 = vpop.f32.mrf.mxu1 }
 0x91d   : > { %v6555_v60 = vmax.f32 %v6469_v41, 0.0  ;;  %v6464_v38 = vadd.f32 %v12823_v15, %v6463_v61 }
 0x91f   : > { %6591 = vst.msk [vmem:[%s12839_s19 + $0xb8] sm:$0xff] %vm3170_vm1, %v6555_v60  ;;  %v6554_v39 = vmax.f32 %v6464_v38, 0.0 }
 0x921   : > { %6590 = vst.msk [vmem:[%s12839_s19 + $0xb0] sm:$0xff] %vm3170_vm1, %v6554_v39 }
 0x92e   : > { %v6973_v29 = vpop.f32.mrf.mxu1 }
 0x92f   : > { %v6479_v42 = vadd.f32 %v6973_v29, %v12823_v15 }
 0x930   : > { %v6473_v5 = vpop.f32.mrf.mxu1 }
 0x931   : > { %v6557_v58 = vmax.f32 %v6479_v42, 0.0  ;;  %v6474_v62 = vadd.f32 %v12823_v15, %v6473_v5 }
 0x933   : > { %6593 = vst.msk [vmem:[%s12839_s19 + $0xc8] sm:$0xff] %vm3170_vm1, %v6557_v58  ;;  %v6556_v11 = vmax.f32 %v6474_v62, 0.0 }
 0x935   : > { %6592 = vst.msk [vmem:[%s12839_s19 + $0xc0] sm:$0xff] %vm3170_vm1, %v6556_v11 }
 0x942   : > { %v6976_v44 = vpop.f32.mrf.mxu1 }
 0x943   : > { %v6489_v57 = vadd.f32 %v6976_v44, %v12823_v15 }
 0x944   : > { %v6483_v9 = vpop.f32.mrf.mxu1 }
 0x945   : > { %v6559_v30 = vmax.f32 %v6489_v57, 0.0  ;;  %v6484_v16 = vadd.f32 %v12823_v15, %v6483_v9 }
 0x947   : > { %6595 = vst.msk [vmem:[%s12839_s19 + $0xd8] sm:$0xff] %vm3170_vm1, %v6559_v30  ;;  %v6558_v55 = vmax.f32 %v6484_v16, 0.0 }
 0x949   : > { %6594 = vst.msk [vmem:[%s12839_s19 + $0xd0] sm:$0xff] %vm3170_vm1, %v6558_v55 }
 0x956   : > { %v6979_v2 = vpop.f32.mrf.mxu1 }
 0x957   : > { %v6499_v20 = vadd.f32 %v6979_v2, %v12823_v15 }
 0x958   : > { %v6493_v1 = vpop.f32.mrf.mxu1 }
 0x959   : > { %v6561_v24 = vmax.f32 %v6499_v20, 0.0  ;;  %v6494_v49 = vadd.f32 %v12823_v15, %v6493_v1 }
 0x95b   : > { %6597 = vst.msk [vmem:[%s12839_s19 + $0xe8] sm:$0xff] %vm3170_vm1, %v6561_v24  ;;  %v6560_v28 = vmax.f32 %v6494_v49, 0.0 }
 0x95d   : > { %6596 = vst.msk [vmem:[%s12839_s19 + $0xe0] sm:$0xff] %vm3170_vm1, %v6560_v28 }
 0x96a   : > { %v6982_v25 = vpop.f32.mrf.mxu1 }
 0x96b   : > { %v6509_v48 = vadd.f32 %v6982_v25, %v12823_v15 }
 0x96c   : > { %v6503_v47 = vpop.f32.mrf.mxu1 }
 0x96d   : > { %v6563_v14 = vmax.f32 %v6509_v48, 0.0  ;;  %v6504_v33 = vadd.f32 %v12823_v15, %v6503_v47 }
 0x96f   : > { %6599 = vst.msk [vmem:[%s12839_s19 + $0xf8] sm:$0xff] %vm3170_vm1, %v6563_v14  ;;  %v6562_v19 = vmax.f32 %v6504_v33, 0.0 }
 0x971   : > { %6598 = vst.msk [vmem:[%s12839_s19 + $0xf0] sm:$0xff] %vm3170_vm1, %v6562_v19 }
 0x97e   : > { %v6985_v50 = vpop.f32.mrf.mxu1 }
 0x97f   : > { %v6519_v6 = vadd.f32 %v6985_v50, %v12823_v15 }
 0x980   : > { %v6513_v37 = vpop.f32.mrf.mxu1 }
 0x981   : > { %v6565_v59 = vmax.f32 %v6519_v6, 0.0  ;;  %v6514_v22 = vadd.f32 %v12823_v15, %v6513_v37 }
 0x983   : > { %6601 = vst.msk [vmem:[%s12839_s19 + $0x108] sm:$0xff] %vm3170_vm1, %v6565_v59  ;;  %v6564_v23 = vmax.f32 %v6514_v22, 0.0 }
 0x985   : > { %6600 = vst.msk [vmem:[%s12839_s19 + $0x100] sm:$0xff] %vm3170_vm1, %v6564_v23 }
 0x98b   : > { %v6988_v53 = vpop.f32.mrf.mxu1 }
 0x98c   : > { %v6529_v13 = vadd.f32 %v6988_v53, %v12823_v15 }
 0x98d   : > { %v6523_v12 = vpop.f32.mrf.mxu1 }
 0x98e   : > { %v6567_v34 = vmax.f32 %v6529_v13, 0.0  ;;  %v6524_v8 = vadd.f32 %v12823_v15, %v6523_v12 }
 0x990   : > { %6603 = vst.msk [vmem:[%s12839_s19 + $0x118] sm:$0xff] %vm3170_vm1, %v6567_v34  ;;  %v6566_v10 = vmax.f32 %v6524_v8, 0.0 }
 0x992   : > { %6602 = vst.msk [vmem:[%s12839_s19 + $0x110] sm:$0xff] %vm3170_vm1, %v6566_v10 }
 0x993 PF: > { %s16_s21 = sadd.s32 1, %s7022_s21  }
 0x994   : > { %p13_p4 = scmp.ge.s32.totalorder %s16_s21, 4  }
 0x996   :  { %15 = sbr.rel (!%p13_p4) target bundleno = 1 (0x1), region = 77 }

</bundles_post_ra>
